<compile_context>
chip_gen: v7x
topology: tpu7x:2x2x1
jax: 0.10.0
libtpu: 0.0.40
codegen_flags: <defaults>
</compile_context>

<pallas_src>
import jax
import jax.numpy as jnp
import numpy as np
from jax import lax
from jax.experimental import pallas as pl
from jax.experimental.pallas import tpu as pltpu


_TAPS = tuple((i, j) for i in range(3) for j in range(3))


# ------------------------------ fused kernel --------------------------------

def _fused_autoencoder_kernel(x_ref, w1_ref, b1_ref, w2_ref, b2_ref,
                              w3_ref, b3_ref, w4_ref, b4_ref,
                              o_ref, p2_ref, p3_ref, p4_ref):
    f32 = jnp.float32

    # -------- conv1: 1->64, pad=1, 16x16 (stride 18), 9 VPU broadcast-FMAs ---
    x = x_ref[0]                                   # (1, 324) pre-padded input
    L1 = 15 * 18 + 16                              # 286
    acc = jnp.zeros((64, L1), f32)
    for t, (i, j) in enumerate(_TAPS):
        s = i * 18 + j
        acc = acc + w1_ref[t] * x[:, s:s + L1]     # (64,1)*(1,L1) -> (64,L1)
    y1 = jnp.maximum(acc + b1_ref[...], 0.0)       # ReLU, (64, 286)

    # fused MaxPool2d(2, stride=1): 16x16 -> 15x15 (stride stays 18)
    Lp1 = 14 * 18 + 15                             # 267
    a1 = jnp.maximum(jnp.maximum(y1[:, 0:Lp1], y1[:, 1:1 + Lp1]),
                     jnp.maximum(y1[:, 18:18 + Lp1], y1[:, 19:19 + Lp1]))

    # -------- conv2: 64->16, pad=1, 15x15 (stride 17), 9 MXU dots ------------
    p2_ref[...] = jnp.zeros_like(p2_ref)           # (64, 17*17) zero-padded slab
    for h in range(15):
        p2_ref[:, (h + 1) * 17 + 1:(h + 1) * 17 + 16] = a1[:, h * 18:h * 18 + 15]
    L2 = 14 * 17 + 15                              # 253
    acc = jnp.zeros((16, L2), f32)
    for t, (i, j) in enumerate(_TAPS):
        s = i * 17 + j
        acc = acc + jnp.dot(w2_ref[t], p2_ref[:, s:s + L2],
                            preferred_element_type=f32)
    y2 = jnp.maximum(acc + b2_ref[...], 0.0)       # (16, 253)

    # fused MaxPool2d(2, stride=1): 15x15 -> 14x14 (stride stays 17)
    Lp2 = 13 * 17 + 14                             # 235
    a2 = jnp.maximum(jnp.maximum(y2[:, 0:Lp2], y2[:, 1:1 + Lp2]),
                     jnp.maximum(y2[:, 17:17 + Lp2], y2[:, 18:18 + Lp2]))

    # Upsample(scale_factor=1, mode='nearest') is the identity -> elided.

    # -------- conv3: 16->64, pad=1, 14x14 (stride 16), 9 MXU dots ------------
    p3_ref[...] = jnp.zeros_like(p3_ref)           # (16, 16*16)
    for h in range(14):
        p3_ref[:, (h + 1) * 16 + 1:(h + 1) * 16 + 15] = a2[:, h * 17:h * 17 + 14]
    L3 = 13 * 16 + 14                              # 222
    acc = jnp.zeros((64, L3), f32)
    for t, (i, j) in enumerate(_TAPS):
        s = i * 16 + j
        acc = acc + jnp.dot(w3_ref[t], p3_ref[:, s:s + L3],
                            preferred_element_type=f32)
    a3 = jnp.maximum(acc + b3_ref[...], 0.0)       # (64, 222)

    # -------- conv4: 64->1, pad=2, out 16x16 (stride 18), VPU FMAs + reduce --
    p4_ref[...] = jnp.zeros_like(p4_ref)           # (64, 18*18)
    for h in range(14):
        p4_ref[:, (h + 2) * 18 + 2:(h + 2) * 18 + 16] = a3[:, h * 16:h * 16 + 14]
    L4 = 15 * 18 + 16                              # 286
    acc = jnp.zeros((64, L4), f32)
    for t, (i, j) in enumerate(_TAPS):
        s = i * 18 + j
        acc = acc + p4_ref[:, s:s + L4] * w4_ref[t]    # (64,L4)*(64,1)
    z = jnp.sum(acc, axis=0, keepdims=True) + b4_ref[...]   # (1, 286)
    z = 1.0 / (1.0 + jnp.exp(-z))                  # sigmoid

    # compact the valid 16x16 region (stride 18) into a lane-dense (1, 256) row
    for h in range(16):
        o_ref[0, :, h * 16:(h + 1) * 16] = z[:, h * 18:h * 18 + 16]


# ------------------------------ model wrapper --------------------------------

def init_params(key):
    """Deterministic parameter init (kaiming-uniform-like bounds), HWIO."""
    def conv_param(key, cin, cout):
        kw_key, b_key = jax.random.split(key)
        bound = 1.0 / np.sqrt(cin * 9)
        w = jax.random.uniform(kw_key, (3, 3, cin, cout), jnp.float32, -bound, bound)
        b = jax.random.uniform(b_key, (cout,), jnp.float32, -bound, bound)
        return w, b

    k1, k2, k3, k4 = jax.random.split(key, 4)
    p = {}
    p["w1"], p["b1"] = conv_param(k1, 1, 64)
    p["w2"], p["b2"] = conv_param(k2, 64, 16)
    p["w3"], p["b3"] = conv_param(k3, 16, 64)
    p["w4"], p["b4"] = conv_param(k4, 64, 1)
    return p


def _taps_cout_cin(w_hwio):
    """(3,3,Cin,Cout) -> (9, Cout, Cin) per-tap matrices."""
    kh, kw, ci, co = w_hwio.shape
    return jnp.transpose(w_hwio, (0, 1, 3, 2)).reshape(kh * kw, co, ci)


@jax.jit
def conv_autoencoder_forward(x_nchw, params):
    """NCHW float32 in / NCHW float32 out (PyTorch convention)."""
    n, c, h, w = x_nchw.shape
    assert (c, h, w) == (1, 16, 16), "kernel is specialized for (1,16,16) inputs"

    # Input prep: squeeze Cin=1, zero-pad by 1, flatten to a (1, 18*18) row slab.
    x = x_nchw[:, 0].astype(jnp.float32)                        # (N,16,16)
    xflat = jnp.pad(x, ((0, 0), (1, 1), (1, 1))).reshape(n, 1, 18 * 18)

    # Weight prep: per-tap (Cout, Cin) matrices / (Cin, 1) columns, (Cout,1) bias.
    w1 = _taps_cout_cin(params["w1"])          # (9, 64, 1)  -> VPU columns
    w2 = _taps_cout_cin(params["w2"])          # (9, 16, 64) -> MXU
    w3 = _taps_cout_cin(params["w3"])          # (9, 64, 16) -> MXU
    w4 = params["w4"].reshape(9, 64, 1)        # (9, 64, 1)  -> VPU columns
    b1 = params["b1"].reshape(64, 1)
    b2 = params["b2"].reshape(16, 1)
    b3 = params["b3"].reshape(64, 1)
    b4 = params["b4"].reshape(1, 1)

    grid_spec = pltpu.PrefetchScalarGridSpec(
        num_scalar_prefetch=0,
        grid=(n,),                                         # one image per step
        in_specs=[
            pl.BlockSpec((1, 1, 324), lambda b: (b, 0, 0)),   # padded input slab
            pl.BlockSpec((9, 64, 1), lambda b: (0, 0, 0)),    # w1 taps
            pl.BlockSpec((64, 1), lambda b: (0, 0)),          # b1
            pl.BlockSpec((9, 16, 64), lambda b: (0, 0, 0)),   # w2 taps
            pl.BlockSpec((16, 1), lambda b: (0, 0)),          # b2
            pl.BlockSpec((9, 64, 16), lambda b: (0, 0, 0)),   # w3 taps
            pl.BlockSpec((64, 1), lambda b: (0, 0)),          # b3
            pl.BlockSpec((9, 64, 1), lambda b: (0, 0, 0)),    # w4 taps
            pl.BlockSpec((1, 1), lambda b: (0, 0)),           # b4
        ],
        out_specs=pl.BlockSpec((1, 1, 256), lambda b: (b, 0, 0)),
        scratch_shapes=[
            pltpu.VMEM((64, 17 * 17), jnp.float32),  # padded conv2 input slab
            pltpu.VMEM((16, 16 * 16), jnp.float32),  # padded conv3 input slab
            pltpu.VMEM((64, 18 * 18), jnp.float32),  # padded conv4 input slab
        ],
    )

    out = pl.pallas_call(
        _fused_autoencoder_kernel,
        out_shape=jax.ShapeDtypeStruct((n, 1, 256), jnp.float32),
        grid_spec=grid_spec,
        compiler_params=pltpu.CompilerParams(
            dimension_semantics=("parallel",),       # batch across TCs on v7x
            vmem_limit_bytes=16 * 1024 * 1024,       # explicit, safe on v5e/v6e/v7x
        ),
    )(xflat, w1, b1, w2, b2, w3, b3, w4, b4)

    return out.reshape(n, 1, 16, 16)                 # row-major h*16+w -> (16,16)


# --------------------------- plain-JAX reference -----------------------------

def _ref_forward(x_nchw, params):
    def conv(x, w, b, pad):
        y = lax.conv_general_dilated(
            x, w, (1, 1), [(pad, pad), (pad, pad)],
            dimension_numbers=("NHWC", "HWIO", "NHWC"),
            precision=lax.Precision.HIGHEST)
        return y + b.reshape(1, 1, 1, -1)

    def pool(x):
        return lax.reduce_window(x, -jnp.inf, lax.max,
                                 (1, 2, 2, 1), (1, 1, 1, 1), "VALID")

    x = jnp.transpose(x_nchw, (0, 2, 3, 1)).astype(jnp.float32)
    x = pool(jax.nn.relu(conv(x, params["w1"], params["b1"], 1)))
    x = pool(jax.nn.relu(conv(x, params["w2"], params["b2"], 1)))
    x = jax.nn.relu(conv(x, params["w3"], params["b3"], 1))
    x = jax.nn.sigmoid(conv(x, params["w4"], params["b4"], 2))
    return jnp.transpose(x, (0, 3, 1, 2))


# ---------------------------------- main -------------------------------------

if __name__ == "__main__":
    key = jax.random.PRNGKey(0)
    pkey, xkey = jax.random.split(key)

    params = init_params(pkey)
    x = jax.random.normal(xkey, (2, 1, 16, 16), jnp.float32)   # NCHW, Cin=1

    out = conv_autoencoder_forward(x, params)
    out = jax.block_until_ready(out)

    # 16x16 -> pool 15 -> pool 14 -> conv(p=2) -> 16x16, 1 channel.
    assert out.shape == (2, 1, 16, 16), out.shape

    ref = jax.block_until_ready(_ref_forward(x, params))
    np.testing.assert_allclose(np.asarray(out), np.asarray(ref),
                               rtol=1e-3, atol=1e-4)

    print("KERNEL_OK")
</pallas_src>

<mosaic_0001>
module attributes {stable_mosaic.version = 11 : i64} {
  func.func @_fused_autoencoder_kernel(%arg0: i32, %arg1: memref<1x1x324xf32, #tpu.memory_space<vmem>>, %arg2: memref<9x64x1xf32, #tpu.memory_space<vmem>>, %arg3: memref<64x1xf32, #tpu.memory_space<vmem>>, %arg4: memref<9x16x64xf32, #tpu.memory_space<vmem>>, %arg5: memref<16x1xf32, #tpu.memory_space<vmem>>, %arg6: memref<9x64x16xf32, #tpu.memory_space<vmem>>, %arg7: memref<64x1xf32, #tpu.memory_space<vmem>>, %arg8: memref<9x64x1xf32, #tpu.memory_space<vmem>>, %arg9: memref<1x1xf32, #tpu.memory_space<vmem>>, %arg10: memref<1x1x256xf32, #tpu.memory_space<vmem>>, %arg11: memref<64x289xf32, #tpu.memory_space<vmem>>, %arg12: memref<16x256xf32, #tpu.memory_space<vmem>>, %arg13: memref<64x324xf32, #tpu.memory_space<vmem>>) attributes {dimension_semantics = [#tpu.dimension_semantics<parallel>], iteration_bounds = array<i64: 2>, scalar_prefetch = 0 : i64, scratch_operands = 3 : i64, tpu.core_type = #tpu.core_type<tc>, window_params = [{transform_indices = @transform_0, window_bounds = array<i64: 1, 1, 324>}, {pipeline_mode = #tpu.pipeline_mode<synchronous>, transform_indices = @transform_1, window_bounds = array<i64: 9, 64, 1>}, {pipeline_mode = #tpu.pipeline_mode<synchronous>, transform_indices = @transform_2, window_bounds = array<i64: 64, 1>}, {pipeline_mode = #tpu.pipeline_mode<synchronous>, transform_indices = @transform_3, window_bounds = array<i64: 9, 16, 64>}, {pipeline_mode = #tpu.pipeline_mode<synchronous>, transform_indices = @transform_4, window_bounds = array<i64: 16, 1>}, {pipeline_mode = #tpu.pipeline_mode<synchronous>, transform_indices = @transform_5, window_bounds = array<i64: 9, 64, 16>}, {pipeline_mode = #tpu.pipeline_mode<synchronous>, transform_indices = @transform_6, window_bounds = array<i64: 64, 1>}, {pipeline_mode = #tpu.pipeline_mode<synchronous>, transform_indices = @transform_7, window_bounds = array<i64: 9, 64, 1>}, {pipeline_mode = #tpu.pipeline_mode<synchronous>, transform_indices = @transform_8, window_bounds = array<i64: 1, 1>}, {transform_indices = @transform_9, window_bounds = array<i64: 1, 1, 256>}]} {
    %c0 = arith.constant 0 : index
    %c0_0 = arith.constant 0 : index
    %c0_1 = arith.constant 0 : index
    %0 = vector.load %arg1[%c0, %c0_0, %c0_1] : memref<1x1x324xf32, #tpu.memory_space<vmem>>, vector<1x1x324xf32>
    %1 = vector.shape_cast %0 : vector<1x1x324xf32> to vector<1x324xf32>
    %cst = arith.constant 0.000000e+00 : f32
    %2 = vector.broadcast %cst : f32 to vector<64x286xf32>
    %c0_2 = arith.constant 0 : index
    %c0_3 = arith.constant 0 : index
    %c0_4 = arith.constant 0 : index
    %3 = vector.load %arg2[%c0_2, %c0_3, %c0_4] : memref<9x64x1xf32, #tpu.memory_space<vmem>>, vector<1x64x1xf32>
    %4 = vector.shape_cast %3 : vector<1x64x1xf32> to vector<64x1xf32>
    %5 = vector.extract_strided_slice %1 {offsets = [0, 0], sizes = [1, 286], strides = [1, 1]} : vector<1x324xf32> to vector<1x286xf32>
    %6 = vector.broadcast %4 : vector<64x1xf32> to vector<64x286xf32>
    %7 = vector.broadcast %5 : vector<1x286xf32> to vector<64x286xf32>
    %8 = arith.mulf %6, %7 : vector<64x286xf32>
    %9 = arith.addf %2, %8 : vector<64x286xf32>
    %c1 = arith.constant 1 : index
    %c0_5 = arith.constant 0 : index
    %c0_6 = arith.constant 0 : index
    %10 = vector.load %arg2[%c1, %c0_5, %c0_6] : memref<9x64x1xf32, #tpu.memory_space<vmem>>, vector<1x64x1xf32>
    %11 = vector.shape_cast %10 : vector<1x64x1xf32> to vector<64x1xf32>
    %12 = vector.extract_strided_slice %1 {offsets = [0, 1], sizes = [1, 286], strides = [1, 1]} : vector<1x324xf32> to vector<1x286xf32>
    %13 = vector.broadcast %11 : vector<64x1xf32> to vector<64x286xf32>
    %14 = vector.broadcast %12 : vector<1x286xf32> to vector<64x286xf32>
    %15 = arith.mulf %13, %14 : vector<64x286xf32>
    %16 = arith.addf %9, %15 : vector<64x286xf32>
    %c2 = arith.constant 2 : index
    %c0_7 = arith.constant 0 : index
    %c0_8 = arith.constant 0 : index
    %17 = vector.load %arg2[%c2, %c0_7, %c0_8] : memref<9x64x1xf32, #tpu.memory_space<vmem>>, vector<1x64x1xf32>
    %18 = vector.shape_cast %17 : vector<1x64x1xf32> to vector<64x1xf32>
    %19 = vector.extract_strided_slice %1 {offsets = [0, 2], sizes = [1, 286], strides = [1, 1]} : vector<1x324xf32> to vector<1x286xf32>
    %20 = vector.broadcast %18 : vector<64x1xf32> to vector<64x286xf32>
    %21 = vector.broadcast %19 : vector<1x286xf32> to vector<64x286xf32>
    %22 = arith.mulf %20, %21 : vector<64x286xf32>
    %23 = arith.addf %16, %22 : vector<64x286xf32>
    %c3 = arith.constant 3 : index
    %c0_9 = arith.constant 0 : index
    %c0_10 = arith.constant 0 : index
    %24 = vector.load %arg2[%c3, %c0_9, %c0_10] : memref<9x64x1xf32, #tpu.memory_space<vmem>>, vector<1x64x1xf32>
    %25 = vector.shape_cast %24 : vector<1x64x1xf32> to vector<64x1xf32>
    %26 = vector.extract_strided_slice %1 {offsets = [0, 18], sizes = [1, 286], strides = [1, 1]} : vector<1x324xf32> to vector<1x286xf32>
    %27 = vector.broadcast %25 : vector<64x1xf32> to vector<64x286xf32>
    %28 = vector.broadcast %26 : vector<1x286xf32> to vector<64x286xf32>
    %29 = arith.mulf %27, %28 : vector<64x286xf32>
    %30 = arith.addf %23, %29 : vector<64x286xf32>
    %c4 = arith.constant 4 : index
    %c0_11 = arith.constant 0 : index
    %c0_12 = arith.constant 0 : index
    %31 = vector.load %arg2[%c4, %c0_11, %c0_12] : memref<9x64x1xf32, #tpu.memory_space<vmem>>, vector<1x64x1xf32>
    %32 = vector.shape_cast %31 : vector<1x64x1xf32> to vector<64x1xf32>
    %33 = vector.extract_strided_slice %1 {offsets = [0, 19], sizes = [1, 286], strides = [1, 1]} : vector<1x324xf32> to vector<1x286xf32>
    %34 = vector.broadcast %32 : vector<64x1xf32> to vector<64x286xf32>
    %35 = vector.broadcast %33 : vector<1x286xf32> to vector<64x286xf32>
    %36 = arith.mulf %34, %35 : vector<64x286xf32>
    %37 = arith.addf %30, %36 : vector<64x286xf32>
    %c5 = arith.constant 5 : index
    %c0_13 = arith.constant 0 : index
    %c0_14 = arith.constant 0 : index
    %38 = vector.load %arg2[%c5, %c0_13, %c0_14] : memref<9x64x1xf32, #tpu.memory_space<vmem>>, vector<1x64x1xf32>
    %39 = vector.shape_cast %38 : vector<1x64x1xf32> to vector<64x1xf32>
    %40 = vector.extract_strided_slice %1 {offsets = [0, 20], sizes = [1, 286], strides = [1, 1]} : vector<1x324xf32> to vector<1x286xf32>
    %41 = vector.broadcast %39 : vector<64x1xf32> to vector<64x286xf32>
    %42 = vector.broadcast %40 : vector<1x286xf32> to vector<64x286xf32>
    %43 = arith.mulf %41, %42 : vector<64x286xf32>
    %44 = arith.addf %37, %43 : vector<64x286xf32>
    %c6 = arith.constant 6 : index
    %c0_15 = arith.constant 0 : index
    %c0_16 = arith.constant 0 : index
    %45 = vector.load %arg2[%c6, %c0_15, %c0_16] : memref<9x64x1xf32, #tpu.memory_space<vmem>>, vector<1x64x1xf32>
    %46 = vector.shape_cast %45 : vector<1x64x1xf32> to vector<64x1xf32>
    %47 = vector.extract_strided_slice %1 {offsets = [0, 36], sizes = [1, 286], strides = [1, 1]} : vector<1x324xf32> to vector<1x286xf32>
    %48 = vector.broadcast %46 : vector<64x1xf32> to vector<64x286xf32>
    %49 = vector.broadcast %47 : vector<1x286xf32> to vector<64x286xf32>
    %50 = arith.mulf %48, %49 : vector<64x286xf32>
    %51 = arith.addf %44, %50 : vector<64x286xf32>
    %c7 = arith.constant 7 : index
    %c0_17 = arith.constant 0 : index
    %c0_18 = arith.constant 0 : index
    %52 = vector.load %arg2[%c7, %c0_17, %c0_18] : memref<9x64x1xf32, #tpu.memory_space<vmem>>, vector<1x64x1xf32>
    %53 = vector.shape_cast %52 : vector<1x64x1xf32> to vector<64x1xf32>
    %54 = vector.extract_strided_slice %1 {offsets = [0, 37], sizes = [1, 286], strides = [1, 1]} : vector<1x324xf32> to vector<1x286xf32>
    %55 = vector.broadcast %53 : vector<64x1xf32> to vector<64x286xf32>
    %56 = vector.broadcast %54 : vector<1x286xf32> to vector<64x286xf32>
    %57 = arith.mulf %55, %56 : vector<64x286xf32>
    %58 = arith.addf %51, %57 : vector<64x286xf32>
    %c8 = arith.constant 8 : index
    %c0_19 = arith.constant 0 : index
    %c0_20 = arith.constant 0 : index
    %59 = vector.load %arg2[%c8, %c0_19, %c0_20] : memref<9x64x1xf32, #tpu.memory_space<vmem>>, vector<1x64x1xf32>
    %60 = vector.shape_cast %59 : vector<1x64x1xf32> to vector<64x1xf32>
    %61 = vector.extract_strided_slice %1 {offsets = [0, 38], sizes = [1, 286], strides = [1, 1]} : vector<1x324xf32> to vector<1x286xf32>
    %62 = vector.broadcast %60 : vector<64x1xf32> to vector<64x286xf32>
    %63 = vector.broadcast %61 : vector<1x286xf32> to vector<64x286xf32>
    %64 = arith.mulf %62, %63 : vector<64x286xf32>
    %65 = arith.addf %58, %64 : vector<64x286xf32>
    %c0_21 = arith.constant 0 : index
    %c0_22 = arith.constant 0 : index
    %66 = vector.load %arg3[%c0_21, %c0_22] : memref<64x1xf32, #tpu.memory_space<vmem>>, vector<64x1xf32>
    %67 = vector.broadcast %66 : vector<64x1xf32> to vector<64x286xf32>
    %68 = arith.addf %65, %67 : vector<64x286xf32>
    %cst_23 = arith.constant 0.000000e+00 : f32
    %69 = vector.broadcast %cst_23 : f32 to vector<64x286xf32>
    %70 = arith.maximumf %68, %69 : vector<64x286xf32>
    %71 = vector.extract_strided_slice %70 {offsets = [0, 0], sizes = [64, 267], strides = [1, 1]} : vector<64x286xf32> to vector<64x267xf32>
    %72 = vector.extract_strided_slice %70 {offsets = [0, 1], sizes = [64, 267], strides = [1, 1]} : vector<64x286xf32> to vector<64x267xf32>
    %73 = arith.maximumf %71, %72 : vector<64x267xf32>
    %74 = vector.extract_strided_slice %70 {offsets = [0, 18], sizes = [64, 267], strides = [1, 1]} : vector<64x286xf32> to vector<64x267xf32>
    %75 = vector.extract_strided_slice %70 {offsets = [0, 19], sizes = [64, 267], strides = [1, 1]} : vector<64x286xf32> to vector<64x267xf32>
    %76 = arith.maximumf %74, %75 : vector<64x267xf32>
    %77 = arith.maximumf %73, %76 : vector<64x267xf32>
    %cst_24 = arith.constant 0.000000e+00 : f32
    %78 = vector.broadcast %cst_24 : f32 to vector<64x289xf32>
    %c0_25 = arith.constant 0 : index
    %c0_26 = arith.constant 0 : index
    %79 = vector.load %arg11[%c0_25, %c0_26] : memref<64x289xf32, #tpu.memory_space<vmem>>, vector<64x289xf32>
    tpu.vector_store %arg11[%c0_25, %c0_26], %78 {strides = array<i32>} : memref<64x289xf32, #tpu.memory_space<vmem>>, vector<64x289xf32>,
    %80 = vector.extract_strided_slice %77 {offsets = [0, 0], sizes = [64, 15], strides = [1, 1]} : vector<64x267xf32> to vector<64x15xf32>
    %c0_27 = arith.constant 0 : index
    %c18 = arith.constant 18 : index
    %81 = vector.load %arg11[%c0_27, %c18] : memref<64x289xf32, #tpu.memory_space<vmem>>, vector<64x15xf32>
    tpu.vector_store %arg11[%c0_27, %c18], %80 {strides = array<i32>} : memref<64x289xf32, #tpu.memory_space<vmem>>, vector<64x15xf32>,
    %82 = vector.extract_strided_slice %77 {offsets = [0, 18], sizes = [64, 15], strides = [1, 1]} : vector<64x267xf32> to vector<64x15xf32>
    %c0_28 = arith.constant 0 : index
    %c35 = arith.constant 35 : index
    %83 = vector.load %arg11[%c0_28, %c35] : memref<64x289xf32, #tpu.memory_space<vmem>>, vector<64x15xf32>
    tpu.vector_store %arg11[%c0_28, %c35], %82 {strides = array<i32>} : memref<64x289xf32, #tpu.memory_space<vmem>>, vector<64x15xf32>,
    %84 = vector.extract_strided_slice %77 {offsets = [0, 36], sizes = [64, 15], strides = [1, 1]} : vector<64x267xf32> to vector<64x15xf32>
    %c0_29 = arith.constant 0 : index
    %c52 = arith.constant 52 : index
    %85 = vector.load %arg11[%c0_29, %c52] : memref<64x289xf32, #tpu.memory_space<vmem>>, vector<64x15xf32>
    tpu.vector_store %arg11[%c0_29, %c52], %84 {strides = array<i32>} : memref<64x289xf32, #tpu.memory_space<vmem>>, vector<64x15xf32>,
    %86 = vector.extract_strided_slice %77 {offsets = [0, 54], sizes = [64, 15], strides = [1, 1]} : vector<64x267xf32> to vector<64x15xf32>
    %c0_30 = arith.constant 0 : index
    %c69 = arith.constant 69 : index
    %87 = vector.load %arg11[%c0_30, %c69] : memref<64x289xf32, #tpu.memory_space<vmem>>, vector<64x15xf32>
    tpu.vector_store %arg11[%c0_30, %c69], %86 {strides = array<i32>} : memref<64x289xf32, #tpu.memory_space<vmem>>, vector<64x15xf32>,
    %88 = vector.extract_strided_slice %77 {offsets = [0, 72], sizes = [64, 15], strides = [1, 1]} : vector<64x267xf32> to vector<64x15xf32>
    %c0_31 = arith.constant 0 : index
    %c86 = arith.constant 86 : index
    %89 = vector.load %arg11[%c0_31, %c86] : memref<64x289xf32, #tpu.memory_space<vmem>>, vector<64x15xf32>
    tpu.vector_store %arg11[%c0_31, %c86], %88 {strides = array<i32>} : memref<64x289xf32, #tpu.memory_space<vmem>>, vector<64x15xf32>,
    %90 = vector.extract_strided_slice %77 {offsets = [0, 90], sizes = [64, 15], strides = [1, 1]} : vector<64x267xf32> to vector<64x15xf32>
    %c0_32 = arith.constant 0 : index
    %c103 = arith.constant 103 : index
    %91 = vector.load %arg11[%c0_32, %c103] : memref<64x289xf32, #tpu.memory_space<vmem>>, vector<64x15xf32>
    tpu.vector_store %arg11[%c0_32, %c103], %90 {strides = array<i32>} : memref<64x289xf32, #tpu.memory_space<vmem>>, vector<64x15xf32>,
    %92 = vector.extract_strided_slice %77 {offsets = [0, 108], sizes = [64, 15], strides = [1, 1]} : vector<64x267xf32> to vector<64x15xf32>
    %c0_33 = arith.constant 0 : index
    %c120 = arith.constant 120 : index
    %93 = vector.load %arg11[%c0_33, %c120] : memref<64x289xf32, #tpu.memory_space<vmem>>, vector<64x15xf32>
    tpu.vector_store %arg11[%c0_33, %c120], %92 {strides = array<i32>} : memref<64x289xf32, #tpu.memory_space<vmem>>, vector<64x15xf32>,
    %94 = vector.extract_strided_slice %77 {offsets = [0, 126], sizes = [64, 15], strides = [1, 1]} : vector<64x267xf32> to vector<64x15xf32>
    %c0_34 = arith.constant 0 : index
    %c137 = arith.constant 137 : index
    %95 = vector.load %arg11[%c0_34, %c137] : memref<64x289xf32, #tpu.memory_space<vmem>>, vector<64x15xf32>
    tpu.vector_store %arg11[%c0_34, %c137], %94 {strides = array<i32>} : memref<64x289xf32, #tpu.memory_space<vmem>>, vector<64x15xf32>,
    %96 = vector.extract_strided_slice %77 {offsets = [0, 144], sizes = [64, 15], strides = [1, 1]} : vector<64x267xf32> to vector<64x15xf32>
    %c0_35 = arith.constant 0 : index
    %c154 = arith.constant 154 : index
    %97 = vector.load %arg11[%c0_35, %c154] : memref<64x289xf32, #tpu.memory_space<vmem>>, vector<64x15xf32>
    tpu.vector_store %arg11[%c0_35, %c154], %96 {strides = array<i32>} : memref<64x289xf32, #tpu.memory_space<vmem>>, vector<64x15xf32>,
    %98 = vector.extract_strided_slice %77 {offsets = [0, 162], sizes = [64, 15], strides = [1, 1]} : vector<64x267xf32> to vector<64x15xf32>
    %c0_36 = arith.constant 0 : index
    %c171 = arith.constant 171 : index
    %99 = vector.load %arg11[%c0_36, %c171] : memref<64x289xf32, #tpu.memory_space<vmem>>, vector<64x15xf32>
    tpu.vector_store %arg11[%c0_36, %c171], %98 {strides = array<i32>} : memref<64x289xf32, #tpu.memory_space<vmem>>, vector<64x15xf32>,
    %100 = vector.extract_strided_slice %77 {offsets = [0, 180], sizes = [64, 15], strides = [1, 1]} : vector<64x267xf32> to vector<64x15xf32>
    %c0_37 = arith.constant 0 : index
    %c188 = arith.constant 188 : index
    %101 = vector.load %arg11[%c0_37, %c188] : memref<64x289xf32, #tpu.memory_space<vmem>>, vector<64x15xf32>
    tpu.vector_store %arg11[%c0_37, %c188], %100 {strides = array<i32>} : memref<64x289xf32, #tpu.memory_space<vmem>>, vector<64x15xf32>,
    %102 = vector.extract_strided_slice %77 {offsets = [0, 198], sizes = [64, 15], strides = [1, 1]} : vector<64x267xf32> to vector<64x15xf32>
    %c0_38 = arith.constant 0 : index
    %c205 = arith.constant 205 : index
    %103 = vector.load %arg11[%c0_38, %c205] : memref<64x289xf32, #tpu.memory_space<vmem>>, vector<64x15xf32>
    tpu.vector_store %arg11[%c0_38, %c205], %102 {strides = array<i32>} : memref<64x289xf32, #tpu.memory_space<vmem>>, vector<64x15xf32>,
    %104 = vector.extract_strided_slice %77 {offsets = [0, 216], sizes = [64, 15], strides = [1, 1]} : vector<64x267xf32> to vector<64x15xf32>
    %c0_39 = arith.constant 0 : index
    %c222 = arith.constant 222 : index
    %105 = vector.load %arg11[%c0_39, %c222] : memref<64x289xf32, #tpu.memory_space<vmem>>, vector<64x15xf32>
    tpu.vector_store %arg11[%c0_39, %c222], %104 {strides = array<i32>} : memref<64x289xf32, #tpu.memory_space<vmem>>, vector<64x15xf32>,
    %106 = vector.extract_strided_slice %77 {offsets = [0, 234], sizes = [64, 15], strides = [1, 1]} : vector<64x267xf32> to vector<64x15xf32>
    %c0_40 = arith.constant 0 : index
    %c239 = arith.constant 239 : index
    %107 = vector.load %arg11[%c0_40, %c239] : memref<64x289xf32, #tpu.memory_space<vmem>>, vector<64x15xf32>
    tpu.vector_store %arg11[%c0_40, %c239], %106 {strides = array<i32>} : memref<64x289xf32, #tpu.memory_space<vmem>>, vector<64x15xf32>,
    %108 = vector.extract_strided_slice %77 {offsets = [0, 252], sizes = [64, 15], strides = [1, 1]} : vector<64x267xf32> to vector<64x15xf32>
    %c0_41 = arith.constant 0 : index
    %c256 = arith.constant 256 : index
    %109 = vector.load %arg11[%c0_41, %c256] : memref<64x289xf32, #tpu.memory_space<vmem>>, vector<64x15xf32>
    tpu.vector_store %arg11[%c0_41, %c256], %108 {strides = array<i32>} : memref<64x289xf32, #tpu.memory_space<vmem>>, vector<64x15xf32>,
    %cst_42 = arith.constant 0.000000e+00 : f32
    %110 = vector.broadcast %cst_42 : f32 to vector<16x253xf32>
    %c0_43 = arith.constant 0 : index
    %c0_44 = arith.constant 0 : index
    %c0_45 = arith.constant 0 : index
    %111 = vector.load %arg4[%c0_43, %c0_44, %c0_45] : memref<9x16x64xf32, #tpu.memory_space<vmem>>, vector<1x16x64xf32>
    %112 = vector.shape_cast %111 : vector<1x16x64xf32> to vector<16x64xf32>
    %c0_46 = arith.constant 0 : index
    %c0_47 = arith.constant 0 : index
    %113 = vector.load %arg11[%c0_46, %c0_47] : memref<64x289xf32, #tpu.memory_space<vmem>>, vector<64x253xf32>
    %cst_48 = arith.constant dense<0.000000e+00> : vector<16x253xf32>
    %114 = tpu.matmul %112, %113, %cst_48 {dimension_numbers = #tpu.dot_dimension_numbers<[1], [0], [0], [1], [0, 0, 1, 1], [], []>} : vector<16x64xf32>, vector<64x253xf32>, vector<16x253xf32> -> vector<16x253xf32>
    %115 = arith.addf %110, %114 : vector<16x253xf32>
    %c1_49 = arith.constant 1 : index
    %c0_50 = arith.constant 0 : index
    %c0_51 = arith.constant 0 : index
    %116 = vector.load %arg4[%c1_49, %c0_50, %c0_51] : memref<9x16x64xf32, #tpu.memory_space<vmem>>, vector<1x16x64xf32>
    %117 = vector.shape_cast %116 : vector<1x16x64xf32> to vector<16x64xf32>
    %c0_52 = arith.constant 0 : index
    %c1_53 = arith.constant 1 : index
    %118 = vector.load %arg11[%c0_52, %c1_53] : memref<64x289xf32, #tpu.memory_space<vmem>>, vector<64x253xf32>
    %cst_54 = arith.constant dense<0.000000e+00> : vector<16x253xf32>
    %119 = tpu.matmul %117, %118, %cst_54 {dimension_numbers = #tpu.dot_dimension_numbers<[1], [0], [0], [1], [0, 0, 1, 1], [], []>} : vector<16x64xf32>, vector<64x253xf32>, vector<16x253xf32> -> vector<16x253xf32>
    %120 = arith.addf %115, %119 : vector<16x253xf32>
    %c2_55 = arith.constant 2 : index
    %c0_56 = arith.constant 0 : index
    %c0_57 = arith.constant 0 : index
    %121 = vector.load %arg4[%c2_55, %c0_56, %c0_57] : memref<9x16x64xf32, #tpu.memory_space<vmem>>, vector<1x16x64xf32>
    %122 = vector.shape_cast %121 : vector<1x16x64xf32> to vector<16x64xf32>
    %c0_58 = arith.constant 0 : index
    %c2_59 = arith.constant 2 : index
    %123 = vector.load %arg11[%c0_58, %c2_59] : memref<64x289xf32, #tpu.memory_space<vmem>>, vector<64x253xf32>
    %cst_60 = arith.constant dense<0.000000e+00> : vector<16x253xf32>
    %124 = tpu.matmul %122, %123, %cst_60 {dimension_numbers = #tpu.dot_dimension_numbers<[1], [0], [0], [1], [0, 0, 1, 1], [], []>} : vector<16x64xf32>, vector<64x253xf32>, vector<16x253xf32> -> vector<16x253xf32>
    %125 = arith.addf %120, %124 : vector<16x253xf32>
    %c3_61 = arith.constant 3 : index
    %c0_62 = arith.constant 0 : index
    %c0_63 = arith.constant 0 : index
    %126 = vector.load %arg4[%c3_61, %c0_62, %c0_63] : memref<9x16x64xf32, #tpu.memory_space<vmem>>, vector<1x16x64xf32>
    %127 = vector.shape_cast %126 : vector<1x16x64xf32> to vector<16x64xf32>
    %c0_64 = arith.constant 0 : index
    %c17 = arith.constant 17 : index
    %128 = vector.load %arg11[%c0_64, %c17] : memref<64x289xf32, #tpu.memory_space<vmem>>, vector<64x253xf32>
    %cst_65 = arith.constant dense<0.000000e+00> : vector<16x253xf32>
    %129 = tpu.matmul %127, %128, %cst_65 {dimension_numbers = #tpu.dot_dimension_numbers<[1], [0], [0], [1], [0, 0, 1, 1], [], []>} : vector<16x64xf32>, vector<64x253xf32>, vector<16x253xf32> -> vector<16x253xf32>
    %130 = arith.addf %125, %129 : vector<16x253xf32>
    %c4_66 = arith.constant 4 : index
    %c0_67 = arith.constant 0 : index
    %c0_68 = arith.constant 0 : index
    %131 = vector.load %arg4[%c4_66, %c0_67, %c0_68] : memref<9x16x64xf32, #tpu.memory_space<vmem>>, vector<1x16x64xf32>
    %132 = vector.shape_cast %131 : vector<1x16x64xf32> to vector<16x64xf32>
    %c0_69 = arith.constant 0 : index
    %c18_70 = arith.constant 18 : index
    %133 = vector.load %arg11[%c0_69, %c18_70] : memref<64x289xf32, #tpu.memory_space<vmem>>, vector<64x253xf32>
    %cst_71 = arith.constant dense<0.000000e+00> : vector<16x253xf32>
    %134 = tpu.matmul %132, %133, %cst_71 {dimension_numbers = #tpu.dot_dimension_numbers<[1], [0], [0], [1], [0, 0, 1, 1], [], []>} : vector<16x64xf32>, vector<64x253xf32>, vector<16x253xf32> -> vector<16x253xf32>
    %135 = arith.addf %130, %134 : vector<16x253xf32>
    %c5_72 = arith.constant 5 : index
    %c0_73 = arith.constant 0 : index
    %c0_74 = arith.constant 0 : index
    %136 = vector.load %arg4[%c5_72, %c0_73, %c0_74] : memref<9x16x64xf32, #tpu.memory_space<vmem>>, vector<1x16x64xf32>
    %137 = vector.shape_cast %136 : vector<1x16x64xf32> to vector<16x64xf32>
    %c0_75 = arith.constant 0 : index
    %c19 = arith.constant 19 : index
    %138 = vector.load %arg11[%c0_75, %c19] : memref<64x289xf32, #tpu.memory_space<vmem>>, vector<64x253xf32>
    %cst_76 = arith.constant dense<0.000000e+00> : vector<16x253xf32>
    %139 = tpu.matmul %137, %138, %cst_76 {dimension_numbers = #tpu.dot_dimension_numbers<[1], [0], [0], [1], [0, 0, 1, 1], [], []>} : vector<16x64xf32>, vector<64x253xf32>, vector<16x253xf32> -> vector<16x253xf32>
    %140 = arith.addf %135, %139 : vector<16x253xf32>
    %c6_77 = arith.constant 6 : index
    %c0_78 = arith.constant 0 : index
    %c0_79 = arith.constant 0 : index
    %141 = vector.load %arg4[%c6_77, %c0_78, %c0_79] : memref<9x16x64xf32, #tpu.memory_space<vmem>>, vector<1x16x64xf32>
    %142 = vector.shape_cast %141 : vector<1x16x64xf32> to vector<16x64xf32>
    %c0_80 = arith.constant 0 : index
    %c34 = arith.constant 34 : index
    %143 = vector.load %arg11[%c0_80, %c34] : memref<64x289xf32, #tpu.memory_space<vmem>>, vector<64x253xf32>
    %cst_81 = arith.constant dense<0.000000e+00> : vector<16x253xf32>
    %144 = tpu.matmul %142, %143, %cst_81 {dimension_numbers = #tpu.dot_dimension_numbers<[1], [0], [0], [1], [0, 0, 1, 1], [], []>} : vector<16x64xf32>, vector<64x253xf32>, vector<16x253xf32> -> vector<16x253xf32>
    %145 = arith.addf %140, %144 : vector<16x253xf32>
    %c7_82 = arith.constant 7 : index
    %c0_83 = arith.constant 0 : index
    %c0_84 = arith.constant 0 : index
    %146 = vector.load %arg4[%c7_82, %c0_83, %c0_84] : memref<9x16x64xf32, #tpu.memory_space<vmem>>, vector<1x16x64xf32>
    %147 = vector.shape_cast %146 : vector<1x16x64xf32> to vector<16x64xf32>
    %c0_85 = arith.constant 0 : index
    %c35_86 = arith.constant 35 : index
    %148 = vector.load %arg11[%c0_85, %c35_86] : memref<64x289xf32, #tpu.memory_space<vmem>>, vector<64x253xf32>
    %cst_87 = arith.constant dense<0.000000e+00> : vector<16x253xf32>
    %149 = tpu.matmul %147, %148, %cst_87 {dimension_numbers = #tpu.dot_dimension_numbers<[1], [0], [0], [1], [0, 0, 1, 1], [], []>} : vector<16x64xf32>, vector<64x253xf32>, vector<16x253xf32> -> vector<16x253xf32>
    %150 = arith.addf %145, %149 : vector<16x253xf32>
    %c8_88 = arith.constant 8 : index
    %c0_89 = arith.constant 0 : index
    %c0_90 = arith.constant 0 : index
    %151 = vector.load %arg4[%c8_88, %c0_89, %c0_90] : memref<9x16x64xf32, #tpu.memory_space<vmem>>, vector<1x16x64xf32>
    %152 = vector.shape_cast %151 : vector<1x16x64xf32> to vector<16x64xf32>
    %c0_91 = arith.constant 0 : index
    %c36 = arith.constant 36 : index
    %153 = vector.load %arg11[%c0_91, %c36] : memref<64x289xf32, #tpu.memory_space<vmem>>, vector<64x253xf32>
    %cst_92 = arith.constant dense<0.000000e+00> : vector<16x253xf32>
    %154 = tpu.matmul %152, %153, %cst_92 {dimension_numbers = #tpu.dot_dimension_numbers<[1], [0], [0], [1], [0, 0, 1, 1], [], []>} : vector<16x64xf32>, vector<64x253xf32>, vector<16x253xf32> -> vector<16x253xf32>
    %155 = arith.addf %150, %154 : vector<16x253xf32>
    %c0_93 = arith.constant 0 : index
    %c0_94 = arith.constant 0 : index
    %156 = vector.load %arg5[%c0_93, %c0_94] : memref<16x1xf32, #tpu.memory_space<vmem>>, vector<16x1xf32>
    %157 = vector.broadcast %156 : vector<16x1xf32> to vector<16x253xf32>
    %158 = arith.addf %155, %157 : vector<16x253xf32>
    %cst_95 = arith.constant 0.000000e+00 : f32
    %159 = vector.broadcast %cst_95 : f32 to vector<16x253xf32>
    %160 = arith.maximumf %158, %159 : vector<16x253xf32>
    %161 = vector.extract_strided_slice %160 {offsets = [0, 0], sizes = [16, 235], strides = [1, 1]} : vector<16x253xf32> to vector<16x235xf32>
    %162 = vector.extract_strided_slice %160 {offsets = [0, 1], sizes = [16, 235], strides = [1, 1]} : vector<16x253xf32> to vector<16x235xf32>
    %163 = arith.maximumf %161, %162 : vector<16x235xf32>
    %164 = vector.extract_strided_slice %160 {offsets = [0, 17], sizes = [16, 235], strides = [1, 1]} : vector<16x253xf32> to vector<16x235xf32>
    %165 = vector.extract_strided_slice %160 {offsets = [0, 18], sizes = [16, 235], strides = [1, 1]} : vector<16x253xf32> to vector<16x235xf32>
    %166 = arith.maximumf %164, %165 : vector<16x235xf32>
    %167 = arith.maximumf %163, %166 : vector<16x235xf32>
    %cst_96 = arith.constant 0.000000e+00 : f32
    %168 = vector.broadcast %cst_96 : f32 to vector<16x256xf32>
    %c0_97 = arith.constant 0 : index
    %c0_98 = arith.constant 0 : index
    %169 = vector.load %arg12[%c0_97, %c0_98] : memref<16x256xf32, #tpu.memory_space<vmem>>, vector<16x256xf32>
    tpu.vector_store %arg12[%c0_97, %c0_98], %168 {strides = array<i32>} : memref<16x256xf32, #tpu.memory_space<vmem>>, vector<16x256xf32>,
    %170 = vector.extract_strided_slice %167 {offsets = [0, 0], sizes = [16, 14], strides = [1, 1]} : vector<16x235xf32> to vector<16x14xf32>
    %c0_99 = arith.constant 0 : index
    %c17_100 = arith.constant 17 : index
    %171 = vector.load %arg12[%c0_99, %c17_100] : memref<16x256xf32, #tpu.memory_space<vmem>>, vector<16x14xf32>
    tpu.vector_store %arg12[%c0_99, %c17_100], %170 {strides = array<i32>} : memref<16x256xf32, #tpu.memory_space<vmem>>, vector<16x14xf32>,
    %172 = vector.extract_strided_slice %167 {offsets = [0, 17], sizes = [16, 14], strides = [1, 1]} : vector<16x235xf32> to vector<16x14xf32>
    %c0_101 = arith.constant 0 : index
    %c33 = arith.constant 33 : index
    %173 = vector.load %arg12[%c0_101, %c33] : memref<16x256xf32, #tpu.memory_space<vmem>>, vector<16x14xf32>
    tpu.vector_store %arg12[%c0_101, %c33], %172 {strides = array<i32>} : memref<16x256xf32, #tpu.memory_space<vmem>>, vector<16x14xf32>,
    %174 = vector.extract_strided_slice %167 {offsets = [0, 34], sizes = [16, 14], strides = [1, 1]} : vector<16x235xf32> to vector<16x14xf32>
    %c0_102 = arith.constant 0 : index
    %c49 = arith.constant 49 : index
    %175 = vector.load %arg12[%c0_102, %c49] : memref<16x256xf32, #tpu.memory_space<vmem>>, vector<16x14xf32>
    tpu.vector_store %arg12[%c0_102, %c49], %174 {strides = array<i32>} : memref<16x256xf32, #tpu.memory_space<vmem>>, vector<16x14xf32>,
    %176 = vector.extract_strided_slice %167 {offsets = [0, 51], sizes = [16, 14], strides = [1, 1]} : vector<16x235xf32> to vector<16x14xf32>
    %c0_103 = arith.constant 0 : index
    %c65 = arith.constant 65 : index
    %177 = vector.load %arg12[%c0_103, %c65] : memref<16x256xf32, #tpu.memory_space<vmem>>, vector<16x14xf32>
    tpu.vector_store %arg12[%c0_103, %c65], %176 {strides = array<i32>} : memref<16x256xf32, #tpu.memory_space<vmem>>, vector<16x14xf32>,
    %178 = vector.extract_strided_slice %167 {offsets = [0, 68], sizes = [16, 14], strides = [1, 1]} : vector<16x235xf32> to vector<16x14xf32>
    %c0_104 = arith.constant 0 : index
    %c81 = arith.constant 81 : index
    %179 = vector.load %arg12[%c0_104, %c81] : memref<16x256xf32, #tpu.memory_space<vmem>>, vector<16x14xf32>
    tpu.vector_store %arg12[%c0_104, %c81], %178 {strides = array<i32>} : memref<16x256xf32, #tpu.memory_space<vmem>>, vector<16x14xf32>,
    %180 = vector.extract_strided_slice %167 {offsets = [0, 85], sizes = [16, 14], strides = [1, 1]} : vector<16x235xf32> to vector<16x14xf32>
    %c0_105 = arith.constant 0 : index
    %c97 = arith.constant 97 : index
    %181 = vector.load %arg12[%c0_105, %c97] : memref<16x256xf32, #tpu.memory_space<vmem>>, vector<16x14xf32>
    tpu.vector_store %arg12[%c0_105, %c97], %180 {strides = array<i32>} : memref<16x256xf32, #tpu.memory_space<vmem>>, vector<16x14xf32>,
    %182 = vector.extract_strided_slice %167 {offsets = [0, 102], sizes = [16, 14], strides = [1, 1]} : vector<16x235xf32> to vector<16x14xf32>
    %c0_106 = arith.constant 0 : index
    %c113 = arith.constant 113 : index
    %183 = vector.load %arg12[%c0_106, %c113] : memref<16x256xf32, #tpu.memory_space<vmem>>, vector<16x14xf32>
    tpu.vector_store %arg12[%c0_106, %c113], %182 {strides = array<i32>} : memref<16x256xf32, #tpu.memory_space<vmem>>, vector<16x14xf32>,
    %184 = vector.extract_strided_slice %167 {offsets = [0, 119], sizes = [16, 14], strides = [1, 1]} : vector<16x235xf32> to vector<16x14xf32>
    %c0_107 = arith.constant 0 : index
    %c129 = arith.constant 129 : index
    %185 = vector.load %arg12[%c0_107, %c129] : memref<16x256xf32, #tpu.memory_space<vmem>>, vector<16x14xf32>
    tpu.vector_store %arg12[%c0_107, %c129], %184 {strides = array<i32>} : memref<16x256xf32, #tpu.memory_space<vmem>>, vector<16x14xf32>,
    %186 = vector.extract_strided_slice %167 {offsets = [0, 136], sizes = [16, 14], strides = [1, 1]} : vector<16x235xf32> to vector<16x14xf32>
    %c0_108 = arith.constant 0 : index
    %c145 = arith.constant 145 : index
    %187 = vector.load %arg12[%c0_108, %c145] : memref<16x256xf32, #tpu.memory_space<vmem>>, vector<16x14xf32>
    tpu.vector_store %arg12[%c0_108, %c145], %186 {strides = array<i32>} : memref<16x256xf32, #tpu.memory_space<vmem>>, vector<16x14xf32>,
    %188 = vector.extract_strided_slice %167 {offsets = [0, 153], sizes = [16, 14], strides = [1, 1]} : vector<16x235xf32> to vector<16x14xf32>
    %c0_109 = arith.constant 0 : index
    %c161 = arith.constant 161 : index
    %189 = vector.load %arg12[%c0_109, %c161] : memref<16x256xf32, #tpu.memory_space<vmem>>, vector<16x14xf32>
    tpu.vector_store %arg12[%c0_109, %c161], %188 {strides = array<i32>} : memref<16x256xf32, #tpu.memory_space<vmem>>, vector<16x14xf32>,
    %190 = vector.extract_strided_slice %167 {offsets = [0, 170], sizes = [16, 14], strides = [1, 1]} : vector<16x235xf32> to vector<16x14xf32>
    %c0_110 = arith.constant 0 : index
    %c177 = arith.constant 177 : index
    %191 = vector.load %arg12[%c0_110, %c177] : memref<16x256xf32, #tpu.memory_space<vmem>>, vector<16x14xf32>
    tpu.vector_store %arg12[%c0_110, %c177], %190 {strides = array<i32>} : memref<16x256xf32, #tpu.memory_space<vmem>>, vector<16x14xf32>,
    %192 = vector.extract_strided_slice %167 {offsets = [0, 187], sizes = [16, 14], strides = [1, 1]} : vector<16x235xf32> to vector<16x14xf32>
    %c0_111 = arith.constant 0 : index
    %c193 = arith.constant 193 : index
    %193 = vector.load %arg12[%c0_111, %c193] : memref<16x256xf32, #tpu.memory_space<vmem>>, vector<16x14xf32>
    tpu.vector_store %arg12[%c0_111, %c193], %192 {strides = array<i32>} : memref<16x256xf32, #tpu.memory_space<vmem>>, vector<16x14xf32>,
    %194 = vector.extract_strided_slice %167 {offsets = [0, 204], sizes = [16, 14], strides = [1, 1]} : vector<16x235xf32> to vector<16x14xf32>
    %c0_112 = arith.constant 0 : index
    %c209 = arith.constant 209 : index
    %195 = vector.load %arg12[%c0_112, %c209] : memref<16x256xf32, #tpu.memory_space<vmem>>, vector<16x14xf32>
    tpu.vector_store %arg12[%c0_112, %c209], %194 {strides = array<i32>} : memref<16x256xf32, #tpu.memory_space<vmem>>, vector<16x14xf32>,
    %196 = vector.extract_strided_slice %167 {offsets = [0, 221], sizes = [16, 14], strides = [1, 1]} : vector<16x235xf32> to vector<16x14xf32>
    %c0_113 = arith.constant 0 : index
    %c225 = arith.constant 225 : index
    %197 = vector.load %arg12[%c0_113, %c225] : memref<16x256xf32, #tpu.memory_space<vmem>>, vector<16x14xf32>
    tpu.vector_store %arg12[%c0_113, %c225], %196 {strides = array<i32>} : memref<16x256xf32, #tpu.memory_space<vmem>>, vector<16x14xf32>,
    %cst_114 = arith.constant 0.000000e+00 : f32
    %198 = vector.broadcast %cst_114 : f32 to vector<64x222xf32>
    %c0_115 = arith.constant 0 : index
    %c0_116 = arith.constant 0 : index
    %c0_117 = arith.constant 0 : index
    %199 = vector.load %arg6[%c0_115, %c0_116, %c0_117] : memref<9x64x16xf32, #tpu.memory_space<vmem>>, vector<1x64x16xf32>
    %200 = vector.shape_cast %199 : vector<1x64x16xf32> to vector<64x16xf32>
    %c0_118 = arith.constant 0 : index
    %c0_119 = arith.constant 0 : index
    %201 = vector.load %arg12[%c0_118, %c0_119] : memref<16x256xf32, #tpu.memory_space<vmem>>, vector<16x222xf32>
    %cst_120 = arith.constant dense<0.000000e+00> : vector<64x222xf32>
    %202 = tpu.matmul %200, %201, %cst_120 {dimension_numbers = #tpu.dot_dimension_numbers<[1], [0], [0], [1], [0, 0, 1, 1], [], []>} : vector<64x16xf32>, vector<16x222xf32>, vector<64x222xf32> -> vector<64x222xf32>
    %203 = arith.addf %198, %202 : vector<64x222xf32>
    %c1_121 = arith.constant 1 : index
    %c0_122 = arith.constant 0 : index
    %c0_123 = arith.constant 0 : index
    %204 = vector.load %arg6[%c1_121, %c0_122, %c0_123] : memref<9x64x16xf32, #tpu.memory_space<vmem>>, vector<1x64x16xf32>
    %205 = vector.shape_cast %204 : vector<1x64x16xf32> to vector<64x16xf32>
    %c0_124 = arith.constant 0 : index
    %c1_125 = arith.constant 1 : index
    %206 = vector.load %arg12[%c0_124, %c1_125] : memref<16x256xf32, #tpu.memory_space<vmem>>, vector<16x222xf32>
    %cst_126 = arith.constant dense<0.000000e+00> : vector<64x222xf32>
    %207 = tpu.matmul %205, %206, %cst_126 {dimension_numbers = #tpu.dot_dimension_numbers<[1], [0], [0], [1], [0, 0, 1, 1], [], []>} : vector<64x16xf32>, vector<16x222xf32>, vector<64x222xf32> -> vector<64x222xf32>
    %208 = arith.addf %203, %207 : vector<64x222xf32>
    %c2_127 = arith.constant 2 : index
    %c0_128 = arith.constant 0 : index
    %c0_129 = arith.constant 0 : index
    %209 = vector.load %arg6[%c2_127, %c0_128, %c0_129] : memref<9x64x16xf32, #tpu.memory_space<vmem>>, vector<1x64x16xf32>
    %210 = vector.shape_cast %209 : vector<1x64x16xf32> to vector<64x16xf32>
    %c0_130 = arith.constant 0 : index
    %c2_131 = arith.constant 2 : index
    %211 = vector.load %arg12[%c0_130, %c2_131] : memref<16x256xf32, #tpu.memory_space<vmem>>, vector<16x222xf32>
    %cst_132 = arith.constant dense<0.000000e+00> : vector<64x222xf32>
    %212 = tpu.matmul %210, %211, %cst_132 {dimension_numbers = #tpu.dot_dimension_numbers<[1], [0], [0], [1], [0, 0, 1, 1], [], []>} : vector<64x16xf32>, vector<16x222xf32>, vector<64x222xf32> -> vector<64x222xf32>
    %213 = arith.addf %208, %212 : vector<64x222xf32>
    %c3_133 = arith.constant 3 : index
    %c0_134 = arith.constant 0 : index
    %c0_135 = arith.constant 0 : index
    %214 = vector.load %arg6[%c3_133, %c0_134, %c0_135] : memref<9x64x16xf32, #tpu.memory_space<vmem>>, vector<1x64x16xf32>
    %215 = vector.shape_cast %214 : vector<1x64x16xf32> to vector<64x16xf32>
    %c0_136 = arith.constant 0 : index
    %c16 = arith.constant 16 : index
    %216 = vector.load %arg12[%c0_136, %c16] : memref<16x256xf32, #tpu.memory_space<vmem>>, vector<16x222xf32>
    %cst_137 = arith.constant dense<0.000000e+00> : vector<64x222xf32>
    %217 = tpu.matmul %215, %216, %cst_137 {dimension_numbers = #tpu.dot_dimension_numbers<[1], [0], [0], [1], [0, 0, 1, 1], [], []>} : vector<64x16xf32>, vector<16x222xf32>, vector<64x222xf32> -> vector<64x222xf32>
    %218 = arith.addf %213, %217 : vector<64x222xf32>
    %c4_138 = arith.constant 4 : index
    %c0_139 = arith.constant 0 : index
    %c0_140 = arith.constant 0 : index
    %219 = vector.load %arg6[%c4_138, %c0_139, %c0_140] : memref<9x64x16xf32, #tpu.memory_space<vmem>>, vector<1x64x16xf32>
    %220 = vector.shape_cast %219 : vector<1x64x16xf32> to vector<64x16xf32>
    %c0_141 = arith.constant 0 : index
    %c17_142 = arith.constant 17 : index
    %221 = vector.load %arg12[%c0_141, %c17_142] : memref<16x256xf32, #tpu.memory_space<vmem>>, vector<16x222xf32>
    %cst_143 = arith.constant dense<0.000000e+00> : vector<64x222xf32>
    %222 = tpu.matmul %220, %221, %cst_143 {dimension_numbers = #tpu.dot_dimension_numbers<[1], [0], [0], [1], [0, 0, 1, 1], [], []>} : vector<64x16xf32>, vector<16x222xf32>, vector<64x222xf32> -> vector<64x222xf32>
    %223 = arith.addf %218, %222 : vector<64x222xf32>
    %c5_144 = arith.constant 5 : index
    %c0_145 = arith.constant 0 : index
    %c0_146 = arith.constant 0 : index
    %224 = vector.load %arg6[%c5_144, %c0_145, %c0_146] : memref<9x64x16xf32, #tpu.memory_space<vmem>>, vector<1x64x16xf32>
    %225 = vector.shape_cast %224 : vector<1x64x16xf32> to vector<64x16xf32>
    %c0_147 = arith.constant 0 : index
    %c18_148 = arith.constant 18 : index
    %226 = vector.load %arg12[%c0_147, %c18_148] : memref<16x256xf32, #tpu.memory_space<vmem>>, vector<16x222xf32>
    %cst_149 = arith.constant dense<0.000000e+00> : vector<64x222xf32>
    %227 = tpu.matmul %225, %226, %cst_149 {dimension_numbers = #tpu.dot_dimension_numbers<[1], [0], [0], [1], [0, 0, 1, 1], [], []>} : vector<64x16xf32>, vector<16x222xf32>, vector<64x222xf32> -> vector<64x222xf32>
    %228 = arith.addf %223, %227 : vector<64x222xf32>
    %c6_150 = arith.constant 6 : index
    %c0_151 = arith.constant 0 : index
    %c0_152 = arith.constant 0 : index
    %229 = vector.load %arg6[%c6_150, %c0_151, %c0_152] : memref<9x64x16xf32, #tpu.memory_space<vmem>>, vector<1x64x16xf32>
    %230 = vector.shape_cast %229 : vector<1x64x16xf32> to vector<64x16xf32>
    %c0_153 = arith.constant 0 : index
    %c32 = arith.constant 32 : index
    %231 = vector.load %arg12[%c0_153, %c32] : memref<16x256xf32, #tpu.memory_space<vmem>>, vector<16x222xf32>
    %cst_154 = arith.constant dense<0.000000e+00> : vector<64x222xf32>
    %232 = tpu.matmul %230, %231, %cst_154 {dimension_numbers = #tpu.dot_dimension_numbers<[1], [0], [0], [1], [0, 0, 1, 1], [], []>} : vector<64x16xf32>, vector<16x222xf32>, vector<64x222xf32> -> vector<64x222xf32>
    %233 = arith.addf %228, %232 : vector<64x222xf32>
    %c7_155 = arith.constant 7 : index
    %c0_156 = arith.constant 0 : index
    %c0_157 = arith.constant 0 : index
    %234 = vector.load %arg6[%c7_155, %c0_156, %c0_157] : memref<9x64x16xf32, #tpu.memory_space<vmem>>, vector<1x64x16xf32>
    %235 = vector.shape_cast %234 : vector<1x64x16xf32> to vector<64x16xf32>
    %c0_158 = arith.constant 0 : index
    %c33_159 = arith.constant 33 : index
    %236 = vector.load %arg12[%c0_158, %c33_159] : memref<16x256xf32, #tpu.memory_space<vmem>>, vector<16x222xf32>
    %cst_160 = arith.constant dense<0.000000e+00> : vector<64x222xf32>
    %237 = tpu.matmul %235, %236, %cst_160 {dimension_numbers = #tpu.dot_dimension_numbers<[1], [0], [0], [1], [0, 0, 1, 1], [], []>} : vector<64x16xf32>, vector<16x222xf32>, vector<64x222xf32> -> vector<64x222xf32>
    %238 = arith.addf %233, %237 : vector<64x222xf32>
    %c8_161 = arith.constant 8 : index
    %c0_162 = arith.constant 0 : index
    %c0_163 = arith.constant 0 : index
    %239 = vector.load %arg6[%c8_161, %c0_162, %c0_163] : memref<9x64x16xf32, #tpu.memory_space<vmem>>, vector<1x64x16xf32>
    %240 = vector.shape_cast %239 : vector<1x64x16xf32> to vector<64x16xf32>
    %c0_164 = arith.constant 0 : index
    %c34_165 = arith.constant 34 : index
    %241 = vector.load %arg12[%c0_164, %c34_165] : memref<16x256xf32, #tpu.memory_space<vmem>>, vector<16x222xf32>
    %cst_166 = arith.constant dense<0.000000e+00> : vector<64x222xf32>
    %242 = tpu.matmul %240, %241, %cst_166 {dimension_numbers = #tpu.dot_dimension_numbers<[1], [0], [0], [1], [0, 0, 1, 1], [], []>} : vector<64x16xf32>, vector<16x222xf32>, vector<64x222xf32> -> vector<64x222xf32>
    %243 = arith.addf %238, %242 : vector<64x222xf32>
    %c0_167 = arith.constant 0 : index
    %c0_168 = arith.constant 0 : index
    %244 = vector.load %arg7[%c0_167, %c0_168] : memref<64x1xf32, #tpu.memory_space<vmem>>, vector<64x1xf32>
    %245 = vector.broadcast %244 : vector<64x1xf32> to vector<64x222xf32>
    %246 = arith.addf %243, %245 : vector<64x222xf32>
    %cst_169 = arith.constant 0.000000e+00 : f32
    %247 = vector.broadcast %cst_169 : f32 to vector<64x222xf32>
    %248 = arith.maximumf %246, %247 : vector<64x222xf32>
    %cst_170 = arith.constant 0.000000e+00 : f32
    %249 = vector.broadcast %cst_170 : f32 to vector<64x324xf32>
    %c0_171 = arith.constant 0 : index
    %c0_172 = arith.constant 0 : index
    %250 = vector.load %arg13[%c0_171, %c0_172] : memref<64x324xf32, #tpu.memory_space<vmem>>, vector<64x324xf32>
    tpu.vector_store %arg13[%c0_171, %c0_172], %249 {strides = array<i32>} : memref<64x324xf32, #tpu.memory_space<vmem>>, vector<64x324xf32>,
    %251 = vector.extract_strided_slice %248 {offsets = [0, 0], sizes = [64, 14], strides = [1, 1]} : vector<64x222xf32> to vector<64x14xf32>
    %c0_173 = arith.constant 0 : index
    %c38 = arith.constant 38 : index
    %252 = vector.load %arg13[%c0_173, %c38] : memref<64x324xf32, #tpu.memory_space<vmem>>, vector<64x14xf32>
    tpu.vector_store %arg13[%c0_173, %c38], %251 {strides = array<i32>} : memref<64x324xf32, #tpu.memory_space<vmem>>, vector<64x14xf32>,
    %253 = vector.extract_strided_slice %248 {offsets = [0, 16], sizes = [64, 14], strides = [1, 1]} : vector<64x222xf32> to vector<64x14xf32>
    %c0_174 = arith.constant 0 : index
    %c56 = arith.constant 56 : index
    %254 = vector.load %arg13[%c0_174, %c56] : memref<64x324xf32, #tpu.memory_space<vmem>>, vector<64x14xf32>
    tpu.vector_store %arg13[%c0_174, %c56], %253 {strides = array<i32>} : memref<64x324xf32, #tpu.memory_space<vmem>>, vector<64x14xf32>,
    %255 = vector.extract_strided_slice %248 {offsets = [0, 32], sizes = [64, 14], strides = [1, 1]} : vector<64x222xf32> to vector<64x14xf32>
    %c0_175 = arith.constant 0 : index
    %c74 = arith.constant 74 : index
    %256 = vector.load %arg13[%c0_175, %c74] : memref<64x324xf32, #tpu.memory_space<vmem>>, vector<64x14xf32>
    tpu.vector_store %arg13[%c0_175, %c74], %255 {strides = array<i32>} : memref<64x324xf32, #tpu.memory_space<vmem>>, vector<64x14xf32>,
    %257 = vector.extract_strided_slice %248 {offsets = [0, 48], sizes = [64, 14], strides = [1, 1]} : vector<64x222xf32> to vector<64x14xf32>
    %c0_176 = arith.constant 0 : index
    %c92 = arith.constant 92 : index
    %258 = vector.load %arg13[%c0_176, %c92] : memref<64x324xf32, #tpu.memory_space<vmem>>, vector<64x14xf32>
    tpu.vector_store %arg13[%c0_176, %c92], %257 {strides = array<i32>} : memref<64x324xf32, #tpu.memory_space<vmem>>, vector<64x14xf32>,
    %259 = vector.extract_strided_slice %248 {offsets = [0, 64], sizes = [64, 14], strides = [1, 1]} : vector<64x222xf32> to vector<64x14xf32>
    %c0_177 = arith.constant 0 : index
    %c110 = arith.constant 110 : index
    %260 = vector.load %arg13[%c0_177, %c110] : memref<64x324xf32, #tpu.memory_space<vmem>>, vector<64x14xf32>
    tpu.vector_store %arg13[%c0_177, %c110], %259 {strides = array<i32>} : memref<64x324xf32, #tpu.memory_space<vmem>>, vector<64x14xf32>,
    %261 = vector.extract_strided_slice %248 {offsets = [0, 80], sizes = [64, 14], strides = [1, 1]} : vector<64x222xf32> to vector<64x14xf32>
    %c0_178 = arith.constant 0 : index
    %c128 = arith.constant 128 : index
    %262 = vector.load %arg13[%c0_178, %c128] : memref<64x324xf32, #tpu.memory_space<vmem>>, vector<64x14xf32>
    tpu.vector_store %arg13[%c0_178, %c128], %261 {strides = array<i32>} : memref<64x324xf32, #tpu.memory_space<vmem>>, vector<64x14xf32>,
    %263 = vector.extract_strided_slice %248 {offsets = [0, 96], sizes = [64, 14], strides = [1, 1]} : vector<64x222xf32> to vector<64x14xf32>
    %c0_179 = arith.constant 0 : index
    %c146 = arith.constant 146 : index
    %264 = vector.load %arg13[%c0_179, %c146] : memref<64x324xf32, #tpu.memory_space<vmem>>, vector<64x14xf32>
    tpu.vector_store %arg13[%c0_179, %c146], %263 {strides = array<i32>} : memref<64x324xf32, #tpu.memory_space<vmem>>, vector<64x14xf32>,
    %265 = vector.extract_strided_slice %248 {offsets = [0, 112], sizes = [64, 14], strides = [1, 1]} : vector<64x222xf32> to vector<64x14xf32>
    %c0_180 = arith.constant 0 : index
    %c164 = arith.constant 164 : index
    %266 = vector.load %arg13[%c0_180, %c164] : memref<64x324xf32, #tpu.memory_space<vmem>>, vector<64x14xf32>
    tpu.vector_store %arg13[%c0_180, %c164], %265 {strides = array<i32>} : memref<64x324xf32, #tpu.memory_space<vmem>>, vector<64x14xf32>,
    %267 = vector.extract_strided_slice %248 {offsets = [0, 128], sizes = [64, 14], strides = [1, 1]} : vector<64x222xf32> to vector<64x14xf32>
    %c0_181 = arith.constant 0 : index
    %c182 = arith.constant 182 : index
    %268 = vector.load %arg13[%c0_181, %c182] : memref<64x324xf32, #tpu.memory_space<vmem>>, vector<64x14xf32>
    tpu.vector_store %arg13[%c0_181, %c182], %267 {strides = array<i32>} : memref<64x324xf32, #tpu.memory_space<vmem>>, vector<64x14xf32>,
    %269 = vector.extract_strided_slice %248 {offsets = [0, 144], sizes = [64, 14], strides = [1, 1]} : vector<64x222xf32> to vector<64x14xf32>
    %c0_182 = arith.constant 0 : index
    %c200 = arith.constant 200 : index
    %270 = vector.load %arg13[%c0_182, %c200] : memref<64x324xf32, #tpu.memory_space<vmem>>, vector<64x14xf32>
    tpu.vector_store %arg13[%c0_182, %c200], %269 {strides = array<i32>} : memref<64x324xf32, #tpu.memory_space<vmem>>, vector<64x14xf32>,
    %271 = vector.extract_strided_slice %248 {offsets = [0, 160], sizes = [64, 14], strides = [1, 1]} : vector<64x222xf32> to vector<64x14xf32>
    %c0_183 = arith.constant 0 : index
    %c218 = arith.constant 218 : index
    %272 = vector.load %arg13[%c0_183, %c218] : memref<64x324xf32, #tpu.memory_space<vmem>>, vector<64x14xf32>
    tpu.vector_store %arg13[%c0_183, %c218], %271 {strides = array<i32>} : memref<64x324xf32, #tpu.memory_space<vmem>>, vector<64x14xf32>,
    %273 = vector.extract_strided_slice %248 {offsets = [0, 176], sizes = [64, 14], strides = [1, 1]} : vector<64x222xf32> to vector<64x14xf32>
    %c0_184 = arith.constant 0 : index
    %c236 = arith.constant 236 : index
    %274 = vector.load %arg13[%c0_184, %c236] : memref<64x324xf32, #tpu.memory_space<vmem>>, vector<64x14xf32>
    tpu.vector_store %arg13[%c0_184, %c236], %273 {strides = array<i32>} : memref<64x324xf32, #tpu.memory_space<vmem>>, vector<64x14xf32>,
    %275 = vector.extract_strided_slice %248 {offsets = [0, 192], sizes = [64, 14], strides = [1, 1]} : vector<64x222xf32> to vector<64x14xf32>
    %c0_185 = arith.constant 0 : index
    %c254 = arith.constant 254 : index
    %276 = vector.load %arg13[%c0_185, %c254] : memref<64x324xf32, #tpu.memory_space<vmem>>, vector<64x14xf32>
    tpu.vector_store %arg13[%c0_185, %c254], %275 {strides = array<i32>} : memref<64x324xf32, #tpu.memory_space<vmem>>, vector<64x14xf32>,
    %277 = vector.extract_strided_slice %248 {offsets = [0, 208], sizes = [64, 14], strides = [1, 1]} : vector<64x222xf32> to vector<64x14xf32>
    %c0_186 = arith.constant 0 : index
    %c272 = arith.constant 272 : index
    %278 = vector.load %arg13[%c0_186, %c272] : memref<64x324xf32, #tpu.memory_space<vmem>>, vector<64x14xf32>
    tpu.vector_store %arg13[%c0_186, %c272], %277 {strides = array<i32>} : memref<64x324xf32, #tpu.memory_space<vmem>>, vector<64x14xf32>,
    %cst_187 = arith.constant 0.000000e+00 : f32
    %279 = vector.broadcast %cst_187 : f32 to vector<64x286xf32>
    %c0_188 = arith.constant 0 : index
    %c0_189 = arith.constant 0 : index
    %280 = vector.load %arg13[%c0_188, %c0_189] : memref<64x324xf32, #tpu.memory_space<vmem>>, vector<64x286xf32>
    %c0_190 = arith.constant 0 : index
    %c0_191 = arith.constant 0 : index
    %c0_192 = arith.constant 0 : index
    %281 = vector.load %arg8[%c0_190, %c0_191, %c0_192] : memref<9x64x1xf32, #tpu.memory_space<vmem>>, vector<1x64x1xf32>
    %282 = vector.shape_cast %281 : vector<1x64x1xf32> to vector<64x1xf32>
    %283 = vector.broadcast %282 : vector<64x1xf32> to vector<64x286xf32>
    %284 = arith.mulf %280, %283 : vector<64x286xf32>
    %285 = arith.addf %279, %284 : vector<64x286xf32>
    %c0_193 = arith.constant 0 : index
    %c1_194 = arith.constant 1 : index
    %286 = vector.load %arg13[%c0_193, %c1_194] : memref<64x324xf32, #tpu.memory_space<vmem>>, vector<64x286xf32>
    %c1_195 = arith.constant 1 : index
    %c0_196 = arith.constant 0 : index
    %c0_197 = arith.constant 0 : index
    %287 = vector.load %arg8[%c1_195, %c0_196, %c0_197] : memref<9x64x1xf32, #tpu.memory_space<vmem>>, vector<1x64x1xf32>
    %288 = vector.shape_cast %287 : vector<1x64x1xf32> to vector<64x1xf32>
    %289 = vector.broadcast %288 : vector<64x1xf32> to vector<64x286xf32>
    %290 = arith.mulf %286, %289 : vector<64x286xf32>
    %291 = arith.addf %285, %290 : vector<64x286xf32>
    %c0_198 = arith.constant 0 : index
    %c2_199 = arith.constant 2 : index
    %292 = vector.load %arg13[%c0_198, %c2_199] : memref<64x324xf32, #tpu.memory_space<vmem>>, vector<64x286xf32>
    %c2_200 = arith.constant 2 : index
    %c0_201 = arith.constant 0 : index
    %c0_202 = arith.constant 0 : index
    %293 = vector.load %arg8[%c2_200, %c0_201, %c0_202] : memref<9x64x1xf32, #tpu.memory_space<vmem>>, vector<1x64x1xf32>
    %294 = vector.shape_cast %293 : vector<1x64x1xf32> to vector<64x1xf32>
    %295 = vector.broadcast %294 : vector<64x1xf32> to vector<64x286xf32>
    %296 = arith.mulf %292, %295 : vector<64x286xf32>
    %297 = arith.addf %291, %296 : vector<64x286xf32>
    %c0_203 = arith.constant 0 : index
    %c18_204 = arith.constant 18 : index
    %298 = vector.load %arg13[%c0_203, %c18_204] : memref<64x324xf32, #tpu.memory_space<vmem>>, vector<64x286xf32>
    %c3_205 = arith.constant 3 : index
    %c0_206 = arith.constant 0 : index
    %c0_207 = arith.constant 0 : index
    %299 = vector.load %arg8[%c3_205, %c0_206, %c0_207] : memref<9x64x1xf32, #tpu.memory_space<vmem>>, vector<1x64x1xf32>
    %300 = vector.shape_cast %299 : vector<1x64x1xf32> to vector<64x1xf32>
    %301 = vector.broadcast %300 : vector<64x1xf32> to vector<64x286xf32>
    %302 = arith.mulf %298, %301 : vector<64x286xf32>
    %303 = arith.addf %297, %302 : vector<64x286xf32>
    %c0_208 = arith.constant 0 : index
    %c19_209 = arith.constant 19 : index
    %304 = vector.load %arg13[%c0_208, %c19_209] : memref<64x324xf32, #tpu.memory_space<vmem>>, vector<64x286xf32>
    %c4_210 = arith.constant 4 : index
    %c0_211 = arith.constant 0 : index
    %c0_212 = arith.constant 0 : index
    %305 = vector.load %arg8[%c4_210, %c0_211, %c0_212] : memref<9x64x1xf32, #tpu.memory_space<vmem>>, vector<1x64x1xf32>
    %306 = vector.shape_cast %305 : vector<1x64x1xf32> to vector<64x1xf32>
    %307 = vector.broadcast %306 : vector<64x1xf32> to vector<64x286xf32>
    %308 = arith.mulf %304, %307 : vector<64x286xf32>
    %309 = arith.addf %303, %308 : vector<64x286xf32>
    %c0_213 = arith.constant 0 : index
    %c20 = arith.constant 20 : index
    %310 = vector.load %arg13[%c0_213, %c20] : memref<64x324xf32, #tpu.memory_space<vmem>>, vector<64x286xf32>
    %c5_214 = arith.constant 5 : index
    %c0_215 = arith.constant 0 : index
    %c0_216 = arith.constant 0 : index
    %311 = vector.load %arg8[%c5_214, %c0_215, %c0_216] : memref<9x64x1xf32, #tpu.memory_space<vmem>>, vector<1x64x1xf32>
    %312 = vector.shape_cast %311 : vector<1x64x1xf32> to vector<64x1xf32>
    %313 = vector.broadcast %312 : vector<64x1xf32> to vector<64x286xf32>
    %314 = arith.mulf %310, %313 : vector<64x286xf32>
    %315 = arith.addf %309, %314 : vector<64x286xf32>
    %c0_217 = arith.constant 0 : index
    %c36_218 = arith.constant 36 : index
    %316 = vector.load %arg13[%c0_217, %c36_218] : memref<64x324xf32, #tpu.memory_space<vmem>>, vector<64x286xf32>
    %c6_219 = arith.constant 6 : index
    %c0_220 = arith.constant 0 : index
    %c0_221 = arith.constant 0 : index
    %317 = vector.load %arg8[%c6_219, %c0_220, %c0_221] : memref<9x64x1xf32, #tpu.memory_space<vmem>>, vector<1x64x1xf32>
    %318 = vector.shape_cast %317 : vector<1x64x1xf32> to vector<64x1xf32>
    %319 = vector.broadcast %318 : vector<64x1xf32> to vector<64x286xf32>
    %320 = arith.mulf %316, %319 : vector<64x286xf32>
    %321 = arith.addf %315, %320 : vector<64x286xf32>
    %c0_222 = arith.constant 0 : index
    %c37 = arith.constant 37 : index
    %322 = vector.load %arg13[%c0_222, %c37] : memref<64x324xf32, #tpu.memory_space<vmem>>, vector<64x286xf32>
    %c7_223 = arith.constant 7 : index
    %c0_224 = arith.constant 0 : index
    %c0_225 = arith.constant 0 : index
    %323 = vector.load %arg8[%c7_223, %c0_224, %c0_225] : memref<9x64x1xf32, #tpu.memory_space<vmem>>, vector<1x64x1xf32>
    %324 = vector.shape_cast %323 : vector<1x64x1xf32> to vector<64x1xf32>
    %325 = vector.broadcast %324 : vector<64x1xf32> to vector<64x286xf32>
    %326 = arith.mulf %322, %325 : vector<64x286xf32>
    %327 = arith.addf %321, %326 : vector<64x286xf32>
    %c0_226 = arith.constant 0 : index
    %c38_227 = arith.constant 38 : index
    %328 = vector.load %arg13[%c0_226, %c38_227] : memref<64x324xf32, #tpu.memory_space<vmem>>, vector<64x286xf32>
    %c8_228 = arith.constant 8 : index
    %c0_229 = arith.constant 0 : index
    %c0_230 = arith.constant 0 : index
    %329 = vector.load %arg8[%c8_228, %c0_229, %c0_230] : memref<9x64x1xf32, #tpu.memory_space<vmem>>, vector<1x64x1xf32>
    %330 = vector.shape_cast %329 : vector<1x64x1xf32> to vector<64x1xf32>
    %331 = vector.broadcast %330 : vector<64x1xf32> to vector<64x286xf32>
    %332 = arith.mulf %328, %331 : vector<64x286xf32>
    %333 = arith.addf %327, %332 : vector<64x286xf32>
    %cst_231 = arith.constant dense<0.000000e+00> : vector<286xf32>
    %334 = vector.multi_reduction <add>, %333, %cst_231 [0] : vector<64x286xf32> to vector<286xf32>
    %335 = vector.shape_cast %334 : vector<286xf32> to vector<1x286xf32>
    %c0_232 = arith.constant 0 : index
    %c0_233 = arith.constant 0 : index
    %336 = vector.load %arg9[%c0_232, %c0_233] : memref<1x1xf32, #tpu.memory_space<vmem>>, vector<1x1xf32>
    %337 = vector.broadcast %336 : vector<1x1xf32> to vector<1x286xf32>
    %338 = arith.addf %335, %337 : vector<1x286xf32>
    %cst_234 = arith.constant 0.000000e+00 : f32
    %339 = vector.broadcast %cst_234 : f32 to vector<1x286xf32>
    %340 = arith.subf %339, %338 : vector<1x286xf32>
    %341 = math.exp %340 : vector<1x286xf32>
    %cst_235 = arith.constant 1.000000e+00 : f32
    %342 = vector.broadcast %cst_235 : f32 to vector<1x286xf32>
    %343 = arith.addf %342, %341 : vector<1x286xf32>
    %cst_236 = arith.constant 1.000000e+00 : f32
    %344 = vector.broadcast %cst_236 : f32 to vector<1x286xf32>
    %345 = arith.divf %344, %343 : vector<1x286xf32>
    %346 = vector.extract_strided_slice %345 {offsets = [0, 0], sizes = [1, 16], strides = [1, 1]} : vector<1x286xf32> to vector<1x16xf32>
    %c0_237 = arith.constant 0 : index
    %c0_238 = arith.constant 0 : index
    %c0_239 = arith.constant 0 : index
    %347 = vector.load %arg10[%c0_237, %c0_238, %c0_239] : memref<1x1x256xf32, #tpu.memory_space<vmem>>, vector<1x1x16xf32>
    %348 = vector.shape_cast %347 : vector<1x1x16xf32> to vector<1x16xf32>
    %349 = vector.shape_cast %346 : vector<1x16xf32> to vector<1x1x16xf32>
    tpu.vector_store %arg10[%c0_237, %c0_238, %c0_239], %349 {strides = array<i32>} : memref<1x1x256xf32, #tpu.memory_space<vmem>>, vector<1x1x16xf32>,
    %350 = vector.extract_strided_slice %345 {offsets = [0, 18], sizes = [1, 16], strides = [1, 1]} : vector<1x286xf32> to vector<1x16xf32>
    %c0_240 = arith.constant 0 : index
    %c0_241 = arith.constant 0 : index
    %c16_242 = arith.constant 16 : index
    %351 = vector.load %arg10[%c0_240, %c0_241, %c16_242] : memref<1x1x256xf32, #tpu.memory_space<vmem>>, vector<1x1x16xf32>
    %352 = vector.shape_cast %351 : vector<1x1x16xf32> to vector<1x16xf32>
    %353 = vector.shape_cast %350 : vector<1x16xf32> to vector<1x1x16xf32>
    tpu.vector_store %arg10[%c0_240, %c0_241, %c16_242], %353 {strides = array<i32>} : memref<1x1x256xf32, #tpu.memory_space<vmem>>, vector<1x1x16xf32>,
    %354 = vector.extract_strided_slice %345 {offsets = [0, 36], sizes = [1, 16], strides = [1, 1]} : vector<1x286xf32> to vector<1x16xf32>
    %c0_243 = arith.constant 0 : index
    %c0_244 = arith.constant 0 : index
    %c32_245 = arith.constant 32 : index
    %355 = vector.load %arg10[%c0_243, %c0_244, %c32_245] : memref<1x1x256xf32, #tpu.memory_space<vmem>>, vector<1x1x16xf32>
    %356 = vector.shape_cast %355 : vector<1x1x16xf32> to vector<1x16xf32>
    %357 = vector.shape_cast %354 : vector<1x16xf32> to vector<1x1x16xf32>
    tpu.vector_store %arg10[%c0_243, %c0_244, %c32_245], %357 {strides = array<i32>} : memref<1x1x256xf32, #tpu.memory_space<vmem>>, vector<1x1x16xf32>,
    %358 = vector.extract_strided_slice %345 {offsets = [0, 54], sizes = [1, 16], strides = [1, 1]} : vector<1x286xf32> to vector<1x16xf32>
    %c0_246 = arith.constant 0 : index
    %c0_247 = arith.constant 0 : index
    %c48 = arith.constant 48 : index
    %359 = vector.load %arg10[%c0_246, %c0_247, %c48] : memref<1x1x256xf32, #tpu.memory_space<vmem>>, vector<1x1x16xf32>
    %360 = vector.shape_cast %359 : vector<1x1x16xf32> to vector<1x16xf32>
    %361 = vector.shape_cast %358 : vector<1x16xf32> to vector<1x1x16xf32>
    tpu.vector_store %arg10[%c0_246, %c0_247, %c48], %361 {strides = array<i32>} : memref<1x1x256xf32, #tpu.memory_space<vmem>>, vector<1x1x16xf32>,
    %362 = vector.extract_strided_slice %345 {offsets = [0, 72], sizes = [1, 16], strides = [1, 1]} : vector<1x286xf32> to vector<1x16xf32>
    %c0_248 = arith.constant 0 : index
    %c0_249 = arith.constant 0 : index
    %c64 = arith.constant 64 : index
    %363 = vector.load %arg10[%c0_248, %c0_249, %c64] : memref<1x1x256xf32, #tpu.memory_space<vmem>>, vector<1x1x16xf32>
    %364 = vector.shape_cast %363 : vector<1x1x16xf32> to vector<1x16xf32>
    %365 = vector.shape_cast %362 : vector<1x16xf32> to vector<1x1x16xf32>
    tpu.vector_store %arg10[%c0_248, %c0_249, %c64], %365 {strides = array<i32>} : memref<1x1x256xf32, #tpu.memory_space<vmem>>, vector<1x1x16xf32>,
    %366 = vector.extract_strided_slice %345 {offsets = [0, 90], sizes = [1, 16], strides = [1, 1]} : vector<1x286xf32> to vector<1x16xf32>
    %c0_250 = arith.constant 0 : index
    %c0_251 = arith.constant 0 : index
    %c80 = arith.constant 80 : index
    %367 = vector.load %arg10[%c0_250, %c0_251, %c80] : memref<1x1x256xf32, #tpu.memory_space<vmem>>, vector<1x1x16xf32>
    %368 = vector.shape_cast %367 : vector<1x1x16xf32> to vector<1x16xf32>
    %369 = vector.shape_cast %366 : vector<1x16xf32> to vector<1x1x16xf32>
    tpu.vector_store %arg10[%c0_250, %c0_251, %c80], %369 {strides = array<i32>} : memref<1x1x256xf32, #tpu.memory_space<vmem>>, vector<1x1x16xf32>,
    %370 = vector.extract_strided_slice %345 {offsets = [0, 108], sizes = [1, 16], strides = [1, 1]} : vector<1x286xf32> to vector<1x16xf32>
    %c0_252 = arith.constant 0 : index
    %c0_253 = arith.constant 0 : index
    %c96 = arith.constant 96 : index
    %371 = vector.load %arg10[%c0_252, %c0_253, %c96] : memref<1x1x256xf32, #tpu.memory_space<vmem>>, vector<1x1x16xf32>
    %372 = vector.shape_cast %371 : vector<1x1x16xf32> to vector<1x16xf32>
    %373 = vector.shape_cast %370 : vector<1x16xf32> to vector<1x1x16xf32>
    tpu.vector_store %arg10[%c0_252, %c0_253, %c96], %373 {strides = array<i32>} : memref<1x1x256xf32, #tpu.memory_space<vmem>>, vector<1x1x16xf32>,
    %374 = vector.extract_strided_slice %345 {offsets = [0, 126], sizes = [1, 16], strides = [1, 1]} : vector<1x286xf32> to vector<1x16xf32>
    %c0_254 = arith.constant 0 : index
    %c0_255 = arith.constant 0 : index
    %c112 = arith.constant 112 : index
    %375 = vector.load %arg10[%c0_254, %c0_255, %c112] : memref<1x1x256xf32, #tpu.memory_space<vmem>>, vector<1x1x16xf32>
    %376 = vector.shape_cast %375 : vector<1x1x16xf32> to vector<1x16xf32>
    %377 = vector.shape_cast %374 : vector<1x16xf32> to vector<1x1x16xf32>
    tpu.vector_store %arg10[%c0_254, %c0_255, %c112], %377 {strides = array<i32>} : memref<1x1x256xf32, #tpu.memory_space<vmem>>, vector<1x1x16xf32>,
    %378 = vector.extract_strided_slice %345 {offsets = [0, 144], sizes = [1, 16], strides = [1, 1]} : vector<1x286xf32> to vector<1x16xf32>
    %c0_256 = arith.constant 0 : index
    %c0_257 = arith.constant 0 : index
    %c128_258 = arith.constant 128 : index
    %379 = vector.load %arg10[%c0_256, %c0_257, %c128_258] : memref<1x1x256xf32, #tpu.memory_space<vmem>>, vector<1x1x16xf32>
    %380 = vector.shape_cast %379 : vector<1x1x16xf32> to vector<1x16xf32>
    %381 = vector.shape_cast %378 : vector<1x16xf32> to vector<1x1x16xf32>
    tpu.vector_store %arg10[%c0_256, %c0_257, %c128_258], %381 {strides = array<i32>} : memref<1x1x256xf32, #tpu.memory_space<vmem>>, vector<1x1x16xf32>,
    %382 = vector.extract_strided_slice %345 {offsets = [0, 162], sizes = [1, 16], strides = [1, 1]} : vector<1x286xf32> to vector<1x16xf32>
    %c0_259 = arith.constant 0 : index
    %c0_260 = arith.constant 0 : index
    %c144 = arith.constant 144 : index
    %383 = vector.load %arg10[%c0_259, %c0_260, %c144] : memref<1x1x256xf32, #tpu.memory_space<vmem>>, vector<1x1x16xf32>
    %384 = vector.shape_cast %383 : vector<1x1x16xf32> to vector<1x16xf32>
    %385 = vector.shape_cast %382 : vector<1x16xf32> to vector<1x1x16xf32>
    tpu.vector_store %arg10[%c0_259, %c0_260, %c144], %385 {strides = array<i32>} : memref<1x1x256xf32, #tpu.memory_space<vmem>>, vector<1x1x16xf32>,
    %386 = vector.extract_strided_slice %345 {offsets = [0, 180], sizes = [1, 16], strides = [1, 1]} : vector<1x286xf32> to vector<1x16xf32>
    %c0_261 = arith.constant 0 : index
    %c0_262 = arith.constant 0 : index
    %c160 = arith.constant 160 : index
    %387 = vector.load %arg10[%c0_261, %c0_262, %c160] : memref<1x1x256xf32, #tpu.memory_space<vmem>>, vector<1x1x16xf32>
    %388 = vector.shape_cast %387 : vector<1x1x16xf32> to vector<1x16xf32>
    %389 = vector.shape_cast %386 : vector<1x16xf32> to vector<1x1x16xf32>
    tpu.vector_store %arg10[%c0_261, %c0_262, %c160], %389 {strides = array<i32>} : memref<1x1x256xf32, #tpu.memory_space<vmem>>, vector<1x1x16xf32>,
    %390 = vector.extract_strided_slice %345 {offsets = [0, 198], sizes = [1, 16], strides = [1, 1]} : vector<1x286xf32> to vector<1x16xf32>
    %c0_263 = arith.constant 0 : index
    %c0_264 = arith.constant 0 : index
    %c176 = arith.constant 176 : index
    %391 = vector.load %arg10[%c0_263, %c0_264, %c176] : memref<1x1x256xf32, #tpu.memory_space<vmem>>, vector<1x1x16xf32>
    %392 = vector.shape_cast %391 : vector<1x1x16xf32> to vector<1x16xf32>
    %393 = vector.shape_cast %390 : vector<1x16xf32> to vector<1x1x16xf32>
    tpu.vector_store %arg10[%c0_263, %c0_264, %c176], %393 {strides = array<i32>} : memref<1x1x256xf32, #tpu.memory_space<vmem>>, vector<1x1x16xf32>,
    %394 = vector.extract_strided_slice %345 {offsets = [0, 216], sizes = [1, 16], strides = [1, 1]} : vector<1x286xf32> to vector<1x16xf32>
    %c0_265 = arith.constant 0 : index
    %c0_266 = arith.constant 0 : index
    %c192 = arith.constant 192 : index
    %395 = vector.load %arg10[%c0_265, %c0_266, %c192] : memref<1x1x256xf32, #tpu.memory_space<vmem>>, vector<1x1x16xf32>
    %396 = vector.shape_cast %395 : vector<1x1x16xf32> to vector<1x16xf32>
    %397 = vector.shape_cast %394 : vector<1x16xf32> to vector<1x1x16xf32>
    tpu.vector_store %arg10[%c0_265, %c0_266, %c192], %397 {strides = array<i32>} : memref<1x1x256xf32, #tpu.memory_space<vmem>>, vector<1x1x16xf32>,
    %398 = vector.extract_strided_slice %345 {offsets = [0, 234], sizes = [1, 16], strides = [1, 1]} : vector<1x286xf32> to vector<1x16xf32>
    %c0_267 = arith.constant 0 : index
    %c0_268 = arith.constant 0 : index
    %c208 = arith.constant 208 : index
    %399 = vector.load %arg10[%c0_267, %c0_268, %c208] : memref<1x1x256xf32, #tpu.memory_space<vmem>>, vector<1x1x16xf32>
    %400 = vector.shape_cast %399 : vector<1x1x16xf32> to vector<1x16xf32>
    %401 = vector.shape_cast %398 : vector<1x16xf32> to vector<1x1x16xf32>
    tpu.vector_store %arg10[%c0_267, %c0_268, %c208], %401 {strides = array<i32>} : memref<1x1x256xf32, #tpu.memory_space<vmem>>, vector<1x1x16xf32>,
    %402 = vector.extract_strided_slice %345 {offsets = [0, 252], sizes = [1, 16], strides = [1, 1]} : vector<1x286xf32> to vector<1x16xf32>
    %c0_269 = arith.constant 0 : index
    %c0_270 = arith.constant 0 : index
    %c224 = arith.constant 224 : index
    %403 = vector.load %arg10[%c0_269, %c0_270, %c224] : memref<1x1x256xf32, #tpu.memory_space<vmem>>, vector<1x1x16xf32>
    %404 = vector.shape_cast %403 : vector<1x1x16xf32> to vector<1x16xf32>
    %405 = vector.shape_cast %402 : vector<1x16xf32> to vector<1x1x16xf32>
    tpu.vector_store %arg10[%c0_269, %c0_270, %c224], %405 {strides = array<i32>} : memref<1x1x256xf32, #tpu.memory_space<vmem>>, vector<1x1x16xf32>,
    %406 = vector.extract_strided_slice %345 {offsets = [0, 270], sizes = [1, 16], strides = [1, 1]} : vector<1x286xf32> to vector<1x16xf32>
    %c0_271 = arith.constant 0 : index
    %c0_272 = arith.constant 0 : index
    %c240 = arith.constant 240 : index
    %407 = vector.load %arg10[%c0_271, %c0_272, %c240] : memref<1x1x256xf32, #tpu.memory_space<vmem>>, vector<1x1x16xf32>
    %408 = vector.shape_cast %407 : vector<1x1x16xf32> to vector<1x16xf32>
    %409 = vector.shape_cast %406 : vector<1x16xf32> to vector<1x1x16xf32>
    tpu.vector_store %arg10[%c0_271, %c0_272, %c240], %409 {strides = array<i32>} : memref<1x1x256xf32, #tpu.memory_space<vmem>>, vector<1x1x16xf32>,
    return
  }
  func.func @transform_0(%arg0: i32) -> (i32, i32, i32) {
    %c0_i32 = arith.constant 0 : i32
    %c0_i32_0 = arith.constant 0 : i32
    %c0_i32_1 = arith.constant 0 : i32
    return %arg0, %c0_i32, %c0_i32_0 : i32, i32, i32
  }
  func.func @transform_1(%arg0: i32) -> (i32, i32, i32) {
    %c0_i32 = arith.constant 0 : i32
    %c0_i32_0 = arith.constant 0 : i32
    %c0_i32_1 = arith.constant 0 : i32
    %c0_i32_2 = arith.constant 0 : i32
    return %c0_i32, %c0_i32_0, %c0_i32_1 : i32, i32, i32
  }
  func.func @transform_2(%arg0: i32) -> (i32, i32) {
    %c0_i32 = arith.constant 0 : i32
    %c0_i32_0 = arith.constant 0 : i32
    %c0_i32_1 = arith.constant 0 : i32
    return %c0_i32, %c0_i32_0 : i32, i32
  }
  func.func @transform_3(%arg0: i32) -> (i32, i32, i32) {
    %c0_i32 = arith.constant 0 : i32
    %c0_i32_0 = arith.constant 0 : i32
    %c0_i32_1 = arith.constant 0 : i32
    %c0_i32_2 = arith.constant 0 : i32
    return %c0_i32, %c0_i32_0, %c0_i32_1 : i32, i32, i32
  }
  func.func @transform_4(%arg0: i32) -> (i32, i32) {
    %c0_i32 = arith.constant 0 : i32
    %c0_i32_0 = arith.constant 0 : i32
    %c0_i32_1 = arith.constant 0 : i32
    return %c0_i32, %c0_i32_0 : i32, i32
  }
  func.func @transform_5(%arg0: i32) -> (i32, i32, i32) {
    %c0_i32 = arith.constant 0 : i32
    %c0_i32_0 = arith.constant 0 : i32
    %c0_i32_1 = arith.constant 0 : i32
    %c0_i32_2 = arith.constant 0 : i32
    return %c0_i32, %c0_i32_0, %c0_i32_1 : i32, i32, i32
  }
  func.func @transform_6(%arg0: i32) -> (i32, i32) {
    %c0_i32 = arith.constant 0 : i32
    %c0_i32_0 = arith.constant 0 : i32
    %c0_i32_1 = arith.constant 0 : i32
    return %c0_i32, %c0_i32_0 : i32, i32
  }
  func.func @transform_7(%arg0: i32) -> (i32, i32, i32) {
    %c0_i32 = arith.constant 0 : i32
    %c0_i32_0 = arith.constant 0 : i32
    %c0_i32_1 = arith.constant 0 : i32
    %c0_i32_2 = arith.constant 0 : i32
    return %c0_i32, %c0_i32_0, %c0_i32_1 : i32, i32, i32
  }
  func.func @transform_8(%arg0: i32) -> (i32, i32) {
    %c0_i32 = arith.constant 0 : i32
    %c0_i32_0 = arith.constant 0 : i32
    %c0_i32_1 = arith.constant 0 : i32
    return %c0_i32, %c0_i32_0 : i32, i32
  }
  func.func @transform_9(%arg0: i32) -> (i32, i32, i32) {
    %c0_i32 = arith.constant 0 : i32
    %c0_i32_0 = arith.constant 0 : i32
    %c0_i32_1 = arith.constant 0 : i32
    return %arg0, %c0_i32, %c0_i32_0 : i32, i32, i32
  }
}

</mosaic_0001>

<bundles_post_ra>
// kernel: conv_autoencoder_forward.1
= control target key start
LH: loop header
LB: loop body
LE: loop exit
PB: predicated region body
PF: predicated region fallthrough
CT: control target
= control target key end

     0   :  { %s10371_s11 = smov 0   ;;  %s16018_s0 = inlined_call_operand.vmem [shape: f32[2,1,324], index: 0, kind: input, shape index: {}]   ;;  %s16019_s1 = inlined_call_operand.vmem [shape: f32[9,64,1], index: 1, kind: input, shape index: {}]   ;;  %s16020_s2 = inlined_call_operand.vmem [shape: f32[64,1], index: 2, kind: input, shape index: {}]   ;;  %s16021_s3 = inlined_call_operand.vmem [shape: f32[9,16,64], index: 3, kind: input, shape index: {}]   ;;  %s16022_s4 = inlined_call_operand.vmem [shape: f32[16,1], index: 4, kind: input, shape index: {}]   ;;  %s16023_s5 = inlined_call_operand.vmem [shape: f32[9,64,16], index: 5, kind: input, shape index: {}]   ;;  %s16024_s6 = inlined_call_operand.vmem [shape: f32[64,1], index: 6, kind: input, shape index: {}]   ;;  %s16025_s7 = inlined_call_operand.vmem [shape: f32[9,64,1], index: 7, kind: input, shape index: {}]   ;;  %s16026_s8 = inlined_call_operand.<no memory space> [shape: f32[1,1], index: 8, kind: input, shape index: {}]   ;;  %s16027_s9 = inlined_call_operand.vmem [shape: f32[2,1,256], index: 9, kind: output, shape index: {}]  }
   0x1   :  { %v14_v0 = vstv %s16026_s8 }
   0x2   :  { %15 = vst [vmem:[#allocation5] sm:$0x1] %v14_v0 }
   0x3 LB: > { %s9002_s12 = sadd.s32 4294967295, %s10259_s11   ;;  %p9006_p0 = scmp.ge.s32.totalorder %s10259_s11, 1  ;;  %s10259_s11 = sphi %s10371_s11, %s21_s11  }
   0x4   : > { %p288_p1 = scmp.lt.s32.totalorder %s10259_s11, 3 }
   0x6   : > { %p289_p2 = pnand %p9006_p0, %p288_p1 }
   0x8   : > { %292 = sbr.rel (%p289_p2) target bundleno = 4480 (0x1180), region = 56 }
   0xf   : > { %v333_v1 = vld [vmem:[%s16019_s1 + $0x10] sm:$0xff]  ;;  %v331_v2 = vld [vmem:[%s16019_s1] sm:$0xff]  ;;  %v10261_v3 = vmov 0   ;;  %v334_v4 = vld [vmem:[%s16019_s1 + $0x18] sm:$0xff]  ;;  %p322_p3 = scmp.lt.s32.totalorder %s9002_s12, 1  ;;  %v16028_v28 = vlaneseq  ;;  %s16154_s24 = smov 127  }
  0x10   : > { %9717 = vset.pattern.permute.xlu1 %v10261_v3  ;;  %9716 = vset.pattern.permute.xlu0 %v10261_v3  ;;  %v332_v5 = vld [vmem:[%s16019_s1 + $0x8] sm:$0xff]  ;;  %v335_v7 = vld [vmem:[%s16019_s1 + $0x20] sm:$0xff]  ;;  %v338_v8 = vld [vmem:[%s16019_s1 + $0x38] sm:$0xff]  ;;  %s16142_s25 = smov 126   ;;  %s16136_s22 = smov 110   ;;  %vm588_vm0 = vcmask 1039360  }
  0x11   : > { %351 = vperm.xlu1 %9717, %v333_v1   ;;  %341 = vperm.xlu0 %9716, %v331_v2   ;;  %v336_v6 = vld [vmem:[%s16019_s1 + $0x28] sm:$0xff]  ;;  %v337_v9 = vld [vmem:[%s16019_s1 + $0x30] sm:$0xff]  ;;  %v9008_v11 = vld [vmem:[%s16019_s1 + $0x40] sm:$0xff]  ;;  %s16812_s12 = smov (!%p322_p3, %s9002_s12), 1  ;;  %v10467_v31 = vshrl.u32 %v16028_v28, 7  ;;  %s16138_s21 = smov 109  }
  0x12   : > { %v9009_v10 = vld [vmem:[%s16019_s1 + $0x48] sm:$0xff]  ;;  %v9011_v12 = vld [vmem:[%s16019_s1 + $0x58] sm:$0xff]  ;;  %v9010_v13 = vld [vmem:[%s16019_s1 + $0x50] sm:$0xff]  ;;  %s9650_s20 = smul.u32 3, %s16812_s12  ;;  %s16146_s27 = smov 92   ;;  %vm16212_vm1 = vcmask 1031168  }
  0x13   : > { %v9013_v14 = vld [vmem:[%s16019_s1 + $0x68] sm:$0xff]  ;;  %v9012_v15 = vld [vmem:[%s16019_s1 + $0x60] sm:$0xff]  ;;  %v9015_v16 = vld [vmem:[%s16019_s1 + $0x78] sm:$0xff]  ;;  %16234 = vst [vmem:[#allocation6_spill] sm:$0xff] %v10467_v31  ;;  %v386_v34 = vsub.s32 1, %v10467_v31  ;;  %v16030_v35 = vsub.s32 0, %v10467_v31 }
  0x14   : > { %v9014_v17 = vld [vmem:[%s16019_s1 + $0x70] sm:$0xff]  ;;  %v9017_v18 = vld [vmem:[%s16019_s1 + $0x88] sm:$0xff]  ;;  %v9016_v19 = vld [vmem:[%s16019_s1 + $0x80] sm:$0xff]  ;;  %s325_s23 = scalar_lea.vmem %s16018_s0, %s9650_s20  ;;  %v390_v41 = vsub.s32 2, %v10467_v31  ;;  %s16134_s30 = smov 91   ;;  %vm16211_vm2 = vcmask 900096  }
  0x15   : > { %356 = vperm.xlu1 %9717, %v334_v4   ;;  %346 = vperm.xlu0 %9716, %v332_v5   ;;  %v9019_v20 = vld [vmem:[%s16019_s1 + $0x98] sm:$0xff]  ;;  %v9018_v21 = vld [vmem:[%s16019_s1 + $0x90] sm:$0xff]  ;;  %v9021_v22 = vld [vmem:[%s16019_s1 + $0xa8] sm:$0xff]  ;;  %s16132_s8 = smov 90   ;;  %vm16210_vm3 = vcmask 891904   ;;  %vm16209_vm4 = vcmask 883712  }
  0x16   : > { %v9020_v23 = vld [vmem:[%s16019_s1 + $0xa0] sm:$0xff]  ;;  %v9023_v24 = vld [vmem:[%s16019_s1 + $0xb8] sm:$0xff]  ;;  %v9022_v25 = vld [vmem:[%s16019_s1 + $0xb0] sm:$0xff]  ;;  %vm16188_vm5 = vcmask 752640   ;;  %vm16187_vm6 = vcmask 744448   ;;  %vm16186_vm7 = vcmask 736256  }
  0x17   : > { %v330_v36 = vld [vmem:[%s325_s23] sm:$0x7]  ;;  %s16130_s23 = smov 108   ;;  %s10271_s19 = smov 18   ;;  %vm2548_vm8 = vcmask 269456   ;;  %vm2581_vm9 = vcmask 408856  }
  0x18   : > { %v10482_v39 = vrot.slane %v330_v36, %v386_v34  ;;  %v10486_v40 = vrot.slane %v330_v36, %v16030_v35  ;;  %v10493_v46 = vrot.slane %v330_v36, %v390_v41  ;;  %s10272_s20 = smov 17   ;;  %s10273_s26 = smov 16   ;;  %vm2614_vm10 = vcmask 548256  }
  0x19   : > { %366 = vperm.xlu1 %9717, %v336_v6   ;;  %361 = vperm.xlu0 %9716, %v335_v7   ;;  %s16156_s28 = smov 15   ;;  %s16152_s29 = smov 14   ;;  %vm2647_vm11 = vcmask 687656   ;;  %vm2680_vm12 = vcmask 827056   ;;  %vm2713_vm13 = vcmask 966456   ;;  %vm2746_vm14 = vcmask 1048512  }
  0x1a   : > { %s16150_s10 = smov 13   ;;  %s16148_s13 = smov 12   ;;  %vm2748_vm15 = vcmask 56320  }
  0x1b   : > { %s16144_s14 = smov 11   ;;  %s10279_s15 = smov 10  }
  0x1c   : > { %s10280_s16 = smov 9   ;;  %s10281_s17 = smov 8  }
  0x1d   : > { %376 = vperm.xlu1 %9717, %v338_v8   ;;  %371 = vperm.xlu0 %9716, %v337_v9   ;;  %s10282_s18 = smov 7  }
  0x21   : > { %459 = vperm.xlu1 %9717, %v9009_v10   ;;  %454 = vperm.xlu0 %9716, %v9008_v11  }
  0x25   : > { %469 = vperm.xlu1 %9717, %v9011_v12   ;;  %464 = vperm.xlu0 %9716, %v9010_v13  }
  0x29   : > { %479 = vperm.xlu1 %9717, %v9013_v14   ;;  %474 = vperm.xlu0 %9716, %v9012_v15  }
  0x2d   : > { %489 = vperm.xlu1 %9717, %v9015_v16   ;;  %484 = vperm.xlu0 %9716, %v9014_v17  }
  0x31   : > { %669 = vperm.xlu1 %9717, %v9017_v18   ;;  %664 = vperm.xlu0 %9716, %v9016_v19  }
  0x35   : > { %679 = vperm.xlu1 %9717, %v9019_v20   ;;  %674 = vperm.xlu0 %9716, %v9018_v21  }
  0x39   : > { %689 = vperm.xlu1 %9717, %v9021_v22   ;;  %684 = vperm.xlu0 %9716, %v9020_v23  }
  0x3d   : > { %699 = vperm.xlu1 %9717, %v9023_v24   ;;  %694 = vperm.xlu0 %9716, %v9022_v25  }
  0x90   : > { %v10453_v26 = vpop.permute.xlu1 %351  ;;  %v10455_v27 = vpop.permute.xlu0 %341 }
  0x94   : > { %v10461_v29 = vpop.permute.xlu1 %356  ;;  %v10463_v30 = vpop.permute.xlu0 %346 }
  0x98   : > { %v10469_v32 = vpop.permute.xlu1 %366  ;;  %v10471_v33 = vpop.permute.xlu0 %361 }
  0x9c   : > { %v10478_v37 = vpop.permute.xlu1 %376  ;;  %v10480_v38 = vpop.permute.xlu0 %371 }
  0xa0   : > { %v455_v42 = vpop.permute.xlu0 %454  ;;  %v460_v45 = vpop.permute.xlu1 %459 }
  0xa1   : > { %v493_v43 = vmul.f32 %v455_v42, %v10482_v39  ;;  %v492_v44 = vmul.f32 %v455_v42, %v10486_v40  ;;  %v495_v47 = vmul.f32 %v460_v45, %v10486_v40  ;;  %v494_v48 = vmul.f32 %v455_v42, %v10493_v46 }
  0xa2   : > { %v497_v49 = vmul.f32 %v460_v45, %v10493_v46  ;;  %v496_v50 = vmul.f32 %v460_v45, %v10482_v39 }
  0xa3   : > { %542 = vrot.lane.b32.xlu1 %v493_v43, %s16154_s24  ;;  %540 = vrot.lane.b32.xlu0 %v492_v44, %s16154_s24 }
  0xa4   : > { %v465_v51 = vpop.permute.xlu0 %464  ;;  %v470_v54 = vpop.permute.xlu1 %469 }
  0xa5   : > { %v499_v52 = vmul.f32 %v465_v51, %v10482_v39  ;;  %v498_v53 = vmul.f32 %v465_v51, %v10486_v40  ;;  %v501_v55 = vmul.f32 %v470_v54, %v10486_v40  ;;  %v500_v56 = vmul.f32 %v465_v51, %v10493_v46 }
  0xa6   : > { %v503_v57 = vmul.f32 %v470_v54, %v10493_v46  ;;  %v502_v58 = vmul.f32 %v470_v54, %v10482_v39 }
  0xa7   : > { %546 = vrot.lane.b32.xlu1 %v495_v47, %s16154_s24  ;;  %544 = vrot.lane.b32.xlu0 %v494_v48, %s16154_s24 }
  0xa8   : > { %v475_v59 = vpop.permute.xlu0 %474  ;;  %v480_v62 = vpop.permute.xlu1 %479 }
  0xa9   : > { %v505_v60 = vmul.f32 %v475_v59, %v10482_v39  ;;  %v504_v61 = vmul.f32 %v475_v59, %v10486_v40  ;;  %v507_v63 = vmul.f32 %v480_v62, %v10486_v40  ;;  %v506_v0 = vmul.f32 %v475_v59, %v10493_v46  ;;  %v9027_v59 = vld [vmem:[%s16019_s1 + $0xd8] sm:$0xff] }
  0xaa   : > { %v509_v1 = vmul.f32 %v480_v62, %v10493_v46  ;;  %v508_v2 = vmul.f32 %v480_v62, %v10482_v39  ;;  %v9028_v62 = vld [vmem:[%s16019_s1 + $0xe0] sm:$0xff] }
  0xab   : > { %550 = vrot.lane.b32.xlu1 %v497_v49, %s16154_s24  ;;  %548 = vrot.lane.b32.xlu0 %v496_v50, %s16154_s24 }
  0xac   : > { %v485_v3 = vpop.permute.xlu0 %484  ;;  %v490_v6 = vpop.permute.xlu1 %489 }
  0xad   : > { %v511_v4 = vmul.f32 %v485_v3, %v10482_v39  ;;  %v510_v5 = vmul.f32 %v485_v3, %v10486_v40  ;;  %v513_v7 = vmul.f32 %v490_v6, %v10486_v40  ;;  %v512_v8 = vmul.f32 %v485_v3, %v10493_v46 }
  0xae   : > { %v515_v9 = vmul.f32 %v490_v6, %v10493_v46  ;;  %v514_v10 = vmul.f32 %v490_v6, %v10482_v39 }
  0xaf   : > { %554 = vrot.lane.b32.xlu1 %v499_v52, %s16154_s24  ;;  %552 = vrot.lane.b32.xlu0 %v498_v53, %s16154_s24 }
  0xb0   : > { %v665_v11 = vpop.permute.xlu0 %664  ;;  %v670_v14 = vpop.permute.xlu1 %669 }
  0xb1   : > { %v703_v12 = vmul.f32 %v665_v11, %v10482_v39  ;;  %v702_v13 = vmul.f32 %v665_v11, %v10486_v40  ;;  %v705_v15 = vmul.f32 %v670_v14, %v10486_v40  ;;  %v704_v16 = vmul.f32 %v665_v11, %v10493_v46 }
  0xb2   : > { %v707_v17 = vmul.f32 %v670_v14, %v10493_v46  ;;  %v706_v18 = vmul.f32 %v670_v14, %v10482_v39 }
  0xb3   : > { %558 = vrot.lane.b32.xlu1 %v501_v55, %s16154_s24  ;;  %556 = vrot.lane.b32.xlu0 %v500_v56, %s16154_s24 }
  0xb4   : > { %v675_v19 = vpop.permute.xlu0 %674  ;;  %v680_v22 = vpop.permute.xlu1 %679 }
  0xb5   : > { %v709_v20 = vmul.f32 %v675_v19, %v10482_v39  ;;  %v708_v21 = vmul.f32 %v675_v19, %v10486_v40  ;;  %v711_v23 = vmul.f32 %v680_v22, %v10486_v40  ;;  %v710_v24 = vmul.f32 %v675_v19, %v10493_v46 }
  0xb6   : > { %v713_v25 = vmul.f32 %v680_v22, %v10493_v46  ;;  %v712_v34 = vmul.f32 %v680_v22, %v10482_v39 }
  0xb7   : > { %562 = vrot.lane.b32.xlu1 %v503_v57, %s16154_s24  ;;  %560 = vrot.lane.b32.xlu0 %v502_v58, %s16154_s24  ;;  %v9025_v57 = vld [vmem:[%s16019_s1 + $0xc8] sm:$0xff]  ;;  %v9024_v58 = vld [vmem:[%s16019_s1 + $0xc0] sm:$0xff] }
  0xb8   : > { %v685_v36 = vpop.permute.xlu0 %684  ;;  %v690_v43 = vpop.permute.xlu1 %689 }
  0xb9   : > { %v715_v41 = vmul.f32 %v685_v36, %v10482_v39  ;;  %v714_v42 = vmul.f32 %v685_v36, %v10486_v40  ;;  %v717_v44 = vmul.f32 %v690_v43, %v10486_v40  ;;  %v716_v45 = vmul.f32 %v685_v36, %v10493_v46 }
  0xba   : > { %v719_v47 = vmul.f32 %v690_v43, %v10493_v46  ;;  %v718_v48 = vmul.f32 %v690_v43, %v10482_v39 }
  0xbb   : > { %566 = vrot.lane.b32.xlu1 %v505_v60, %s16154_s24  ;;  %564 = vrot.lane.b32.xlu0 %v504_v61, %s16154_s24  ;;  %v9026_v60 = vld [vmem:[%s16019_s1 + $0xd0] sm:$0xff]  ;;  %v9029_v61 = vld [vmem:[%s16019_s1 + $0xe8] sm:$0xff] }
  0xbc   : > { %v695_v49 = vpop.permute.xlu0 %694  ;;  %v700_v52 = vpop.permute.xlu1 %699 }
  0xbd   : > { %v721_v50 = vmul.f32 %v695_v49, %v10482_v39  ;;  %v720_v51 = vmul.f32 %v695_v49, %v10486_v40  ;;  %v723_v53 = vmul.f32 %v700_v52, %v10486_v40  ;;  %v722_v54 = vmul.f32 %v695_v49, %v10493_v46 }
  0xbe   : > { %v725_v55 = vmul.f32 %v700_v52, %v10493_v46  ;;  %v724_v56 = vmul.f32 %v700_v52, %v10482_v39 }
  0xbf   : > { %570 = vrot.lane.b32.xlu1 %v507_v63, %s16154_s24  ;;  %568 = vrot.lane.b32.xlu0 %v506_v0, %s16154_s24  ;;  %v9031_v63 = vld [vmem:[%s16019_s1 + $0xf8] sm:$0xff]  ;;  %v9030_v0 = vld [vmem:[%s16019_s1 + $0xf0] sm:$0xff] }
  0xc3   : > { %574 = vrot.lane.b32.xlu1 %v509_v1, %s16154_s24  ;;  %572 = vrot.lane.b32.xlu0 %v508_v2, %s16154_s24 }
  0xc7   : > { %578 = vrot.lane.b32.xlu1 %v511_v4, %s16154_s24  ;;  %576 = vrot.lane.b32.xlu0 %v510_v5, %s16154_s24 }
  0xcb   : > { %582 = vrot.lane.b32.xlu1 %v513_v7, %s16154_s24  ;;  %580 = vrot.lane.b32.xlu0 %v512_v8, %s16154_s24 }
  0xcf   : > { %586 = vrot.lane.b32.xlu1 %v515_v9, %s16154_s24  ;;  %584 = vrot.lane.b32.xlu0 %v514_v10, %s16154_s24 }
  0xd3   : > { %752 = vrot.lane.b32.xlu1 %v703_v12, %s16142_s25  ;;  %750 = vrot.lane.b32.xlu0 %v702_v13, %s16142_s25 }
  0xd7   : > { %756 = vrot.lane.b32.xlu1 %v705_v15, %s16142_s25  ;;  %754 = vrot.lane.b32.xlu0 %v704_v16, %s16142_s25 }
  0xdb   : > { %760 = vrot.lane.b32.xlu1 %v707_v17, %s16142_s25  ;;  %758 = vrot.lane.b32.xlu0 %v706_v18, %s16142_s25 }
  0xdf   : > { %764 = vrot.lane.b32.xlu1 %v709_v20, %s16142_s25  ;;  %762 = vrot.lane.b32.xlu0 %v708_v21, %s16142_s25 }
  0xe3   : > { %768 = vrot.lane.b32.xlu1 %v711_v23, %s16142_s25  ;;  %766 = vrot.lane.b32.xlu0 %v710_v24, %s16142_s25 }
  0xe7   : > { %772 = vrot.lane.b32.xlu1 %v713_v25, %s16142_s25  ;;  %770 = vrot.lane.b32.xlu0 %v712_v34, %s16142_s25 }
  0xeb   : > { %776 = vrot.lane.b32.xlu1 %v715_v41, %s16142_s25  ;;  %774 = vrot.lane.b32.xlu0 %v714_v42, %s16142_s25 }
  0xef   : > { %780 = vrot.lane.b32.xlu1 %v717_v44, %s16142_s25  ;;  %778 = vrot.lane.b32.xlu0 %v716_v45, %s16142_s25 }
  0xf3   : > { %784 = vrot.lane.b32.xlu1 %v719_v47, %s16142_s25  ;;  %782 = vrot.lane.b32.xlu0 %v718_v48, %s16142_s25 }
  0xf7   : > { %788 = vrot.lane.b32.xlu1 %v721_v50, %s16142_s25  ;;  %786 = vrot.lane.b32.xlu0 %v720_v51, %s16142_s25 }
  0xfb   : > { %792 = vrot.lane.b32.xlu1 %v723_v53, %s16142_s25  ;;  %790 = vrot.lane.b32.xlu0 %v722_v54, %s16142_s25 }
  0xff   : > { %796 = vrot.lane.b32.xlu1 %v725_v55, %s16142_s25  ;;  %794 = vrot.lane.b32.xlu0 %v724_v56, %s16142_s25 }
 0x103   : > { %879 = vperm.xlu1 %9717, %v9025_v57   ;;  %874 = vperm.xlu0 %9716, %v9024_v58  }
 0x107   : > { %889 = vperm.xlu1 %9717, %v9027_v59   ;;  %884 = vperm.xlu0 %9716, %v9026_v60  }
 0x10b   : > { %899 = vperm.xlu1 %9717, %v9029_v61   ;;  %894 = vperm.xlu0 %9716, %v9028_v62  }
 0x10f   : > { %909 = vperm.xlu1 %9717, %v9031_v63   ;;  %904 = vperm.xlu0 %9716, %v9030_v0  }
 0x115   : > { %v10611_v1 = vpop.permute.xlu1 %542  ;;  %v10613_v2 = vpop.permute.xlu0 %540 }
 0x119   : > { %v10615_v3 = vpop.permute.xlu1 %546  ;;  %v10617_v4 = vpop.permute.xlu0 %544 }
 0x11d   : > { %v10619_v5 = vpop.permute.xlu1 %550  ;;  %v10621_v6 = vpop.permute.xlu0 %548 }
 0x121   : > { %v10623_v7 = vpop.permute.xlu1 %554  ;;  %v10625_v8 = vpop.permute.xlu0 %552 }
 0x125   : > { %v10627_v9 = vpop.permute.xlu1 %558  ;;  %v10629_v10 = vpop.permute.xlu0 %556 }
 0x129   : > { %v10631_v11 = vpop.permute.xlu1 %562  ;;  %v10633_v12 = vpop.permute.xlu0 %560 }
 0x12d   : > { %v10635_v13 = vpop.permute.xlu1 %566  ;;  %v10637_v14 = vpop.permute.xlu0 %564 }
 0x131   : > { %v10639_v15 = vpop.permute.xlu1 %570  ;;  %v10641_v16 = vpop.permute.xlu0 %568 }
 0x135   : > { %v10643_v17 = vpop.permute.xlu1 %574  ;;  %v10645_v18 = vpop.permute.xlu0 %572 }
 0x139   : > { %v10647_v19 = vpop.permute.xlu1 %578  ;;  %v10649_v20 = vpop.permute.xlu0 %576 }
 0x13d   : > { %v10651_v21 = vpop.permute.xlu1 %582  ;;  %v10653_v22 = vpop.permute.xlu0 %580 }
 0x141   : > { %v10655_v23 = vpop.permute.xlu1 %586  ;;  %v10657_v24 = vpop.permute.xlu0 %584 }
 0x145   : > { %v10659_v25 = vpop.permute.xlu1 %752  ;;  %v10661_v34 = vpop.permute.xlu0 %750 }
 0x149   : > { %v10663_v36 = vpop.permute.xlu1 %756  ;;  %v10665_v41 = vpop.permute.xlu0 %754 }
 0x14d   : > { %v10667_v42 = vpop.permute.xlu1 %760  ;;  %v10669_v43 = vpop.permute.xlu0 %758 }
 0x151   : > { %v10671_v44 = vpop.permute.xlu1 %764  ;;  %v10673_v45 = vpop.permute.xlu0 %762 }
 0x152   : > { %16235 = vst [vmem:[#allocation7_spill] sm:$0xff] %v10673_v45 }
 0x155   : > { %v10675_v47 = vpop.permute.xlu0 %766  ;;  %v10677_v48 = vpop.permute.xlu1 %768 }
 0x156   : > { %16236 = vst [vmem:[#allocation8_spill] sm:$0xff] %v10675_v47  ;;  %16237 = vst [vmem:[#allocation9_spill] sm:$0xff] %v10677_v48  ;;  %v414_v48 = vmul.f32 %v10482_v39, %v10480_v38 }
 0x159   : > { %v10679_v49 = vpop.permute.xlu0 %770  ;;  %v10681_v50 = vpop.permute.xlu1 %772 }
 0x15a   : > { %16238 = vst [vmem:[#allocation10_spill] sm:$0xff] %v10679_v49  ;;  %16239 = vst [vmem:[#allocation11_spill] sm:$0xff] %v10681_v50  ;;  %v417_v50 = vmul.f32 %v10482_v39, %v10478_v37  ;;  %v590_v49 = vsel %vm588_vm0, %v10611_v1, %v10617_v4 }
 0x15d   : > { %v10683_v51 = vpop.permute.xlu0 %774  ;;  %v10685_v52 = vpop.permute.xlu1 %776 }
 0x15e   : > { %16240 = vst [vmem:[#allocation12_spill] sm:$0xff] %v10683_v51  ;;  %16241 = vst [vmem:[#allocation13_spill] sm:$0xff] %v10685_v52  ;;  %v412_v51 = vmul.f32 %v10493_v46, %v10469_v32 }
 0x161   : > { %v10687_v53 = vpop.permute.xlu0 %778  ;;  %v10689_v54 = vpop.permute.xlu1 %780 }
 0x162   : > { %16242 = vst [vmem:[#allocation14_spill] sm:$0xff] %v10687_v53  ;;  %16243 = vst [vmem:[#allocation15_spill] sm:$0xff] %v10689_v54  ;;  %v410_v54 = vmul.f32 %v10486_v40, %v10469_v32  ;;  %v416_v53 = vmul.f32 %v10486_v40, %v10478_v37 }
 0x165   : > { %v10691_v55 = vpop.permute.xlu0 %782  ;;  %v10693_v56 = vpop.permute.xlu1 %784 }
 0x166   : > { %16244 = vst [vmem:[#allocation16_spill] sm:$0xff] %v10691_v55  ;;  %16245 = vst [vmem:[#allocation17_spill] sm:$0xff] %v10693_v56  ;;  %v406_v56 = vmul.f32 %v10493_v46, %v10461_v29  ;;  %v407_v55 = vmul.f32 %v10486_v40, %v10471_v33 }
 0x169   : > { %v10695_v57 = vpop.permute.xlu0 %786  ;;  %v10697_v58 = vpop.permute.xlu1 %788 }
 0x16a   : > { %16246 = vst [vmem:[#allocation18_spill] sm:$0xff] %v10695_v57  ;;  %16247 = vst [vmem:[#allocation19_spill] sm:$0xff] %v10697_v58 }
 0x16d   : > { %v10699_v59 = vpop.permute.xlu0 %790  ;;  %v10701_v60 = vpop.permute.xlu1 %792 }
 0x16e   : > { %16248 = vst [vmem:[#allocation20_spill] sm:$0xff] %v10699_v59  ;;  %16249 = vst [vmem:[#allocation21_spill] sm:$0xff] %v10701_v60 }
 0x171   : > { %v10703_v61 = vpop.permute.xlu0 %794  ;;  %v10705_v62 = vpop.permute.xlu1 %796 }
 0x172   : > { %16250 = vst [vmem:[#allocation22_spill] sm:$0xff] %v10703_v61  ;;  %16251 = vst [vmem:[#allocation23_spill] sm:$0xff] %v10705_v62 }
 0x182   : > { %v875_v63 = vpop.permute.xlu0 %874  ;;  %v880_v35 = vpop.permute.xlu1 %879 }
 0x183   : > { %v913_v0 = vmul.f32 %v875_v63, %v10482_v39  ;;  %v912_v28 = vmul.f32 %v875_v63, %v10486_v40  ;;  %v915_v31 = vmul.f32 %v880_v35, %v10486_v40  ;;  %v914_v59 = vmul.f32 %v875_v63, %v10493_v46 }
 0x184   : > { %v917_v62 = vmul.f32 %v880_v35, %v10493_v46  ;;  %v916_v60 = vmul.f32 %v880_v35, %v10482_v39 }
 0x185   : > { %962 = vrot.lane.b32.xlu1 %v913_v0, %s16136_s22  ;;  %960 = vrot.lane.b32.xlu0 %v912_v28, %s16136_s22 }
 0x186   : > { %v885_v61 = vpop.permute.xlu0 %884  ;;  %v890_v57 = vpop.permute.xlu1 %889 }
 0x187   : > { %v919_v0 = vmul.f32 %v885_v61, %v10482_v39  ;;  %v918_v28 = vmul.f32 %v885_v61, %v10486_v40  ;;  %v923_v35 = vmul.f32 %v890_v57, %v10493_v46 }
 0x189   : > { %966 = vrot.lane.b32.xlu1 %v915_v31, %s16136_s22  ;;  %964 = vrot.lane.b32.xlu0 %v914_v59, %s16136_s22  ;;  %v921_v31 = vmul.f32 %v890_v57, %v10486_v40  ;;  %v920_v59 = vmul.f32 %v885_v61, %v10493_v46 }
 0x18d   : > { %970 = vrot.lane.b32.xlu1 %v917_v62, %s16136_s22  ;;  %968 = vrot.lane.b32.xlu0 %v916_v60, %s16136_s22  ;;  %v922_v60 = vmul.f32 %v890_v57, %v10482_v39  ;;  %v895_v62 = vpop.permute.xlu0 %894 }
 0x18e   : > { %v925_v63 = vmul.f32 %v895_v62, %v10482_v39 }
 0x191   : > { %974 = vrot.lane.b32.xlu1 %v919_v0, %s16136_s22  ;;  %972 = vrot.lane.b32.xlu0 %v918_v28, %s16136_s22  ;;  %v924_v0 = vmul.f32 %v895_v62, %v10486_v40  ;;  %v900_v28 = vpop.permute.xlu1 %899 }
 0x192   : > { %v927_v61 = vmul.f32 %v900_v28, %v10486_v40  ;;  %v929_v57 = vmul.f32 %v900_v28, %v10493_v46 }
 0x195   : > { %978 = vrot.lane.b32.xlu1 %v921_v31, %s16136_s22  ;;  %976 = vrot.lane.b32.xlu0 %v920_v59, %s16136_s22  ;;  %v926_v31 = vmul.f32 %v895_v62, %v10493_v46  ;;  %v928_v59 = vmul.f32 %v900_v28, %v10482_v39 }
 0x199   : > { %982 = vrot.lane.b32.xlu1 %v923_v35, %s16136_s22  ;;  %980 = vrot.lane.b32.xlu0 %v922_v60, %s16136_s22  ;;  %v905_v35 = vpop.permute.xlu0 %904 }
 0x19a   : > { %v930_v60 = vmul.f32 %v905_v35, %v10486_v40 }
 0x19d   : > { %986 = vrot.lane.b32.xlu1 %v925_v63, %s16136_s22  ;;  %984 = vrot.lane.b32.xlu0 %v924_v0, %s16136_s22  ;;  %v931_v63 = vmul.f32 %v905_v35, %v10482_v39  ;;  %v910_v0 = vpop.permute.xlu1 %909 }
 0x19e   : > { %v933_v62 = vmul.f32 %v910_v0, %v10486_v40  ;;  %v934_v28 = vmul.f32 %v910_v0, %v10482_v39 }
 0x1a1   : > { %990 = vrot.lane.b32.xlu1 %v927_v61, %s16136_s22  ;;  %988 = vrot.lane.b32.xlu0 %v926_v31, %s16136_s22  ;;  %v932_v61 = vmul.f32 %v905_v35, %v10493_v46  ;;  %v935_v31 = vmul.f32 %v910_v0, %v10493_v46  ;;  %v9035_v35 = vld [vmem:[%s16019_s1 + $0x118] sm:$0xff]  ;;  %v9036_v0 = vld [vmem:[%s16019_s1 + $0x120] sm:$0xff] }
 0x1a5   : > { %994 = vrot.lane.b32.xlu1 %v929_v57, %s16136_s22  ;;  %992 = vrot.lane.b32.xlu0 %v928_v59, %s16136_s22  ;;  %v9033_v57 = vld [vmem:[%s16019_s1 + $0x108] sm:$0xff]  ;;  %v9032_v59 = vld [vmem:[%s16019_s1 + $0x100] sm:$0xff] }
 0x1a9   : > { %998 = vrot.lane.b32.xlu1 %v931_v63, %s16136_s22  ;;  %996 = vrot.lane.b32.xlu0 %v930_v60, %s16136_s22  ;;  %v9034_v60 = vld [vmem:[%s16019_s1 + $0x110] sm:$0xff]  ;;  %v9037_v63 = vld [vmem:[%s16019_s1 + $0x128] sm:$0xff] }
 0x1ad   : > { %1002 = vrot.lane.b32.xlu1 %v933_v62, %s16136_s22  ;;  %1000 = vrot.lane.b32.xlu0 %v932_v61, %s16136_s22  ;;  %v9039_v62 = vld [vmem:[%s16019_s1 + $0x138] sm:$0xff]  ;;  %v9038_v61 = vld [vmem:[%s16019_s1 + $0x130] sm:$0xff] }
 0x1b1   : > { %1006 = vrot.lane.b32.xlu1 %v935_v31, %s16136_s22  ;;  %1004 = vrot.lane.b32.xlu0 %v934_v28, %s16136_s22 }
 0x1b5   : > { %1089 = vperm.xlu1 %9717, %v9033_v57   ;;  %1084 = vperm.xlu0 %9716, %v9032_v59  }
 0x1b9   : > { %1099 = vperm.xlu1 %9717, %v9035_v35   ;;  %1094 = vperm.xlu0 %9716, %v9034_v60  }
 0x1bd   : > { %1109 = vperm.xlu1 %9717, %v9037_v63   ;;  %1104 = vperm.xlu0 %9716, %v9036_v0  }
 0x1c1   : > { %1119 = vperm.xlu1 %9717, %v9039_v62   ;;  %1114 = vperm.xlu0 %9716, %v9038_v61  }
 0x1f7   : > { %v10779_v28 = vpop.permute.xlu1 %962  ;;  %v10781_v31 = vpop.permute.xlu0 %960 }
 0x1f8   : > { %16252 = vst [vmem:[#allocation24_spill] sm:$0xff] %v10779_v28  ;;  %16253 = vst [vmem:[#allocation25_spill] sm:$0xff] %v10781_v31 }
 0x1fb   : > { %v10783_v57 = vpop.permute.xlu1 %966  ;;  %v10785_v59 = vpop.permute.xlu0 %964 }
 0x1fc   : > { %16254 = vst [vmem:[#allocation26_spill] sm:$0xff] %v10783_v57  ;;  %16255 = vst [vmem:[#allocation27_spill] sm:$0xff] %v10785_v59 }
 0x1ff   : > { %v10787_v35 = vpop.permute.xlu1 %970  ;;  %v10789_v60 = vpop.permute.xlu0 %968 }
 0x200   : > { %16256 = vst [vmem:[#allocation28_spill] sm:$0xff] %v10787_v35  ;;  %16257 = vst [vmem:[#allocation29_spill] sm:$0xff] %v10789_v60 }
 0x203   : > { %v10791_v63 = vpop.permute.xlu1 %974  ;;  %v10793_v0 = vpop.permute.xlu0 %972 }
 0x204   : > { %16258 = vst [vmem:[#allocation30_spill] sm:$0xff] %v10791_v63  ;;  %16259 = vst [vmem:[#allocation31_spill] sm:$0xff] %v10793_v0 }
 0x207   : > { %v10795_v58 = vpop.permute.xlu0 %976  ;;  %v10797_v62 = vpop.permute.xlu1 %978 }
 0x208   : > { %16260 = vst [vmem:[#allocation32_spill] sm:$0xff] %v10795_v58  ;;  %16261 = vst [vmem:[#allocation33_spill] sm:$0xff] %v10797_v62 }
 0x20b   : > { %v10799_v61 = vpop.permute.xlu0 %980  ;;  %v10801_v28 = vpop.permute.xlu1 %982 }
 0x20c   : > { %16262 = vst [vmem:[#allocation34_spill] sm:$0xff] %v10799_v61  ;;  %16263 = vst [vmem:[#allocation35_spill] sm:$0xff] %v10801_v28 }
 0x20f   : > { %v10803_v31 = vpop.permute.xlu0 %984  ;;  %v10805_v57 = vpop.permute.xlu1 %986 }
 0x210   : > { %16264 = vst [vmem:[#allocation36_spill] sm:$0xff] %v10803_v31  ;;  %16265 = vst [vmem:[#allocation37_spill] sm:$0xff] %v10805_v57 }
 0x213   : > { %v10807_v59 = vpop.permute.xlu0 %988  ;;  %v10809_v35 = vpop.permute.xlu1 %990 }
 0x214   : > { %16266 = vst [vmem:[#allocation38_spill] sm:$0xff] %v10807_v59  ;;  %16267 = vst [vmem:[#allocation39_spill] sm:$0xff] %v10809_v35 }
 0x217   : > { %v10811_v60 = vpop.permute.xlu0 %992  ;;  %v10813_v63 = vpop.permute.xlu1 %994 }
 0x218   : > { %16268 = vst [vmem:[#allocation40_spill] sm:$0xff] %v10811_v60  ;;  %16269 = vst [vmem:[#allocation41_spill] sm:$0xff] %v10813_v63 }
 0x21b   : > { %v10815_v0 = vpop.permute.xlu0 %996  ;;  %v10817_v58 = vpop.permute.xlu1 %998 }
 0x21c   : > { %16270 = vst [vmem:[#allocation42_spill] sm:$0xff] %v10815_v0  ;;  %16271 = vst [vmem:[#allocation43_spill] sm:$0xff] %v10817_v58 }
 0x21f   : > { %v10819_v62 = vpop.permute.xlu0 %1000  ;;  %v10821_v61 = vpop.permute.xlu1 %1002 }
 0x220   : > { %16272 = vst [vmem:[#allocation44_spill] sm:$0xff] %v10819_v62  ;;  %16273 = vst [vmem:[#allocation45_spill] sm:$0xff] %v10821_v61 }
 0x223   : > { %v10823_v28 = vpop.permute.xlu0 %1004  ;;  %v10825_v31 = vpop.permute.xlu1 %1006 }
 0x224   : > { %16274 = vst [vmem:[#allocation46_spill] sm:$0xff] %v10823_v28  ;;  %16275 = vst [vmem:[#allocation47_spill] sm:$0xff] %v10825_v31 }
 0x234   : > { %v1085_v57 = vpop.permute.xlu0 %1084  ;;  %v1090_v60 = vpop.permute.xlu1 %1089 }
 0x235   : > { %v1122_v59 = vmul.f32 %v1085_v57, %v10486_v40  ;;  %v1123_v35 = vmul.f32 %v1085_v57, %v10482_v39  ;;  %v1124_v0 = vmul.f32 %v1085_v57, %v10493_v46  ;;  %v1125_v62 = vmul.f32 %v1090_v60, %v10486_v40 }
 0x236   : > { %v1126_v31 = vmul.f32 %v1090_v60, %v10482_v39  ;;  %v1127_v61 = vmul.f32 %v1090_v60, %v10493_v46 }
 0x237   : > { %1170 = vrot.lane.b32.xlu0 %v1122_v59, %s16138_s21  ;;  %1172 = vrot.lane.b32.xlu1 %v1123_v35, %s16138_s21 }
 0x238   : > { %v1095_v28 = vpop.permute.xlu0 %1094  ;;  %v1100_v57 = vpop.permute.xlu1 %1099 }
 0x239   : > { %v1128_v59 = vmul.f32 %v1095_v28, %v10486_v40  ;;  %v1129_v35 = vmul.f32 %v1095_v28, %v10482_v39  ;;  %v1133_v60 = vmul.f32 %v1100_v57, %v10493_v46 }
 0x23b   : > { %1174 = vrot.lane.b32.xlu0 %v1124_v0, %s16138_s21  ;;  %1176 = vrot.lane.b32.xlu1 %v1125_v62, %s16138_s21  ;;  %v1130_v0 = vmul.f32 %v1095_v28, %v10493_v46  ;;  %v1131_v62 = vmul.f32 %v1100_v57, %v10486_v40 }
 0x23c   : > { %v1110_v28 = vpop.permute.xlu1 %1109 }
 0x23f   : > { %1178 = vrot.lane.b32.xlu0 %v1126_v31, %s16138_s21  ;;  %1180 = vrot.lane.b32.xlu1 %v1127_v61, %s16138_s21  ;;  %v1132_v31 = vmul.f32 %v1100_v57, %v10482_v39  ;;  %v1105_v61 = vpop.permute.xlu0 %1104  ;;  %v1138_v57 = vmul.f32 %v1110_v28, %v10482_v39 }
 0x243   : > { %1182 = vrot.lane.b32.xlu0 %v1128_v59, %s16138_s21  ;;  %1184 = vrot.lane.b32.xlu1 %v1129_v35, %s16138_s21  ;;  %v1134_v59 = vmul.f32 %v1105_v61, %v10486_v40  ;;  %v1135_v35 = vmul.f32 %v1105_v61, %v10482_v39 }
 0x247   : > { %1186 = vrot.lane.b32.xlu0 %v1130_v0, %s16138_s21  ;;  %1188 = vrot.lane.b32.xlu1 %v1131_v62, %s16138_s21  ;;  %v1136_v0 = vmul.f32 %v1105_v61, %v10493_v46  ;;  %v1137_v62 = vmul.f32 %v1110_v28, %v10486_v40  ;;  %v1120_v61 = vpop.permute.xlu1 %1119 }
 0x24b   : > { %1190 = vrot.lane.b32.xlu0 %v1132_v31, %s16138_s21  ;;  %1192 = vrot.lane.b32.xlu1 %v1133_v60, %s16138_s21  ;;  %v1139_v31 = vmul.f32 %v1110_v28, %v10493_v46  ;;  %v1115_v60 = vpop.permute.xlu0 %1114  ;;  %v1144_v28 = vmul.f32 %v1120_v61, %v10482_v39 }
 0x24f   : > { %1194 = vrot.lane.b32.xlu0 %v1134_v59, %s16138_s21  ;;  %1196 = vrot.lane.b32.xlu1 %v1135_v35, %s16138_s21  ;;  %v1140_v59 = vmul.f32 %v1115_v60, %v10486_v40  ;;  %v1141_v35 = vmul.f32 %v1115_v60, %v10482_v39 }
 0x253   : > { %1198 = vrot.lane.b32.xlu0 %v1136_v0, %s16138_s21  ;;  %1200 = vrot.lane.b32.xlu1 %v1137_v62, %s16138_s21  ;;  %v1142_v0 = vmul.f32 %v1115_v60, %v10493_v46  ;;  %v1143_v62 = vmul.f32 %v1120_v61, %v10486_v40  ;;  %v9041_v60 = vld [vmem:[%s16019_s1 + $0x148] sm:$0xff] }
 0x257   : > { %1202 = vrot.lane.b32.xlu0 %v1138_v57, %s16138_s21  ;;  %1204 = vrot.lane.b32.xlu1 %v1139_v31, %s16138_s21  ;;  %v1145_v57 = vmul.f32 %v1120_v61, %v10493_v46  ;;  %v9040_v31 = vld [vmem:[%s16019_s1 + $0x140] sm:$0xff] }
 0x258   : > { %v9044_v61 = vld [vmem:[%s16019_s1 + $0x160] sm:$0xff] }
 0x25b   : > { %1206 = vrot.lane.b32.xlu0 %v1140_v59, %s16138_s21  ;;  %1208 = vrot.lane.b32.xlu1 %v1141_v35, %s16138_s21  ;;  %v9042_v59 = vld [vmem:[%s16019_s1 + $0x150] sm:$0xff]  ;;  %v9043_v35 = vld [vmem:[%s16019_s1 + $0x158] sm:$0xff] }
 0x25f   : > { %1210 = vrot.lane.b32.xlu0 %v1142_v0, %s16138_s21  ;;  %1212 = vrot.lane.b32.xlu1 %v1143_v62, %s16138_s21  ;;  %v9045_v0 = vld [vmem:[%s16019_s1 + $0x168] sm:$0xff]  ;;  %v9046_v62 = vld [vmem:[%s16019_s1 + $0x170] sm:$0xff] }
 0x263   : > { %1214 = vrot.lane.b32.xlu0 %v1144_v28, %s16138_s21  ;;  %1216 = vrot.lane.b32.xlu1 %v1145_v57, %s16138_s21  ;;  %v9047_v28 = vld [vmem:[%s16019_s1 + $0x178] sm:$0xff] }
 0x267   : > { %1294 = vperm.xlu0 %9716, %v9040_v31   ;;  %1299 = vperm.xlu1 %9717, %v9041_v60  }
 0x26b   : > { %1304 = vperm.xlu0 %9716, %v9042_v59   ;;  %1309 = vperm.xlu1 %9717, %v9043_v35  }
 0x26f   : > { %1314 = vperm.xlu0 %9716, %v9044_v61   ;;  %1319 = vperm.xlu1 %9717, %v9045_v0  }
 0x273   : > { %1324 = vperm.xlu0 %9716, %v9046_v62   ;;  %1329 = vperm.xlu1 %9717, %v9047_v28  }
 0x2a9   : > { %v10899_v57 = vpop.permute.xlu0 %1170  ;;  %v10901_v31 = vpop.permute.xlu1 %1172 }
 0x2aa   : > { %16276 = vst [vmem:[#allocation48_spill] sm:$0xff] %v10899_v57  ;;  %16277 = vst [vmem:[#allocation49_spill] sm:$0xff] %v10901_v31 }
 0x2ad   : > { %v10903_v60 = vpop.permute.xlu0 %1174  ;;  %v10905_v59 = vpop.permute.xlu1 %1176 }
 0x2ae   : > { %16278 = vst [vmem:[#allocation50_spill] sm:$0xff] %v10903_v60  ;;  %16279 = vst [vmem:[#allocation51_spill] sm:$0xff] %v10905_v59 }
 0x2b1   : > { %v10907_v35 = vpop.permute.xlu0 %1178  ;;  %v10909_v61 = vpop.permute.xlu1 %1180 }
 0x2b2   : > { %16280 = vst [vmem:[#allocation52_spill] sm:$0xff] %v10907_v35  ;;  %16281 = vst [vmem:[#allocation53_spill] sm:$0xff] %v10909_v61 }
 0x2b5   : > { %v10911_v0 = vpop.permute.xlu0 %1182  ;;  %v10913_v58 = vpop.permute.xlu1 %1184 }
 0x2b6   : > { %16282 = vst [vmem:[#allocation54_spill] sm:$0xff] %v10911_v0  ;;  %16283 = vst [vmem:[#allocation55_spill] sm:$0xff] %v10913_v58 }
 0x2b9   : > { %v10915_v63 = vpop.permute.xlu0 %1186  ;;  %v10917_v62 = vpop.permute.xlu1 %1188 }
 0x2ba   : > { %16284 = vst [vmem:[#allocation56_spill] sm:$0xff] %v10915_v63  ;;  %16285 = vst [vmem:[#allocation57_spill] sm:$0xff] %v10917_v62 }
 0x2bd   : > { %v10919_v28 = vpop.permute.xlu0 %1190  ;;  %v10921_v57 = vpop.permute.xlu1 %1192 }
 0x2be   : > { %16286 = vst [vmem:[#allocation58_spill] sm:$0xff] %v10919_v28  ;;  %16287 = vst [vmem:[#allocation59_spill] sm:$0xff] %v10921_v57 }
 0x2c1   : > { %v10923_v31 = vpop.permute.xlu0 %1194  ;;  %v10925_v60 = vpop.permute.xlu1 %1196 }
 0x2c2   : > { %16288 = vst [vmem:[#allocation60_spill] sm:$0xff] %v10923_v31  ;;  %16289 = vst [vmem:[#allocation61_spill] sm:$0xff] %v10925_v60 }
 0x2c5   : > { %v10927_v59 = vpop.permute.xlu0 %1198  ;;  %v10929_v35 = vpop.permute.xlu1 %1200 }
 0x2c6   : > { %16290 = vst [vmem:[#allocation62_spill] sm:$0xff] %v10927_v59  ;;  %16291 = vst [vmem:[#allocation63_spill] sm:$0xff] %v10929_v35 }
 0x2c9   : > { %v10931_v61 = vpop.permute.xlu0 %1202  ;;  %v10933_v0 = vpop.permute.xlu1 %1204 }
 0x2ca   : > { %16292 = vst [vmem:[#allocation64_spill] sm:$0xff] %v10931_v61  ;;  %16293 = vst [vmem:[#allocation65_spill] sm:$0xff] %v10933_v0 }
 0x2cd   : > { %v10935_v58 = vpop.permute.xlu0 %1206  ;;  %v10937_v63 = vpop.permute.xlu1 %1208 }
 0x2ce   : > { %16294 = vst [vmem:[#allocation66_spill] sm:$0xff] %v10935_v58  ;;  %16295 = vst [vmem:[#allocation67_spill] sm:$0xff] %v10937_v63 }
 0x2d1   : > { %v10939_v62 = vpop.permute.xlu0 %1210  ;;  %v10941_v28 = vpop.permute.xlu1 %1212 }
 0x2d2   : > { %16296 = vst [vmem:[#allocation68_spill] sm:$0xff] %v10939_v62  ;;  %16297 = vst [vmem:[#allocation69_spill] sm:$0xff] %v10941_v28 }
 0x2d5   : > { %v10943_v57 = vpop.permute.xlu0 %1214  ;;  %v10945_v31 = vpop.permute.xlu1 %1216 }
 0x2d6   : > { %16298 = vst [vmem:[#allocation70_spill] sm:$0xff] %v10943_v57  ;;  %16299 = vst [vmem:[#allocation71_spill] sm:$0xff] %v10945_v31 }
 0x2e6   : > { %v1295_v60 = vpop.permute.xlu0 %1294  ;;  %v1300_v61 = vpop.permute.xlu1 %1299 }
 0x2e7   : > { %v1332_v59 = vmul.f32 %v1295_v60, %v10486_v40  ;;  %v1333_v35 = vmul.f32 %v1295_v60, %v10482_v39  ;;  %v1335_v58 = vmul.f32 %v1300_v61, %v10486_v40  ;;  %v1334_v62 = vmul.f32 %v1295_v60, %v10493_v46 }
 0x2e8   : > { %v1336_v31 = vmul.f32 %v1300_v61, %v10482_v39  ;;  %v1337_v28 = vmul.f32 %v1300_v61, %v10493_v46 }
 0x2e9   : > { %1382 = vrot.lane.b32.xlu1 %v1333_v35, %s16130_s23  ;;  %1380 = vrot.lane.b32.xlu0 %v1332_v59, %s16130_s23 }
 0x2ea   : > { %v1305_v57 = vpop.permute.xlu0 %1304  ;;  %v1310_v63 = vpop.permute.xlu1 %1309 }
 0x2eb   : > { %v1338_v35 = vmul.f32 %v1305_v57, %v10486_v40  ;;  %v1339_v59 = vmul.f32 %v1305_v57, %v10482_v39  ;;  %v1340_v60 = vmul.f32 %v1305_v57, %v10493_v46  ;;  %v1342_v61 = vmul.f32 %v1310_v63, %v10482_v39 }
 0x2ed   : > { %1386 = vrot.lane.b32.xlu1 %v1335_v58, %s16130_s23  ;;  %1384 = vrot.lane.b32.xlu0 %v1334_v62, %s16130_s23  ;;  %v1341_v58 = vmul.f32 %v1310_v63, %v10486_v40 }
 0x2ee   : > { %v1315_v62 = vpop.permute.xlu0 %1314 }
 0x2f1   : > { %1390 = vrot.lane.b32.xlu1 %v1337_v28, %s16130_s23  ;;  %1388 = vrot.lane.b32.xlu0 %v1336_v31, %s16130_s23  ;;  %v1343_v31 = vmul.f32 %v1310_v63, %v10493_v46  ;;  %v1344_v28 = vmul.f32 %v1315_v62, %v10486_v40 }
 0x2f5   : > { %1394 = vrot.lane.b32.xlu1 %v1339_v59, %s16130_s23  ;;  %1392 = vrot.lane.b32.xlu0 %v1338_v35, %s16130_s23  ;;  %v1345_v35 = vmul.f32 %v1315_v62, %v10482_v39  ;;  %v1320_v59 = vpop.permute.xlu1 %1319 }
 0x2f6   : > { %v1347_v57 = vmul.f32 %v1320_v59, %v10486_v40  ;;  %v1348_v63 = vmul.f32 %v1320_v59, %v10482_v39 }
 0x2f9   : > { %1398 = vrot.lane.b32.xlu1 %v1341_v58, %s16130_s23  ;;  %1396 = vrot.lane.b32.xlu0 %v1340_v60, %s16130_s23  ;;  %v1346_v58 = vmul.f32 %v1315_v62, %v10493_v46  ;;  %v1349_v60 = vmul.f32 %v1320_v59, %v10493_v46 }
 0x2fd   : > { %1402 = vrot.lane.b32.xlu1 %v1343_v31, %s16130_s23  ;;  %1400 = vrot.lane.b32.xlu0 %v1342_v61, %s16130_s23  ;;  %v1325_v61 = vpop.permute.xlu0 %1324 }
 0x2fe   : > { %v1350_v31 = vmul.f32 %v1325_v61, %v10486_v40 }
 0x301   : > { %1406 = vrot.lane.b32.xlu1 %v1345_v35, %s16130_s23  ;;  %1404 = vrot.lane.b32.xlu0 %v1344_v28, %s16130_s23  ;;  %v1351_v28 = vmul.f32 %v1325_v61, %v10482_v39  ;;  %v1330_v35 = vpop.permute.xlu1 %1329 }
 0x302   : > { %v1353_v62 = vmul.f32 %v1330_v35, %v10486_v40  ;;  %v1354_v59 = vmul.f32 %v1330_v35, %v10482_v39 }
 0x305   : > { %1410 = vrot.lane.b32.xlu1 %v1347_v57, %s16130_s23  ;;  %1408 = vrot.lane.b32.xlu0 %v1346_v58, %s16130_s23  ;;  %v1352_v57 = vmul.f32 %v1325_v61, %v10493_v46  ;;  %v1355_v58 = vmul.f32 %v1330_v35, %v10493_v46  ;;  %v9051_v61 = vld [vmem:[%s16019_s1 + $0x198] sm:$0xff]  ;;  %v9052_v35 = vld [vmem:[%s16019_s1 + $0x1a0] sm:$0xff] }
 0x309   : > { %1414 = vrot.lane.b32.xlu1 %v1349_v60, %s16130_s23  ;;  %1412 = vrot.lane.b32.xlu0 %v1348_v63, %s16130_s23  ;;  %v9049_v63 = vld [vmem:[%s16019_s1 + $0x188] sm:$0xff]  ;;  %v9048_v60 = vld [vmem:[%s16019_s1 + $0x180] sm:$0xff] }
 0x30d   : > { %1418 = vrot.lane.b32.xlu1 %v1351_v28, %s16130_s23  ;;  %1416 = vrot.lane.b32.xlu0 %v1350_v31, %s16130_s23  ;;  %v9050_v31 = vld [vmem:[%s16019_s1 + $0x190] sm:$0xff]  ;;  %v9053_v28 = vld [vmem:[%s16019_s1 + $0x1a8] sm:$0xff] }
 0x311   : > { %1422 = vrot.lane.b32.xlu1 %v1353_v62, %s16130_s23  ;;  %1420 = vrot.lane.b32.xlu0 %v1352_v57, %s16130_s23  ;;  %v9055_v62 = vld [vmem:[%s16019_s1 + $0x1b8] sm:$0xff]  ;;  %v9054_v57 = vld [vmem:[%s16019_s1 + $0x1b0] sm:$0xff] }
 0x315   : > { %1426 = vrot.lane.b32.xlu1 %v1355_v58, %s16130_s23  ;;  %1424 = vrot.lane.b32.xlu0 %v1354_v59, %s16130_s23  ;;  %s10284_s23 = smov 5  }
 0x319   : > { %1509 = vperm.xlu1 %9717, %v9049_v63   ;;  %1504 = vperm.xlu0 %9716, %v9048_v60  }
 0x31d   : > { %1519 = vperm.xlu1 %9717, %v9051_v61   ;;  %1514 = vperm.xlu0 %9716, %v9050_v31  }
 0x321   : > { %1529 = vperm.xlu1 %9717, %v9053_v28   ;;  %1524 = vperm.xlu0 %9716, %v9052_v35  }
 0x325   : > { %1539 = vperm.xlu1 %9717, %v9055_v62   ;;  %1534 = vperm.xlu0 %9716, %v9054_v57  }
 0x35b   : > { %v11019_v59 = vpop.permute.xlu1 %1382  ;;  %v11021_v58 = vpop.permute.xlu0 %1380 }
 0x35c   : > { %16300 = vst [vmem:[#allocation72_spill] sm:$0xff] %v11019_v59  ;;  %16301 = vst [vmem:[#allocation73_spill] sm:$0xff] %v11021_v58 }
 0x35f   : > { %v11023_v63 = vpop.permute.xlu1 %1386  ;;  %v11025_v60 = vpop.permute.xlu0 %1384 }
 0x360   : > { %16302 = vst [vmem:[#allocation74_spill] sm:$0xff] %v11023_v63  ;;  %16303 = vst [vmem:[#allocation75_spill] sm:$0xff] %v11025_v60 }
 0x363   : > { %v11027_v61 = vpop.permute.xlu1 %1390  ;;  %v11029_v31 = vpop.permute.xlu0 %1388 }
 0x364   : > { %16304 = vst [vmem:[#allocation76_spill] sm:$0xff] %v11027_v61  ;;  %16305 = vst [vmem:[#allocation77_spill] sm:$0xff] %v11029_v31 }
 0x367   : > { %v11031_v28 = vpop.permute.xlu1 %1394  ;;  %v11033_v35 = vpop.permute.xlu0 %1392 }
 0x368   : > { %16306 = vst [vmem:[#allocation78_spill] sm:$0xff] %v11031_v28  ;;  %16307 = vst [vmem:[#allocation79_spill] sm:$0xff] %v11033_v35 }
 0x36b   : > { %v11035_v0 = vpop.permute.xlu0 %1396  ;;  %v11037_v62 = vpop.permute.xlu1 %1398 }
 0x36c   : > { %16308 = vst [vmem:[#allocation80_spill] sm:$0xff] %v11035_v0  ;;  %16309 = vst [vmem:[#allocation81_spill] sm:$0xff] %v11037_v62 }
 0x36f   : > { %v11039_v57 = vpop.permute.xlu0 %1400  ;;  %v11041_v59 = vpop.permute.xlu1 %1402 }
 0x370   : > { %16310 = vst [vmem:[#allocation82_spill] sm:$0xff] %v11039_v57  ;;  %16311 = vst [vmem:[#allocation83_spill] sm:$0xff] %v11041_v59 }
 0x373   : > { %v11043_v58 = vpop.permute.xlu0 %1404  ;;  %v11045_v63 = vpop.permute.xlu1 %1406 }
 0x374   : > { %16312 = vst [vmem:[#allocation84_spill] sm:$0xff] %v11043_v58  ;;  %16313 = vst [vmem:[#allocation85_spill] sm:$0xff] %v11045_v63 }
 0x377   : > { %v11047_v60 = vpop.permute.xlu0 %1408  ;;  %v11049_v61 = vpop.permute.xlu1 %1410 }
 0x378   : > { %16314 = vst [vmem:[#allocation86_spill] sm:$0xff] %v11047_v60  ;;  %16315 = vst [vmem:[#allocation87_spill] sm:$0xff] %v11049_v61 }
 0x37b   : > { %v11051_v31 = vpop.permute.xlu0 %1412  ;;  %v11053_v28 = vpop.permute.xlu1 %1414 }
 0x37c   : > { %16316 = vst [vmem:[#allocation88_spill] sm:$0xff] %v11051_v31  ;;  %16317 = vst [vmem:[#allocation89_spill] sm:$0xff] %v11053_v28 }
 0x37f   : > { %v11055_v35 = vpop.permute.xlu0 %1416  ;;  %v11057_v0 = vpop.permute.xlu1 %1418 }
 0x380   : > { %16318 = vst [vmem:[#allocation90_spill] sm:$0xff] %v11055_v35  ;;  %16319 = vst [vmem:[#allocation91_spill] sm:$0xff] %v11057_v0 }
 0x383   : > { %v11059_v62 = vpop.permute.xlu0 %1420  ;;  %v11061_v57 = vpop.permute.xlu1 %1422 }
 0x384   : > { %16320 = vst [vmem:[#allocation92_spill] sm:$0xff] %v11059_v62  ;;  %16321 = vst [vmem:[#allocation93_spill] sm:$0xff] %v11061_v57 }
 0x387   : > { %v11063_v59 = vpop.permute.xlu0 %1424  ;;  %v11065_v58 = vpop.permute.xlu1 %1426 }
 0x388   : > { %16322 = vst [vmem:[#allocation94_spill] sm:$0xff] %v11063_v59  ;;  %16323 = vst [vmem:[#allocation95_spill] sm:$0xff] %v11065_v58 }
 0x398   : > { %v1505_v63 = vpop.permute.xlu0 %1504  ;;  %v1510_v31 = vpop.permute.xlu1 %1509 }
 0x399   : > { %v1542_v60 = vmul.f32 %v1505_v63, %v10486_v40  ;;  %v1543_v61 = vmul.f32 %v1505_v63, %v10482_v39  ;;  %v1544_v35 = vmul.f32 %v1505_v63, %v10493_v46  ;;  %v1545_v62 = vmul.f32 %v1510_v31, %v10486_v40 }
 0x39a   : > { %v1546_v58 = vmul.f32 %v1510_v31, %v10482_v39  ;;  %v1547_v57 = vmul.f32 %v1510_v31, %v10493_v46 }
 0x39b   : > { %1590 = vrot.lane.b32.xlu0 %v1542_v60, %s16146_s27  ;;  %1592 = vrot.lane.b32.xlu1 %v1543_v61, %s16146_s27 }
 0x39c   : > { %v1515_v59 = vpop.permute.xlu0 %1514  ;;  %v1520_v63 = vpop.permute.xlu1 %1519 }
 0x39d   : > { %v1548_v60 = vmul.f32 %v1515_v59, %v10486_v40  ;;  %v1549_v61 = vmul.f32 %v1515_v59, %v10482_v39  ;;  %v1553_v31 = vmul.f32 %v1520_v63, %v10493_v46 }
 0x39f   : > { %1594 = vrot.lane.b32.xlu0 %v1544_v35, %s16146_s27  ;;  %1596 = vrot.lane.b32.xlu1 %v1545_v62, %s16146_s27  ;;  %v1550_v35 = vmul.f32 %v1515_v59, %v10493_v46  ;;  %v1551_v62 = vmul.f32 %v1520_v63, %v10486_v40 }
 0x3a0   : > { %v1530_v59 = vpop.permute.xlu1 %1529 }
 0x3a3   : > { %1598 = vrot.lane.b32.xlu0 %v1546_v58, %s16146_s27  ;;  %1600 = vrot.lane.b32.xlu1 %v1547_v57, %s16146_s27  ;;  %v1552_v58 = vmul.f32 %v1520_v63, %v10482_v39  ;;  %v1525_v57 = vpop.permute.xlu0 %1524  ;;  %v1558_v63 = vmul.f32 %v1530_v59, %v10482_v39 }
 0x3a7   : > { %1602 = vrot.lane.b32.xlu0 %v1548_v60, %s16146_s27  ;;  %1604 = vrot.lane.b32.xlu1 %v1549_v61, %s16146_s27  ;;  %v1554_v60 = vmul.f32 %v1525_v57, %v10486_v40  ;;  %v1555_v61 = vmul.f32 %v1525_v57, %v10482_v39 }
 0x3ab   : > { %1606 = vrot.lane.b32.xlu0 %v1550_v35, %s16146_s27  ;;  %1608 = vrot.lane.b32.xlu1 %v1551_v62, %s16146_s27  ;;  %v1556_v35 = vmul.f32 %v1525_v57, %v10493_v46  ;;  %v1557_v62 = vmul.f32 %v1530_v59, %v10486_v40  ;;  %v1540_v57 = vpop.permute.xlu1 %1539 }
 0x3af   : > { %1610 = vrot.lane.b32.xlu0 %v1552_v58, %s16146_s27  ;;  %1612 = vrot.lane.b32.xlu1 %v1553_v31, %s16146_s27  ;;  %v1559_v58 = vmul.f32 %v1530_v59, %v10493_v46  ;;  %v1535_v31 = vpop.permute.xlu0 %1534  ;;  %v1564_v59 = vmul.f32 %v1540_v57, %v10482_v39 }
 0x3b3   : > { %1614 = vrot.lane.b32.xlu0 %v1554_v60, %s16146_s27  ;;  %1616 = vrot.lane.b32.xlu1 %v1555_v61, %s16146_s27  ;;  %v1560_v60 = vmul.f32 %v1535_v31, %v10486_v40  ;;  %v1561_v61 = vmul.f32 %v1535_v31, %v10482_v39 }
 0x3b7   : > { %1618 = vrot.lane.b32.xlu0 %v1556_v35, %s16146_s27  ;;  %1620 = vrot.lane.b32.xlu1 %v1557_v62, %s16146_s27  ;;  %v1562_v35 = vmul.f32 %v1535_v31, %v10493_v46  ;;  %v1563_v62 = vmul.f32 %v1540_v57, %v10486_v40  ;;  %v9057_v31 = vld [vmem:[%s16019_s1 + $0x1c8] sm:$0xff] }
 0x3bb   : > { %1622 = vrot.lane.b32.xlu0 %v1558_v63, %s16146_s27  ;;  %1624 = vrot.lane.b32.xlu1 %v1559_v58, %s16146_s27  ;;  %v1565_v63 = vmul.f32 %v1540_v57, %v10493_v46  ;;  %v9056_v58 = vld [vmem:[%s16019_s1 + $0x1c0] sm:$0xff] }
 0x3bc   : > { %v9060_v57 = vld [vmem:[%s16019_s1 + $0x1e0] sm:$0xff] }
 0x3bf   : > { %1626 = vrot.lane.b32.xlu0 %v1560_v60, %s16146_s27  ;;  %1628 = vrot.lane.b32.xlu1 %v1561_v61, %s16146_s27  ;;  %v9058_v60 = vld [vmem:[%s16019_s1 + $0x1d0] sm:$0xff]  ;;  %v9059_v61 = vld [vmem:[%s16019_s1 + $0x1d8] sm:$0xff] }
 0x3c3   : > { %1630 = vrot.lane.b32.xlu0 %v1562_v35, %s16146_s27  ;;  %1632 = vrot.lane.b32.xlu1 %v1563_v62, %s16146_s27  ;;  %v9061_v35 = vld [vmem:[%s16019_s1 + $0x1e8] sm:$0xff]  ;;  %v9062_v62 = vld [vmem:[%s16019_s1 + $0x1f0] sm:$0xff] }
 0x3c7   : > { %1634 = vrot.lane.b32.xlu0 %v1564_v59, %s16146_s27  ;;  %1636 = vrot.lane.b32.xlu1 %v1565_v63, %s16146_s27  ;;  %v9063_v59 = vld [vmem:[%s16019_s1 + $0x1f8] sm:$0xff] }
 0x3cb   : > { %1714 = vperm.xlu0 %9716, %v9056_v58   ;;  %1719 = vperm.xlu1 %9717, %v9057_v31  }
 0x3cf   : > { %1724 = vperm.xlu0 %9716, %v9058_v60   ;;  %1729 = vperm.xlu1 %9717, %v9059_v61  }
 0x3d3   : > { %1734 = vperm.xlu0 %9716, %v9060_v57   ;;  %1739 = vperm.xlu1 %9717, %v9061_v35  }
 0x3d7   : > { %1744 = vperm.xlu0 %9716, %v9062_v62   ;;  %1749 = vperm.xlu1 %9717, %v9063_v59  }
 0x40d   : > { %v11139_v63 = vpop.permute.xlu0 %1590  ;;  %v11141_v58 = vpop.permute.xlu1 %1592 }
 0x40e   : > { %16324 = vst [vmem:[#allocation96_spill] sm:$0xff] %v11139_v63  ;;  %16325 = vst [vmem:[#allocation97_spill] sm:$0xff] %v11141_v58 }
 0x411   : > { %v11143_v31 = vpop.permute.xlu0 %1594  ;;  %v11145_v60 = vpop.permute.xlu1 %1596 }
 0x412   : > { %16326 = vst [vmem:[#allocation98_spill] sm:$0xff] %v11143_v31  ;;  %16327 = vst [vmem:[#allocation99_spill] sm:$0xff] %v11145_v60 }
 0x415   : > { %v11147_v61 = vpop.permute.xlu0 %1598  ;;  %v11149_v57 = vpop.permute.xlu1 %1600 }
 0x416   : > { %16328 = vst [vmem:[#allocation100_spill] sm:$0xff] %v11147_v61  ;;  %16329 = vst [vmem:[#allocation101_spill] sm:$0xff] %v11149_v57 }
 0x419   : > { %v11151_v35 = vpop.permute.xlu0 %1602  ;;  %v11153_v0 = vpop.permute.xlu1 %1604 }
 0x41a   : > { %16330 = vst [vmem:[#allocation102_spill] sm:$0xff] %v11151_v35  ;;  %16331 = vst [vmem:[#allocation103_spill] sm:$0xff] %v11153_v0 }
 0x41d   : > { %v11155_v28 = vpop.permute.xlu0 %1606  ;;  %v11157_v62 = vpop.permute.xlu1 %1608 }
 0x41e   : > { %16332 = vst [vmem:[#allocation104_spill] sm:$0xff] %v11155_v28  ;;  %16333 = vst [vmem:[#allocation105_spill] sm:$0xff] %v11157_v62 }
 0x421   : > { %v11159_v59 = vpop.permute.xlu0 %1610  ;;  %v11161_v63 = vpop.permute.xlu1 %1612 }
 0x422   : > { %16334 = vst [vmem:[#allocation106_spill] sm:$0xff] %v11159_v59  ;;  %16335 = vst [vmem:[#allocation107_spill] sm:$0xff] %v11161_v63 }
 0x425   : > { %v11163_v58 = vpop.permute.xlu0 %1614  ;;  %v11165_v31 = vpop.permute.xlu1 %1616 }
 0x426   : > { %16336 = vst [vmem:[#allocation108_spill] sm:$0xff] %v11163_v58  ;;  %16337 = vst [vmem:[#allocation109_spill] sm:$0xff] %v11165_v31 }
 0x429   : > { %v11167_v60 = vpop.permute.xlu0 %1618  ;;  %v11169_v61 = vpop.permute.xlu1 %1620 }
 0x42a   : > { %16338 = vst [vmem:[#allocation110_spill] sm:$0xff] %v11167_v60  ;;  %16339 = vst [vmem:[#allocation111_spill] sm:$0xff] %v11169_v61 }
 0x42d   : > { %v11171_v57 = vpop.permute.xlu0 %1622  ;;  %v11173_v35 = vpop.permute.xlu1 %1624 }
 0x42e   : > { %16340 = vst [vmem:[#allocation112_spill] sm:$0xff] %v11171_v57  ;;  %16341 = vst [vmem:[#allocation113_spill] sm:$0xff] %v11173_v35 }
 0x431   : > { %v11175_v0 = vpop.permute.xlu0 %1626  ;;  %v11177_v28 = vpop.permute.xlu1 %1628 }
 0x432   : > { %16342 = vst [vmem:[#allocation114_spill] sm:$0xff] %v11175_v0  ;;  %16343 = vst [vmem:[#allocation115_spill] sm:$0xff] %v11177_v28 }
 0x435   : > { %v11179_v62 = vpop.permute.xlu0 %1630  ;;  %v11181_v59 = vpop.permute.xlu1 %1632 }
 0x436   : > { %16344 = vst [vmem:[#allocation116_spill] sm:$0xff] %v11179_v62  ;;  %16345 = vst [vmem:[#allocation117_spill] sm:$0xff] %v11181_v59 }
 0x439   : > { %v11183_v63 = vpop.permute.xlu0 %1634  ;;  %v11185_v58 = vpop.permute.xlu1 %1636 }
 0x43a   : > { %16346 = vst [vmem:[#allocation118_spill] sm:$0xff] %v11183_v63  ;;  %16347 = vst [vmem:[#allocation119_spill] sm:$0xff] %v11185_v58 }
 0x44a   : > { %v1715_v31 = vpop.permute.xlu0 %1714  ;;  %v1720_v57 = vpop.permute.xlu1 %1719 }
 0x44b   : > { %v1752_v60 = vmul.f32 %v1715_v31, %v10486_v40  ;;  %v1753_v61 = vmul.f32 %v1715_v31, %v10482_v39  ;;  %v1755_v0 = vmul.f32 %v1720_v57, %v10486_v40  ;;  %v1754_v62 = vmul.f32 %v1715_v31, %v10493_v46 }
 0x44c   : > { %v1756_v58 = vmul.f32 %v1720_v57, %v10482_v39  ;;  %v1757_v59 = vmul.f32 %v1720_v57, %v10493_v46 }
 0x44d   : > { %1802 = vrot.lane.b32.xlu1 %v1753_v61, %s16134_s30  ;;  %1800 = vrot.lane.b32.xlu0 %v1752_v60, %s16134_s30 }
 0x44e   : > { %v1725_v63 = vpop.permute.xlu0 %1724  ;;  %v1730_v28 = vpop.permute.xlu1 %1729 }
 0x44f   : > { %v1758_v61 = vmul.f32 %v1725_v63, %v10486_v40  ;;  %v1759_v60 = vmul.f32 %v1725_v63, %v10482_v39  ;;  %v1760_v31 = vmul.f32 %v1725_v63, %v10493_v46  ;;  %v1762_v57 = vmul.f32 %v1730_v28, %v10482_v39 }
 0x451   : > { %1806 = vrot.lane.b32.xlu1 %v1755_v0, %s16134_s30  ;;  %1804 = vrot.lane.b32.xlu0 %v1754_v62, %s16134_s30  ;;  %v1761_v0 = vmul.f32 %v1730_v28, %v10486_v40 }
 0x452   : > { %v1735_v62 = vpop.permute.xlu0 %1734 }
 0x455   : > { %1810 = vrot.lane.b32.xlu1 %v1757_v59, %s16134_s30  ;;  %1808 = vrot.lane.b32.xlu0 %v1756_v58, %s16134_s30  ;;  %v1763_v58 = vmul.f32 %v1730_v28, %v10493_v46  ;;  %v1764_v59 = vmul.f32 %v1735_v62, %v10486_v40 }
 0x459   : > { %1814 = vrot.lane.b32.xlu1 %v1759_v60, %s16134_s30  ;;  %1812 = vrot.lane.b32.xlu0 %v1758_v61, %s16134_s30  ;;  %v1765_v61 = vmul.f32 %v1735_v62, %v10482_v39  ;;  %v1740_v60 = vpop.permute.xlu1 %1739 }
 0x45a   : > { %v1767_v63 = vmul.f32 %v1740_v60, %v10486_v40  ;;  %v1768_v28 = vmul.f32 %v1740_v60, %v10482_v39 }
 0x45d   : > { %1818 = vrot.lane.b32.xlu1 %v1761_v0, %s16134_s30  ;;  %1816 = vrot.lane.b32.xlu0 %v1760_v31, %s16134_s30  ;;  %v1766_v0 = vmul.f32 %v1735_v62, %v10493_v46  ;;  %v1769_v31 = vmul.f32 %v1740_v60, %v10493_v46 }
 0x461   : > { %1822 = vrot.lane.b32.xlu1 %v1763_v58, %s16134_s30  ;;  %1820 = vrot.lane.b32.xlu0 %v1762_v57, %s16134_s30  ;;  %v1745_v57 = vpop.permute.xlu0 %1744 }
 0x462   : > { %v1770_v58 = vmul.f32 %v1745_v57, %v10486_v40 }
 0x465   : > { %1826 = vrot.lane.b32.xlu1 %v1765_v61, %s16134_s30  ;;  %1824 = vrot.lane.b32.xlu0 %v1764_v59, %s16134_s30  ;;  %v1771_v59 = vmul.f32 %v1745_v57, %v10482_v39  ;;  %v1750_v61 = vpop.permute.xlu1 %1749 }
 0x466   : > { %v1773_v62 = vmul.f32 %v1750_v61, %v10486_v40  ;;  %v1774_v60 = vmul.f32 %v1750_v61, %v10482_v39 }
 0x469   : > { %1830 = vrot.lane.b32.xlu1 %v1767_v63, %s16134_s30  ;;  %1828 = vrot.lane.b32.xlu0 %v1766_v0, %s16134_s30  ;;  %v1772_v63 = vmul.f32 %v1745_v57, %v10493_v46  ;;  %v1775_v0 = vmul.f32 %v1750_v61, %v10493_v46  ;;  %v9067_v57 = vld [vmem:[%s16019_s1 + $0x218] sm:$0xff]  ;;  %v9068_v61 = vld [vmem:[%s16019_s1 + $0x220] sm:$0xff] }
 0x46d   : > { %1834 = vrot.lane.b32.xlu1 %v1769_v31, %s16134_s30  ;;  %1832 = vrot.lane.b32.xlu0 %v1768_v28, %s16134_s30  ;;  %v9065_v28 = vld [vmem:[%s16019_s1 + $0x208] sm:$0xff]  ;;  %v9064_v31 = vld [vmem:[%s16019_s1 + $0x200] sm:$0xff] }
 0x471   : > { %1838 = vrot.lane.b32.xlu1 %v1771_v59, %s16134_s30  ;;  %1836 = vrot.lane.b32.xlu0 %v1770_v58, %s16134_s30  ;;  %v9066_v58 = vld [vmem:[%s16019_s1 + $0x210] sm:$0xff]  ;;  %v9069_v59 = vld [vmem:[%s16019_s1 + $0x228] sm:$0xff] }
 0x475   : > { %1842 = vrot.lane.b32.xlu1 %v1773_v62, %s16134_s30  ;;  %1840 = vrot.lane.b32.xlu0 %v1772_v63, %s16134_s30  ;;  %v9071_v62 = vld [vmem:[%s16019_s1 + $0x238] sm:$0xff]  ;;  %v9070_v63 = vld [vmem:[%s16019_s1 + $0x230] sm:$0xff] }
 0x479   : > { %1846 = vrot.lane.b32.xlu1 %v1775_v0, %s16134_s30  ;;  %1844 = vrot.lane.b32.xlu0 %v1774_v60, %s16134_s30  ;;  %s10286_s30 = smov 111  }
 0x47d   : > { %1929 = vperm.xlu1 %9717, %v9065_v28   ;;  %1924 = vperm.xlu0 %9716, %v9064_v31  }
 0x481   : > { %1939 = vperm.xlu1 %9717, %v9067_v57   ;;  %1934 = vperm.xlu0 %9716, %v9066_v58  }
 0x485   : > { %1949 = vperm.xlu1 %9717, %v9069_v59   ;;  %1944 = vperm.xlu0 %9716, %v9068_v61  }
 0x489   : > { %1959 = vperm.xlu1 %9717, %v9071_v62   ;;  %1954 = vperm.xlu0 %9716, %v9070_v63  }
 0x4bf   : > { %v11259_v60 = vpop.permute.xlu1 %1802  ;;  %v11261_v0 = vpop.permute.xlu0 %1800 }
 0x4c0   : > { %16348 = vst [vmem:[#allocation120_spill] sm:$0xff] %v11259_v60  ;;  %16349 = vst [vmem:[#allocation121_spill] sm:$0xff] %v11261_v0 }
 0x4c3   : > { %v11263_v28 = vpop.permute.xlu1 %1806  ;;  %v11265_v31 = vpop.permute.xlu0 %1804 }
 0x4c4   : > { %16350 = vst [vmem:[#allocation122_spill] sm:$0xff] %v11263_v28  ;;  %16351 = vst [vmem:[#allocation123_spill] sm:$0xff] %v11265_v31 }
 0x4c7   : > { %v11267_v57 = vpop.permute.xlu1 %1810  ;;  %v11269_v58 = vpop.permute.xlu0 %1808 }
 0x4c8   : > { %16352 = vst [vmem:[#allocation124_spill] sm:$0xff] %v11267_v57  ;;  %16353 = vst [vmem:[#allocation125_spill] sm:$0xff] %v11269_v58 }
 0x4cb   : > { %v11271_v59 = vpop.permute.xlu1 %1814  ;;  %v11273_v61 = vpop.permute.xlu0 %1812 }
 0x4cc   : > { %16354 = vst [vmem:[#allocation126_spill] sm:$0xff] %v11271_v59  ;;  %16355 = vst [vmem:[#allocation127_spill] sm:$0xff] %v11273_v61 }
 0x4cf   : > { %v11275_v35 = vpop.permute.xlu0 %1816  ;;  %v11277_v62 = vpop.permute.xlu1 %1818 }
 0x4d0   : > { %16356 = vst [vmem:[#allocation128_spill] sm:$0xff] %v11275_v35  ;;  %16357 = vst [vmem:[#allocation129_spill] sm:$0xff] %v11277_v62 }
 0x4d3   : > { %v11279_v63 = vpop.permute.xlu0 %1820  ;;  %v11281_v60 = vpop.permute.xlu1 %1822 }
 0x4d4   : > { %16358 = vst [vmem:[#allocation130_spill] sm:$0xff] %v11279_v63  ;;  %16359 = vst [vmem:[#allocation131_spill] sm:$0xff] %v11281_v60 }
 0x4d7   : > { %v11283_v0 = vpop.permute.xlu0 %1824  ;;  %v11285_v28 = vpop.permute.xlu1 %1826 }
 0x4d8   : > { %16360 = vst [vmem:[#allocation132_spill] sm:$0xff] %v11283_v0  ;;  %16361 = vst [vmem:[#allocation133_spill] sm:$0xff] %v11285_v28 }
 0x4db   : > { %v11287_v31 = vpop.permute.xlu0 %1828  ;;  %v11289_v57 = vpop.permute.xlu1 %1830 }
 0x4dc   : > { %16362 = vst [vmem:[#allocation134_spill] sm:$0xff] %v11287_v31  ;;  %16363 = vst [vmem:[#allocation135_spill] sm:$0xff] %v11289_v57 }
 0x4df   : > { %v11291_v58 = vpop.permute.xlu0 %1832  ;;  %v11293_v59 = vpop.permute.xlu1 %1834 }
 0x4e0   : > { %16364 = vst [vmem:[#allocation136_spill] sm:$0xff] %v11291_v58  ;;  %16365 = vst [vmem:[#allocation137_spill] sm:$0xff] %v11293_v59  ;;  %v399_v59 = vmul.f32 %v10482_v39, %v10463_v30 }
 0x4e3   : > { %v11295_v61 = vpop.permute.xlu0 %1836  ;;  %v11297_v35 = vpop.permute.xlu1 %1838 }
 0x4e4   : > { %16366 = vst [vmem:[#allocation138_spill] sm:$0xff] %v11295_v61  ;;  %16367 = vst [vmem:[#allocation139_spill] sm:$0xff] %v11297_v35 }
 0x4e7   : > { %v11299_v62 = vpop.permute.xlu0 %1840  ;;  %v11301_v63 = vpop.permute.xlu1 %1842 }
 0x4e8   : > { %16368 = vst [vmem:[#allocation140_spill] sm:$0xff] %v11299_v62  ;;  %16369 = vst [vmem:[#allocation141_spill] sm:$0xff] %v11301_v63 }
 0x4eb   : > { %v11303_v60 = vpop.permute.xlu0 %1844  ;;  %v11305_v0 = vpop.permute.xlu1 %1846 }
 0x4ec   : > { %16370 = vst [vmem:[#allocation142_spill] sm:$0xff] %v11303_v60  ;;  %16371 = vst [vmem:[#allocation143_spill] sm:$0xff] %v11305_v0 }
 0x4fc   : > { %v1925_v28 = vpop.permute.xlu0 %1924  ;;  %v1930_v58 = vpop.permute.xlu1 %1929 }
 0x4fd   : > { %v1962_v31 = vmul.f32 %v1925_v28, %v10486_v40  ;;  %v1963_v57 = vmul.f32 %v1925_v28, %v10482_v39  ;;  %v1964_v61 = vmul.f32 %v1925_v28, %v10493_v46  ;;  %v1965_v62 = vmul.f32 %v1930_v58, %v10486_v40 }
 0x4fe   : > { %v1966_v0 = vmul.f32 %v1930_v58, %v10482_v39  ;;  %v1967_v63 = vmul.f32 %v1930_v58, %v10493_v46 }
 0x4ff   : > { %2010 = vrot.lane.b32.xlu0 %v1962_v31, %s16132_s8  ;;  %2012 = vrot.lane.b32.xlu1 %v1963_v57, %s16132_s8 }
 0x500   : > { %v1935_v60 = vpop.permute.xlu0 %1934  ;;  %v1940_v28 = vpop.permute.xlu1 %1939 }
 0x501   : > { %v1968_v31 = vmul.f32 %v1935_v60, %v10486_v40  ;;  %v1969_v57 = vmul.f32 %v1935_v60, %v10482_v39  ;;  %v1973_v58 = vmul.f32 %v1940_v28, %v10493_v46 }
 0x503   : > { %2014 = vrot.lane.b32.xlu0 %v1964_v61, %s16132_s8  ;;  %2016 = vrot.lane.b32.xlu1 %v1965_v62, %s16132_s8  ;;  %v1970_v61 = vmul.f32 %v1935_v60, %v10493_v46  ;;  %v1971_v62 = vmul.f32 %v1940_v28, %v10486_v40 }
 0x504   : > { %v1950_v60 = vpop.permute.xlu1 %1949 }
 0x507   : > { %2018 = vrot.lane.b32.xlu0 %v1966_v0, %s16132_s8  ;;  %2020 = vrot.lane.b32.xlu1 %v1967_v63, %s16132_s8  ;;  %v1972_v0 = vmul.f32 %v1940_v28, %v10482_v39  ;;  %v1945_v63 = vpop.permute.xlu0 %1944  ;;  %v1978_v28 = vmul.f32 %v1950_v60, %v10482_v39 }
 0x50b   : > { %2022 = vrot.lane.b32.xlu0 %v1968_v31, %s16132_s8  ;;  %2024 = vrot.lane.b32.xlu1 %v1969_v57, %s16132_s8  ;;  %v1974_v31 = vmul.f32 %v1945_v63, %v10486_v40  ;;  %v1975_v57 = vmul.f32 %v1945_v63, %v10482_v39 }
 0x50f   : > { %2026 = vrot.lane.b32.xlu0 %v1970_v61, %s16132_s8  ;;  %2028 = vrot.lane.b32.xlu1 %v1971_v62, %s16132_s8  ;;  %v1976_v61 = vmul.f32 %v1945_v63, %v10493_v46  ;;  %v1977_v62 = vmul.f32 %v1950_v60, %v10486_v40  ;;  %v1960_v63 = vpop.permute.xlu1 %1959 }
 0x513   : > { %2030 = vrot.lane.b32.xlu0 %v1972_v0, %s16132_s8  ;;  %2032 = vrot.lane.b32.xlu1 %v1973_v58, %s16132_s8  ;;  %v1979_v0 = vmul.f32 %v1950_v60, %v10493_v46  ;;  %v1955_v58 = vpop.permute.xlu0 %1954  ;;  %v1984_v60 = vmul.f32 %v1960_v63, %v10482_v39 }
 0x517   : > { %2034 = vrot.lane.b32.xlu0 %v1974_v31, %s16132_s8  ;;  %2036 = vrot.lane.b32.xlu1 %v1975_v57, %s16132_s8  ;;  %v1980_v31 = vmul.f32 %v1955_v58, %v10486_v40  ;;  %v1981_v57 = vmul.f32 %v1955_v58, %v10482_v39 }
 0x51b   : > { %2038 = vrot.lane.b32.xlu0 %v1976_v61, %s16132_s8  ;;  %2040 = vrot.lane.b32.xlu1 %v1977_v62, %s16132_s8  ;;  %v1982_v61 = vmul.f32 %v1955_v58, %v10493_v46  ;;  %v1983_v62 = vmul.f32 %v1960_v63, %v10486_v40  ;;  %v2124_v58 = vld [vmem:[%s16020_s2 + $0x8] sm:$0xff] }
 0x51f   : > { %2042 = vrot.lane.b32.xlu0 %v1978_v28, %s16132_s8  ;;  %2044 = vrot.lane.b32.xlu1 %v1979_v0, %s16132_s8  ;;  %v1985_v28 = vmul.f32 %v1960_v63, %v10493_v46  ;;  %v2123_v0 = vld [vmem:[%s16020_s2] sm:$0xff] }
 0x520   : > { %v2127_v63 = vld [vmem:[%s16020_s2 + $0x20] sm:$0xff] }
 0x523   : > { %2046 = vrot.lane.b32.xlu0 %v1980_v31, %s16132_s8  ;;  %2048 = vrot.lane.b32.xlu1 %v1981_v57, %s16132_s8  ;;  %v2125_v31 = vld [vmem:[%s16020_s2 + $0x10] sm:$0xff]  ;;  %v2126_v57 = vld [vmem:[%s16020_s2 + $0x18] sm:$0xff] }
 0x527   : > { %2050 = vrot.lane.b32.xlu0 %v1982_v61, %s16132_s8  ;;  %2052 = vrot.lane.b32.xlu1 %v1983_v62, %s16132_s8  ;;  %v2128_v61 = vld [vmem:[%s16020_s2 + $0x28] sm:$0xff]  ;;  %v2129_v62 = vld [vmem:[%s16020_s2 + $0x30] sm:$0xff] }
 0x52b   : > { %2054 = vrot.lane.b32.xlu0 %v1984_v60, %s16132_s8  ;;  %2056 = vrot.lane.b32.xlu1 %v1985_v28, %s16132_s8  ;;  %v2130_v60 = vld [vmem:[%s16020_s2 + $0x38] sm:$0xff]  ;;  %v402_v28 = vmul.f32 %v10482_v39, %v10453_v26  ;;  %s10285_s8 = smov 4  }
 0x52f   : > { %2133 = vperm.xlu0 %9716, %v2123_v0   ;;  %2138 = vperm.xlu1 %9717, %v2124_v58   ;;  %v396_v0 = vmul.f32 %v10482_v39, %v10455_v27  ;;  %v395_v58 = vmul.f32 %v10486_v40, %v10455_v27 }
 0x533   : > { %2143 = vperm.xlu0 %9716, %v2125_v31   ;;  %2148 = vperm.xlu1 %9717, %v2126_v57   ;;  %v397_v31 = vmul.f32 %v10493_v46, %v10455_v27  ;;  %v401_v57 = vmul.f32 %v10486_v40, %v10453_v26  ;;  %v398_v27 = vmul.f32 %v10486_v40, %v10463_v30 }
 0x535   : > { %v631_v45 = vadd.f32 %v10617_v4, %v397_v31 }
 0x537   : > { %2153 = vperm.xlu0 %9716, %v2127_v63   ;;  %2158 = vperm.xlu1 %9717, %v2128_v61   ;;  %v404_v61 = vmul.f32 %v10486_v40, %v10461_v29 }
 0x53b   : > { %2163 = vperm.xlu0 %9716, %v2129_v62   ;;  %2168 = vperm.xlu1 %9717, %v2130_v60   ;;  %v405_v62 = vmul.f32 %v10482_v39, %v10461_v29  ;;  %v403_v60 = vmul.f32 %v10493_v46, %v10453_v26  ;;  %v411_v26 = vmul.f32 %v10482_v39, %v10469_v32 }
 0x53c   : > { %v409_v29 = vmul.f32 %v10493_v46, %v10471_v33  ;;  %v591_v32 = vsel %vm588_vm0, %v10615_v3, %v10621_v6  ;;  %v630_v3 = vadd.f32 %v590_v49, %v396_v0 }
 0x53d   : > { %v637_v0 = vadd.f32 %v10629_v10, %v403_v60 }
 0x571   : > { %v11389_v63 = vpop.permute.xlu0 %2010  ;;  %v11397_v35 = vpop.permute.xlu1 %2012 }
 0x572   : > { %16372 = vst [vmem:[#allocation144_spill] sm:$0xff] %v11389_v63  ;;  %16373 = vst [vmem:[#allocation145_spill] sm:$0xff] %v11397_v35  ;;  %v400_v63 = vmul.f32 %v10493_v46, %v10463_v30  ;;  %v408_v35 = vmul.f32 %v10482_v39, %v10471_v33  ;;  %v589_v30 = vsel %vm588_vm0, %v10613_v2, %v10611_v1 }
 0x573   : > { %v413_v2 = vmul.f32 %v10486_v40, %v10480_v38  ;;  %v592_v33 = vsel %vm588_vm0, %v10621_v6, %v10619_v5  ;;  %v415_v39 = vmul.f32 %v10493_v46, %v10480_v38  ;;  %v629_v1 = vadd.f32 %v589_v30, %v395_v58  ;;  %v16379_v30 = vld [vmem:[#allocation9_spill] sm:$0xff] }
 0x574   : > { %v593_v40 = vsel %vm588_vm0, %v10625_v8, %v10623_v7  ;;  %v634_v6 = vadd.f32 %v10619_v5, %v400_v63  ;;  %v595_v38 = vsel %vm588_vm0, %v10627_v9, %v10633_v12  ;;  %v633_v58 = vadd.f32 %v592_v33, %v399_v59 }
 0x575   : > { %v11424_v52 = vpop.permute.xlu0 %2014  ;;  %v11435_v47 = vpop.permute.xlu1 %2016  ;;  %v596_v8 = vsel %vm588_vm0, %v10633_v12, %v10631_v11  ;;  %v635_v4 = vadd.f32 %v593_v40, %v401_v57  ;;  %v598_v9 = vsel %vm588_vm0, %v10635_v13, %v10641_v16  ;;  %v640_v59 = vadd.f32 %v10631_v11, %v406_v56 }
 0x576   : > { %16374 = vst [vmem:[#allocation146_spill] sm:$0xff] %v11424_v52  ;;  %16375 = vst [vmem:[#allocation147_spill] sm:$0xff] %v11435_v47  ;;  %v418_v52 = vmul.f32 %v10493_v46, %v10478_v37  ;;  %v594_v47 = vsel %vm588_vm0, %v10623_v7, %v10629_v10  ;;  %v632_v46 = vadd.f32 %v591_v32, %v398_v27  ;;  %v16380_v32 = vld [vmem:[#allocation11_spill] sm:$0xff] }
 0x577   : > { %v597_v7 = vsel %vm588_vm0, %v10637_v14, %v10635_v13  ;;  %v636_v5 = vadd.f32 %v594_v47, %v402_v28  ;;  %v638_v31 = vadd.f32 %v595_v38, %v404_v61  ;;  %v599_v12 = vsel %vm588_vm0, %v10639_v15, %v10645_v18 }
 0x578   : > { %v600_v14 = vsel %vm588_vm0, %v10645_v18, %v10643_v17  ;;  %v639_v63 = vadd.f32 %v596_v8, %v405_v62  ;;  %v641_v57 = vadd.f32 %v597_v7, %v407_v55  ;;  %v601_v10 = vsel %vm588_vm0, %v10649_v20, %v10647_v19 }
 0x579   : > { %v11458_v37 = vpop.permute.xlu0 %2018  ;;  %v11466_v49 = vpop.permute.xlu1 %2020  ;;  %v602_v13 = vsel %vm588_vm0, %v10647_v19, %v10653_v22  ;;  %v642_v47 = vadd.f32 %v598_v9, %v408_v35  ;;  %v643_v56 = vadd.f32 %v10641_v16, %v409_v29  ;;  %v646_v15 = vadd.f32 %v10643_v17, %v412_v51 }
 0x57a   : > { %v603_v18 = vsel %vm588_vm0, %v10651_v21, %v10657_v24  ;;  %v644_v28 = vadd.f32 %v599_v12, %v410_v54  ;;  %v645_v61 = vadd.f32 %v600_v14, %v411_v26  ;;  %v604_v20 = vsel %vm588_vm0, %v10657_v24, %v10655_v23  ;;  %v16388_v14 = vld [vmem:[#allocation18_spill] sm:$0xff] }
 0x57b   : > { %v799_v19 = vsel %vm16212_vm1, %v10661_v34, %v10659_v25  ;;  %v647_v35 = vadd.f32 %v601_v10, %v413_v2  ;;  %v648_v16 = vadd.f32 %v602_v13, %v414_v48  ;;  %v649_v17 = vadd.f32 %v10653_v22, %v415_v39  ;;  %v16376_v22 = vld [vmem:[#allocation7_spill] sm:$0xff]  ;;  %v16381_v39 = vld [vmem:[#allocation13_spill] sm:$0xff] }
 0x57c   : > { %v800_v21 = vsel %vm16212_vm1, %v10659_v25, %v10665_v41  ;;  %v652_v51 = vadd.f32 %v10655_v23, %v418_v52  ;;  %v650_v54 = vadd.f32 %v603_v18, %v416_v53  ;;  %v801_v62 = vsel %vm16212_vm1, %v10663_v36, %v10669_v43  ;;  %v16377_v25 = vld [vmem:[#allocation8_spill] sm:$0xff] }
 0x57d   : > { %v11485_v11 = vpop.permute.xlu0 %2022  ;;  %v11492_v55 = vpop.permute.xlu1 %2024  ;;  %v802_v24 = vsel %vm16212_vm1, %v10669_v43, %v10667_v42  ;;  %v651_v48 = vadd.f32 %v604_v20, %v417_v50  ;;  %v839_v60 = vadd.f32 %v799_v19, %v629_v1  ;;  %v803_v27 = vsel %vm16212_vm1, %v16376_v22, %v10671_v44  ;;  %v16378_v43 = vld [vmem:[#allocation10_spill] sm:$0xff]  ;;  %v16382_v1 = vld [vmem:[#allocation12_spill] sm:$0xff] }
 0x57e   : > { %v804_v23 = vsel %vm16212_vm1, %v10671_v44, %v16377_v25  ;;  %v840_v53 = vadd.f32 %v800_v21, %v630_v3  ;;  %v841_v36 = vadd.f32 %v10665_v41, %v631_v45  ;;  %v844_v26 = vadd.f32 %v10667_v42, %v634_v6  ;;  %v16383_v45 = vld [vmem:[#allocation14_spill] sm:$0xff]  ;;  %v16389_v20 = vld [vmem:[#allocation20_spill] sm:$0xff]  ;;  %v16391_v21 = vld [vmem:[#allocation21_spill] sm:$0xff] }
 0x57f   : > { %v805_v50 = vsel %vm16212_vm1, %v16379_v30, %v16378_v43  ;;  %v842_v29 = vadd.f32 %v801_v62, %v632_v46  ;;  %v843_v2 = vadd.f32 %v802_v24, %v633_v58  ;;  %v806_v33 = vsel %vm16212_vm1, %v16378_v43, %v16380_v32  ;;  %v16384_v46 = vld [vmem:[#allocation16_spill] sm:$0xff]  ;;  %v16385_v58 = vld [vmem:[#allocation15_spill] sm:$0xff]  ;;  %v16390_v19 = vld [vmem:[#allocation22_spill] sm:$0xff] }
 0x580   : > { %v807_v44 = vsel %vm16212_vm1, %v16382_v1, %v16381_v39  ;;  %v845_v40 = vadd.f32 %v803_v27, %v635_v4  ;;  %v846_v3 = vadd.f32 %v804_v23, %v636_v5  ;;  %v847_v41 = vadd.f32 %v16377_v25, %v637_v0  ;;  %v16386_v4 = vld [vmem:[#allocation17_spill] sm:$0xff]  ;;  %v16387_v0 = vld [vmem:[#allocation19_spill] sm:$0xff]  ;;  %v16393_v27 = vld [vmem:[#allocation24_spill] sm:$0xff] }
 0x581   : > { %v11511_v34 = vpop.permute.xlu0 %2026  ;;  %v11519_v52 = vpop.permute.xlu1 %2028  ;;  %v808_v42 = vsel %vm16212_vm1, %v16381_v39, %v16383_v45  ;;  %v850_v6 = vadd.f32 %v16380_v32, %v640_v59  ;;  %v848_v38 = vadd.f32 %v805_v50, %v638_v31  ;;  %v809_v8 = vsel %vm16212_vm1, %v16385_v58, %v16384_v46  ;;  %v16392_v24 = vld [vmem:[#allocation23_spill] sm:$0xff]  ;;  %v16394_v25 = vld [vmem:[#allocation25_spill] sm:$0xff]  ;;  %v16398_v1 = vld [vmem:[#allocation28_spill] sm:$0xff] }
 0x582   : > { %v849_v9 = vadd.f32 %v806_v33, %v639_v63  ;;  %v851_v12 = vadd.f32 %v807_v44, %v641_v57  ;;  %v810_v5 = vsel %vm16212_vm1, %v16384_v46, %v16386_v4  ;;  %v811_v10 = vsel %vm16212_vm1, %v16388_v14, %v16387_v0  ;;  %v16395_v43 = vld [vmem:[#allocation27_spill] sm:$0xff]  ;;  %v16396_v32 = vld [vmem:[#allocation29_spill] sm:$0xff]  ;;  %v16397_v33 = vld [vmem:[#allocation26_spill] sm:$0xff] }
 0x583   : > { %v852_v59 = vadd.f32 %v808_v42, %v642_v47  ;;  %v853_v31 = vadd.f32 %v16383_v45, %v643_v56  ;;  %v856_v18 = vadd.f32 %v16386_v4, %v646_v15  ;;  %v812_v63 = vsel %vm16212_vm1, %v16387_v0, %v16389_v20  ;;  %v16399_v42 = vld [vmem:[#allocation30_spill] sm:$0xff]  ;;  %v16403_v0 = vld [vmem:[#allocation33_spill] sm:$0xff] }
 0x584   : > { %v854_v57 = vadd.f32 %v809_v8, %v644_v28  ;;  %v813_v62 = vsel %vm16212_vm1, %v16391_v21, %v16390_v19  ;;  %v814_v22 = vsel %vm16212_vm1, %v16390_v19, %v16392_v24  ;;  %v1009_v47 = vsel %vm16211_vm2, %v16394_v25, %v16393_v27  ;;  %v16401_v8 = vld [vmem:[#allocation32_spill] sm:$0xff]  ;;  %v16405_v19 = vld [vmem:[#allocation37_spill] sm:$0xff]  ;;  %v16409_v25 = vld [vmem:[#allocation39_spill] sm:$0xff] }
 0x585   : > { %v11540_v7 = vpop.permute.xlu0 %2030  ;;  %v11548_v13 = vpop.permute.xlu1 %2032  ;;  %v855_v56 = vadd.f32 %v810_v5, %v645_v61  ;;  %v857_v23 = vadd.f32 %v811_v10, %v647_v35  ;;  %v859_v15 = vadd.f32 %v16389_v20, %v649_v17  ;;  %v1010_v28 = vsel %vm16211_vm2, %v16393_v27, %v16395_v43  ;;  %v16400_v17 = vld [vmem:[#allocation31_spill] sm:$0xff]  ;;  %v16402_v5 = vld [vmem:[#allocation34_spill] sm:$0xff]  ;;  %v16406_v21 = vld [vmem:[#allocation36_spill] sm:$0xff] }
 0x586   : > { %v858_v30 = vadd.f32 %v812_v63, %v648_v16  ;;  %v862_v50 = vadd.f32 %v16392_v24, %v652_v51  ;;  %v1011_v39 = vsel %vm16211_vm2, %v16397_v33, %v16396_v32  ;;  %v1012_v44 = vsel %vm16211_vm2, %v16396_v32, %v16398_v1  ;;  %v16404_v20 = vld [vmem:[#allocation35_spill] sm:$0xff]  ;;  %v16407_v24 = vld [vmem:[#allocation38_spill] sm:$0xff] }
 0x587   : > { %v860_v45 = vadd.f32 %v813_v62, %v650_v54  ;;  %v861_v61 = vadd.f32 %v814_v22, %v651_v48  ;;  %v1049_v35 = vadd.f32 %v1009_v47, %v839_v60  ;;  %v1013_v46 = vsel %vm16211_vm2, %v16400_v17, %v16399_v42  ;;  %v16412_v32 = vld [vmem:[#allocation42_spill] sm:$0xff] }
 0x588   : > { %v1050_v16 = vadd.f32 %v1010_v28, %v840_v53  ;;  %v1051_v51 = vadd.f32 %v16395_v43, %v841_v36  ;;  %v1014_v4 = vsel %vm16211_vm2, %v16399_v42, %v16401_v8  ;;  %v1015_v14 = vsel %vm16211_vm2, %v16403_v0, %v16402_v5  ;;  %v16411_v28 = vld [vmem:[#allocation43_spill] sm:$0xff]  ;;  %v16414_v17 = vld [vmem:[#allocation46_spill] sm:$0xff] }
 0x589   : > { %v11578_v58 = vpop.permute.xlu0 %2034  ;;  %v11587_v54 = vpop.permute.xlu1 %2036  ;;  %v1054_v48 = vadd.f32 %v16398_v1, %v844_v26  ;;  %v1052_v60 = vadd.f32 %v1011_v39, %v842_v29  ;;  %v1053_v10 = vadd.f32 %v1012_v44, %v843_v2  ;;  %v1016_v53 = vsel %vm16211_vm2, %v16402_v5, %v16404_v20  ;;  %v16408_v2 = vld [vmem:[#allocation40_spill] sm:$0xff] }
 0x58a   : > { %v1055_v63 = vadd.f32 %v1013_v46, %v845_v40  ;;  %v1057_v36 = vadd.f32 %v16401_v8, %v847_v41  ;;  %v1017_v62 = vsel %vm16211_vm2, %v16406_v21, %v16405_v19  ;;  %v1018_v22 = vsel %vm16211_vm2, %v16405_v19, %v16407_v24  ;;  %v16410_v40 = vld [vmem:[#allocation41_spill] sm:$0xff]  ;;  %v16420_v21 = vld [vmem:[#allocation52_spill] sm:$0xff] }
 0x58b   : > { %v1056_v27 = vadd.f32 %v1014_v4, %v846_v3  ;;  %v1060_v26 = vadd.f32 %v16404_v20, %v850_v6  ;;  %v1058_v29 = vadd.f32 %v1015_v14, %v848_v38  ;;  %v1019_v47 = vsel %vm16211_vm2, %v16409_v25, %v16408_v2  ;;  %v16413_v6 = vld [vmem:[#allocation44_spill] sm:$0xff]  ;;  %v16415_v46 = vld [vmem:[#allocation45_spill] sm:$0xff]  ;;  %v16416_v4 = vld [vmem:[#allocation47_spill] sm:$0xff] }
 0x58c   : > { %v1059_v43 = vadd.f32 %v1016_v53, %v849_v9  ;;  %v1020_v41 = vsel %vm16211_vm2, %v16408_v2, %v16410_v40  ;;  %v1021_v33 = vsel %vm16211_vm2, %v16412_v32, %v16411_v28  ;;  %v1061_v39 = vadd.f32 %v1017_v62, %v851_v12  ;;  %v16417_v14 = vld [vmem:[#allocation49_spill] sm:$0xff]  ;;  %v16418_v20 = vld [vmem:[#allocation48_spill] sm:$0xff]  ;;  %v16421_v62 = vld [vmem:[#allocation51_spill] sm:$0xff] }
 0x58d   : > { %v1062_v1 = vadd.f32 %v1018_v22, %v852_v59  ;;  %v1063_v3 = vadd.f32 %v16407_v24, %v853_v31  ;;  %v1022_v38 = vsel %vm16211_vm2, %v16411_v28, %v16413_v6  ;;  %v11614_v44 = vpop.permute.xlu0 %2038  ;;  %v1066_v9 = vadd.f32 %v16410_v40, %v856_v18  ;;  %v11623_v59 = vpop.permute.xlu1 %2040  ;;  %v16422_v22 = vld [vmem:[#allocation53_spill] sm:$0xff]  ;;  %v16423_v25 = vld [vmem:[#allocation55_spill] sm:$0xff]  ;;  %v16425_v28 = vld [vmem:[#allocation56_spill] sm:$0xff] }
 0x58e   : > { %v1064_v42 = vadd.f32 %v1019_v47, %v854_v57  ;;  %v1023_v8 = vsel %vm16211_vm2, %v16415_v46, %v16414_v17  ;;  %v1024_v12 = vsel %vm16211_vm2, %v16414_v17, %v16416_v4  ;;  %v1065_v31 = vadd.f32 %v1020_v41, %v855_v56  ;;  %v16419_v57 = vld [vmem:[#allocation50_spill] sm:$0xff] }
 0x58f   : > { %v1067_v5 = vadd.f32 %v1021_v33, %v857_v23  ;;  %v1069_v0 = vadd.f32 %v16413_v6, %v859_v15  ;;  %v1219_v53 = vsel %vm16210_vm3, %v16418_v20, %v16417_v14  ;;  %v1068_v18 = vadd.f32 %v1022_v38, %v858_v30  ;;  %v16424_v47 = vld [vmem:[#allocation54_spill] sm:$0xff]  ;;  %v16427_v6 = vld [vmem:[#allocation57_spill] sm:$0xff] }
 0x590   : > { %v1220_v19 = vsel %vm16210_vm3, %v16417_v14, %v16419_v57  ;;  %v1221_v24 = vsel %vm16210_vm3, %v16421_v62, %v16420_v21  ;;  %v1222_v56 = vsel %vm16210_vm3, %v16420_v21, %v16422_v22  ;;  %v1072_v23 = vadd.f32 %v16416_v4, %v862_v50  ;;  %v16426_v33 = vld [vmem:[#allocation58_spill] sm:$0xff]  ;;  %v16428_v4 = vld [vmem:[#allocation59_spill] sm:$0xff]  ;;  %v16430_v14 = vld [vmem:[#allocation60_spill] sm:$0xff] }
 0x591   : > { %v1070_v15 = vadd.f32 %v1023_v8, %v860_v45  ;;  %v1071_v2 = vadd.f32 %v1024_v12, %v861_v61  ;;  %v1223_v30 = vsel %vm16210_vm3, %v16424_v47, %v16423_v25  ;;  %v1259_v40 = vadd.f32 %v1219_v53, %v1049_v35  ;;  %v11650_v46 = vpop.permute.xlu0 %2042  ;;  %v16429_v12 = vld [vmem:[#allocation61_spill] sm:$0xff]  ;;  %v11659_v53 = vpop.permute.xlu1 %2044 }
 0x592   : > { %v1261_v41 = vadd.f32 %v16419_v57, %v1051_v51  ;;  %v1224_v32 = vsel %vm16210_vm3, %v16423_v25, %v16425_v28  ;;  %v1225_v38 = vsel %vm16210_vm3, %v16427_v6, %v16426_v33  ;;  %v1260_v17 = vadd.f32 %v1220_v19, %v1050_v16  ;;  %v16432_v57 = vld [vmem:[#allocation64_spill] sm:$0xff]  ;;  %v16434_v21 = vld [vmem:[#allocation65_spill] sm:$0xff] }
 0x593   : > { %v1264_v50 = vadd.f32 %v16422_v22, %v1054_v48  ;;  %v1262_v45 = vadd.f32 %v1221_v24, %v1052_v60  ;;  %v1263_v61 = vadd.f32 %v1222_v56, %v1053_v10  ;;  %v1265_v8 = vadd.f32 %v1223_v30, %v1055_v63  ;;  %v16431_v10 = vld [vmem:[#allocation62_spill] sm:$0xff]  ;;  %v16435_v24 = vld [vmem:[#allocation67_spill] sm:$0xff]  ;;  %v16437_v25 = vld [vmem:[#allocation68_spill] sm:$0xff] }
 0x594   : > { %v1267_v35 = vadd.f32 %v16425_v28, %v1057_v36  ;;  %v1226_v51 = vsel %vm16210_vm3, %v16426_v33, %v16428_v4  ;;  %v1227_v20 = vsel %vm16210_vm3, %v16430_v14, %v16429_v12  ;;  %v1266_v16 = vadd.f32 %v1224_v32, %v1056_v27  ;;  %v16433_v36 = vld [vmem:[#allocation63_spill] sm:$0xff]  ;;  %v16436_v22 = vld [vmem:[#allocation66_spill] sm:$0xff]  ;;  %v16439_v33 = vld [vmem:[#allocation69_spill] sm:$0xff] }
 0x595   : > { %v1270_v48 = vadd.f32 %v16428_v4, %v1060_v26  ;;  %v1268_v60 = vadd.f32 %v1225_v38, %v1058_v29  ;;  %v1228_v63 = vsel %vm16210_vm3, %v16429_v12, %v16431_v10  ;;  %v1229_v19 = vsel %vm16210_vm3, %v16433_v36, %v16432_v57  ;;  %v16438_v32 = vld [vmem:[#allocation70_spill] sm:$0xff]  ;;  %v16440_v38 = vld [vmem:[#allocation71_spill] sm:$0xff]  ;;  %v16448_v36 = vld [vmem:[#allocation77_spill] sm:$0xff] }
 0x596   : > { %v1230_v62 = vsel %vm16210_vm3, %v16432_v57, %v16434_v21  ;;  %v1231_v56 = vsel %vm16210_vm3, %v16436_v22, %v16435_v24  ;;  %v1269_v27 = vadd.f32 %v1226_v51, %v1059_v43  ;;  %v1271_v26 = vadd.f32 %v1227_v20, %v1061_v39  ;;  %v16442_v51 = vld [vmem:[#allocation73_spill] sm:$0xff]  ;;  %v16452_v22 = vld [vmem:[#allocation79_spill] sm:$0xff] }
 0x597   : > { %v1273_v29 = vadd.f32 %v16431_v10, %v1063_v3  ;;  %v1232_v47 = vsel %vm16210_vm3, %v16435_v24, %v16437_v25  ;;  %v1272_v30 = vadd.f32 %v1228_v63, %v1062_v1  ;;  %v1276_v28 = vadd.f32 %v16434_v21, %v1066_v9  ;;  %v16441_v3 = vld [vmem:[#allocation72_spill] sm:$0xff]  ;;  %v11692_v1 = vpop.permute.xlu0 %2046  ;;  %v16445_v63 = vld [vmem:[#allocation75_spill] sm:$0xff]  ;;  %v16451_v24 = vld [vmem:[#allocation78_spill] sm:$0xff] }
 0x598   : > { %v1233_v6 = vsel %vm16210_vm3, %v16439_v33, %v16438_v32  ;;  %v1234_v4 = vsel %vm16210_vm3, %v16438_v32, %v16440_v38  ;;  %v1274_v12 = vadd.f32 %v1229_v19, %v1064_v42  ;;  %v11685_v43 = vadd.f32 %v1230_v62, %v1065_v31  ;;  %16443 = vst [vmem:[#allocation7_spill] sm:$0xff] %v11692_v1  ;;  %v11705_v31 = vpop.permute.xlu1 %2048  ;;  %v16449_v19 = vld [vmem:[#allocation74_spill] sm:$0xff]  ;;  %v16450_v21 = vld [vmem:[#allocation76_spill] sm:$0xff]  ;;  %v16455_v33 = vld [vmem:[#allocation81_spill] sm:$0xff] }
 0x599   : > { %v11687_v39 = vadd.f32 %v1231_v56, %v1067_v5  ;;  %v1429_v14 = vsel %vm16209_vm4, %v16442_v51, %v16441_v3  ;;  %v11694_v9 = vadd.f32 %v1232_v47, %v1068_v18  ;;  %v11697_v20 = vadd.f32 %v16437_v25, %v1069_v0  ;;  %16446 = vst [vmem:[#allocation10_spill] sm:$0xff] %v11705_v31  ;;  %v16453_v25 = vld [vmem:[#allocation80_spill] sm:$0xff]  ;;  %v16454_v32 = vld [vmem:[#allocation82_spill] sm:$0xff] }
 0x59a   : > { %v11700_v10 = vadd.f32 %v16440_v38, %v1072_v23  ;;  %v1430_v42 = vsel %vm16209_vm4, %v16441_v3, %v16445_v63  ;;  %v11707_v5 = vadd.f32 %v1233_v6, %v1070_v15  ;;  %v11709_v57 = vadd.f32 %v1234_v4, %v1071_v2  ;;  %v16456_v38 = vld [vmem:[#allocation83_spill] sm:$0xff]  ;;  %v16457_v3 = vld [vmem:[#allocation85_spill] sm:$0xff]  ;;  %v16458_v51 = vld [vmem:[#allocation84_spill] sm:$0xff] }
 0x59b   : > { %v1431_v18 = vsel %vm16209_vm4, %v16449_v19, %v16448_v36  ;;  %v1432_v0 = vsel %vm16209_vm4, %v16448_v36, %v16450_v21  ;;  %v1469_v23 = vadd.f32 %v1429_v14, %v1259_v40  ;;  %v1471_v62 = vadd.f32 %v16445_v63, %v1261_v41  ;;  %v11742_v19 = vpop.permute.xlu0 %2050 }
 0x59c   : > { %16444 = vst [vmem:[#allocation8_spill] sm:$0xff] %v11700_v10  ;;  %16447 = vst [vmem:[#allocation9_spill] sm:$0xff] %v11709_v57  ;;  %v1433_v56 = vsel %vm16209_vm4, %v16452_v22, %v16451_v24  ;;  %v1434_v15 = vsel %vm16209_vm4, %v16451_v24, %v16453_v25  ;;  %v1470_v2 = vadd.f32 %v1430_v42, %v1260_v17  ;;  %v16464_v24 = vld [vmem:[#allocation97_spill] sm:$0xff]  ;;  %v16465_v22 = vld [vmem:[#allocation96_spill] sm:$0xff] }
 0x59d   : > { %v1474_v47 = vadd.f32 %v16450_v21, %v1264_v50  ;;  %v1435_v6 = vsel %vm16209_vm4, %v16455_v33, %v16454_v32  ;;  %v1436_v40 = vsel %vm16209_vm4, %v16454_v32, %v16456_v38  ;;  %v1472_v41 = vadd.f32 %v1431_v18, %v1262_v45  ;;  %v16459_v50 = vld [vmem:[#allocation86_spill] sm:$0xff]  ;;  %16460 = vst [vmem:[#allocation11_spill] sm:$0xff] %v11742_v19  ;;  %v16463_v21 = vld [vmem:[#allocation87_spill] sm:$0xff]  ;;  %v16468_v33 = vld [vmem:[#allocation100_spill] sm:$0xff] }
 0x59e   : > { %v1473_v4 = vadd.f32 %v1432_v0, %v1263_v61  ;;  %v1437_v14 = vsel %vm16209_vm4, %v16458_v51, %v16457_v3  ;;  %v1475_v63 = vadd.f32 %v1433_v56, %v1265_v8  ;;  %v11734_v36 = vadd.f32 %v1434_v15, %v1266_v16  ;;  %v11751_v8 = vpop.permute.xlu1 %2052  ;;  %v16467_v15 = vld [vmem:[#allocation89_spill] sm:$0xff]  ;;  %v16472_v51 = vld [vmem:[#allocation123_spill] sm:$0xff]  ;;  %v16478_v57 = vld [vmem:[#allocation146_spill] sm:$0xff] }
 0x59f   : > { %v11737_v17 = vadd.f32 %v16453_v25, %v1267_v35  ;;  %v1438_v42 = vsel %vm16209_vm4, %v16457_v3, %v16459_v50  ;;  %v11745_v45 = vadd.f32 %v16456_v38, %v1270_v48  ;;  %v11747_v61 = vadd.f32 %v1435_v6, %v1268_v60  ;;  %16461 = vst [vmem:[#allocation13_spill] sm:$0xff] %v11751_v8  ;;  %v16462_v35 = vld [vmem:[#allocation88_spill] sm:$0xff]  ;;  %v16466_v25 = vld [vmem:[#allocation98_spill] sm:$0xff]  ;;  %v16469_v6 = vld [vmem:[#allocation99_spill] sm:$0xff] }
 0x5a0   : > { %v11749_v18 = vadd.f32 %v1436_v40, %v1269_v27  ;;  %v11753_v16 = vadd.f32 %v1437_v14, %v1271_v26  ;;  %v1439_v0 = vsel %vm16209_vm4, %v16463_v21, %v16462_v35  ;;  %v1639_v56 = vsel %vm16188_vm5, %v16465_v22, %v16464_v24  ;;  %v16470_v40 = vld [vmem:[#allocation120_spill] sm:$0xff]  ;;  %v16471_v3 = vld [vmem:[#allocation121_spill] sm:$0xff]  ;;  %v16475_v22 = vld [vmem:[#allocation122_spill] sm:$0xff] }
 0x5a1   : > { %v1640_v48 = vsel %vm16188_vm5, %v16464_v24, %v16466_v25  ;;  %v11764_v60 = vadd.f32 %v1438_v42, %v1272_v30  ;;  %v11767_v27 = vadd.f32 %v16459_v50, %v1273_v29  ;;  %v11770_v26 = vadd.f32 %v16467_v15, %v1276_v28  ;;  %v16473_v21 = vld [vmem:[#allocation101_spill] sm:$0xff] }
 0x5a2   : > { %v1440_v32 = vsel %vm16209_vm4, %v16462_v35, %v16467_v15  ;;  %v1641_v38 = vsel %vm16188_vm5, %v16469_v6, %v16468_v33  ;;  %v1849_v30 = vsel %vm16187_vm6, %v16471_v3, %v16470_v40  ;;  %v1850_v29 = vsel %vm16187_vm6, %v16470_v40, %v16472_v51  ;;  %v16474_v24 = vld [vmem:[#allocation125_spill] sm:$0xff]  ;;  %v16477_v3 = vld [vmem:[#allocation144_spill] sm:$0xff]  ;;  %v16483_v40 = vld [vmem:[#allocation91_spill] sm:$0xff] }
 0x5a3   : > { %v11784_v14 = vadd.f32 %v1439_v0, %v1274_v12  ;;  %v1679_v28 = vadd.f32 %v1639_v56, %v1469_v23  ;;  %v1680_v50 = vadd.f32 %v1640_v48, %v1470_v2  ;;  %v1681_v42 = vadd.f32 %v16466_v25, %v1471_v62  ;;  %v16476_v6 = vld [vmem:[#allocation145_spill] sm:$0xff]  ;;  %v11799_v23 = vpop.permute.xlu0 %2054  ;;  %v16480_v62 = vld [vmem:[#allocation103_spill] sm:$0xff]  ;;  %v16481_v0 = vld [vmem:[#allocation102_spill] sm:$0xff] }
 0x5a4   : > { %v1642_v35 = vsel %vm16188_vm5, %v16468_v33, %v16473_v21  ;;  %v1851_v15 = vsel %vm16187_vm6, %v16475_v22, %v16474_v24  ;;  %v2059_v8 = vsel %vm16186_vm7, %v16477_v3, %v16476_v6  ;;  %v2060_v12 = vsel %vm16186_vm7, %v16476_v6, %v16478_v57  ;;  %16479 = vst [vmem:[#allocation12_spill] sm:$0xff] %v11799_v23  ;;  %v11804_v33 = vpop.permute.xlu1 %2056  ;;  %v16484_v22 = vld [vmem:[#allocation90_spill] sm:$0xff]  ;;  %v16485_v6 = vld [vmem:[#allocation147_spill] sm:$0xff]  ;;  %v16487_v23 = vld [vmem:[#allocation104_spill] sm:$0xff] }
 0x5a5   : > { %v1682_v2 = vadd.f32 %v1641_v38, %v1472_v41  ;;  %v1643_v56 = vsel %vm16188_vm5, %v16481_v0, %v16480_v62  ;;  %v1889_v25 = vadd.f32 %v1849_v30, %v1679_v28  ;;  %v1890_v48 = vadd.f32 %v1850_v29, %v1680_v50  ;;  %16482 = vst [vmem:[#allocation14_spill] sm:$0xff] %v11804_v33  ;;  %v16486_v38 = vld [vmem:[#allocation124_spill] sm:$0xff] }
 0x5a6   : > { %v1441_v10 = vsel %vm16209_vm4, %v16484_v22, %v16483_v40  ;;  %v1684_v3 = vadd.f32 %v16473_v21, %v1474_v47  ;;  %v1891_v19 = vadd.f32 %v16472_v51, %v1681_v42  ;;  %v2061_v41 = vsel %vm16186_vm7, %v16485_v6, %v11458_v37 }
 0x5a7   : > { %v1852_v0 = vsel %vm16187_vm6, %v16474_v24, %v16486_v38  ;;  %v1892_v30 = vadd.f32 %v1851_v15, %v1682_v2  ;;  %v2099_v29 = vadd.f32 %v2059_v8, %v1889_v25  ;;  %v2100_v28 = vadd.f32 %v2060_v12, %v1890_v48  ;;  %v16488_v8 = vld [vmem:[#allocation126_spill] sm:$0xff]  ;;  %v16489_v15 = vld [vmem:[#allocation127_spill] sm:$0xff] }
 0x5a8   : > { %v1683_v50 = vadd.f32 %v1642_v35, %v1473_v4  ;;  %v1685_v33 = vadd.f32 %v1643_v56, %v1475_v63  ;;  %v1644_v22 = vsel %vm16188_vm5, %v16480_v62, %v16487_v23  ;;  %v1894_v47 = vadd.f32 %v16486_v38, %v1684_v3  ;;  %v16490_v63 = vld [vmem:[#allocation128_spill] sm:$0xff]  ;;  %v16491_v3 = vld [vmem:[#allocation106_spill] sm:$0xff] }
 0x5a9   : > { %v2101_v42 = vadd.f32 %v16478_v57, %v1891_v19  ;;  %v2102_v21 = vadd.f32 %v2061_v41, %v1892_v30  ;;  %v1853_v4 = vsel %vm16187_vm6, %v16489_v15, %v16488_v8  ;;  %v1854_v35 = vsel %vm16187_vm6, %v16488_v8, %v16490_v63  ;;  %v16492_v41 = vld [vmem:[#allocation105_spill] sm:$0xff] }
 0x5aa   : > { %v1893_v24 = vadd.f32 %v1852_v0, %v1683_v50  ;;  %v2062_v12 = vsel %vm16186_vm7, %v11458_v37, %v11466_v49  ;;  %v11842_v56 = vadd.f32 %v1440_v32, %v11685_v43  ;;  %v11845_v25 = vadd.f32 %v1441_v10, %v11687_v39  ;;  %v16493_v39 = vld [vmem:[#allocation130_spill] sm:$0xff]  ;;  %v16494_v10 = vld [vmem:[#allocation129_spill] sm:$0xff] }
 0x5ab   : > { %v1686_v48 = vadd.f32 %v1644_v22, %v11734_v36  ;;  %v1645_v37 = vsel %vm16188_vm5, %v16492_v41, %v16491_v3  ;;  %v1895_v38 = vadd.f32 %v1853_v4, %v1685_v33  ;;  %v2104_v0 = vadd.f32 %v11466_v49, %v1894_v47  ;;  %v16495_v47 = vld [vmem:[#allocation107_spill] sm:$0xff]  ;;  %v16499_v41 = vld [vmem:[#allocation92_spill] sm:$0xff] }
 0x5ac   : > { %v2103_v30 = vadd.f32 %v2062_v12, %v1893_v24  ;;  %v1855_v36 = vsel %vm16187_vm6, %v16494_v10, %v16493_v39  ;;  %v2063_v32 = vsel %vm16186_vm7, %v11485_v11, %v11492_v55  ;;  %v2064_v49 = vsel %vm16186_vm7, %v11492_v55, %v11511_v34 }
 0x5ad   : > { %v1896_v43 = vadd.f32 %v1854_v35, %v1686_v48  ;;  %v1687_v22 = vadd.f32 %v16487_v23, %v11737_v17  ;;  %v1646_v11 = vsel %vm16188_vm5, %v16491_v3, %v16495_v47  ;;  %v1688_v55 = vadd.f32 %v1645_v37, %v11747_v61 }
 0x5ae   : > { %v2134_v51 = vpop.permute.xlu0 %2133  ;;  %v2139_v6 = vpop.permute.xlu1 %2138  ;;  %v2105_v8 = vadd.f32 %v2063_v32, %v1895_v38  ;;  %v2065_v4 = vsel %vm16186_vm7, %v11519_v52, %v11540_v7  ;;  %v1689_v37 = vadd.f32 %v1646_v11, %v11749_v18  ;;  %v16503_v32 = vld [vmem:[#allocation134_spill] sm:$0xff] }
 0x5af   : > { %v11822_v1 = vadd.f32 %v2134_v51, %v2099_v29  ;;  %v11824_v31 = vadd.f32 %v2134_v51, %v2100_v28  ;;  %v11835_v57 = vadd.f32 %v2139_v6, %v2102_v21  ;;  %v11837_v19 = vadd.f32 %v2134_v51, %v2101_v42  ;;  %v16496_v21 = vld [vmem:[#allocation109_spill] sm:$0xff] }
 0x5b0   : > { %v11867_v33 = vadd.f32 %v2139_v6, %v2103_v30  ;;  %v11869_v29 = vadd.f32 %v2139_v6, %v2104_v0  ;;  %v1690_v51 = vadd.f32 %v16495_v47, %v11745_v45  ;;  %v16497_v6 = vld [vmem:[#allocation108_spill] sm:$0xff]  ;;  %v2106_v15 = vadd.f32 %v2064_v49, %v1896_v43  ;;  %v16498_v45 = vld [vmem:[#allocation131_spill] sm:$0xff]  ;;  %v16500_v0 = vld [vmem:[#allocation110_spill] sm:$0xff] }
 0x5b1   : > { %v2195_v2 = vmax.f32 %v11822_v1, 0.0  ;;  %v2196_v62 = vmax.f32 %v11824_v31, 0.0  ;;  %v2198_v28 = vmax.f32 %v11835_v57, 0.0  ;;  %v2197_v50 = vmax.f32 %v11837_v19, 0.0 }
 0x5b2   : > { %v2144_v42 = vpop.permute.xlu0 %2143  ;;  %v1647_v24 = vsel %vm16188_vm5, %v16497_v6, %v16496_v21  ;;  %v1897_v17 = vadd.f32 %v16490_v63, %v1687_v22  ;;  %v1856_v61 = vsel %vm16187_vm6, %v16493_v39, %v16498_v45  ;;  %v1898_v23 = vadd.f32 %v1855_v36, %v1688_v55  ;;  %v2149_v30 = vpop.permute.xlu1 %2148 }
 0x5b3   : > { %2245 = vrot.lane.b32.xlu1 %v2196_v62, %s16154_s24  ;;  %2243 = vrot.lane.b32.xlu0 %v2195_v2, %s16154_s24  ;;  %v2199_v35 = vmax.f32 %v11867_v33, 0.0  ;;  %v2200_v12 = vmax.f32 %v11869_v29, 0.0  ;;  %v11899_v48 = vadd.f32 %v2144_v42, %v2105_v8  ;;  %v11901_v3 = vadd.f32 %v2144_v42, %v2106_v15  ;;  %v16505_v8 = vld [vmem:[#allocation111_spill] sm:$0xff] }
 0x5b4   : > { %v1442_v63 = vsel %vm16209_vm4, %v16483_v40, %v16499_v41  ;;  %v1691_v38 = vadd.f32 %v1647_v24, %v11753_v16  ;;  %v1648_v52 = vsel %vm16188_vm5, %v16496_v21, %v16500_v0  ;;  %v1900_v43 = vadd.f32 %v16498_v45, %v1690_v51  ;;  %v16501_v16 = vld [vmem:[#allocation133_spill] sm:$0xff]  ;;  %v16502_v40 = vld [vmem:[#allocation132_spill] sm:$0xff]  ;;  %v16507_v45 = vld [vmem:[#allocation135_spill] sm:$0xff] }
 0x5b5   : > { %v2107_v39 = vadd.f32 %v11511_v34, %v1897_v17  ;;  %v2108_v10 = vadd.f32 %v2065_v4, %v1898_v23  ;;  %v1899_v18 = vadd.f32 %v1856_v61, %v1689_v37  ;;  %v1857_v36 = vsel %vm16187_vm6, %v16502_v40, %v16501_v16  ;;  %v16504_v24 = vld [vmem:[#allocation112_spill] sm:$0xff] }
 0x5b6   : > { %v1858_v49 = vsel %vm16187_vm6, %v16501_v16, %v16503_v32  ;;  %v2066_v34 = vsel %vm16186_vm7, %v11540_v7, %v11548_v13  ;;  %v2201_v51 = vmax.f32 %v11899_v48, 0.0  ;;  %v2202_v11 = vmax.f32 %v11901_v3, 0.0 }
 0x5b7   : > { %2249 = vrot.lane.b32.xlu1 %v2198_v28, %s16154_s24  ;;  %2247 = vrot.lane.b32.xlu0 %v2197_v50, %s16154_s24  ;;  %v11928_v22 = vadd.f32 %v2149_v30, %v2108_v10  ;;  %v11930_v47 = vadd.f32 %v2144_v42, %v2107_v39  ;;  %v1488_v55 = vadd.f32 %v1442_v63, %v11694_v9  ;;  %v16509_v39 = vld [vmem:[#allocation115_spill] sm:$0xff] }
 0x5b8   : > { %v11937_v21 = vadd.f32 %v16499_v41, %v11697_v20  ;;  %v1692_v6 = vadd.f32 %v1648_v52, %v11764_v60  ;;  %v1649_v7 = vsel %vm16188_vm5, %v16505_v8, %v16504_v24  ;;  %v1901_v15 = vadd.f32 %v1857_v36, %v1691_v38  ;;  %v16506_v20 = vld [vmem:[#allocation136_spill] sm:$0xff]  ;;  %v16508_v38 = vld [vmem:[#allocation113_spill] sm:$0xff] }
 0x5b9   : > { %v2110_v42 = vadd.f32 %v11548_v13, %v1900_v43  ;;  %v2109_v17 = vadd.f32 %v2066_v34, %v1899_v18  ;;  %v1859_v60 = vsel %vm16187_vm6, %v16507_v45, %v16506_v20  ;;  %v2067_v61 = vsel %vm16186_vm7, %v11578_v58, %v11587_v54  ;;  %v2154_v43 = vpop.permute.xlu0 %2153  ;;  %v16513_v8 = vld [vmem:[#allocation93_spill] sm:$0xff] }
 0x5ba   : > { %v1902_v9 = vadd.f32 %v1858_v49, %v1692_v6  ;;  %v2068_v13 = vsel %vm16186_vm7, %v11587_v54, %v11614_v44  ;;  %v2204_v41 = vmax.f32 %v11928_v22, 0.0  ;;  %v2203_v63 = vmax.f32 %v11930_v47, 0.0 }
 0x5bb   : > { %2253 = vrot.lane.b32.xlu1 %v2200_v12, %s16154_s24  ;;  %2251 = vrot.lane.b32.xlu0 %v2199_v35, %s16154_s24  ;;  %v11959_v23 = vadd.f32 %v2149_v30, %v2109_v17  ;;  %v11961_v4 = vadd.f32 %v2149_v30, %v2110_v42  ;;  %v1693_v37 = vadd.f32 %v16500_v0, %v11767_v27  ;;  %v16510_v30 = vld [vmem:[#allocation114_spill] sm:$0xff]  ;;  %v16514_v42 = vld [vmem:[#allocation116_spill] sm:$0xff]  ;;  %v2159_v17 = vpop.permute.xlu1 %2158 }
 0x5bc   : > { %v1696_v52 = vadd.f32 %v16508_v38, %v11770_v26  ;;  %v1650_v58 = vsel %vm16188_vm5, %v16504_v24, %v16508_v38  ;;  %v1694_v54 = vadd.f32 %v1649_v7, %v11784_v14  ;;  %v1651_v10 = vsel %vm16188_vm5, %v16510_v30, %v16509_v39  ;;  %v16511_v26 = vld [vmem:[#allocation137_spill] sm:$0xff]  ;;  %v16512_v24 = vld [vmem:[#allocation94_spill] sm:$0xff] }
 0x5bd   : > { %v2111_v18 = vadd.f32 %v2067_v61, %v1901_v15  ;;  %v2112_v16 = vadd.f32 %v2068_v13, %v1902_v9  ;;  %v1903_v27 = vadd.f32 %v16503_v32, %v1693_v37  ;;  %v1860_v14 = vsel %vm16187_vm6, %v16506_v20, %v16511_v26  ;;  %v16517_v13 = vld [vmem:[#allocation140_spill] sm:$0xff] }
 0x5be   : > { %v1904_v0 = vadd.f32 %v1859_v60, %v1694_v54  ;;  %v2069_v40 = vsel %vm16186_vm7, %v11623_v59, %v11650_v46  ;;  %v2205_v36 = vmax.f32 %v11959_v23, 0.0  ;;  %v2206_v49 = vmax.f32 %v11961_v4, 0.0  ;;  %v16516_v60 = vld [vmem:[#allocation138_spill] sm:$0xff] }
 0x5bf   : > { %2257 = vrot.lane.b32.xlu1 %v2202_v11, %s16154_s24  ;;  %2255 = vrot.lane.b32.xlu0 %v2201_v51, %s16154_s24  ;;  %v11991_v34 = vadd.f32 %v2154_v43, %v2111_v18  ;;  %v11993_v6 = vadd.f32 %v2154_v43, %v2112_v16  ;;  %v1443_v32 = vsel %vm16209_vm4, %v16513_v8, %v16512_v24  ;;  %v16519_v16 = vld [vmem:[#allocation118_spill] sm:$0xff]  ;;  %v16524_v8 = vld [vmem:[#allocation7_spill] sm:$0xff] }
 0x5c0   : > { %v1695_v7 = vadd.f32 %v1650_v58, %v11842_v56  ;;  %v1697_v15 = vadd.f32 %v1651_v10, %v11845_v25  ;;  %v1652_v59 = vsel %vm16188_vm5, %v16509_v39, %v16514_v42  ;;  %v1906_v9 = vadd.f32 %v16511_v26, %v1696_v52  ;;  %v16515_v25 = vld [vmem:[#allocation139_spill] sm:$0xff] }
 0x5c1   : > { %v2113_v20 = vadd.f32 %v11614_v44, %v1903_v27  ;;  %v2114_v45 = vadd.f32 %v2069_v40, %v1904_v0  ;;  %v1861_v61 = vsel %vm16187_vm6, %v16516_v60, %v16515_v25  ;;  %v1862_v37 = vsel %vm16187_vm6, %v16515_v25, %v16517_v13  ;;  %v16518_v39 = vld [vmem:[#allocation95_spill] sm:$0xff]  ;;  %v16520_v27 = vld [vmem:[#allocation117_spill] sm:$0xff]  ;;  %v16521_v40 = vld [vmem:[#allocation142_spill] sm:$0xff] }
 0x5c2   : > { %v1905_v56 = vadd.f32 %v1860_v14, %v1695_v7  ;;  %v2070_v44 = vsel %vm16186_vm7, %v11650_v46, %v11659_v53  ;;  %v2207_v58 = vmax.f32 %v11991_v34, 0.0  ;;  %v2208_v54 = vmax.f32 %v11993_v6, 0.0  ;;  %v16525_v7 = vld [vmem:[#allocation11_spill] sm:$0xff]  ;;  %v16527_v25 = vld [vmem:[#allocation9_spill] sm:$0xff] }
 0x5c3   : > { %2261 = vrot.lane.b32.xlu1 %v2204_v41, %s16154_s24  ;;  %2259 = vrot.lane.b32.xlu0 %v2203_v63, %s16154_s24  ;;  %v12020_v38 = vadd.f32 %v2159_v17, %v2114_v45  ;;  %v12022_v52 = vadd.f32 %v2154_v43, %v2113_v20  ;;  %v1444_v30 = vsel %vm16209_vm4, %v16512_v24, %v16518_v39  ;;  %v16523_v24 = vld [vmem:[#allocation10_spill] sm:$0xff]  ;;  %v16526_v45 = vld [vmem:[#allocation8_spill] sm:$0xff]  ;;  %vm6827_vm4 = vcmask 999264  }
 0x5c4   : > { %v1490_v10 = vadd.f32 %v1443_v32, %v11707_v5  ;;  %v1698_v18 = vadd.f32 %v1652_v59, %v1488_v55  ;;  %v1653_v26 = vsel %vm16188_vm5, %v16520_v27, %v16519_v16  ;;  %v1907_v46 = vadd.f32 %v1861_v61, %v1697_v15  ;;  %v16522_v5 = vld [vmem:[#allocation141_spill] sm:$0xff] }
 0x5c5   : > { %v2116_v14 = vadd.f32 %v11659_v53, %v1906_v9  ;;  %v2115_v43 = vadd.f32 %v2070_v44, %v1905_v56  ;;  %v1863_v55 = vsel %vm16187_vm6, %v16522_v5, %v16521_v40  ;;  %v2071_v32 = vsel %vm16186_vm7, %v16524_v8, %v16523_v24  ;;  %v2164_v44 = vpop.permute.xlu0 %2163  ;;  %v2169_v8 = vpop.permute.xlu1 %2168 }
 0x5c6   : > { %v1908_v0 = vadd.f32 %v1862_v37, %v1698_v18  ;;  %v2072_v53 = vsel %vm16186_vm7, %v16523_v24, %v16525_v7  ;;  %v2210_v9 = vmax.f32 %v12020_v38, 0.0  ;;  %v2209_v20 = vmax.f32 %v12022_v52, 0.0  ;;  %v16528_v18 = vld [vmem:[#allocation119_spill] sm:$0xff] }
 0x5c7   : > { %2265 = vrot.lane.b32.xlu1 %v2206_v49, %s16154_s24  ;;  %2263 = vrot.lane.b32.xlu0 %v2205_v36, %s16154_s24  ;;  %v12049_v15 = vadd.f32 %v2159_v17, %v2115_v43  ;;  %v12051_v59 = vadd.f32 %v2159_v17, %v2116_v14  ;;  %v1492_v56 = vadd.f32 %v16518_v39, %v16526_v45  ;;  %v16532_v45 = vld [vmem:[#allocation14_spill] sm:$0xff] }
 0x5c8   : > { %v1491_v60 = vadd.f32 %v1444_v30, %v16527_v25  ;;  %v1699_v61 = vadd.f32 %v16514_v42, %v11937_v21  ;;  %v1700_v37 = vadd.f32 %v1653_v26, %v1490_v10  ;;  %v1654_v27 = vsel %vm16188_vm5, %v16519_v16, %v16528_v18  ;;  %v16529_v30 = vld [vmem:[#allocation143_spill] sm:$0xff]  ;;  %v16530_v10 = vld [vmem:[#allocation12_spill] sm:$0xff]  ;;  %v16531_v26 = vld [vmem:[#allocation13_spill] sm:$0xff] }
 0x5c9   : > { %v2117_v17 = vadd.f32 %v2071_v32, %v1907_v46  ;;  %v2118_v14 = vadd.f32 %v2072_v53, %v1908_v0  ;;  %v1864_v21 = vsel %vm16187_vm6, %v16521_v40, %v16529_v30  ;;  %v2073_v16 = vsel %vm16186_vm7, %v16531_v26, %v16530_v10 }
 0x5ca   : > { %v1909_v39 = vadd.f32 %v16517_v13, %v1699_v61  ;;  %v1910_v42 = vadd.f32 %v1863_v55, %v1700_v37  ;;  %v2211_v46 = vmax.f32 %v12049_v15, 0.0  ;;  %v2212_v43 = vmax.f32 %v12051_v59, 0.0 }
 0x5cb   : > { %2269 = vrot.lane.b32.xlu1 %v2208_v54, %s16154_s24  ;;  %2267 = vrot.lane.b32.xlu0 %v2207_v58, %s16154_s24  ;;  %v12078_v0 = vadd.f32 %v2164_v44, %v2117_v17  ;;  %v12080_v5 = vadd.f32 %v2164_v44, %v2118_v14  ;;  %v1702_v24 = vadd.f32 %v16528_v18, %v1492_v56  ;;  %vm4714_vm6 = vcmask 80896  }
 0x5cc   : > { %v1701_v13 = vadd.f32 %v1654_v27, %v1491_v60  ;;  %v2119_v32 = vadd.f32 %v16525_v7, %v1909_v39  ;;  %v2120_v40 = vadd.f32 %v2073_v16, %v1910_v42  ;;  %v2074_v56 = vsel %vm16186_vm7, %v16530_v10, %v16532_v45 }
 0x5cd   : > { %v1912_v55 = vadd.f32 %v16529_v30, %v1702_v24  ;;  %v2213_v7 = vmax.f32 %v12078_v0, 0.0  ;;  %v2214_v61 = vmax.f32 %v12080_v5, 0.0  ;;  %vm4701_vm7 = vcmask 1040264  }
 0x5ce   : > { %v1911_v53 = vadd.f32 %v1864_v21, %v1701_v13  ;;  %v12094_v25 = vadd.f32 %v2169_v8, %v2120_v40  ;;  %v12096_v60 = vadd.f32 %v2164_v44, %v2119_v32 }
 0x5cf   : > { %2273 = vrot.lane.b32.xlu1 %v2210_v9, %s16154_s24  ;;  %2271 = vrot.lane.b32.xlu0 %v2209_v20, %s16154_s24  ;;  %v2122_v37 = vadd.f32 %v16532_v45, %v1912_v55 }
 0x5d0   : > { %v2121_v18 = vadd.f32 %v2074_v56, %v1911_v53  ;;  %v2216_v44 = vmax.f32 %v12094_v25, 0.0  ;;  %v2215_v14 = vmax.f32 %v12096_v60, 0.0  ;;  %v10270_v25 = vmov 0.0  }
 0x5d1   : > { %v12109_v17 = vadd.f32 %v2169_v8, %v2122_v37  ;;  %2491 = vst [vmem:[#allocation2] sm:$0xff] %v10270_v25  ;;  %2492 = vst [vmem:[#allocation2 + $0x8] sm:$0xff] %v10270_v25  ;;  %3258 = vmatprep.mubr.f32.mxu0 %v10270_v25  ;;  %5201 = vmatprep.mubr.f32.mxu1 %v10270_v25 }
 0x5d2   : > { %v12107_v27 = vadd.f32 %v2169_v8, %v2121_v18  ;;  %2495 = vst [vmem:[#allocation2 + $0x18] sm:$0xff] %v10270_v25  ;;  %2496 = vst [vmem:[#allocation2 + $0x20] sm:$0xff] %v10270_v25 }
 0x5d3   : > { %2277 = vrot.lane.b32.xlu1 %v2212_v43, %s16154_s24  ;;  %2275 = vrot.lane.b32.xlu0 %v2211_v46, %s16154_s24  ;;  %v2218_v30 = vmax.f32 %v12109_v17, 0.0  ;;  %2498 = vst [vmem:[#allocation2 + $0x30] sm:$0xff] %v10270_v25  ;;  %2499 = vst [vmem:[#allocation2 + $0x38] sm:$0xff] %v10270_v25 }
 0x5d4   : > { %v2217_v39 = vmax.f32 %v12107_v27, 0.0  ;;  %2501 = vst [vmem:[#allocation2 + $0x48] sm:$0xff] %v10270_v25  ;;  %2502 = vst [vmem:[#allocation2 + $0x50] sm:$0xff] %v10270_v25 }
 0x5d5   : > { %2504 = vst [vmem:[#allocation2 + $0x60] sm:$0xff] %v10270_v25  ;;  %2505 = vst [vmem:[#allocation2 + $0x68] sm:$0xff] %v10270_v25 }
 0x5d6   : > { %2507 = vst [vmem:[#allocation2 + $0x78] sm:$0xff] %v10270_v25  ;;  %2508 = vst [vmem:[#allocation2 + $0x80] sm:$0xff] %v10270_v25 }
 0x5d7   : > { %2281 = vrot.lane.b32.xlu1 %v2214_v61, %s16154_s24  ;;  %2279 = vrot.lane.b32.xlu0 %v2213_v7, %s16154_s24  ;;  %2510 = vst [vmem:[#allocation2 + $0x90] sm:$0xff] %v10270_v25  ;;  %2511 = vst [vmem:[#allocation2 + $0x98] sm:$0xff] %v10270_v25 }
 0x5d8   : > { %2513 = vst [vmem:[#allocation2 + $0xa8] sm:$0xff] %v10270_v25  ;;  %2514 = vst [vmem:[#allocation2 + $0xb0] sm:$0xff] %v10270_v25 }
 0x5d9   : > { %4635 = vst [vmem:[#allocation3] sm:$0xff] %v10270_v25  ;;  %4636 = vst [vmem:[#allocation3 + $0x8] sm:$0xff] %v10270_v25 }
 0x5da   : > { %4637 = vst [vmem:[#allocation3 + $0x10] sm:$0xff] %v10270_v25  ;;  %4638 = vst [vmem:[#allocation3 + $0x18] sm:$0xff] %v10270_v25 }
 0x5db   : > { %2285 = vrot.lane.b32.xlu1 %v2216_v44, %s16154_s24  ;;  %2283 = vrot.lane.b32.xlu0 %v2215_v14, %s16154_s24  ;;  %6399 = vst [vmem:[#allocation4] sm:$0xff] %v10270_v25  ;;  %6400 = vst [vmem:[#allocation4 + $0x8] sm:$0xff] %v10270_v25 }
 0x5dc   : > { %6403 = vst [vmem:[#allocation4 + $0x18] sm:$0xff] %v10270_v25  ;;  %6404 = vst [vmem:[#allocation4 + $0x20] sm:$0xff] %v10270_v25 }
 0x5dd   : > { %6406 = vst [vmem:[#allocation4 + $0x30] sm:$0xff] %v10270_v25  ;;  %6407 = vst [vmem:[#allocation4 + $0x38] sm:$0xff] %v10270_v25 }
 0x5de   : > { %6409 = vst [vmem:[#allocation4 + $0x48] sm:$0xff] %v10270_v25  ;;  %6410 = vst [vmem:[#allocation4 + $0x50] sm:$0xff] %v10270_v25 }
 0x5df   : > { %2289 = vrot.lane.b32.xlu1 %v2218_v30, %s16154_s24  ;;  %2287 = vrot.lane.b32.xlu0 %v2217_v39, %s16154_s24  ;;  %6412 = vst [vmem:[#allocation4 + $0x60] sm:$0xff] %v10270_v25  ;;  %6413 = vst [vmem:[#allocation4 + $0x68] sm:$0xff] %v10270_v25 }
 0x5e0   : > { %6415 = vst [vmem:[#allocation4 + $0x78] sm:$0xff] %v10270_v25  ;;  %6416 = vst [vmem:[#allocation4 + $0x80] sm:$0xff] %v10270_v25 }
 0x5e1   : > { %6418 = vst [vmem:[#allocation4 + $0x90] sm:$0xff] %v10270_v25  ;;  %6419 = vst [vmem:[#allocation4 + $0x98] sm:$0xff] %v10270_v25 }
 0x5e2   : > { %6421 = vst [vmem:[#allocation4 + $0xa8] sm:$0xff] %v10270_v25  ;;  %6422 = vst [vmem:[#allocation4 + $0xb0] sm:$0xff] %v10270_v25 }
 0x625   : > { %v2246_v21 = vpop.permute.xlu1 %2245  ;;  %v2244_v42 = vpop.permute.xlu0 %2243 }
 0x626   : > { %v2291_v10 = vsel %vm588_vm0, %v2244_v42, %v2246_v21 }
 0x627   : > { %v12130_v26 = vmax.f32 %v2195_v2, %v2291_v10 }
 0x629   : > { %v2250_v16 = vpop.permute.xlu1 %2249  ;;  %2379 = vrot.lane.b32.xlu0 %v12130_v26, %s16136_s22  ;;  %v2248_v24 = vpop.permute.xlu0 %2247 }
 0x62a   : > { %v2292_v13 = vsel %vm588_vm0, %v2246_v21, %v2248_v24  ;;  %v12137_v8 = vmax.f32 %v2197_v50, %v2248_v24 }
 0x62b   : > { %v12141_v32 = vmax.f32 %v2196_v62, %v2292_v13 }
 0x62d   : > { %v2254_v40 = vpop.permute.xlu1 %2253  ;;  %2383 = vrot.lane.b32.xlu0 %v12137_v8, %s16136_s22  ;;  %2381 = vrot.lane.b32.xlu1 %v12141_v32, %s16136_s22  ;;  %v2252_v1 = vpop.permute.xlu0 %2251 }
 0x62e   : > { %v2293_v2 = vsel %vm588_vm0, %v2250_v16, %v2252_v1  ;;  %v2294_v55 = vsel %vm588_vm0, %v2252_v1, %v2254_v40  ;;  %v12164_v45 = vmax.f32 %v2200_v12, %v2254_v40 }
 0x62f   : > { %v12151_v19 = vmax.f32 %v2198_v28, %v2293_v2  ;;  %v12155_v31 = vmax.f32 %v2199_v35, %v2294_v55 }
 0x631   : > { %v2258_v62 = vpop.permute.xlu1 %2257  ;;  %2387 = vrot.lane.b32.xlu0 %v12155_v31, %s16136_s22  ;;  %2385 = vrot.lane.b32.xlu1 %v12151_v19, %s16136_s22  ;;  %v2256_v50 = vpop.permute.xlu0 %2255 }
 0x632   : > { %v2295_v53 = vsel %vm588_vm0, %v2256_v50, %v2258_v62 }
 0x633   : > { %v12168_v57 = vmax.f32 %v2201_v51, %v2295_v53 }
 0x635   : > { %v2262_v33 = vpop.permute.xlu1 %2261  ;;  %2389 = vrot.lane.b32.xlu1 %v12164_v45, %s16136_s22  ;;  %2391 = vrot.lane.b32.xlu0 %v12168_v57, %s16136_s22  ;;  %v2260_v28 = vpop.permute.xlu0 %2259 }
 0x636   : > { %v2296_v35 = vsel %vm588_vm0, %v2258_v62, %v2260_v28  ;;  %v12177_v56 = vmax.f32 %v2203_v63, %v2260_v28 }
 0x637   : > { %v12181_v29 = vmax.f32 %v2202_v11, %v2296_v35 }
 0x639   : > { %v2266_v12 = vpop.permute.xlu1 %2265  ;;  %2395 = vrot.lane.b32.xlu0 %v12177_v56, %s16136_s22  ;;  %2393 = vrot.lane.b32.xlu1 %v12181_v29, %s16136_s22  ;;  %v2264_v48 = vpop.permute.xlu0 %2263 }
 0x63a   : > { %v2297_v51 = vsel %vm588_vm0, %v2262_v33, %v2264_v48  ;;  %v2298_v37 = vsel %vm588_vm0, %v2264_v48, %v2266_v12  ;;  %v12204_v21 = vmax.f32 %v2206_v49, %v2266_v12 }
 0x63b   : > { %v12191_v47 = vmax.f32 %v2204_v41, %v2297_v51  ;;  %v12195_v3 = vmax.f32 %v2205_v36, %v2298_v37 }
 0x63d   : > { %v2270_v11 = vpop.permute.xlu1 %2269  ;;  %2399 = vrot.lane.b32.xlu0 %v12195_v3, %s16136_s22  ;;  %2397 = vrot.lane.b32.xlu1 %v12191_v47, %s16136_s22  ;;  %v2268_v63 = vpop.permute.xlu0 %2267 }
 0x63e   : > { %v2299_v18 = vsel %vm588_vm0, %v2268_v63, %v2270_v11 }
 0x63f   : > { %v12208_v22 = vmax.f32 %v2207_v58, %v2299_v18 }
 0x641   : > { %v2274_v23 = vpop.permute.xlu1 %2273  ;;  %2401 = vrot.lane.b32.xlu1 %v12204_v21, %s16136_s22  ;;  %2403 = vrot.lane.b32.xlu0 %v12208_v22, %s16136_s22  ;;  %v2272_v41 = vpop.permute.xlu0 %2271 }
 0x642   : > { %v2300_v36 = vsel %vm588_vm0, %v2270_v11, %v2272_v41  ;;  %v12217_v42 = vmax.f32 %v2209_v20, %v2272_v41 }
 0x643   : > { %v12221_v4 = vmax.f32 %v2208_v54, %v2300_v36 }
 0x645   : > { %v2278_v49 = vpop.permute.xlu1 %2277  ;;  %2407 = vrot.lane.b32.xlu0 %v12217_v42, %s16136_s22  ;;  %2405 = vrot.lane.b32.xlu1 %v12221_v4, %s16136_s22  ;;  %v2276_v34 = vpop.permute.xlu0 %2275 }
 0x646   : > { %v2301_v58 = vsel %vm588_vm0, %v2274_v23, %v2276_v34  ;;  %v2302_v10 = vsel %vm588_vm0, %v2276_v34, %v2278_v49  ;;  %v12244_v24 = vmax.f32 %v2212_v43, %v2278_v49 }
 0x647   : > { %v12231_v52 = vmax.f32 %v2210_v9, %v2301_v58  ;;  %v12235_v6 = vmax.f32 %v2211_v46, %v2302_v10 }
 0x649   : > { %v2282_v54 = vpop.permute.xlu1 %2281  ;;  %2411 = vrot.lane.b32.xlu0 %v12235_v6, %s16136_s22  ;;  %2409 = vrot.lane.b32.xlu1 %v12231_v52, %s16136_s22  ;;  %v2280_v20 = vpop.permute.xlu0 %2279 }
 0x64a   : > { %v2303_v16 = vsel %vm588_vm0, %v2280_v20, %v2282_v54 }
 0x64b   : > { %v12248_v38 = vmax.f32 %v2213_v7, %v2303_v16 }
 0x64d   : > { %v2286_v15 = vpop.permute.xlu1 %2285  ;;  %2413 = vrot.lane.b32.xlu1 %v12244_v24, %s16136_s22  ;;  %2415 = vrot.lane.b32.xlu0 %v12248_v38, %s16136_s22  ;;  %v2284_v9 = vpop.permute.xlu0 %2283 }
 0x64e   : > { %v2304_v46 = vsel %vm588_vm0, %v2282_v54, %v2284_v9  ;;  %v12257_v13 = vmax.f32 %v2215_v14, %v2284_v9 }
 0x64f   : > { %v12261_v59 = vmax.f32 %v2214_v61, %v2304_v46 }
 0x651   : > { %v2290_v43 = vpop.permute.xlu1 %2289  ;;  %2419 = vrot.lane.b32.xlu0 %v12257_v13, %s16136_s22  ;;  %2417 = vrot.lane.b32.xlu1 %v12261_v59, %s16136_s22  ;;  %v2288_v0 = vpop.permute.xlu0 %2287 }
 0x652   : > { %v2305_v7 = vsel %vm588_vm0, %v2286_v15, %v2288_v0  ;;  %v2306_v40 = vsel %vm588_vm0, %v2288_v0, %v2290_v43  ;;  %v12283_v61 = vmax.f32 %v2218_v30, %v2290_v43 }
 0x653   : > { %v12271_v60 = vmax.f32 %v2216_v44, %v2305_v7  ;;  %v12275_v5 = vmax.f32 %v2217_v39, %v2306_v40 }
 0x655   : > { %2423 = vrot.lane.b32.xlu0 %v12275_v5, %s16136_s22  ;;  %2421 = vrot.lane.b32.xlu1 %v12271_v60, %s16136_s22 }
 0x659   : > { %2425 = vrot.lane.b32.xlu1 %v12283_v61, %s16136_s22 }
 0x69b   : > { %v2380_v27 = vpop.permute.xlu0 %2379 }
 0x69f   : > { %v12325_v17 = vpop.permute.xlu1 %2381  ;;  %v12327_v44 = vpop.permute.xlu0 %2383 }
 0x6a0   : > { %v2427_v14 = vsel %vm16211_vm2, %v2380_v27, %v12325_v17  ;;  %v2428_v7 = vsel %vm16211_vm2, %v12325_v17, %v12327_v44 }
 0x6a1   : > { %v12332_v39 = vmax.f32 %v12130_v26, %v2427_v14  ;;  %v12519_v40 = vmax.f32 %v12141_v32, %v2428_v7 }
 0x6a3   : > { %v2386_v30 = vpop.permute.xlu1 %2385  ;;  %2524 = vrot.lane.b32.xlu0 %v12332_v39, %s10271_s19  ;;  %v12336_v1 = vpop.permute.xlu0 %2387 }
 0x6a4   : > { %v2429_v2 = vsel %vm16211_vm2, %v2386_v30, %v12336_v1 }
 0x6a5   : > { %v12341_v55 = vmax.f32 %v12151_v19, %v2429_v2 }
 0x6a7   : > { %v12343_v62 = vpop.permute.xlu1 %2389  ;;  %2526 = vrot.lane.b32.xlu1 %v12341_v55, %s10271_s19  ;;  %v2392_v26 = vpop.permute.xlu0 %2391 }
 0x6a8   : > { %v2430_v27 = vsel %vm16211_vm2, %v12336_v1, %v12343_v62 }
 0x6a9   : > { %v12530_v17 = vmax.f32 %v12155_v31, %v2430_v27 }
 0x6ab   : > { %v12347_v50 = vpop.permute.xlu1 %2393  ;;  %v12349_v53 = vpop.permute.xlu0 %2395 }
 0x6ac   : > { %v2431_v33 = vsel %vm16211_vm2, %v2392_v26, %v12347_v50  ;;  %v2432_v32 = vsel %vm16211_vm2, %v12347_v50, %v12349_v53 }
 0x6ad   : > { %v12354_v28 = vmax.f32 %v12168_v57, %v2431_v33 }
 0x6af   : > { %v2398_v35 = vpop.permute.xlu1 %2397  ;;  %2528 = vrot.lane.b32.xlu0 %v12354_v28, %s10271_s19  ;;  %v12358_v19 = vpop.permute.xlu0 %2399 }
 0x6b0   : > { %v2433_v12 = vsel %vm16211_vm2, %v2398_v35, %v12358_v19 }
 0x6b1   : > { %v12363_v48 = vmax.f32 %v12191_v47, %v2433_v12 }
 0x6b3   : > { %v12365_v51 = vpop.permute.xlu1 %2401  ;;  %2530 = vrot.lane.b32.xlu1 %v12363_v48, %s10271_s19  ;;  %v2404_v37 = vpop.permute.xlu0 %2403 }
 0x6b4   : > { %v2434_v31 = vsel %vm16211_vm2, %v12358_v19, %v12365_v51 }
 0x6b5   : > { %v12551_v30 = vmax.f32 %v12195_v3, %v2434_v31 }
 0x6b7   : > { %v12369_v57 = vpop.permute.xlu1 %2405  ;;  %v12371_v11 = vpop.permute.xlu0 %2407 }
 0x6b8   : > { %v2435_v63 = vsel %vm16211_vm2, %v2404_v37, %v12369_v57  ;;  %v2436_v2 = vsel %vm16211_vm2, %v12369_v57, %v12371_v11 }
 0x6b9   : > { %v12376_v18 = vmax.f32 %v12208_v22, %v2435_v63 }
 0x6bb   : > { %v2410_v23 = vpop.permute.xlu1 %2409  ;;  %2532 = vrot.lane.b32.xlu0 %v12376_v18, %s10271_s19  ;;  %v12380_v47 = vpop.permute.xlu0 %2411 }
 0x6bc   : > { %v2437_v41 = vsel %vm16211_vm2, %v2410_v23, %v12380_v47 }
 0x6bd   : > { %v12385_v36 = vmax.f32 %v12231_v52, %v2437_v41 }
 0x6bf   : > { %v12387_v49 = vpop.permute.xlu1 %2413  ;;  %2534 = vrot.lane.b32.xlu1 %v12385_v36, %s10271_s19  ;;  %v2416_v34 = vpop.permute.xlu0 %2415 }
 0x6c0   : > { %v2438_v26 = vsel %vm16211_vm2, %v12380_v47, %v12387_v49 }
 0x6c1   : > { %v12574_v50 = vmax.f32 %v12235_v6, %v2438_v26 }
 0x6c3   : > { %v12391_v22 = vpop.permute.xlu1 %2417  ;;  %v12393_v58 = vpop.permute.xlu0 %2419 }
 0x6c4   : > { %v2439_v10 = vsel %vm16211_vm2, %v2416_v34, %v12391_v22 }
 0x6c5   : > { %v12398_v54 = vmax.f32 %v12248_v38, %v2439_v10 }
 0x6c7   : > { %v2422_v20 = vpop.permute.xlu1 %2421  ;;  %2536 = vrot.lane.b32.xlu0 %v12398_v54, %s10271_s19  ;;  %v12402_v52 = vpop.permute.xlu0 %2423 }
 0x6c8   : > { %v2441_v16 = vsel %vm16211_vm2, %v2422_v20, %v12402_v52 }
 0x6c9   : > { %v12407_v15 = vmax.f32 %v12271_v60, %v2441_v16 }
 0x6cb   : > { %2557 = vrot.lane.b32.xlu0 %v12332_v39, %s10272_s20  ;;  %2538 = vrot.lane.b32.xlu1 %v12407_v15, %s10271_s19  ;;  %v12485_v38 = vpop.permute.xlu1 %2425  ;;  %s10283_s19 = smov 6  }
 0x6cc   : > { %v2442_v12 = vsel %vm16211_vm2, %v12402_v52, %v12485_v38 }
 0x6cf   : > { %2561 = vrot.lane.b32.xlu0 %v12354_v28, %s10272_s20  ;;  %2559 = vrot.lane.b32.xlu1 %v12341_v55, %s10272_s20 }
 0x6d3   : > { %2565 = vrot.lane.b32.xlu0 %v12376_v18, %s10272_s20  ;;  %2563 = vrot.lane.b32.xlu1 %v12363_v48, %s10272_s20 }
 0x6d7   : > { %2569 = vrot.lane.b32.xlu0 %v12398_v54, %s10272_s20  ;;  %2567 = vrot.lane.b32.xlu1 %v12385_v36, %s10272_s20 }
 0x6db   : > { %2590 = vrot.lane.b32.xlu0 %v12332_v39, %s10273_s26  ;;  %2571 = vrot.lane.b32.xlu1 %v12407_v15, %s10272_s20 }
 0x6df   : > { %2594 = vrot.lane.b32.xlu0 %v12354_v28, %s10273_s26  ;;  %2592 = vrot.lane.b32.xlu1 %v12341_v55, %s10273_s26 }
 0x6e3   : > { %2598 = vrot.lane.b32.xlu0 %v12376_v18, %s10273_s26  ;;  %2596 = vrot.lane.b32.xlu1 %v12363_v48, %s10273_s26 }
 0x6e7   : > { %2602 = vrot.lane.b32.xlu0 %v12398_v54, %s10273_s26  ;;  %2600 = vrot.lane.b32.xlu1 %v12385_v36, %s10273_s26 }
 0x6eb   : > { %2623 = vrot.lane.b32.xlu0 %v12332_v39, %s16156_s28  ;;  %2604 = vrot.lane.b32.xlu1 %v12407_v15, %s10273_s26 }
 0x6ef   : > { %2627 = vrot.lane.b32.xlu0 %v12354_v28, %s16156_s28  ;;  %2625 = vrot.lane.b32.xlu1 %v12341_v55, %s16156_s28 }
 0x6f3   : > { %2631 = vrot.lane.b32.xlu0 %v12376_v18, %s16156_s28  ;;  %2629 = vrot.lane.b32.xlu1 %v12363_v48, %s16156_s28 }
 0x6f7   : > { %2635 = vrot.lane.b32.xlu0 %v12398_v54, %s16156_s28  ;;  %2633 = vrot.lane.b32.xlu1 %v12385_v36, %s16156_s28 }
 0x6fb   : > { %2656 = vrot.lane.b32.xlu0 %v12332_v39, %s16152_s29  ;;  %2637 = vrot.lane.b32.xlu1 %v12407_v15, %s16156_s28  ;;  %s10298_s28 = smov 50  }
 0x6ff   : > { %2660 = vrot.lane.b32.xlu0 %v12354_v28, %s16152_s29  ;;  %2658 = vrot.lane.b32.xlu1 %v12341_v55, %s16152_s29 }
 0x703   : > { %2664 = vrot.lane.b32.xlu0 %v12376_v18, %s16152_s29  ;;  %2662 = vrot.lane.b32.xlu1 %v12363_v48, %s16152_s29 }
 0x707   : > { %2668 = vrot.lane.b32.xlu0 %v12398_v54, %s16152_s29  ;;  %2666 = vrot.lane.b32.xlu1 %v12385_v36, %s16152_s29 }
 0x70b   : > { %2689 = vrot.lane.b32.xlu0 %v12332_v39, %s16150_s10  ;;  %2670 = vrot.lane.b32.xlu1 %v12407_v15, %s16152_s29  ;;  %s10295_s29 = smov 44  }
 0x70f   : > { %2693 = vrot.lane.b32.xlu0 %v12354_v28, %s16150_s10  ;;  %2691 = vrot.lane.b32.xlu1 %v12341_v55, %s16150_s10 }
 0x713   : > { %2697 = vrot.lane.b32.xlu0 %v12376_v18, %s16150_s10  ;;  %2695 = vrot.lane.b32.xlu1 %v12363_v48, %s16150_s10 }
 0x715   : > { %v2525_v9 = vpop.permute.xlu0 %2524 }
 0x716   : > { %2549 = vst.msk [vmem:[#allocation2] sm:$0xff] %vm2548_vm8, %v2525_v9 }
 0x717   : > { %2701 = vrot.lane.b32.xlu0 %v12398_v54, %s16150_s10  ;;  %2699 = vrot.lane.b32.xlu1 %v12385_v36, %s16150_s10 }
 0x719   : > { %v2527_v46 = vpop.permute.xlu1 %2526 }
 0x71a   : > { %2550 = vst.msk [vmem:[#allocation2 + $0x18] sm:$0xff] %vm2548_vm8, %v2527_v46 }
 0x71b   : > { %2722 = vrot.lane.b32.xlu0 %v12332_v39, %s16148_s13  ;;  %2703 = vrot.lane.b32.xlu1 %v12407_v15, %s16150_s10  ;;  %s16579_s10 = smov 94  }
 0x71f   : > { %2726 = vrot.lane.b32.xlu0 %v12354_v28, %s16148_s13  ;;  %2724 = vrot.lane.b32.xlu1 %v12341_v55, %s16148_s13 }
 0x721   : > { %v2529_v43 = vpop.permute.xlu0 %2528 }
 0x722   : > { %2551 = vst.msk [vmem:[#allocation2 + $0x30] sm:$0xff] %vm2548_vm8, %v2529_v43 }
 0x723   : > { %2730 = vrot.lane.b32.xlu0 %v12376_v18, %s16148_s13  ;;  %2728 = vrot.lane.b32.xlu1 %v12363_v48, %s16148_s13 }
 0x725   : > { %v2531_v0 = vpop.permute.xlu1 %2530 }
 0x726   : > { %2552 = vst.msk [vmem:[#allocation2 + $0x48] sm:$0xff] %vm2548_vm8, %v2531_v0 }
 0x727   : > { %2734 = vrot.lane.b32.xlu0 %v12398_v54, %s16148_s13  ;;  %2732 = vrot.lane.b32.xlu1 %v12385_v36, %s16148_s13 }
 0x72b   : > { %2772 = vrot.lane.b32.xlu0 %v12332_v39, %s16144_s14  ;;  %2736 = vrot.lane.b32.xlu1 %v12407_v15, %s16148_s13  ;;  %v12541_v39 = vmax.f32 %v12181_v29, %v2432_v32  ;;  %v12562_v29 = vmax.f32 %v12221_v4, %v2436_v2  ;;  %s16578_s13 = smov 110  }
 0x72d   : > { %v2533_v60 = vpop.permute.xlu0 %2532 }
 0x72e   : > { %2553 = vst.msk [vmem:[#allocation2 + $0x60] sm:$0xff] %vm2548_vm8, %v2533_v60 }
 0x72f   : > { %2776 = vrot.lane.b32.xlu0 %v12341_v55, %s16144_s14  ;;  %2774 = vrot.lane.b32.xlu1 %v12519_v40, %s16144_s14 }
 0x731   : > { %v2535_v14 = vpop.permute.xlu1 %2534 }
 0x732   : > { %2554 = vst.msk [vmem:[#allocation2 + $0x78] sm:$0xff] %vm2548_vm8, %v2535_v14 }
 0x733   : > { %2780 = vrot.lane.b32.xlu0 %v12354_v28, %s16144_s14  ;;  %2778 = vrot.lane.b32.xlu1 %v12530_v17, %s16144_s14  ;;  %v2440_v28 = vsel %vm16211_vm2, %v12391_v22, %v12393_v58 }
 0x734   : > { %v12586_v35 = vmax.f32 %v12261_v59, %v2440_v28 }
 0x737   : > { %2784 = vrot.lane.b32.xlu0 %v12363_v48, %s16144_s14  ;;  %2782 = vrot.lane.b32.xlu1 %v12541_v39, %s16144_s14  ;;  %v12598_v48 = vmax.f32 %v12275_v5, %v2442_v12 }
 0x739   : > { %v2537_v1 = vpop.permute.xlu0 %2536 }
 0x73a   : > { %2555 = vst.msk [vmem:[#allocation2 + $0x90] sm:$0xff] %vm2548_vm8, %v2537_v1 }
 0x73b   : > { %2788 = vrot.lane.b32.xlu0 %v12376_v18, %s16144_s14  ;;  %2786 = vrot.lane.b32.xlu1 %v12551_v30, %s16144_s14 }
 0x73d   : > { %v2539_v55 = vpop.permute.xlu1 %2538  ;;  %v2558_v3 = vpop.permute.xlu0 %2557 }
 0x73e   : > { %2556 = vst.msk [vmem:[#allocation2 + $0xa8] sm:$0xff] %vm2548_vm8, %v2539_v55  ;;  %vm2804_vm8 = vcmask 89088  }
 0x73f   : > { %2582 = vst.msk [vmem:[#allocation2] sm:$0xff] %vm2581_vm9, %v2558_v3  ;;  %2792 = vrot.lane.b32.xlu0 %v12385_v36, %s16144_s14  ;;  %2790 = vrot.lane.b32.xlu1 %v12562_v29, %s16144_s14 }
 0x741   : > { %v2560_v4 = vpop.permute.xlu1 %2559  ;;  %v2562_v33 = vpop.permute.xlu0 %2561 }
 0x742   : > { %2583 = vst.msk [vmem:[#allocation2 + $0x18] sm:$0xff] %vm2581_vm9, %v2560_v4  ;;  %2584 = vst.msk [vmem:[#allocation2 + $0x30] sm:$0xff] %vm2581_vm9, %v2562_v33 }
 0x743   : > { %2796 = vrot.lane.b32.xlu0 %v12398_v54, %s16144_s14  ;;  %2794 = vrot.lane.b32.xlu1 %v12574_v50, %s16144_s14 }
 0x745   : > { %v2564_v6 = vpop.permute.xlu1 %2563  ;;  %v2566_v19 = vpop.permute.xlu0 %2565 }
 0x746   : > { %2585 = vst.msk [vmem:[#allocation2 + $0x48] sm:$0xff] %vm2581_vm9, %v2564_v6  ;;  %2586 = vst.msk [vmem:[#allocation2 + $0x60] sm:$0xff] %vm2581_vm9, %v2566_v19 }
 0x747   : > { %2800 = vrot.lane.b32.xlu0 %v12407_v15, %s16144_s14  ;;  %2798 = vrot.lane.b32.xlu1 %v12586_v35, %s16144_s14 }
 0x749   : > { %v2568_v59 = vpop.permute.xlu1 %2567  ;;  %v2570_v37 = vpop.permute.xlu0 %2569 }
 0x74a   : > { %2587 = vst.msk [vmem:[#allocation2 + $0x78] sm:$0xff] %vm2581_vm9, %v2568_v59  ;;  %2588 = vst.msk [vmem:[#allocation2 + $0x90] sm:$0xff] %vm2581_vm9, %v2570_v37 }
 0x74b   : > { %2830 = vrot.lane.b32.xlu0 %v12519_v40, %s10279_s15  ;;  %2802 = vrot.lane.b32.xlu1 %v12598_v48, %s16144_s14  ;;  %s10296_s14 = smov 46  }
 0x74d   : > { %v2572_v57 = vpop.permute.xlu1 %2571  ;;  %v2591_v63 = vpop.permute.xlu0 %2590 }
 0x74e   : > { %2589 = vst.msk [vmem:[#allocation2 + $0xa8] sm:$0xff] %vm2581_vm9, %v2572_v57  ;;  %vm2821_vm9 = vcmask 195656  }
 0x74f   : > { %2615 = vst.msk [vmem:[#allocation2] sm:$0xff] %vm2614_vm10, %v2591_v63  ;;  %2834 = vrot.lane.b32.xlu0 %v12541_v39, %s10279_s15  ;;  %2832 = vrot.lane.b32.xlu1 %v12530_v17, %s10279_s15 }
 0x751   : > { %v2593_v5 = vpop.permute.xlu1 %2592  ;;  %v2595_v18 = vpop.permute.xlu0 %2594 }
 0x752   : > { %2616 = vst.msk [vmem:[#allocation2 + $0x18] sm:$0xff] %vm2614_vm10, %v2593_v5  ;;  %2617 = vst.msk [vmem:[#allocation2 + $0x30] sm:$0xff] %vm2614_vm10, %v2595_v18 }
 0x753   : > { %2838 = vrot.lane.b32.xlu0 %v12562_v29, %s10279_s15  ;;  %2836 = vrot.lane.b32.xlu1 %v12551_v30, %s10279_s15 }
 0x755   : > { %v2597_v23 = vpop.permute.xlu1 %2596  ;;  %v2599_v47 = vpop.permute.xlu0 %2598 }
 0x756   : > { %2618 = vst.msk [vmem:[#allocation2 + $0x48] sm:$0xff] %vm2614_vm10, %v2597_v23  ;;  %2619 = vst.msk [vmem:[#allocation2 + $0x60] sm:$0xff] %vm2614_vm10, %v2599_v47 }
 0x757   : > { %2842 = vrot.lane.b32.xlu0 %v12586_v35, %s10279_s15  ;;  %2840 = vrot.lane.b32.xlu1 %v12574_v50, %s10279_s15 }
 0x759   : > { %v2601_v41 = vpop.permute.xlu1 %2600  ;;  %v2603_v36 = vpop.permute.xlu0 %2602 }
 0x75a   : > { %2620 = vst.msk [vmem:[#allocation2 + $0x78] sm:$0xff] %vm2614_vm10, %v2601_v41  ;;  %2621 = vst.msk [vmem:[#allocation2 + $0x90] sm:$0xff] %vm2614_vm10, %v2603_v36 }
 0x75b   : > { %2863 = vrot.lane.b32.xlu0 %v12519_v40, %s10280_s16  ;;  %2844 = vrot.lane.b32.xlu1 %v12598_v48, %s10279_s15 }
 0x75d   : > { %v2605_v34 = vpop.permute.xlu1 %2604  ;;  %v2624_v22 = vpop.permute.xlu0 %2623 }
 0x75e   : > { %2622 = vst.msk [vmem:[#allocation2 + $0xa8] sm:$0xff] %vm2614_vm10, %v2605_v34  ;;  %vm2493_vm10 = vcmask 269312  }
 0x75f   : > { %2648 = vst.msk [vmem:[#allocation2] sm:$0xff] %vm2647_vm11, %v2624_v22  ;;  %2867 = vrot.lane.b32.xlu0 %v12541_v39, %s10280_s16  ;;  %2865 = vrot.lane.b32.xlu1 %v12530_v17, %s10280_s16 }
 0x760   : > { %2494 = vst.msk [vmem:[#allocation2 + $0x10] sm:$0xff] %vm2493_vm10, %v10270_v25  ;;  %2497 = vst.msk [vmem:[#allocation2 + $0x28] sm:$0xff] %vm2493_vm10, %v10270_v25 }
 0x761   : > { %v2626_v10 = vpop.permute.xlu1 %2625  ;;  %v2628_v54 = vpop.permute.xlu0 %2627  ;;  %2500 = vst.msk [vmem:[#allocation2 + $0x40] sm:$0xff] %vm2493_vm10, %v10270_v25  ;;  %2503 = vst.msk [vmem:[#allocation2 + $0x58] sm:$0xff] %vm2493_vm10, %v10270_v25 }
 0x762   : > { %2649 = vst.msk [vmem:[#allocation2 + $0x18] sm:$0xff] %vm2647_vm11, %v2626_v10  ;;  %2650 = vst.msk [vmem:[#allocation2 + $0x30] sm:$0xff] %vm2647_vm11, %v2628_v54  ;;  %v2469_v54 = vmax.f32 %v12137_v8, %v12327_v44  ;;  %v2475_v8 = vmax.f32 %v12177_v56, %v12349_v53  ;;  %v2481_v56 = vmax.f32 %v12217_v42, %v12371_v11 }
 0x763   : > { %2871 = vrot.lane.b32.xlu0 %v12562_v29, %s10280_s16  ;;  %2869 = vrot.lane.b32.xlu1 %v12551_v30, %s10280_s16  ;;  %2506 = vst.msk [vmem:[#allocation2 + $0x70] sm:$0xff] %vm2493_vm10, %v10270_v25  ;;  %2509 = vst.msk [vmem:[#allocation2 + $0x88] sm:$0xff] %vm2493_vm10, %v10270_v25  ;;  %v2487_v42 = vmax.f32 %v12257_v13, %v12393_v58 }
 0x764   : > { %2512 = vst.msk [vmem:[#allocation2 + $0xa0] sm:$0xff] %vm2493_vm10, %v10270_v25  ;;  %2515 = vst.msk [vmem:[#allocation2 + $0xb8] sm:$0xff] %vm2493_vm10, %v10270_v25  ;;  %vm3085_vm10 = vcmask 121856  }
 0x765   : > { %v2630_v20 = vpop.permute.xlu1 %2629  ;;  %v2632_v52 = vpop.permute.xlu0 %2631 }
 0x766   : > { %2651 = vst.msk [vmem:[#allocation2 + $0x48] sm:$0xff] %vm2647_vm11, %v2630_v20  ;;  %2652 = vst.msk [vmem:[#allocation2 + $0x60] sm:$0xff] %vm2647_vm11, %v2632_v52 }
 0x767   : > { %2875 = vrot.lane.b32.xlu0 %v12586_v35, %s10280_s16  ;;  %2873 = vrot.lane.b32.xlu1 %v12574_v50, %s10280_s16 }
 0x769   : > { %v2634_v16 = vpop.permute.xlu1 %2633  ;;  %v2636_v15 = vpop.permute.xlu0 %2635 }
 0x76a   : > { %2653 = vst.msk [vmem:[#allocation2 + $0x78] sm:$0xff] %vm2647_vm11, %v2634_v16  ;;  %2654 = vst.msk [vmem:[#allocation2 + $0x90] sm:$0xff] %vm2647_vm11, %v2636_v15  ;;  %v2472_v15 = vmax.f32 %v12164_v45, %v12343_v62  ;;  %v2478_v45 = vmax.f32 %v12204_v21, %v12365_v51  ;;  %v2484_v21 = vmax.f32 %v12244_v24, %v12387_v49 }
 0x76b   : > { %2896 = vrot.lane.b32.xlu0 %v12519_v40, %s10281_s17  ;;  %2877 = vrot.lane.b32.xlu1 %v12598_v48, %s10280_s16  ;;  %v2490_v24 = vmax.f32 %v12283_v61, %v12485_v38 }
 0x76d   : > { %v2638_v9 = vpop.permute.xlu1 %2637  ;;  %v2657_v46 = vpop.permute.xlu0 %2656 }
 0x76e   : > { %2655 = vst.msk [vmem:[#allocation2 + $0xa8] sm:$0xff] %vm2647_vm11, %v2638_v9  ;;  %vm2854_vm11 = vcmask 335056  }
 0x76f   : > { %2681 = vst.msk [vmem:[#allocation2] sm:$0xff] %vm2680_vm12, %v2657_v46  ;;  %2900 = vrot.lane.b32.xlu0 %v12541_v39, %s10281_s17  ;;  %2898 = vrot.lane.b32.xlu1 %v12530_v17, %s10281_s17 }
 0x771   : > { %v2659_v43 = vpop.permute.xlu1 %2658  ;;  %v2661_v0 = vpop.permute.xlu0 %2660 }
 0x772   : > { %2682 = vst.msk [vmem:[#allocation2 + $0x18] sm:$0xff] %vm2680_vm12, %v2659_v43  ;;  %2683 = vst.msk [vmem:[#allocation2 + $0x30] sm:$0xff] %vm2680_vm12, %v2661_v0 }
 0x773   : > { %2904 = vrot.lane.b32.xlu0 %v12562_v29, %s10281_s17  ;;  %2902 = vrot.lane.b32.xlu1 %v12551_v30, %s10281_s17 }
 0x775   : > { %v2663_v7 = vpop.permute.xlu1 %2662  ;;  %v2665_v60 = vpop.permute.xlu0 %2664 }
 0x776   : > { %2684 = vst.msk [vmem:[#allocation2 + $0x48] sm:$0xff] %vm2680_vm12, %v2663_v7  ;;  %2685 = vst.msk [vmem:[#allocation2 + $0x60] sm:$0xff] %vm2680_vm12, %v2665_v60 }
 0x777   : > { %2908 = vrot.lane.b32.xlu0 %v12586_v35, %s10281_s17  ;;  %2906 = vrot.lane.b32.xlu1 %v12574_v50, %s10281_s17 }
 0x779   : > { %v2667_v27 = vpop.permute.xlu1 %2666  ;;  %v2669_v14 = vpop.permute.xlu0 %2668 }
 0x77a   : > { %2686 = vst.msk [vmem:[#allocation2 + $0x78] sm:$0xff] %vm2680_vm12, %v2667_v27  ;;  %2687 = vst.msk [vmem:[#allocation2 + $0x90] sm:$0xff] %vm2680_vm12, %v2669_v14 }
 0x77b   : > { %2929 = vrot.lane.b32.xlu0 %v12519_v40, %s10282_s18  ;;  %2910 = vrot.lane.b32.xlu1 %v12598_v48, %s10281_s17 }
 0x77d   : > { %v2671_v32 = vpop.permute.xlu1 %2670  ;;  %v2690_v31 = vpop.permute.xlu0 %2689 }
 0x77e   : > { %2688 = vst.msk [vmem:[#allocation2 + $0xa8] sm:$0xff] %vm2680_vm12, %v2671_v32  ;;  %vm2887_vm12 = vcmask 474456  }
 0x77f   : > { %2714 = vst.msk [vmem:[#allocation2] sm:$0xff] %vm2713_vm13, %v2690_v31  ;;  %2931 = vrot.lane.b32.xlu1 %v12530_v17, %s10282_s18  ;;  %2933 = vrot.lane.b32.xlu0 %v12541_v39, %s10282_s18 }
 0x781   : > { %v2692_v1 = vpop.permute.xlu1 %2691  ;;  %v2694_v2 = vpop.permute.xlu0 %2693 }
 0x782   : > { %2715 = vst.msk [vmem:[#allocation2 + $0x18] sm:$0xff] %vm2713_vm13, %v2692_v1  ;;  %2716 = vst.msk [vmem:[#allocation2 + $0x30] sm:$0xff] %vm2713_vm13, %v2694_v2 }
 0x783   : > { %2935 = vrot.lane.b32.xlu1 %v12551_v30, %s10282_s18  ;;  %2937 = vrot.lane.b32.xlu0 %v12562_v29, %s10282_s18 }
 0x785   : > { %v2696_v55 = vpop.permute.xlu1 %2695  ;;  %v2698_v3 = vpop.permute.xlu0 %2697 }
 0x786   : > { %2717 = vst.msk [vmem:[#allocation2 + $0x48] sm:$0xff] %vm2713_vm13, %v2696_v55  ;;  %2718 = vst.msk [vmem:[#allocation2 + $0x60] sm:$0xff] %vm2713_vm13, %v2698_v3 }
 0x787   : > { %2939 = vrot.lane.b32.xlu1 %v12574_v50, %s10282_s18  ;;  %2941 = vrot.lane.b32.xlu0 %v12586_v35, %s10282_s18 }
 0x789   : > { %v2700_v26 = vpop.permute.xlu1 %2699  ;;  %v2702_v4 = vpop.permute.xlu0 %2701 }
 0x78a   : > { %2719 = vst.msk [vmem:[#allocation2 + $0x78] sm:$0xff] %vm2713_vm13, %v2700_v26  ;;  %2720 = vst.msk [vmem:[#allocation2 + $0x90] sm:$0xff] %vm2713_vm13, %v2702_v4 }
 0x78b   : > { %2943 = vrot.lane.b32.xlu1 %v12598_v48, %s10282_s18  ;;  %2962 = vrot.lane.b32.xlu0 %v12519_v40, %s10283_s19 }
 0x78d   : > { %v2704_v33 = vpop.permute.xlu1 %2703  ;;  %v2723_v28 = vpop.permute.xlu0 %2722 }
 0x78e   : > { %2721 = vst.msk [vmem:[#allocation2 + $0xa8] sm:$0xff] %vm2713_vm13, %v2704_v33  ;;  %vm2920_vm13 = vcmask 613856  }
 0x78f   : > { %2747 = vst.msk [vmem:[#allocation2] sm:$0xff] %vm2746_vm14, %v2723_v28  ;;  %2964 = vrot.lane.b32.xlu1 %v12530_v17, %s10283_s19  ;;  %2966 = vrot.lane.b32.xlu0 %v12541_v39, %s10283_s19 }
 0x790   : > { %2749 = vst.msk [vmem:[#allocation2 + $0x8] sm:$0xff] %vm2748_vm15, %v2723_v28 }
 0x791   : > { %v2725_v6 = vpop.permute.xlu1 %2724  ;;  %v2727_v19 = vpop.permute.xlu0 %2726 }
 0x792   : > { %2750 = vst.msk [vmem:[#allocation2 + $0x18] sm:$0xff] %vm2746_vm14, %v2725_v6  ;;  %2752 = vst.msk [vmem:[#allocation2 + $0x30] sm:$0xff] %vm2746_vm14, %v2727_v19 }
 0x793   : > { %2751 = vst.msk [vmem:[#allocation2 + $0x20] sm:$0xff] %vm2748_vm15, %v2725_v6  ;;  %2753 = vst.msk [vmem:[#allocation2 + $0x38] sm:$0xff] %vm2748_vm15, %v2727_v19  ;;  %2968 = vrot.lane.b32.xlu1 %v12551_v30, %s10283_s19  ;;  %2970 = vrot.lane.b32.xlu0 %v12562_v29, %s10283_s19 }
 0x795   : > { %v2729_v12 = vpop.permute.xlu1 %2728  ;;  %v2731_v59 = vpop.permute.xlu0 %2730 }
 0x796   : > { %2754 = vst.msk [vmem:[#allocation2 + $0x48] sm:$0xff] %vm2746_vm14, %v2729_v12  ;;  %2756 = vst.msk [vmem:[#allocation2 + $0x60] sm:$0xff] %vm2746_vm14, %v2731_v59 }
 0x797   : > { %2755 = vst.msk [vmem:[#allocation2 + $0x50] sm:$0xff] %vm2748_vm15, %v2729_v12  ;;  %2757 = vst.msk [vmem:[#allocation2 + $0x68] sm:$0xff] %vm2748_vm15, %v2731_v59  ;;  %2972 = vrot.lane.b32.xlu1 %v12574_v50, %s10283_s19  ;;  %2974 = vrot.lane.b32.xlu0 %v12586_v35, %s10283_s19 }
 0x799   : > { %v2733_v37 = vpop.permute.xlu1 %2732  ;;  %v2735_v57 = vpop.permute.xlu0 %2734 }
 0x79a   : > { %2758 = vst.msk [vmem:[#allocation2 + $0x78] sm:$0xff] %vm2746_vm14, %v2733_v37  ;;  %2760 = vst.msk [vmem:[#allocation2 + $0x90] sm:$0xff] %vm2746_vm14, %v2735_v57 }
 0x79b   : > { %2759 = vst.msk [vmem:[#allocation2 + $0x80] sm:$0xff] %vm2748_vm15, %v2733_v37  ;;  %2761 = vst.msk [vmem:[#allocation2 + $0x98] sm:$0xff] %vm2748_vm15, %v2735_v57  ;;  %2976 = vrot.lane.b32.xlu1 %v12598_v48, %s10283_s19  ;;  %2995 = vrot.lane.b32.xlu0 %v12519_v40, %s10284_s23 }
 0x79d   : > { %v2737_v63 = vpop.permute.xlu1 %2736  ;;  %v2773_v5 = vpop.permute.xlu0 %2772 }
 0x79e   : > { %2762 = vst.msk [vmem:[#allocation2 + $0xa8] sm:$0xff] %vm2746_vm14, %v2737_v63  ;;  %vm2953_vm14 = vcmask 753256  }
 0x79f   : > { %2763 = vst.msk [vmem:[#allocation2 + $0xb0] sm:$0xff] %vm2748_vm15, %v2737_v63  ;;  %2997 = vrot.lane.b32.xlu1 %v12530_v17, %s10284_s23  ;;  %2999 = vrot.lane.b32.xlu0 %v12541_v39, %s10284_s23  ;;  %vm2986_vm15 = vcmask 892656  }
 0x7a1   : > { %v2775_v18 = vpop.permute.xlu1 %2774  ;;  %v2777_v23 = vpop.permute.xlu0 %2776 }
 0x7a2   : > { %v2805_v47 = vsel %vm2804_vm8, %v2773_v5, %v2775_v18 }
 0x7a3   : > { %3001 = vrot.lane.b32.xlu1 %v12551_v30, %s10284_s23  ;;  %3003 = vrot.lane.b32.xlu0 %v12562_v29, %s10284_s23  ;;  %2822 = vst.msk [vmem:[#allocation2 + $0x8] sm:$0xff] %vm2821_vm9, %v2805_v47 }
 0x7a5   : > { %v2779_v41 = vpop.permute.xlu1 %2778  ;;  %v2781_v36 = vpop.permute.xlu0 %2780 }
 0x7a6   : > { %v2806_v34 = vsel %vm2804_vm8, %v2777_v23, %v2779_v41 }
 0x7a7   : > { %3005 = vrot.lane.b32.xlu1 %v12574_v50, %s10284_s23  ;;  %3007 = vrot.lane.b32.xlu0 %v12586_v35, %s10284_s23  ;;  %2823 = vst.msk [vmem:[#allocation2 + $0x20] sm:$0xff] %vm2821_vm9, %v2806_v34 }
 0x7a9   : > { %v2783_v25 = vpop.permute.xlu1 %2782  ;;  %v2785_v22 = vpop.permute.xlu0 %2784 }
 0x7aa   : > { %v2807_v10 = vsel %vm2804_vm8, %v2781_v36, %v2783_v25 }
 0x7ab   : > { %3009 = vrot.lane.b32.xlu1 %v12598_v48, %s10284_s23  ;;  %3036 = vrot.lane.b32.xlu0 %v12519_v40, %s10285_s8  ;;  %2824 = vst.msk [vmem:[#allocation2 + $0x38] sm:$0xff] %vm2821_vm9, %v2807_v10 }
 0x7ad   : > { %v2787_v20 = vpop.permute.xlu1 %2786  ;;  %v2789_v52 = vpop.permute.xlu0 %2788 }
 0x7ae   : > { %v2808_v16 = vsel %vm2804_vm8, %v2785_v22, %v2787_v20 }
 0x7af   : > { %3038 = vrot.lane.b32.xlu1 %v2469_v54, %s10285_s8  ;;  %3040 = vrot.lane.b32.xlu0 %v12530_v17, %s10285_s8  ;;  %2825 = vst.msk [vmem:[#allocation2 + $0x50] sm:$0xff] %vm2821_vm9, %v2808_v16  ;;  %v12856_v16 = vld [vmem:[#allocation2] sm:$0xff] }
 0x7b1   : > { %v2791_v40 = vpop.permute.xlu1 %2790  ;;  %v2793_v9 = vpop.permute.xlu0 %2792 }
 0x7b2   : > { %v2809_v46 = vsel %vm2804_vm8, %v2789_v52, %v2791_v40 }
 0x7b3   : > { %3042 = vrot.lane.b32.xlu1 %v2472_v15, %s10285_s8  ;;  %3044 = vrot.lane.b32.xlu0 %v12541_v39, %s10285_s8  ;;  %2826 = vst.msk [vmem:[#allocation2 + $0x68] sm:$0xff] %vm2821_vm9, %v2809_v46 }
 0x7b5   : > { %v2795_v44 = vpop.permute.xlu1 %2794  ;;  %v2797_v17 = vpop.permute.xlu0 %2796 }
 0x7b6   : > { %v2810_v43 = vsel %vm2804_vm8, %v2793_v9, %v2795_v44  ;;  %v12868_v9 = vld [vmem:[#allocation2 + $0x18] sm:$0xff] }
 0x7b7   : > { %3046 = vrot.lane.b32.xlu1 %v2475_v8, %s10285_s8  ;;  %3048 = vrot.lane.b32.xlu0 %v12551_v30, %s10285_s8  ;;  %2827 = vst.msk [vmem:[#allocation2 + $0x80] sm:$0xff] %vm2821_vm9, %v2810_v43 }
 0x7b9   : > { %v2799_v62 = vpop.permute.xlu1 %2798  ;;  %v2801_v39 = vpop.permute.xlu0 %2800 }
 0x7ba   : > { %v2811_v0 = vsel %vm2804_vm8, %v2797_v17, %v2799_v62  ;;  %v12872_v17 = vld [vmem:[#allocation2 + $0x30] sm:$0xff] }
 0x7bb   : > { %3050 = vrot.lane.b32.xlu1 %v2478_v45, %s10285_s8  ;;  %3052 = vrot.lane.b32.xlu0 %v12562_v29, %s10285_s8  ;;  %2828 = vst.msk [vmem:[#allocation2 + $0x98] sm:$0xff] %vm2821_vm9, %v2811_v0  ;;  %v12889_v0 = vld [vmem:[#allocation2 + $0x48] sm:$0xff] }
 0x7bd   : > { %v2803_v53 = vpop.permute.xlu1 %2802  ;;  %v2831_v30 = vpop.permute.xlu0 %2830 }
 0x7be   : > { %v2812_v7 = vsel %vm2804_vm8, %v2801_v39, %v2803_v53  ;;  %2855 = vst.msk [vmem:[#allocation2 + $0x8] sm:$0xff] %vm2854_vm11, %v2831_v30  ;;  %vm3019_vm8 = vcmask 1032056  }
 0x7bf   : > { %2829 = vst.msk [vmem:[#allocation2 + $0xb0] sm:$0xff] %vm2821_vm9, %v2812_v7  ;;  %3054 = vrot.lane.b32.xlu1 %v2481_v56, %s10285_s8  ;;  %3056 = vrot.lane.b32.xlu0 %v12574_v50, %s10285_s8  ;;  %v12893_v7 = vld [vmem:[#allocation2 + $0x60] sm:$0xff]  ;;  %vm3068_vm9 = vcmask 31744  }
 0x7c1   : > { %v2833_v51 = vpop.permute.xlu1 %2832  ;;  %v2835_v29 = vpop.permute.xlu0 %2834 }
 0x7c2   : > { %2856 = vst.msk [vmem:[#allocation2 + $0x20] sm:$0xff] %vm2854_vm11, %v2833_v51  ;;  %2857 = vst.msk [vmem:[#allocation2 + $0x38] sm:$0xff] %vm2854_vm11, %v2835_v29 }
 0x7c3   : > { %3058 = vrot.lane.b32.xlu1 %v2484_v21, %s10285_s8  ;;  %3060 = vrot.lane.b32.xlu0 %v12586_v35, %s10285_s8 }
 0x7c5   : > { %v2837_v11 = vpop.permute.xlu1 %2836  ;;  %v2839_v60 = vpop.permute.xlu0 %2838 }
 0x7c6   : > { %2858 = vst.msk [vmem:[#allocation2 + $0x50] sm:$0xff] %vm2854_vm11, %v2837_v11  ;;  %2859 = vst.msk [vmem:[#allocation2 + $0x68] sm:$0xff] %vm2854_vm11, %v2839_v60  ;;  %v12909_v11 = vld [vmem:[#allocation2 + $0x78] sm:$0xff] }
 0x7c7   : > { %3062 = vrot.lane.b32.xlu1 %v2487_v42, %s10285_s8  ;;  %3064 = vrot.lane.b32.xlu0 %v12598_v48, %s10285_s8 }
 0x7c9   : > { %v2841_v49 = vpop.permute.xlu1 %2840  ;;  %v2843_v50 = vpop.permute.xlu0 %2842 }
 0x7ca   : > { %2860 = vst.msk [vmem:[#allocation2 + $0x80] sm:$0xff] %vm2854_vm11, %v2841_v49  ;;  %2861 = vst.msk [vmem:[#allocation2 + $0x98] sm:$0xff] %vm2854_vm11, %v2843_v50  ;;  %v12913_v50 = vld [vmem:[#allocation2 + $0x90] sm:$0xff] }
 0x7cb   : > { %3066 = vrot.lane.b32.xlu1 %v2490_v24, %s10285_s8 }
 0x7cd   : > { %v2845_v13 = vpop.permute.xlu1 %2844  ;;  %v2864_v58 = vpop.permute.xlu0 %2863 }
 0x7ce   : > { %2862 = vst.msk [vmem:[#allocation2 + $0xb0] sm:$0xff] %vm2854_vm11, %v2845_v13  ;;  %vm3187_vm11 = vcmask 523264  }
 0x7cf   : > { %2888 = vst.msk [vmem:[#allocation2 + $0x8] sm:$0xff] %vm2887_vm12, %v2864_v58 }
 0x7d1   : > { %v2866_v35 = vpop.permute.xlu1 %2865  ;;  %v2868_v48 = vpop.permute.xlu0 %2867 }
 0x7d2   : > { %2889 = vst.msk [vmem:[#allocation2 + $0x20] sm:$0xff] %vm2887_vm12, %v2866_v35  ;;  %2890 = vst.msk [vmem:[#allocation2 + $0x38] sm:$0xff] %vm2887_vm12, %v2868_v48 }
 0x7d5   : > { %v2870_v61 = vpop.permute.xlu1 %2869  ;;  %v2872_v38 = vpop.permute.xlu0 %2871 }
 0x7d6   : > { %2891 = vst.msk [vmem:[#allocation2 + $0x50] sm:$0xff] %vm2887_vm12, %v2870_v61  ;;  %2892 = vst.msk [vmem:[#allocation2 + $0x68] sm:$0xff] %vm2887_vm12, %v2872_v38 }
 0x7d9   : > { %v2874_v27 = vpop.permute.xlu1 %2873  ;;  %v2876_v14 = vpop.permute.xlu0 %2875 }
 0x7da   : > { %2893 = vst.msk [vmem:[#allocation2 + $0x80] sm:$0xff] %vm2887_vm12, %v2874_v27  ;;  %2894 = vst.msk [vmem:[#allocation2 + $0x98] sm:$0xff] %vm2887_vm12, %v2876_v14  ;;  %v12930_v14 = vld [vmem:[#allocation2 + $0xa8] sm:$0xff] }
 0x7dd   : > { %v2878_v32 = vpop.permute.xlu1 %2877  ;;  %v2897_v31 = vpop.permute.xlu0 %2896 }
 0x7de   : > { %2895 = vst.msk [vmem:[#allocation2 + $0xb0] sm:$0xff] %vm2887_vm12, %v2878_v32  ;;  %vm3599_vm12 = vcmask 908288  }
 0x7df   : > { %2921 = vst.msk [vmem:[#allocation2 + $0x8] sm:$0xff] %vm2920_vm13, %v2897_v31 }
 0x7e1   : > { %v2899_v1 = vpop.permute.xlu1 %2898  ;;  %v2901_v2 = vpop.permute.xlu0 %2900 }
 0x7e2   : > { %2922 = vst.msk [vmem:[#allocation2 + $0x20] sm:$0xff] %vm2920_vm13, %v2899_v1  ;;  %2923 = vst.msk [vmem:[#allocation2 + $0x38] sm:$0xff] %vm2920_vm13, %v2901_v2 }
 0x7e5   : > { %v2903_v55 = vpop.permute.xlu1 %2902  ;;  %v2905_v3 = vpop.permute.xlu0 %2904 }
 0x7e6   : > { %2924 = vst.msk [vmem:[#allocation2 + $0x50] sm:$0xff] %vm2920_vm13, %v2903_v55  ;;  %2925 = vst.msk [vmem:[#allocation2 + $0x68] sm:$0xff] %vm2920_vm13, %v2905_v3 }
 0x7e9   : > { %v2907_v26 = vpop.permute.xlu1 %2906  ;;  %v2909_v4 = vpop.permute.xlu0 %2908 }
 0x7ea   : > { %2926 = vst.msk [vmem:[#allocation2 + $0x80] sm:$0xff] %vm2920_vm13, %v2907_v26  ;;  %2927 = vst.msk [vmem:[#allocation2 + $0x98] sm:$0xff] %vm2920_vm13, %v2909_v4 }
 0x7ed   : > { %v2911_v33 = vpop.permute.xlu1 %2910  ;;  %v2930_v28 = vpop.permute.xlu0 %2929 }
 0x7ee   : > { %2928 = vst.msk [vmem:[#allocation2 + $0xb0] sm:$0xff] %vm2920_vm13, %v2911_v33  ;;  %vm4110_vm13 = vcmask 769024  }
 0x7ef   : > { %2954 = vst.msk [vmem:[#allocation2 + $0x8] sm:$0xff] %vm2953_vm14, %v2930_v28 }
 0x7f1   : > { %v2932_v6 = vpop.permute.xlu1 %2931  ;;  %v2934_v19 = vpop.permute.xlu0 %2933 }
 0x7f2   : > { %2955 = vst.msk [vmem:[#allocation2 + $0x20] sm:$0xff] %vm2953_vm14, %v2932_v6  ;;  %2956 = vst.msk [vmem:[#allocation2 + $0x38] sm:$0xff] %vm2953_vm14, %v2934_v19 }
 0x7f5   : > { %v2936_v12 = vpop.permute.xlu1 %2935  ;;  %v2938_v59 = vpop.permute.xlu0 %2937 }
 0x7f6   : > { %2957 = vst.msk [vmem:[#allocation2 + $0x50] sm:$0xff] %vm2953_vm14, %v2936_v12  ;;  %2958 = vst.msk [vmem:[#allocation2 + $0x68] sm:$0xff] %vm2953_vm14, %v2938_v59 }
 0x7f9   : > { %v2940_v37 = vpop.permute.xlu1 %2939  ;;  %v2942_v57 = vpop.permute.xlu0 %2941 }
 0x7fa   : > { %2959 = vst.msk [vmem:[#allocation2 + $0x80] sm:$0xff] %vm2953_vm14, %v2940_v37  ;;  %2960 = vst.msk [vmem:[#allocation2 + $0x98] sm:$0xff] %vm2953_vm14, %v2942_v57 }
 0x7fd   : > { %v2944_v63 = vpop.permute.xlu1 %2943  ;;  %v2963_v5 = vpop.permute.xlu0 %2962 }
 0x7fe   : > { %2961 = vst.msk [vmem:[#allocation2 + $0xb0] sm:$0xff] %vm2953_vm14, %v2944_v63  ;;  %vm4281_vm14 = vcmask 760832  }
 0x7ff   : > { %2987 = vst.msk [vmem:[#allocation2 + $0x8] sm:$0xff] %vm2986_vm15, %v2963_v5 }
 0x801   : > { %v2965_v18 = vpop.permute.xlu1 %2964  ;;  %v2967_v23 = vpop.permute.xlu0 %2966 }
 0x802   : > { %2988 = vst.msk [vmem:[#allocation2 + $0x20] sm:$0xff] %vm2986_vm15, %v2965_v18  ;;  %2989 = vst.msk [vmem:[#allocation2 + $0x38] sm:$0xff] %vm2986_vm15, %v2967_v23 }
 0x805   : > { %v2969_v47 = vpop.permute.xlu1 %2968  ;;  %v2971_v41 = vpop.permute.xlu0 %2970 }
 0x806   : > { %2990 = vst.msk [vmem:[#allocation2 + $0x50] sm:$0xff] %vm2986_vm15, %v2969_v47  ;;  %2991 = vst.msk [vmem:[#allocation2 + $0x68] sm:$0xff] %vm2986_vm15, %v2971_v41 }
 0x809   : > { %v2973_v36 = vpop.permute.xlu1 %2972  ;;  %v2975_v34 = vpop.permute.xlu0 %2974 }
 0x80a   : > { %2992 = vst.msk [vmem:[#allocation2 + $0x80] sm:$0xff] %vm2986_vm15, %v2973_v36  ;;  %2993 = vst.msk [vmem:[#allocation2 + $0x98] sm:$0xff] %vm2986_vm15, %v2975_v34 }
 0x80d   : > { %v2977_v25 = vpop.permute.xlu1 %2976  ;;  %v2996_v22 = vpop.permute.xlu0 %2995 }
 0x80e   : > { %2994 = vst.msk [vmem:[#allocation2 + $0xb0] sm:$0xff] %vm2986_vm15, %v2977_v25  ;;  %vm4647_vm15 = vcmask 253064  }
 0x80f   : > { %3020 = vst.msk [vmem:[#allocation2 + $0x8] sm:$0xff] %vm3019_vm8, %v2996_v22 }
 0x811   : > { %v2998_v10 = vpop.permute.xlu1 %2997  ;;  %v3000_v54 = vpop.permute.xlu0 %2999 }
 0x812   : > { %3021 = vst.msk [vmem:[#allocation2 + $0x20] sm:$0xff] %vm3019_vm8, %v2998_v10  ;;  %3022 = vst.msk [vmem:[#allocation2 + $0x38] sm:$0xff] %vm3019_vm8, %v3000_v54 }
 0x815   : > { %v3002_v20 = vpop.permute.xlu1 %3001  ;;  %v3004_v52 = vpop.permute.xlu0 %3003 }
 0x816   : > { %v12858_v15 = vld [vmem:[#allocation2 + $0x8] sm:$0xff]  ;;  %3023 = vst.msk [vmem:[#allocation2 + $0x50] sm:$0xff] %vm3019_vm8, %v3002_v20  ;;  %3024 = vst.msk [vmem:[#allocation2 + $0x68] sm:$0xff] %vm3019_vm8, %v3004_v52 }
 0x817   : > { %v12864_v40 = vpack.i.bf16 %v12858_v15, %v12856_v16 }
 0x819   : > { %9719 = vrot.lane.b32.xlu0 %v12864_v40, %s16154_s24  ;;  %v3006_v46 = vpop.permute.xlu1 %3005  ;;  %v3008_v8 = vpop.permute.xlu0 %3007  ;;  %v12870_v44 = vld [vmem:[#allocation2 + $0x20] sm:$0xff]  ;;  %v12874_v43 = vld [vmem:[#allocation2 + $0x38] sm:$0xff] }
 0x81a   : > { %3025 = vst.msk [vmem:[#allocation2 + $0x80] sm:$0xff] %vm3019_vm8, %v3006_v46  ;;  %3026 = vst.msk [vmem:[#allocation2 + $0x98] sm:$0xff] %vm3019_vm8, %v3008_v8  ;;  %v9723_v45 = vpack.i.bf16 %v12870_v44, %v12868_v9  ;;  %v12882_v62 = vpack.i.bf16 %v12874_v43, %v12872_v17  ;;  %v9324_v39 = vpack.c.bf16 %v12870_v44, %v12858_v15 }
 0x81c   : > { %9724 = vrot.lane.b32.xlu1 %v9723_v45, %s16154_s24 }
 0x81d   : > { %9729 = vrot.lane.b32.xlu0 %v12882_v62, %s16154_s24  ;;  %v3010_v56 = vpop.permute.xlu1 %3009  ;;  %v3037_v53 = vpop.permute.xlu0 %3036  ;;  %v12891_v30 = vld [vmem:[#allocation2 + $0x50] sm:$0xff]  ;;  %v12895_v21 = vld [vmem:[#allocation2 + $0x68] sm:$0xff] }
 0x81e   : > { %3027 = vst.msk [vmem:[#allocation2 + $0xb0] sm:$0xff] %vm3019_vm8, %v3010_v56  ;;  %v9733_v51 = vpack.i.bf16 %v12891_v30, %v12889_v0  ;;  %v12902_v29 = vpack.i.bf16 %v12895_v21, %v12893_v7  ;;  %v9328_v42 = vpack.c.bf16 %v12891_v30, %v12874_v43  ;;  %vm4656_vm8 = vcmask 384264  }
 0x820   : > { %9734 = vrot.lane.b32.xlu1 %v9733_v51, %s16154_s24 }
 0x821   : > { %9739 = vrot.lane.b32.xlu0 %v12902_v29, %s16154_s24  ;;  %v3039_v60 = vpop.permute.xlu1 %3038  ;;  %v3041_v24 = vpop.permute.xlu0 %3040  ;;  %v12911_v49 = vld [vmem:[#allocation2 + $0x80] sm:$0xff]  ;;  %v12915_v13 = vld [vmem:[#allocation2 + $0x98] sm:$0xff] }
 0x822   : > { %v3069_v58 = vsel %vm3068_vm9, %v3037_v53, %v3039_v60  ;;  %v9743_v35 = vpack.i.bf16 %v12911_v49, %v12909_v11  ;;  %v12922_v48 = vpack.i.bf16 %v12915_v13, %v12913_v50  ;;  %v9332_v61 = vpack.c.bf16 %v12911_v49, %v12895_v21 }
 0x823   : > { %3086 = vst.msk [vmem:[#allocation2 + $0x10] sm:$0xff] %vm3085_vm10, %v3069_v58  ;;  %v13046_v58 = vpack.i.bf16 %v12889_v0, %v12872_v17 }
 0x824   : > { %9744 = vrot.lane.b32.xlu1 %v9743_v35, %s16154_s24 }
 0x825   : > { %9749 = vrot.lane.b32.xlu0 %v12922_v48, %s16154_s24  ;;  %v3043_v38 = vpop.permute.xlu1 %3042  ;;  %v3045_v27 = vpop.permute.xlu0 %3044  ;;  %v12932_v32 = vld [vmem:[#allocation2 + $0xb0] sm:$0xff] }
 0x826   : > { %v3070_v31 = vsel %vm3068_vm9, %v3041_v24, %v3043_v38  ;;  %v9753_v1 = vpack.i.bf16 %v12932_v32, %v12930_v14  ;;  %v9336_v2 = vpack.c.bf16 %v12932_v32, %v12915_v13  ;;  %v13069_v38 = vpack.i.bf16 %v12930_v14, %v12913_v50 }
 0x827   : > { %3087 = vst.msk [vmem:[#allocation2 + $0x28] sm:$0xff] %vm3085_vm10, %v3070_v31 }
 0x828   : > { %9754 = vrot.lane.b32.xlu1 %v9753_v1, %s16154_s24 }
 0x829   : > { %9759 = vrot.lane.b32.xlu0 %v12864_v40, %s16142_s25  ;;  %v3047_v55 = vpop.permute.xlu1 %3046  ;;  %v3049_v3 = vpop.permute.xlu0 %3048 }
 0x82a   : > { %v3071_v26 = vsel %vm3068_vm9, %v3045_v27, %v3047_v55  ;;  %v3505_v63 = vld [vmem:[#allocation2 + $0x10] sm:$0xff] }
 0x82b   : > { %3088 = vst.msk [vmem:[#allocation2 + $0x40] sm:$0xff] %vm3085_vm10, %v3071_v26  ;;  %v9803_v47 = vpack.i.bf16 %v12868_v9, %v3505_v63 }
 0x82c   : > { %9764 = vrot.lane.b32.xlu1 %v9723_v45, %s16142_s25 }
 0x82d   : > { %9769 = vrot.lane.b32.xlu0 %v12882_v62, %s16142_s25  ;;  %v3051_v4 = vpop.permute.xlu1 %3050  ;;  %v3053_v33 = vpop.permute.xlu0 %3052 }
 0x82e   : > { %v3072_v28 = vsel %vm3068_vm9, %v3049_v3, %v3051_v4  ;;  %v3508_v5 = vld [vmem:[#allocation2 + $0x28] sm:$0xff] }
 0x82f   : > { %3089 = vst.msk [vmem:[#allocation2 + $0x58] sm:$0xff] %vm3085_vm10, %v3072_v28  ;;  %v12966_v41 = vpack.i.bf16 %v3508_v5, %v12870_v44 }
 0x830   : > { %9774 = vrot.lane.b32.xlu1 %v9733_v51, %s16142_s25 }
 0x831   : > { %9779 = vrot.lane.b32.xlu0 %v12902_v29, %s16142_s25  ;;  %v3055_v6 = vpop.permute.xlu1 %3054  ;;  %v3057_v19 = vpop.permute.xlu0 %3056 }
 0x832   : > { %v3073_v12 = vsel %vm3068_vm9, %v3053_v33, %v3055_v6  ;;  %v3511_v36 = vld [vmem:[#allocation2 + $0x40] sm:$0xff] }
 0x833   : > { %3090 = vst.msk [vmem:[#allocation2 + $0x70] sm:$0xff] %vm3085_vm10, %v3073_v12  ;;  %v9818_v10 = vpack.i.bf16 %v12889_v0, %v3511_v36 }
 0x834   : > { %9784 = vrot.lane.b32.xlu1 %v9743_v35, %s16142_s25  ;;  %v13054_v35 = vpack.i.bf16 %v12909_v11, %v12893_v7 }
 0x835   : > { %9789 = vrot.lane.b32.xlu0 %v12922_v48, %s16142_s25  ;;  %v3059_v59 = vpop.permute.xlu1 %3058  ;;  %v3061_v57 = vpop.permute.xlu0 %3060 }
 0x836   : > { %v3074_v37 = vsel %vm3068_vm9, %v3057_v19, %v3059_v59  ;;  %v3514_v54 = vld [vmem:[#allocation2 + $0x58] sm:$0xff] }
 0x837   : > { %3091 = vst.msk [vmem:[#allocation2 + $0x88] sm:$0xff] %vm3085_vm10, %v3074_v37  ;;  %v12979_v20 = vpack.i.bf16 %v3514_v54, %v12891_v30 }
 0x838   : > { %9794 = vrot.lane.b32.xlu1 %v9753_v1, %s16142_s25  ;;  %s10294_s25 = smov 42  }
 0x839   : > { %9799 = vrot.lane.b32.xlu0 %v12864_v40, %s10286_s30  ;;  %v3063_v18 = vpop.permute.xlu1 %3062  ;;  %v3065_v34 = vpop.permute.xlu0 %3064 }
 0x83a   : > { %v3075_v23 = vsel %vm3068_vm9, %v3061_v57, %v3063_v18  ;;  %v3517_v52 = vld [vmem:[#allocation2 + $0x70] sm:$0xff] }
 0x83b   : > { %3092 = vst.msk [vmem:[#allocation2 + $0xa0] sm:$0xff] %vm3085_vm10, %v3075_v23  ;;  %v9833_v8 = vpack.i.bf16 %v12909_v11, %v3517_v52  ;;  %v13042_v24 = vpack.i.bf16 %v3517_v52, %v12895_v21 }
 0x83c   : > { %9804 = vrot.lane.b32.xlu1 %v9803_v47, %s10286_s30 }
 0x83d   : > { %9809 = vrot.lane.b32.xlu0 %v12966_v41, %s10286_s30  ;;  %v3067_v25 = vpop.permute.xlu1 %3066 }
 0x83e   : > { %v3076_v22 = vsel %vm3068_vm9, %v3065_v34, %v3067_v25  ;;  %v3520_v46 = vld [vmem:[#allocation2 + $0x88] sm:$0xff]  ;;  %vm4665_vm9 = vcmask 515464  }
 0x83f   : > { %3093 = vst.msk [vmem:[#allocation2 + $0xb8] sm:$0xff] %vm3085_vm10, %v3076_v22  ;;  %v12987_v45 = vpack.i.bf16 %v3520_v46, %v12911_v49  ;;  %vm4674_vm10 = vcmask 646664  }
 0x840   : > { %9814 = vrot.lane.b32.xlu1 %v12882_v62, %s10286_s30 }
 0x841   : > { %9819 = vrot.lane.b32.xlu0 %v9818_v10, %s10286_s30 }
 0x842   : > { %v3523_v56 = vld [vmem:[#allocation2 + $0xa0] sm:$0xff] }
 0x843   : > { %v9848_v53 = vpack.i.bf16 %v12930_v14, %v3523_v56 }
 0x844   : > { %9824 = vrot.lane.b32.xlu1 %v12979_v20, %s10286_s30 }
 0x845   : > { %9829 = vrot.lane.b32.xlu0 %v12902_v29, %s10286_s30 }
 0x846   : > { %v3526_v51 = vld [vmem:[#allocation2 + $0xb8] sm:$0xff] }
 0x847   : > { %v12997_v60 = vpack.i.bf16 %v3526_v51, %v12932_v32 }
 0x848   : > { %9834 = vrot.lane.b32.xlu1 %v9833_v8, %s10286_s30 }
 0x849   : > { %9839 = vrot.lane.b32.xlu0 %v12987_v45, %s10286_s30 }
 0x84c   : > { %9844 = vrot.lane.b32.xlu1 %v12922_v48, %s10286_s30 }
 0x84d   : > { %9849 = vrot.lane.b32.xlu0 %v9848_v53, %s10286_s30 }
 0x850   : > { %9854 = vrot.lane.b32.xlu1 %v12997_v60, %s10286_s30 }
 0x851   : > { %9859 = vrot.lane.b32.xlu0 %v12864_v40, %s16136_s22  ;;  %v13020_v40 = vpack.i.bf16 %v3505_v63, %v12858_v15 }
 0x854   : > { %9864 = vrot.lane.b32.xlu1 %v9803_v47, %s16136_s22 }
 0x855   : > { %9869 = vrot.lane.b32.xlu0 %v12966_v41, %s16136_s22 }
 0x858   : > { %9874 = vrot.lane.b32.xlu1 %v12882_v62, %s16136_s22  ;;  %v13028_v62 = vpack.i.bf16 %v12868_v9, %v12856_v16 }
 0x859   : > { %9879 = vrot.lane.b32.xlu0 %v9818_v10, %s16136_s22 }
 0x85c   : > { %9884 = vrot.lane.b32.xlu1 %v12979_v20, %s16136_s22 }
 0x85d   : > { %9889 = vrot.lane.b32.xlu0 %v12902_v29, %s16136_s22  ;;  %v13035_v29 = vpack.i.bf16 %v3511_v36, %v12874_v43 }
 0x860   : > { %9894 = vrot.lane.b32.xlu1 %v9833_v8, %s16136_s22 }
 0x861   : > { %9899 = vrot.lane.b32.xlu0 %v12987_v45, %s16136_s22 }
 0x864   : > { %9904 = vrot.lane.b32.xlu1 %v12922_v48, %s16136_s22  ;;  %v13061_v48 = vpack.i.bf16 %v3523_v56, %v12915_v13  ;;  %v3094_v13 = vld [vmem:[%s16021_s3] sm:$0xff] }
 0x865   : > { %9909 = vrot.lane.b32.xlu0 %v9848_v53, %s16136_s22 }
 0x868   : > { %9914 = vrot.lane.b32.xlu1 %v12997_v60, %s16136_s22  ;;  %s16140_s22 = smov 94  }
 0x869   : > { %9919 = vrot.lane.b32.xlu0 %v13020_v40, %s16138_s21 }
 0x86c   : > { %9924 = vrot.lane.b32.xlu1 %v12966_v41, %s16138_s21 }
 0x86d   : > { %9929 = vrot.lane.b32.xlu0 %v13028_v62, %s16138_s21 }
 0x870   : > { %9934 = vrot.lane.b32.xlu1 %v13035_v29, %s16138_s21 }
 0x871   : > { %9939 = vrot.lane.b32.xlu0 %v12979_v20, %s16138_s21 }
 0x874   : > { %9944 = vrot.lane.b32.xlu1 %v13046_v58, %s16138_s21 }
 0x875   : > { %9949 = vrot.lane.b32.xlu0 %v13042_v24, %s16138_s21 }
 0x878   : > { %9954 = vrot.lane.b32.xlu1 %v12987_v45, %s16138_s21 }
 0x879   : > { %9959 = vrot.lane.b32.xlu0 %v13054_v35, %s16138_s21 }
 0x87c   : > { %9964 = vrot.lane.b32.xlu1 %v13061_v48, %s16138_s21 }
 0x87d   : > { %9969 = vrot.lane.b32.xlu0 %v12997_v60, %s16138_s21 }
 0x880   : > { %9974 = vrot.lane.b32.xlu1 %v13069_v38, %s16138_s21  ;;  %s10288_s21 = smov 93  }
 0x881   : > { %9979 = vrot.lane.b32.xlu0 %v13020_v40, %s16140_s22 }
 0x884   : > { %9984 = vrot.lane.b32.xlu1 %v12966_v41, %s16140_s22 }
 0x885   : > { %9989 = vrot.lane.b32.xlu0 %v13028_v62, %s16140_s22 }
 0x888   : > { %9994 = vrot.lane.b32.xlu1 %v13035_v29, %s16140_s22 }
 0x889   : > { %9999 = vrot.lane.b32.xlu0 %v12979_v20, %s16140_s22 }
 0x88b   : > { %v9720_v27 = vpop.permute.xlu0 %9719 }
 0x88c   : > { %v9721_v31 = vunpack.i.l.bf16 %v9720_v27  ;;  %10004 = vrot.lane.b32.xlu1 %v13046_v58, %s16140_s22  ;;  %v9722_v1 = vunpack.i.h.bf16 %v9720_v27 }
 0x88d   : > { %10009 = vrot.lane.b32.xlu0 %v13042_v24, %s16140_s22 }
 0x88e   : > { %v9725_v55 = vpop.permute.xlu1 %9724  ;;  %v3163_v33 = vsel %vm588_vm0, %v9721_v31, %v9722_v1 }
 0x88f   : > { %v9730_v3 = vpop.permute.xlu0 %9729  ;;  %v9726_v26 = vunpack.i.l.bf16 %v9725_v55  ;;  %v9727_v4 = vunpack.i.h.bf16 %v9725_v55 }
 0x890   : > { %10014 = vrot.lane.b32.xlu1 %v12987_v45, %s16140_s22  ;;  %v9732_v28 = vunpack.i.h.bf16 %v9730_v3  ;;  %v9731_v6 = vunpack.i.l.bf16 %v9730_v3 }
 0x891   : > { %10019 = vrot.lane.b32.xlu0 %v13054_v35, %s16140_s22  ;;  %v9308_v19 = vpack.c.bf16 %v9727_v4, %v9722_v1  ;;  %v3164_v12 = vsel %vm588_vm0, %v9726_v26, %v9727_v4 }
 0x892   : > { %v9735_v59 = vpop.permute.xlu1 %9734  ;;  %v9310_v57 = vpack.c.bf16 %v3164_v12, %v3163_v33  ;;  %v3165_v36 = vsel %vm588_vm0, %v9731_v6, %v9732_v28 }
 0x893   : > { %v9740_v37 = vpop.permute.xlu0 %9739  ;;  %v9737_v63 = vunpack.i.h.bf16 %v9735_v59  ;;  %v9736_v5 = vunpack.i.l.bf16 %v9735_v59  ;;  %9309 = vmatprep.subr.bf16.mxu0 %v9308_v19 }
 0x894   : > { %v9742_v18 = vunpack.i.h.bf16 %v9740_v37  ;;  %v9741_v23 = vunpack.i.l.bf16 %v9740_v37  ;;  %10024 = vrot.lane.b32.xlu1 %v13061_v48, %s16140_s22  ;;  %9311 = vmatpush1.bf16.msra.mxu0 %v9310_v57  ;;  %v9072_v37 = vld [vmem:[%s16021_s3 + $0x10] sm:$0xff]  ;;  %v9326_v57 = vpack.c.bf16 %v12868_v9, %v12856_v16  ;;  %v9330_v16 = vpack.c.bf16 %v12889_v0, %v12872_v17 }
 0x895   : > { %10029 = vrot.lane.b32.xlu0 %v12997_v60, %s16140_s22  ;;  %v9312_v47 = vpack.c.bf16 %v9737_v63, %v9732_v28  ;;  %v3166_v34 = vsel %vm588_vm0, %v9736_v5, %v9737_v63  ;;  %v9073_v63 = vld [vmem:[%s16021_s3 + $0x18] sm:$0xff]  ;;  %v9334_v17 = vpack.c.bf16 %v12909_v11, %v12893_v7  ;;  %v9338_v7 = vpack.c.bf16 %v12930_v14, %v12913_v50 }
 0x896   : > { %v9745_v25 = vpop.permute.xlu1 %9744  ;;  %v9314_v10 = vpack.c.bf16 %v3166_v34, %v3165_v36  ;;  %v3167_v46 = vsel %vm588_vm0, %v9741_v23, %v9742_v18 }
 0x897   : > { %v9750_v22 = vpop.permute.xlu0 %9749  ;;  %v9747_v54 = vunpack.i.h.bf16 %v9745_v25  ;;  %v9746_v52 = vunpack.i.l.bf16 %v9745_v25  ;;  %9313 = vmatprep.subr.bf16.mxu0 %v9312_v47 }
 0x898   : > { %10034 = vrot.lane.b32.xlu1 %v13069_v38, %s16140_s22  ;;  %v9752_v8 = vunpack.i.h.bf16 %v9750_v22  ;;  %v9751_v56 = vunpack.i.l.bf16 %v9750_v22  ;;  %9315 = vmatpush1.bf16.msra.mxu0 %v9314_v10  ;;  %s10290_s22 = smov 96  }
 0x899   : > { %10039 = vrot.lane.b32.xlu0 %v13020_v40, %s10288_s21  ;;  %v9316_v53 = vpack.c.bf16 %v9747_v54, %v9742_v18  ;;  %v3168_v51 = vsel %vm588_vm0, %v9746_v52, %v9747_v54 }
 0x89a   : > { %v9755_v27 = vpop.permute.xlu1 %9754  ;;  %v9318_v1 = vpack.c.bf16 %v3168_v51, %v3167_v46  ;;  %v3169_v4 = vsel %vm588_vm0, %v9751_v56, %v9752_v8 }
 0x89b   : > { %v13105_v31 = vpop.permute.xlu0 %9759  ;;  %v9757_v55 = vunpack.i.h.bf16 %v9755_v27  ;;  %v9756_v3 = vunpack.i.l.bf16 %v9755_v27  ;;  %9317 = vmatprep.subr.bf16.mxu0 %v9316_v53 }
 0x89c   : > { %10044 = vrot.lane.b32.xlu1 %v12966_v41, %s10288_s21  ;;  %9319 = vmatpush1.bf16.msra.mxu0 %v9318_v1  ;;  %v9762_v18 = vunpack.i.h.bf16 %v13105_v31  ;;  %v9761_v21 = vunpack.i.l.bf16 %v13105_v31 }
 0x89d   : > { %10049 = vrot.lane.b32.xlu0 %v13028_v62, %s10288_s21  ;;  %v9320_v26 = vpack.c.bf16 %v9757_v55, %v9752_v8  ;;  %v3170_v33 = vsel %vm588_vm0, %v9756_v3, %v9757_v55 }
 0x89e   : > { %v9765_v28 = vpop.permute.xlu1 %9764  ;;  %v9322_v19 = vpack.c.bf16 %v3170_v33, %v3169_v4  ;;  %v3389_v32 = vsel %vm16212_vm1, %v9761_v21, %v9762_v18 }
 0x89f   : > { %v13113_v6 = vpop.permute.xlu0 %9769  ;;  %9321 = vmatprep.subr.bf16.mxu0 %v9320_v26  ;;  %v9767_v43 = vunpack.i.h.bf16 %v9765_v28  ;;  %v9766_v0 = vunpack.i.l.bf16 %v9765_v28 }
 0x8a0   : > { %10054 = vrot.lane.b32.xlu1 %v13035_v29, %s10288_s21  ;;  %9323 = vmatpush1.bf16.msra.mxu0 %v9322_v19  ;;  %v9771_v50 = vunpack.i.l.bf16 %v13113_v6 }
 0x8a1   : > { %10059 = vrot.lane.b32.xlu0 %v12979_v20, %s10288_s21  ;;  %9325 = vmatprep.subr.bf16.mxu0 %v9324_v39  ;;  %v13138_v39 = vld [vmem:[#allocation3] sm:$0xff]  ;;  %v3390_v11 = vsel %vm16212_vm1, %v9766_v0, %v9767_v43  ;;  %v9340_v23 = vpack.c.bf16 %v9767_v43, %v9762_v18 }
 0x8a2   : > { %v9775_v12 = vpop.permute.xlu1 %9774  ;;  %v9342_v14 = vpack.c.bf16 %v3390_v11, %v3389_v32 }
 0x8a3   : > { %v13122_v59 = vpop.permute.xlu0 %9779  ;;  %9074 = vmatmul.mubr.msk.f32.vlgmr.msra.gmra.mrb[0].mxu0 %vm3187_vm11, %v9072_v37  ;;  %v9777_v49 = vunpack.i.h.bf16 %v9775_v12 }
 0x8a4   : > { %10064 = vrot.lane.b32.xlu1 %v13046_v58, %s10288_s21  ;;  %9327 = vmatpush1.bf16.msra.mxu0 %v9326_v57  ;;  %v9782_v52 = vunpack.i.h.bf16 %v13122_v59  ;;  %v9781_v46 = vunpack.i.l.bf16 %v13122_v59 }
 0x8a5   : > { %10069 = vrot.lane.b32.xlu0 %v13042_v24, %s10288_s21  ;;  %3264 = vmatprep.mubr.f32.mxu0 %v13138_v39 }
 0x8a6   : > { %v13134_v15 = vpop.permute.xlu1 %9784  ;;  %9329 = vmatprep.subr.bf16.mxu0 %v9328_v42  ;;  %v3393_v3 = vsel %vm16212_vm1, %v9781_v46, %v9782_v52 }
 0x8a7   : > { %v13136_v44 = vpop.permute.xlu0 %9789  ;;  %9075 = vmatmul.mubr.msk.f32.gmra.mrb[2].mxu0 %vm3187_vm11, %v9073_v63  ;;  %v9787_v34 = vunpack.i.h.bf16 %v13134_v15  ;;  %v9786_v25 = vunpack.i.l.bf16 %v13134_v15 }
 0x8a8   : > { %10074 = vrot.lane.b32.xlu1 %v12987_v45, %s10288_s21  ;;  %9331 = vmatpush1.bf16.msra.mxu0 %v9330_v16  ;;  %v9792_v26 = vunpack.i.h.bf16 %v13136_v44  ;;  %v9791_v4 = vunpack.i.l.bf16 %v13136_v44 }
 0x8a9   : > { %10079 = vrot.lane.b32.xlu0 %v13054_v35, %s10288_s21  ;;  %3341 = vmatprep.mubr.f32.mxu0 %v13138_v39  ;;  %v3394_v56 = vsel %vm16212_vm1, %v9786_v25, %v9787_v34  ;;  %v9348_v27 = vpack.c.bf16 %v9787_v34, %v9782_v52  ;;  %v9079_v25 = vld [vmem:[%s16021_s3 + $0x28] sm:$0xff] }
 0x8aa   : > { %v13154_v9 = vpop.permute.xlu1 %9794  ;;  %9333 = vmatprep.subr.bf16.mxu0 %v9332_v61  ;;  %v9776_v61 = vunpack.i.l.bf16 %v9775_v12  ;;  %v9350_v28 = vpack.c.bf16 %v3394_v56, %v3393_v3  ;;  %v3395_v44 = vsel %vm16212_vm1, %v9791_v4, %v9792_v26  ;;  %v6319_v56 = vld [vmem:[%s16024_s6] sm:$0xff] }
 0x8ab   : > { %v13156_v5 = vpop.permute.xlu0 %9799  ;;  %v9797_v53 = vunpack.i.h.bf16 %v13154_v9  ;;  %v9796_v51 = vunpack.i.l.bf16 %v13154_v9 }
 0x8ac   : > { %10084 = vrot.lane.b32.xlu1 %v13061_v48, %s10288_s21  ;;  %9335 = vmatpush1.bf16.msra.mxu0 %v9334_v17  ;;  %v9802_v33 = vunpack.i.h.bf16 %v13156_v5  ;;  %v9801_v63 = vunpack.i.l.bf16 %v13156_v5 }
 0x8ad   : > { %10089 = vrot.lane.b32.xlu0 %v12997_v60, %s10288_s21  ;;  %9337 = vmatprep.subr.bf16.mxu0 %v9336_v2  ;;  %v9772_v2 = vunpack.i.h.bf16 %v13113_v6  ;;  %v3396_v6 = vsel %vm16212_vm1, %v9796_v51, %v9797_v53  ;;  %v9352_v12 = vpack.c.bf16 %v9797_v53, %v9792_v26 }
 0x8ae   : > { %v13168_v30 = vpop.permute.xlu1 %9804  ;;  %v9354_v17 = vpack.c.bf16 %v3396_v6, %v3395_v44 }
 0x8af   : > { %v13170_v42 = vpop.permute.xlu0 %9809  ;;  %v9344_v22 = vpack.c.bf16 %v9777_v49, %v9772_v2  ;;  %v9806_v31 = vunpack.i.l.bf16 %v13168_v30  ;;  %v9807_v19 = vunpack.i.h.bf16 %v13168_v30 }
 0x8b0   : > { %10094 = vrot.lane.b32.xlu1 %v13069_v38, %s10288_s21  ;;  %9339 = vmatpush1.bf16.msra.mxu0 %v9338_v7  ;;  %v9812_v1 = vunpack.i.h.bf16 %v13170_v42  ;;  %v9811_v55 = vunpack.i.l.bf16 %v13170_v42  ;;  %v3600_v7 = vsel %vm3599_vm12, %v9801_v63, %v9802_v33  ;;  %s10291_s21 = smov 95  }
 0x8b1   : > { %10099 = vrot.lane.b32.xlu0 %v13020_v40, %s16146_s27  ;;  %9341 = vmatprep.subr.bf16.mxu0 %v9340_v23  ;;  %v3392_v40 = vsel %vm16212_vm1, %v9776_v61, %v9777_v49 }
 0x8b2   : > { %v13184_v47 = vpop.permute.xlu1 %9814  ;;  %v3602_v43 = vsel %vm3599_vm12, %v9807_v19, %v9811_v55 }
 0x8b3   : > { %v13186_v36 = vpop.permute.xlu0 %9819  ;;  %9076 = vmatmul.mubr.msk.f32.vlgmr.msra.gmra.mrb[0].mxu0 %vm3187_vm11, %v3094_v13  ;;  %v9817_v16 = vunpack.i.h.bf16 %v13184_v47  ;;  %v9816_v11 = vunpack.i.l.bf16 %v13184_v47  ;;  %v9358_v23 = vpack.c.bf16 %v3602_v43, %v3600_v7 }
 0x8b4   : > { %10104 = vrot.lane.b32.xlu1 %v12966_v41, %s16146_s27  ;;  %9343 = vmatpush1.bf16.msra.mxu0 %v9342_v14  ;;  %v3095_v41 = vld [vmem:[%s16021_s3 + $0x8] sm:$0xff]  ;;  %v9821_v9 = vunpack.i.l.bf16 %v13186_v36  ;;  %v9822_v49 = vunpack.i.h.bf16 %v13186_v36  ;;  %v4571_v36 = vld [vmem:[%s16022_s4] sm:$0xff] }
 0x8b5   : > { %10109 = vrot.lane.b32.xlu0 %v13028_v62, %s16146_s27  ;;  %3347 = vmatprep.mubr.f32.mxu0 %v13138_v39  ;;  %v3391_v62 = vsel %vm16212_vm1, %v9771_v50, %v9772_v2 }
 0x8b6   : > { %v13202_v10 = vpop.permute.xlu1 %9824  ;;  %9345 = vmatprep.subr.bf16.mxu0 %v9344_v22  ;;  %v9346_v8 = vpack.c.bf16 %v3392_v40, %v3391_v62  ;;  %v3605_v13 = vsel %vm3599_vm12, %v9817_v16, %v9821_v9  ;;  %v3604_v22 = vsel %vm3599_vm12, %v9816_v11, %v9817_v16 }
 0x8b7   : > { %v13204_v54 = vpop.permute.xlu0 %9829  ;;  %9077 = vmatmul.mubr.msk.f32.gmra.mrb[2].mxu0 %vm3187_vm11, %v3095_v41  ;;  %v9827_v59 = vunpack.i.h.bf16 %v13202_v10  ;;  %v9826_v37 = vunpack.i.l.bf16 %v13202_v10 }
 0x8b8   : > { %10114 = vrot.lane.b32.xlu1 %v13035_v29, %s16146_s27  ;;  %9347 = vmatpush1.bf16.msra.mxu0 %v9346_v8  ;;  %v9832_v61 = vunpack.i.h.bf16 %v13204_v54  ;;  %v9831_v10 = vunpack.i.l.bf16 %v13204_v54  ;;  %v4572_v54 = vld [vmem:[%s16022_s4 + $0x8] sm:$0xff] }
 0x8b9   : > { %10119 = vrot.lane.b32.xlu0 %v12979_v20, %s16146_s27  ;;  %3483 = vmatprep.mubr.f32.mxu0 %v13138_v39  ;;  %v3606_v32 = vsel %vm3599_vm12, %v9822_v49, %v9826_v37  ;;  %v9082_v49 = vld [vmem:[%s16021_s3 + $0x30] sm:$0xff] }
 0x8ba   : > { %v13224_v20 = vpop.permute.xlu1 %9834  ;;  %9349 = vmatprep.subr.bf16.mxu0 %v9348_v27  ;;  %v9362_v52 = vpack.c.bf16 %v3606_v32, %v3604_v22  ;;  %v9083_v22 = vld [vmem:[%s16021_s3 + $0x38] sm:$0xff] }
 0x8bb   : > { %v13226_v29 = vpop.permute.xlu0 %9839  ;;  %v9836_v30 = vunpack.i.l.bf16 %v13224_v20  ;;  %v9837_v2 = vunpack.i.h.bf16 %v13224_v20 }
 0x8bc   : > { %10124 = vrot.lane.b32.xlu1 %v13046_v58, %s16146_s27  ;;  %9351 = vmatpush1.bf16.msra.mxu0 %v9350_v28  ;;  %v3603_v58 = vsel %vm3599_vm12, %v9811_v55, %v9812_v1  ;;  %v9842_v42 = vunpack.i.h.bf16 %v13226_v29  ;;  %v9841_v5 = vunpack.i.l.bf16 %v13226_v29  ;;  %v3608_v55 = vsel %vm3599_vm12, %v9831_v10, %v9832_v61 }
 0x8bd   : > { %10129 = vrot.lane.b32.xlu0 %v13042_v24, %s16146_s27  ;;  %v3601_v24 = vsel %vm3599_vm12, %v9802_v33, %v9806_v31  ;;  %9353 = vmatprep.subr.bf16.mxu0 %v9352_v12  ;;  %v6321_v12 = vld [vmem:[%s16024_s6 + $0x10] sm:$0xff] }
 0x8be   : > { %v13241_v57 = vpop.permute.xlu1 %9844  ;;  %v9356_v0 = vpack.c.bf16 %v3603_v58, %v3601_v24  ;;  %v3611_v34 = vsel %vm3599_vm12, %v9841_v5, %v9842_v42  ;;  %v3610_v46 = vsel %vm3599_vm12, %v9837_v2, %v9841_v5  ;;  %v6323_v42 = vld [vmem:[%s16024_s6 + $0x20] sm:$0xff]  ;;  %v6322_v5 = vld [vmem:[%s16024_s6 + $0x18] sm:$0xff] }
 0x8bf   : > { %v13243_v15 = vpop.permute.xlu0 %9849  ;;  %v9847_v41 = vunpack.i.h.bf16 %v13241_v57  ;;  %v9846_v20 = vunpack.i.l.bf16 %v13241_v57  ;;  %v9366_v26 = vpack.c.bf16 %v3610_v46, %v3608_v55 }
 0x8c0   : > { %10134 = vrot.lane.b32.xlu1 %v12987_v45, %s16146_s27  ;;  %9355 = vmatpush1.bf16.msra.mxu0 %v9354_v17  ;;  %v3607_v45 = vsel %vm3599_vm12, %v9826_v37, %v9827_v59  ;;  %v9851_v62 = vunpack.i.l.bf16 %v13243_v15  ;;  %v9852_v29 = vunpack.i.h.bf16 %v13243_v15  ;;  %v6320_v59 = vld [vmem:[%s16024_s6 + $0x8] sm:$0xff] }
 0x8c1   : > { %10139 = vrot.lane.b32.xlu0 %v13054_v35, %s16146_s27  ;;  %v9078_v35 = vld [vmem:[%s16021_s3 + $0x20] sm:$0xff]  ;;  %9357 = vmatprep.subr.bf16.mxu0 %v9356_v0  ;;  %v9360_v47 = vpack.c.bf16 %v3607_v45, %v3605_v13  ;;  %v3612_v63 = vsel %vm3599_vm12, %v9846_v20, %v9847_v41 }
 0x8c2   : > { %v9855_v18 = vpop.permute.xlu1 %9854  ;;  %v3613_v4 = vsel %vm3599_vm12, %v9847_v41, %v9851_v62 }
 0x8c3   : > { %v13259_v21 = vpop.permute.xlu0 %9859  ;;  %9080 = vmatmul.mubr.msk.f32.vlgmr.msra.gmra.mrb[0].mxu0 %vm3187_vm11, %v9078_v35  ;;  %v9857_v50 = vunpack.i.h.bf16 %v9855_v18  ;;  %v9856_v14 = vunpack.i.l.bf16 %v9855_v18 }
 0x8c4   : > { %10144 = vrot.lane.b32.xlu1 %v13061_v48, %s16146_s27  ;;  %9359 = vmatpush1.bf16.msra.mxu0 %v9358_v23  ;;  %v3609_v48 = vsel %vm3599_vm12, %v9832_v61, %v9836_v30  ;;  %v9862_v3 = vunpack.i.h.bf16 %v13259_v21  ;;  %v9861_v28 = vunpack.i.l.bf16 %v13259_v21 }
 0x8c5   : > { %10149 = vrot.lane.b32.xlu0 %v12997_v60, %s16146_s27  ;;  %3489 = vmatprep.mubr.f32.mxu0 %v13138_v39  ;;  %v9364_v8 = vpack.c.bf16 %v3611_v34, %v3609_v48  ;;  %v3615_v1 = vsel %vm3599_vm12, %v9856_v14, %v9857_v50  ;;  %v3614_v33 = vsel %vm3599_vm12, %v9852_v29, %v9856_v14  ;;  %v6325_v14 = vld [vmem:[%s16024_s6 + $0x30] sm:$0xff] }
 0x8c6   : > { %v9865_v60 = vpop.permute.xlu1 %9864  ;;  %9361 = vmatprep.subr.bf16.mxu0 %v9360_v47  ;;  %v9368_v19 = vpack.c.bf16 %v3615_v1, %v3613_v4  ;;  %v9370_v17 = vpack.c.bf16 %v3614_v33, %v3612_v63  ;;  %v3770_v43 = vsel %vm16211_vm2, %v9861_v28, %v9862_v3 }
 0x8c7   : > { %v9870_v40 = vpop.permute.xlu0 %9869  ;;  %9081 = vmatmul.mubr.msk.f32.gmra.mrb[2].mxu0 %vm3187_vm11, %v9079_v25  ;;  %v9866_v53 = vunpack.i.l.bf16 %v9865_v60  ;;  %v9867_v6 = vunpack.i.h.bf16 %v9865_v60  ;;  %v6324_v60 = vld [vmem:[%s16024_s6 + $0x28] sm:$0xff] }
 0x8c8   : > { %10154 = vrot.lane.b32.xlu1 %v13069_v38, %s16146_s27  ;;  %v9872_v51 = vunpack.i.h.bf16 %v9870_v40  ;;  %v9871_v27 = vunpack.i.l.bf16 %v9870_v40  ;;  %9363 = vmatpush1.bf16.msra.mxu0 %v9362_v52  ;;  %s10289_s27 = smov 112  }
 0x8c9   : > { %4575 = vperm.xlu0 %9716, %v4571_v36   ;;  %3702 = vmatprep.mubr.f32.mxu0 %v13138_v39  ;;  %v3771_v58 = vsel %vm16211_vm2, %v9862_v3, %v9866_v53  ;;  %v6326_v53 = vld [vmem:[%s16024_s6 + $0x38] sm:$0xff] }
 0x8ca   : > { %v13300_v31 = vpop.permute.xlu1 %9874  ;;  %9365 = vmatprep.subr.bf16.mxu0 %v9364_v8  ;;  %v3773_v44 = vsel %vm16211_vm2, %v9871_v27, %v9872_v51  ;;  %v3772_v0 = vsel %vm16211_vm2, %v9867_v6, %v9871_v27 }
 0x8cb   : > { %v9880_v38 = vpop.permute.xlu0 %9879  ;;  %v9877_v37 = vunpack.i.h.bf16 %v13300_v31  ;;  %v9372_v30 = vpack.c.bf16 %v3773_v44, %v3771_v58  ;;  %v9876_v21 = vunpack.i.l.bf16 %v13300_v31  ;;  %v9374_v47 = vpack.c.bf16 %v3772_v0, %v3770_v43  ;;  %v9086_v0 = vld [vmem:[%s16021_s3 + $0x40] sm:$0xff] }
 0x8cc   : > { %4580 = vperm.xlu1 %9717, %v4572_v54   ;;  %v9881_v57 = vunpack.i.l.bf16 %v9880_v38  ;;  %9367 = vmatpush1.bf16.msra.mxu0 %v9366_v26  ;;  %v9882_v35 = vunpack.i.h.bf16 %v9880_v38 }
 0x8cd   : > { %6329 = vperm.xlu0 %9716, %v6319_v56   ;;  %9369 = vmatprep.subr.bf16.mxu0 %v9368_v19  ;;  %v3774_v10 = vsel %vm16211_vm2, %v9876_v21, %v9877_v37 }
 0x8ce   : > { %v9885_v15 = vpop.permute.xlu1 %9884  ;;  %v3775_v61 = vsel %vm16211_vm2, %v9877_v37, %v9881_v57 }
 0x8cf   : > { %v13318_v24 = vpop.permute.xlu0 %9889  ;;  %v9887_v16 = vunpack.i.h.bf16 %v9885_v15  ;;  %v9886_v9 = vunpack.i.l.bf16 %v9885_v15 }
 0x8d0   : > { %6334 = vperm.xlu1 %9717, %v6320_v59   ;;  %v9892_v45 = vunpack.i.h.bf16 %v13318_v24  ;;  %9371 = vmatpush1.bf16.msra.mxu0 %v9370_v17  ;;  %v9891_v41 = vunpack.i.l.bf16 %v13318_v24 }
 0x8d1   : > { %6339 = vperm.xlu0 %9716, %v6321_v12   ;;  %v3777_v18 = vsel %vm16211_vm2, %v9886_v9, %v9887_v16  ;;  %9373 = vmatprep.subr.bf16.mxu0 %v9372_v30  ;;  %v3776_v36 = vsel %vm16211_vm2, %v9882_v35, %v9886_v9 }
 0x8d2   : > { %v9895_v7 = vpop.permute.xlu1 %9894  ;;  %v9376_v2 = vpack.c.bf16 %v3777_v18, %v3775_v61  ;;  %v9378_v56 = vpack.c.bf16 %v3776_v36, %v3774_v10  ;;  %v3778_v31 = vsel %vm16211_vm2, %v9891_v41, %v9892_v45  ;;  %v9087_v61 = vld [vmem:[%s16021_s3 + $0x48] sm:$0xff] }
 0x8d3   : > { %v9900_v11 = vpop.permute.xlu0 %9899  ;;  %v9896_v23 = vunpack.i.l.bf16 %v9895_v7  ;;  %v9897_v50 = vunpack.i.h.bf16 %v9895_v7  ;;  %9084 = vmatmul.mubr.msk.f32.vlgmr.msra.gmra.mrb[0].mxu0 %vm3187_vm11, %v9082_v49 }
 0x8d4   : > { %v9902_v13 = vunpack.i.h.bf16 %v9900_v11  ;;  %v9901_v32 = vunpack.i.l.bf16 %v9900_v11  ;;  %6344 = vperm.xlu1 %9717, %v6322_v5   ;;  %9375 = vmatpush1.bf16.msra.mxu0 %v9374_v47 }
 0x8d5   : > { %6349 = vperm.xlu0 %9716, %v6323_v42   ;;  %v3779_v40 = vsel %vm16211_vm2, %v9892_v45, %v9896_v23  ;;  %3708 = vmatprep.mubr.f32.mxu0 %v13138_v39 }
 0x8d6   : > { %v3781_v48 = vsel %vm16211_vm2, %v9901_v32, %v9902_v13  ;;  %v9905_v34 = vpop.permute.xlu1 %9904  ;;  %9377 = vmatprep.subr.bf16.mxu0 %v9376_v2  ;;  %v3780_v54 = vsel %vm16211_vm2, %v9897_v50, %v9901_v32 }
 0x8d7   : > { %v9910_v25 = vpop.permute.xlu0 %9909  ;;  %v9380_v62 = vpack.c.bf16 %v3781_v48, %v3779_v40  ;;  %v9907_v52 = vunpack.i.h.bf16 %v9905_v34  ;;  %v9906_v46 = vunpack.i.l.bf16 %v9905_v34  ;;  %9085 = vmatmul.mubr.msk.f32.gmra.mrb[2].mxu0 %vm3187_vm11, %v9083_v22  ;;  %v9382_v29 = vpack.c.bf16 %v3780_v54, %v3778_v31 }
 0x8d8   : > { %v9911_v8 = vunpack.i.l.bf16 %v9910_v25  ;;  %6354 = vperm.xlu1 %9717, %v6324_v60   ;;  %9379 = vmatpush1.bf16.msra.mxu0 %v9378_v56  ;;  %v9912_v38 = vunpack.i.h.bf16 %v9910_v25 }
 0x8d9   : > { %6359 = vperm.xlu0 %9716, %v6325_v14   ;;  %3872 = vmatprep.mubr.f32.mxu0 %v13138_v39  ;;  %v3782_v20 = vsel %vm16211_vm2, %v9906_v46, %v9907_v52 }
 0x8da   : > { %v9915_v51 = vpop.permute.xlu1 %9914  ;;  %9381 = vmatprep.subr.bf16.mxu0 %v9380_v62  ;;  %v3783_v3 = vsel %vm16211_vm2, %v9907_v52, %v9911_v8 }
 0x8db   : > { %v9920_v27 = vpop.permute.xlu0 %9919  ;;  %v9917_v1 = vunpack.i.h.bf16 %v9915_v51  ;;  %v9916_v55 = vunpack.i.l.bf16 %v9915_v51 }
 0x8dc   : > { %6364 = vperm.xlu1 %9717, %v6326_v53   ;;  %v9922_v4 = vunpack.i.h.bf16 %v9920_v27  ;;  %v9921_v33 = vunpack.i.l.bf16 %v9920_v27  ;;  %9383 = vmatpush1.bf16.msra.mxu0 %v9382_v29 }
 0x8dd   : > { %v3784_v26 = vsel %vm16211_vm2, %v9912_v38, %v9916_v55  ;;  %v3785_v28 = vsel %vm16211_vm2, %v9916_v55, %v9917_v1 }
 0x8de   : > { %v9925_v6 = vpop.permute.xlu1 %9924  ;;  %v9384_v12 = vpack.c.bf16 %v3785_v28, %v3783_v3  ;;  %v9386_v59 = vpack.c.bf16 %v3784_v26, %v3782_v20  ;;  %v3941_v63 = vsel %vm16210_vm3, %v9921_v33, %v9922_v4 }
 0x8df   : > { %v9930_v19 = vpop.permute.xlu0 %9929  ;;  %v9927_v37 = vunpack.i.h.bf16 %v9925_v6  ;;  %v9926_v57 = vunpack.i.l.bf16 %v9925_v6 }
 0x8e0   : > { %v9932_v15 = vunpack.i.h.bf16 %v9930_v19  ;;  %v9931_v24 = vunpack.i.l.bf16 %v9930_v19  ;;  %9385 = vmatprep.subr.bf16.mxu0 %v9384_v12 }
 0x8e1   : > { %v3943_v16 = vsel %vm16210_vm3, %v9926_v57, %v9927_v37  ;;  %9387 = vmatpush1.bf16.msra.mxu0 %v9386_v59 }
 0x8e2   : > { %v3942_v58 = vsel %vm16210_vm3, %v9932_v15, %v9926_v57  ;;  %v3940_v44 = vsel %vm16210_vm3, %v9931_v24, %v9921_v33  ;;  %v9935_v9 = vpop.permute.xlu1 %9934  ;;  %v9388_v43 = vpack.c.bf16 %v3943_v16, %v3941_v63  ;;  %v9090_v24 = vld [vmem:[%s16021_s3 + $0x50] sm:$0xff] }
 0x8e3   : > { %v9940_v17 = vpop.permute.xlu0 %9939  ;;  %v9390_v30 = vpack.c.bf16 %v3942_v58, %v3940_v44  ;;  %v9937_v42 = vunpack.i.h.bf16 %v9935_v9  ;;  %v9936_v5 = vunpack.i.l.bf16 %v9935_v9 }
 0x8e4   : > { %v9942_v18 = vunpack.i.h.bf16 %v9940_v17  ;;  %v9941_v21 = vunpack.i.l.bf16 %v9940_v17  ;;  %9389 = vmatprep.subr.bf16.mxu0 %v9388_v43  ;;  %9088 = vmatmul.mubr.msk.f32.vlgmr.msra.gmra.mrb[0].mxu0 %vm3187_vm11, %v9086_v0 }
 0x8e5   : > { %v3945_v35 = vsel %vm16210_vm3, %v9936_v5, %v9937_v42  ;;  %9391 = vmatpush1.bf16.msra.mxu0 %v9390_v30  ;;  %3878 = vmatprep.mubr.f32.mxu0 %v13138_v39 }
 0x8e6   : > { %v3947_v45 = vsel %vm16210_vm3, %v9941_v21, %v9942_v18  ;;  %v9945_v7 = vpop.permute.xlu1 %9944 }
 0x8e7   : > { %v9950_v11 = vpop.permute.xlu0 %9949  ;;  %v9392_v49 = vpack.c.bf16 %v3947_v45, %v3945_v35  ;;  %v9947_v23 = vunpack.i.h.bf16 %v9945_v7  ;;  %v9946_v13 = vunpack.i.l.bf16 %v9945_v7 }
 0x8e8   : > { %v9952_v47 = vunpack.i.h.bf16 %v9950_v11  ;;  %v9951_v36 = vunpack.i.l.bf16 %v9950_v11  ;;  %9089 = vmatmul.mubr.msk.f32.gmra.mrb[2].mxu0 %vm3187_vm11, %v9087_v61 }
 0x8e9   : > { %9393 = vmatprep.subr.bf16.mxu0 %v9392_v49  ;;  %v3944_v32 = vsel %vm16210_vm3, %v9946_v13, %v9936_v5  ;;  %v3946_v2 = vsel %vm16210_vm3, %v9947_v23, %v9941_v21  ;;  %4042 = vmatprep.mubr.f32.mxu0 %v13138_v39  ;;  %v9091_v21 = vld [vmem:[%s16021_s3 + $0x58] sm:$0xff] }
 0x8ea   : > { %v9955_v50 = vpop.permute.xlu1 %9954  ;;  %v9394_v60 = vpack.c.bf16 %v3946_v2, %v3944_v32  ;;  %v3949_v41 = vsel %vm16210_vm3, %v9951_v36, %v9952_v47 }
 0x8eb   : > { %v9960_v14 = vpop.permute.xlu0 %9959  ;;  %v9957_v40 = vunpack.i.h.bf16 %v9955_v50  ;;  %v9956_v48 = vunpack.i.l.bf16 %v9955_v50 }
 0x8ec   : > { %v9962_v34 = vunpack.i.h.bf16 %v9960_v14  ;;  %v9961_v25 = vunpack.i.l.bf16 %v9960_v14  ;;  %9395 = vmatpush1.bf16.msra.mxu0 %v9394_v60 }
 0x8ed   : > { %v3951_v62 = vsel %vm16210_vm3, %v9956_v48, %v9957_v40 }
 0x8ee   : > { %v3950_v22 = vsel %vm16210_vm3, %v9962_v34, %v9956_v48  ;;  %v3948_v10 = vsel %vm16210_vm3, %v9961_v25, %v9951_v36  ;;  %v9965_v52 = vpop.permute.xlu1 %9964  ;;  %v9396_v8 = vpack.c.bf16 %v3951_v62, %v3949_v41 }
 0x8ef   : > { %v9970_v46 = vpop.permute.xlu0 %9969  ;;  %v9398_v56 = vpack.c.bf16 %v3950_v22, %v3948_v10  ;;  %v9967_v54 = vunpack.i.h.bf16 %v9965_v52  ;;  %v9966_v53 = vunpack.i.l.bf16 %v9965_v52 }
 0x8f0   : > { %v9972_v51 = vunpack.i.h.bf16 %v9970_v46  ;;  %v9971_v27 = vunpack.i.l.bf16 %v9970_v46  ;;  %9397 = vmatprep.subr.bf16.mxu0 %v9396_v8 }
 0x8f1   : > { %9399 = vmatpush1.bf16.msra.mxu0 %v9398_v56  ;;  %v3953_v31 = vsel %vm16210_vm3, %v9966_v53, %v9967_v54 }
 0x8f2   : > { %v3955_v38 = vsel %vm16210_vm3, %v9971_v27, %v9972_v51  ;;  %v9975_v1 = vpop.permute.xlu1 %9974 }
 0x8f3   : > { %v9980_v55 = vpop.permute.xlu0 %9979  ;;  %v9400_v20 = vpack.c.bf16 %v3955_v38, %v3953_v31  ;;  %v9977_v29 = vunpack.i.h.bf16 %v9975_v1  ;;  %v9976_v3 = vunpack.i.l.bf16 %v9975_v1 }
 0x8f4   : > { %v9982_v33 = vunpack.i.h.bf16 %v9980_v55  ;;  %v9981_v28 = vunpack.i.l.bf16 %v9980_v55 }
 0x8f5   : > { %9401 = vmatprep.subr.bf16.mxu0 %v9400_v20  ;;  %v3952_v26 = vsel %vm16210_vm3, %v9976_v3, %v9966_v53  ;;  %v3954_v4 = vsel %vm16210_vm3, %v9977_v29, %v9971_v27  ;;  %vm6860_vm3 = vcmask 1048560  }
 0x8f6   : > { %v9985_v6 = vpop.permute.xlu1 %9984  ;;  %v9402_v12 = vpack.c.bf16 %v3954_v4, %v3952_v26  ;;  %v4112_v63 = vsel %vm4110_vm13, %v9981_v28, %v9982_v33 }
 0x8f7   : > { %v9990_v19 = vpop.permute.xlu0 %9989  ;;  %v9987_v59 = vunpack.i.h.bf16 %v9985_v6  ;;  %v9986_v37 = vunpack.i.l.bf16 %v9985_v6 }
 0x8f8   : > { %v9992_v57 = vunpack.i.h.bf16 %v9990_v19  ;;  %v9991_v15 = vunpack.i.l.bf16 %v9990_v19  ;;  %9403 = vmatpush1.bf16.msra.mxu0 %v9402_v12 }
 0x8f9   : > { %v4114_v16 = vsel %vm4110_vm13, %v9986_v37, %v9987_v59 }
 0x8fa   : > { %v4113_v58 = vsel %vm4110_vm13, %v9992_v57, %v9986_v37  ;;  %v4111_v44 = vsel %vm4110_vm13, %v9991_v15, %v9981_v28  ;;  %v9995_v9 = vpop.permute.xlu1 %9994  ;;  %v9404_v43 = vpack.c.bf16 %v4114_v16, %v4112_v63  ;;  %v9094_v15 = vld [vmem:[%s16021_s3 + $0x60] sm:$0xff] }
 0x8fb   : > { %v10000_v17 = vpop.permute.xlu0 %9999  ;;  %v9406_v0 = vpack.c.bf16 %v4113_v58, %v4111_v44  ;;  %v9997_v30 = vunpack.i.h.bf16 %v9995_v9  ;;  %v9996_v42 = vunpack.i.l.bf16 %v9995_v9  ;;  %9092 = vmatmul.mubr.msk.f32.vlgmr.msra.gmra.mrb[0].mxu0 %vm3187_vm11, %v9090_v24 }
 0x8fc   : > { %v10002_v5 = vunpack.i.h.bf16 %v10000_v17  ;;  %v10001_v18 = vunpack.i.l.bf16 %v10000_v17  ;;  %9405 = vmatprep.subr.bf16.mxu0 %v9404_v43  ;;  %4048 = vmatprep.mubr.f32.mxu0 %v13138_v39 }
 0x8fd   : > { %9407 = vmatpush1.bf16.msra.mxu0 %v9406_v0  ;;  %v4116_v35 = vsel %vm4110_vm13, %v9996_v42, %v9997_v30 }
 0x8fe   : > { %v4118_v45 = vsel %vm4110_vm13, %v10001_v18, %v10002_v5  ;;  %v10005_v7 = vpop.permute.xlu1 %10004 }
 0x8ff   : > { %v10010_v11 = vpop.permute.xlu0 %10009  ;;  %v9408_v49 = vpack.c.bf16 %v4118_v45, %v4116_v35  ;;  %v10007_v61 = vunpack.i.h.bf16 %v10005_v7  ;;  %v10006_v23 = vunpack.i.l.bf16 %v10005_v7  ;;  %9093 = vmatmul.mubr.msk.f32.gmra.mrb[2].mxu0 %vm3187_vm11, %v9091_v21 }
 0x900   : > { %4213 = vmatprep.mubr.f32.mxu0 %v13138_v39  ;;  %v10012_v2 = vunpack.i.h.bf16 %v10010_v11  ;;  %v10011_v47 = vunpack.i.l.bf16 %v10010_v11 }
 0x901   : > { %9409 = vmatprep.subr.bf16.mxu0 %v9408_v49  ;;  %v4115_v13 = vsel %vm4110_vm13, %v10006_v23, %v9996_v42  ;;  %v4117_v32 = vsel %vm4110_vm13, %v10007_v61, %v10001_v18  ;;  %v9095_v18 = vld [vmem:[%s16021_s3 + $0x68] sm:$0xff] }
 0x902   : > { %v10015_v36 = vpop.permute.xlu1 %10014  ;;  %v9410_v14 = vpack.c.bf16 %v4117_v32, %v4115_v13  ;;  %v4120_v10 = vsel %vm4110_vm13, %v10011_v47, %v10012_v2 }
 0x903   : > { %v10020_v50 = vpop.permute.xlu0 %10019  ;;  %v10017_v60 = vunpack.i.h.bf16 %v10015_v36  ;;  %v10016_v40 = vunpack.i.l.bf16 %v10015_v36 }
 0x904   : > { %v10022_v48 = vunpack.i.h.bf16 %v10020_v50  ;;  %v10021_v34 = vunpack.i.l.bf16 %v10020_v50  ;;  %9411 = vmatpush1.bf16.msra.mxu0 %v9410_v14 }
 0x905   : > { %v4122_v41 = vsel %vm4110_vm13, %v10016_v40, %v10017_v60 }
 0x906   : > { %v4121_v25 = vsel %vm4110_vm13, %v10022_v48, %v10016_v40  ;;  %v4119_v22 = vsel %vm4110_vm13, %v10021_v34, %v10011_v47  ;;  %v10025_v62 = vpop.permute.xlu1 %10024  ;;  %v9412_v46 = vpack.c.bf16 %v4122_v41, %v4120_v10 }
 0x907   : > { %v10030_v52 = vpop.permute.xlu0 %10029  ;;  %v9414_v8 = vpack.c.bf16 %v4121_v25, %v4119_v22  ;;  %v10027_v56 = vunpack.i.h.bf16 %v10025_v62  ;;  %v10026_v54 = vunpack.i.l.bf16 %v10025_v62 }
 0x908   : > { %v10032_v53 = vunpack.i.h.bf16 %v10030_v52  ;;  %v10031_v51 = vunpack.i.l.bf16 %v10030_v52  ;;  %9413 = vmatprep.subr.bf16.mxu0 %v9412_v46 }
 0x909   : > { %9415 = vmatpush1.bf16.msra.mxu0 %v9414_v8  ;;  %v4124_v27 = vsel %vm4110_vm13, %v10026_v54, %v10027_v56 }
 0x90a   : > { %v4126_v31 = vsel %vm4110_vm13, %v10031_v51, %v10032_v53  ;;  %v10035_v38 = vpop.permute.xlu1 %10034 }
 0x90b   : > { %v10040_v1 = vpop.permute.xlu0 %10039  ;;  %v9416_v55 = vpack.c.bf16 %v4126_v31, %v4124_v27  ;;  %v10037_v20 = vunpack.i.h.bf16 %v10035_v38  ;;  %v10036_v29 = vunpack.i.l.bf16 %v10035_v38 }
 0x90c   : > { %v10042_v4 = vunpack.i.h.bf16 %v10040_v1  ;;  %v10041_v33 = vunpack.i.l.bf16 %v10040_v1 }
 0x90d   : > { %9417 = vmatprep.subr.bf16.mxu0 %v9416_v55  ;;  %v4123_v3 = vsel %vm4110_vm13, %v10036_v29, %v10026_v54  ;;  %v4125_v26 = vsel %vm4110_vm13, %v10037_v20, %v10031_v51 }
 0x90e   : > { %v10045_v28 = vpop.permute.xlu1 %10044  ;;  %v9418_v19 = vpack.c.bf16 %v4125_v26, %v4123_v3  ;;  %v4283_v44 = vsel %vm4281_vm14, %v10041_v33, %v10042_v4 }
 0x90f   : > { %v10050_v6 = vpop.permute.xlu0 %10049  ;;  %v10047_v12 = vunpack.i.h.bf16 %v10045_v28  ;;  %v10046_v59 = vunpack.i.l.bf16 %v10045_v28 }
 0x910   : > { %v10052_v37 = vunpack.i.h.bf16 %v10050_v6  ;;  %v10051_v57 = vunpack.i.l.bf16 %v10050_v6  ;;  %9419 = vmatpush1.bf16.msra.mxu0 %v9418_v19 }
 0x911   : > { %v4285_v63 = vsel %vm4281_vm14, %v10046_v59, %v10047_v12 }
 0x912   : > { %v4284_v24 = vsel %vm4281_vm14, %v10052_v37, %v10046_v59  ;;  %v4282_v58 = vsel %vm4281_vm14, %v10051_v57, %v10041_v33  ;;  %v10055_v16 = vpop.permute.xlu1 %10054  ;;  %v9420_v17 = vpack.c.bf16 %v4285_v63, %v4283_v44  ;;  %v9098_v57 = vld [vmem:[%s16021_s3 + $0x70] sm:$0xff] }
 0x913   : > { %v10060_v9 = vpop.permute.xlu0 %10059  ;;  %v9422_v43 = vpack.c.bf16 %v4284_v24, %v4282_v58  ;;  %v10057_v0 = vunpack.i.h.bf16 %v10055_v16  ;;  %v10056_v30 = vunpack.i.l.bf16 %v10055_v16  ;;  %9096 = vmatmul.mubr.msk.f32.vlgmr.msra.gmra.mrb[0].mxu0 %vm3187_vm11, %v9094_v15 }
 0x914   : > { %v10062_v42 = vunpack.i.h.bf16 %v10060_v9  ;;  %v10061_v5 = vunpack.i.l.bf16 %v10060_v9  ;;  %9421 = vmatprep.subr.bf16.mxu0 %v9420_v17  ;;  %4219 = vmatprep.mubr.f32.mxu0 %v13138_v39 }
 0x915   : > { %9423 = vmatpush1.bf16.msra.mxu0 %v9422_v43  ;;  %v4287_v21 = vsel %vm4281_vm14, %v10056_v30, %v10057_v0 }
 0x916   : > { %v4289_v35 = vsel %vm4281_vm14, %v10061_v5, %v10062_v42  ;;  %v10065_v45 = vpop.permute.xlu1 %10064 }
 0x917   : > { %v10070_v7 = vpop.permute.xlu0 %10069  ;;  %v9424_v11 = vpack.c.bf16 %v4289_v35, %v4287_v21  ;;  %v10067_v49 = vunpack.i.h.bf16 %v10065_v45  ;;  %v10066_v61 = vunpack.i.l.bf16 %v10065_v45  ;;  %9097 = vmatmul.mubr.msk.f32.gmra.mrb[2].mxu0 %vm3187_vm11, %v9095_v18 }
 0x918   : > { %4384 = vmatprep.mubr.f32.mxu0 %v13138_v39  ;;  %v10072_v32 = vunpack.i.h.bf16 %v10070_v7  ;;  %v10071_v2 = vunpack.i.l.bf16 %v10070_v7 }
 0x919   : > { %9425 = vmatprep.subr.bf16.mxu0 %v9424_v11  ;;  %v4286_v23 = vsel %vm4281_vm14, %v10066_v61, %v10056_v30  ;;  %v4288_v13 = vsel %vm4281_vm14, %v10067_v49, %v10061_v5  ;;  %v9099_v5 = vld [vmem:[%s16021_s3 + $0x78] sm:$0xff] }
 0x91a   : > { %v10075_v47 = vpop.permute.xlu1 %10074  ;;  %v9426_v50 = vpack.c.bf16 %v4288_v13, %v4286_v23  ;;  %v4291_v22 = vsel %vm4281_vm14, %v10071_v2, %v10072_v32 }
 0x91b   : > { %v10080_v36 = vpop.permute.xlu0 %10079  ;;  %v10077_v14 = vunpack.i.h.bf16 %v10075_v47  ;;  %v10076_v60 = vunpack.i.l.bf16 %v10075_v47 }
 0x91c   : > { %v10082_v40 = vunpack.i.h.bf16 %v10080_v36  ;;  %v10081_v48 = vunpack.i.l.bf16 %v10080_v36  ;;  %9427 = vmatpush1.bf16.msra.mxu0 %v9426_v50 }
 0x91d   : > { %v4293_v10 = vsel %vm4281_vm14, %v10076_v60, %v10077_v14 }
 0x91e   : > { %v4292_v34 = vsel %vm4281_vm14, %v10082_v40, %v10076_v60  ;;  %v4290_v25 = vsel %vm4281_vm14, %v10081_v48, %v10071_v2  ;;  %v10085_v41 = vpop.permute.xlu1 %10084  ;;  %v9428_v52 = vpack.c.bf16 %v4293_v10, %v4291_v22 }
 0x91f   : > { %v10090_v62 = vpop.permute.xlu0 %10089  ;;  %v9430_v46 = vpack.c.bf16 %v4292_v34, %v4290_v25  ;;  %v10087_v8 = vunpack.i.h.bf16 %v10085_v41  ;;  %v10086_v56 = vunpack.i.l.bf16 %v10085_v41 }
 0x920   : > { %v10092_v54 = vunpack.i.h.bf16 %v10090_v62  ;;  %v10091_v53 = vunpack.i.l.bf16 %v10090_v62  ;;  %9429 = vmatprep.subr.bf16.mxu0 %v9428_v52 }
 0x921   : > { %9431 = vmatpush1.bf16.msra.mxu0 %v9430_v46  ;;  %v4295_v51 = vsel %vm4281_vm14, %v10086_v56, %v10087_v8 }
 0x922   : > { %v4297_v27 = vsel %vm4281_vm14, %v10091_v53, %v10092_v54  ;;  %v10095_v31 = vpop.permute.xlu1 %10094 }
 0x923   : > { %v10100_v38 = vpop.permute.xlu0 %10099  ;;  %v9432_v1 = vpack.c.bf16 %v4297_v27, %v4295_v51  ;;  %v10097_v55 = vunpack.i.h.bf16 %v10095_v31  ;;  %v10096_v20 = vunpack.i.l.bf16 %v10095_v31 }
 0x924   : > { %v10102_v26 = vunpack.i.h.bf16 %v10100_v38  ;;  %v10101_v4 = vunpack.i.l.bf16 %v10100_v38 }
 0x925   : > { %9433 = vmatprep.subr.bf16.mxu0 %v9432_v1  ;;  %v4294_v29 = vsel %vm4281_vm14, %v10096_v20, %v10086_v56  ;;  %v4296_v3 = vsel %vm4281_vm14, %v10097_v55, %v10091_v53  ;;  %vm4692_vm14 = vcmask 909064  }
 0x926   : > { %v10105_v33 = vpop.permute.xlu1 %10104  ;;  %v9434_v6 = vpack.c.bf16 %v4296_v3, %v4294_v29  ;;  %v4453_v58 = vsel %vm16188_vm5, %v10101_v4, %v10102_v26  ;;  %v9102_v29 = vld [vmem:[%s16021_s3 + $0x80] sm:$0xff]  ;;  %v9103_v26 = vld [vmem:[%s16021_s3 + $0x88] sm:$0xff] }
 0x927   : > { %v10110_v28 = vpop.permute.xlu0 %10109  ;;  %v10107_v19 = vunpack.i.h.bf16 %v10105_v33  ;;  %v10106_v12 = vunpack.i.l.bf16 %v10105_v33  ;;  %v13473_v3 = vld [vmem:[#allocation3] sm:$0xff] }
 0x928   : > { %v10112_v59 = vunpack.i.h.bf16 %v10110_v28  ;;  %v10111_v37 = vunpack.i.l.bf16 %v10110_v28  ;;  %9435 = vmatpush1.bf16.msra.mxu0 %v9434_v6 }
 0x929   : > { %v4455_v44 = vsel %vm16188_vm5, %v10106_v12, %v10107_v19 }
 0x92a   : > { %v4454_v15 = vsel %vm16188_vm5, %v10112_v59, %v10106_v12  ;;  %v4452_v24 = vsel %vm16188_vm5, %v10111_v37, %v10101_v4  ;;  %v10115_v63 = vpop.permute.xlu1 %10114  ;;  %v9436_v9 = vpack.c.bf16 %v4455_v44, %v4453_v58  ;;  %v6936_v44 = vld [vmem:[%s16025_s7 + $0x8] sm:$0xff] }
 0x92b   : > { %v10120_v16 = vpop.permute.xlu0 %10119  ;;  %v9438_v17 = vpack.c.bf16 %v4454_v15, %v4452_v24  ;;  %v10117_v43 = vunpack.i.h.bf16 %v10115_v63  ;;  %v10116_v0 = vunpack.i.l.bf16 %v10115_v63  ;;  %9100 = vmatmul.mubr.msk.f32.vlgmr.msra.gmra.mrb[0].mxu0 %vm3187_vm11, %v9098_v57 }
 0x92c   : > { %v10122_v30 = vunpack.i.h.bf16 %v10120_v16  ;;  %v10121_v42 = vunpack.i.l.bf16 %v10120_v16  ;;  %9437 = vmatprep.subr.bf16.mxu0 %v9436_v9  ;;  %4390 = vmatprep.mubr.f32.mxu0 %v13138_v39  ;;  %v6935_v16 = vld [vmem:[%s16025_s7] sm:$0xff] }
 0x92d   : > { %9439 = vmatpush1.bf16.msra.mxu0 %v9438_v17  ;;  %v4457_v18 = vsel %vm16188_vm5, %v10116_v0, %v10117_v43  ;;  %v6937_v17 = vld [vmem:[%s16025_s7 + $0x10] sm:$0xff]  ;;  %v6938_v43 = vld [vmem:[%s16025_s7 + $0x18] sm:$0xff] }
 0x92e   : > { %v4459_v21 = vsel %vm16188_vm5, %v10121_v42, %v10122_v30  ;;  %v10125_v35 = vpop.permute.xlu1 %10124  ;;  %v6940_v30 = vld [vmem:[%s16025_s7 + $0x28] sm:$0xff] }
 0x92f   : > { %v10130_v45 = vpop.permute.xlu0 %10129  ;;  %v9440_v7 = vpack.c.bf16 %v4459_v21, %v4457_v18  ;;  %v10127_v11 = vunpack.i.h.bf16 %v10125_v35  ;;  %v10126_v49 = vunpack.i.l.bf16 %v10125_v35  ;;  %9101 = vmatmul.mubr.msk.f32.gmra.mrb[2].mxu0 %vm3187_vm11, %v9099_v5  ;;  %v6942_v5 = vld [vmem:[%s16025_s7 + $0x38] sm:$0xff]  ;;  %v9242_v18 = vld [vmem:[%s16025_s7 + $0x40] sm:$0xff]  ;;  %v9243_v21 = vld [vmem:[%s16025_s7 + $0x48] sm:$0xff] }
 0x930   : > { %4554 = vmatprep.mubr.f32.mxu0 %v13138_v39  ;;  %v10132_v13 = vunpack.i.h.bf16 %v10130_v45  ;;  %v10131_v32 = vunpack.i.l.bf16 %v10130_v45  ;;  %v9244_v35 = vld [vmem:[%s16025_s7 + $0x50] sm:$0xff]  ;;  %v9245_v45 = vld [vmem:[%s16025_s7 + $0x58] sm:$0xff] }
 0x931   : > { %9441 = vmatprep.subr.bf16.mxu0 %v9440_v7  ;;  %v4456_v61 = vsel %vm16188_vm5, %v10126_v49, %v10116_v0  ;;  %v4458_v23 = vsel %vm16188_vm5, %v10127_v11, %v10121_v42  ;;  %v6939_v0 = vld [vmem:[%s16025_s7 + $0x20] sm:$0xff]  ;;  %v6941_v42 = vld [vmem:[%s16025_s7 + $0x30] sm:$0xff]  ;;  %v9247_v11 = vld [vmem:[%s16025_s7 + $0x68] sm:$0xff] }
 0x932   : > { %v10135_v2 = vpop.permute.xlu1 %10134  ;;  %v9442_v36 = vpack.c.bf16 %v4458_v23, %v4456_v61  ;;  %v4461_v39 = vsel %vm16188_vm5, %v10131_v32, %v10132_v13  ;;  %v9246_v7 = vld [vmem:[%s16025_s7 + $0x60] sm:$0xff]  ;;  %v9248_v49 = vld [vmem:[%s16025_s7 + $0x70] sm:$0xff]  ;;  %v9249_v61 = vld [vmem:[%s16025_s7 + $0x78] sm:$0xff] }
 0x933   : > { %v10140_v47 = vpop.permute.xlu0 %10139  ;;  %v10137_v50 = vunpack.i.h.bf16 %v10135_v2  ;;  %v10136_v14 = vunpack.i.l.bf16 %v10135_v2  ;;  %v9250_v23 = vld [vmem:[%s16025_s7 + $0x80] sm:$0xff]  ;;  %v9251_v13 = vld [vmem:[%s16025_s7 + $0x88] sm:$0xff]  ;;  %v9253_v2 = vld [vmem:[%s16025_s7 + $0x98] sm:$0xff] }
 0x934   : > { %v10142_v60 = vunpack.i.h.bf16 %v10140_v47  ;;  %v10141_v40 = vunpack.i.l.bf16 %v10140_v47  ;;  %9443 = vmatpush1.bf16.msra.mxu0 %v9442_v36  ;;  %v9254_v47 = vld [vmem:[%s16025_s7 + $0xa0] sm:$0xff]  ;;  %v9255_v36 = vld [vmem:[%s16025_s7 + $0xa8] sm:$0xff] }
 0x935   : > { %v4463_v25 = vsel %vm16188_vm5, %v10136_v14, %v10137_v50  ;;  %v9256_v50 = vld [vmem:[%s16025_s7 + $0xb0] sm:$0xff] }
 0x936   : > { %v4462_v48 = vsel %vm16188_vm5, %v10142_v60, %v10136_v14  ;;  %v4460_v34 = vsel %vm16188_vm5, %v10141_v40, %v10131_v32  ;;  %v10145_v22 = vpop.permute.xlu1 %10144  ;;  %v9444_v41 = vpack.c.bf16 %v4463_v25, %v4461_v39  ;;  %v9252_v32 = vld [vmem:[%s16025_s7 + $0x90] sm:$0xff]  ;;  %v9257_v14 = vld [vmem:[%s16025_s7 + $0xb8] sm:$0xff]  ;;  %v9258_v60 = vld [vmem:[%s16025_s7 + $0xc0] sm:$0xff] }
 0x937   : > { %v10150_v10 = vpop.permute.xlu0 %10149  ;;  %v9446_v62 = vpack.c.bf16 %v4462_v48, %v4460_v34  ;;  %v10147_v52 = vunpack.i.h.bf16 %v10145_v22  ;;  %v10146_v46 = vunpack.i.l.bf16 %v10145_v22  ;;  %v9259_v40 = vld [vmem:[%s16025_s7 + $0xc8] sm:$0xff]  ;;  %v9260_v48 = vld [vmem:[%s16025_s7 + $0xd0] sm:$0xff]  ;;  %v9261_v34 = vld [vmem:[%s16025_s7 + $0xd8] sm:$0xff] }
 0x938   : > { %v10152_v8 = vunpack.i.h.bf16 %v10150_v10  ;;  %v10151_v56 = vunpack.i.l.bf16 %v10150_v10  ;;  %9445 = vmatprep.subr.bf16.mxu0 %v9444_v41  ;;  %v9262_v39 = vld [vmem:[%s16025_s7 + $0xe0] sm:$0xff]  ;;  %v9263_v25 = vld [vmem:[%s16025_s7 + $0xe8] sm:$0xff]  ;;  %v9264_v22 = vld [vmem:[%s16025_s7 + $0xf0] sm:$0xff] }
 0x939   : > { %9447 = vmatpush1.bf16.msra.mxu0 %v9446_v62  ;;  %v4465_v54 = vsel %vm16188_vm5, %v10146_v46, %v10147_v52  ;;  %v9265_v10 = vld [vmem:[%s16025_s7 + $0xf8] sm:$0xff]  ;;  %v9266_v41 = vld [vmem:[%s16025_s7 + $0x100] sm:$0xff]  ;;  %v9267_v62 = vld [vmem:[%s16025_s7 + $0x108] sm:$0xff] }
 0x93a   : > { %v4467_v53 = vsel %vm16188_vm5, %v10151_v56, %v10152_v8  ;;  %v10155_v51 = vpop.permute.xlu1 %10154  ;;  %v9268_v52 = vld [vmem:[%s16025_s7 + $0x110] sm:$0xff]  ;;  %v9270_v8 = vld [vmem:[%s16025_s7 + $0x120] sm:$0xff] }
 0x93b   : > { %v9448_v27 = vpack.c.bf16 %v4467_v53, %v4465_v54  ;;  %v10157_v31 = vunpack.i.h.bf16 %v10155_v51  ;;  %v10156_v38 = vunpack.i.l.bf16 %v10155_v51  ;;  %v9272_v54 = vld [vmem:[%s16025_s7 + $0x130] sm:$0xff]  ;;  %v9273_v53 = vld [vmem:[%s16025_s7 + $0x138] sm:$0xff]  ;;  %v9274_v51 = vld [vmem:[%s16025_s7 + $0x140] sm:$0xff] }
 0x93d   : > { %9449 = vmatprep.subr.bf16.mxu0 %v9448_v27  ;;  %v4464_v1 = vsel %vm16188_vm5, %v10156_v38, %v10146_v46  ;;  %v4466_v55 = vsel %vm16188_vm5, %v10157_v31, %v10151_v56  ;;  %v9269_v46 = vld [vmem:[%s16025_s7 + $0x118] sm:$0xff]  ;;  %v9271_v56 = vld [vmem:[%s16025_s7 + $0x128] sm:$0xff]  ;;  %v9276_v31 = vld [vmem:[%s16025_s7 + $0x150] sm:$0xff]  ;;  %vm4719_vm5 = vcmask 121864  }
 0x93e   : > { %v9450_v20 = vpack.c.bf16 %v4466_v55, %v4464_v1  ;;  %v9275_v27 = vld [vmem:[%s16025_s7 + $0x148] sm:$0xff]  ;;  %v9277_v38 = vld [vmem:[%s16025_s7 + $0x158] sm:$0xff] }
 0x940   : > { %9451 = vmatpush1.bf16.msra.mxu0 %v9450_v20  ;;  %v9278_v20 = vld [vmem:[%s16025_s7 + $0x160] sm:$0xff] }
 0x943   : > { %9104 = vmatmul.mubr.msk.f32.vlgmr.msra.gmra.mrb[0].mxu0 %vm3187_vm11, %v9102_v29  ;;  %v9279_v29 = vld [vmem:[%s16025_s7 + $0x168] sm:$0xff] }
 0x944   : > { %4560 = vmatprep.mubr.f32.mxu0 %v13473_v3 }
 0x947   : > { %9105 = vmatmul.mubr.msk.f32.gmra.mrb[2].mxu0 %vm3187_vm11, %v9103_v26  ;;  %v9280_v26 = vld [vmem:[%s16025_s7 + $0x170] sm:$0xff]  ;;  %vm4683_vm11 = vcmask 777864  }
 0x948   : > { %4898 = vmatprep.mubr.f32.mxu0 %v13473_v3  ;;  %v4576_v4 = vpop.permute.xlu0 %4575 }
 0x94b   : > { %v4581_v59 = vpop.permute.xlu1 %4580 }
 0x94c   : > { %v13637_v1 = vpop.permute.xlu0 %6329 }
 0x94f   : > { %v13639_v55 = vpop.permute.xlu1 %6334 }
 0xa16   : > { %v4556_v33 = vpop.f32.mrb[0].mxu0 }
 0xa17   : > { %v13481_v28 = vadd.f32 %v4576_v4, %v4556_v33  ;;  %v4558_v6 = vpop.f32.mrb[1].mxu0  ;;  %v9281_v33 = vld [vmem:[%s16025_s7 + $0x178] sm:$0xff] }
 0xa18   : > { %v13483_v19 = vadd.f32 %v4576_v4, %v4558_v6  ;;  %v13650_v4 = vpop.permute.xlu0 %6339  ;;  %v13655_v6 = vpop.permute.xlu1 %6344 }
 0xa19   : > { %v4587_v12 = vmax.f32 %v13481_v28, 0.0 }
 0xa1a   : > { %v4588_v37 = vmax.f32 %v13483_v19, 0.0  ;;  %v4562_v57 = vpop.f32.mrb[2].mxu0 }
 0xa1b   : > { %v13487_v15 = vadd.f32 %v4581_v59, %v4562_v57  ;;  %4595 = vrot.lane.b32.xlu0 %v4587_v12, %s16154_s24  ;;  %v4564_v24 = vpop.f32.mrb[3].mxu0  ;;  %v9283_v57 = vld [vmem:[%s16025_s7 + $0x188] sm:$0xff] }
 0xa1c   : > { %4597 = vrot.lane.b32.xlu1 %v4588_v37, %s16154_s24  ;;  %v13499_v63 = vadd.f32 %v4581_v59, %v4564_v24  ;;  %v9282_v59 = vld [vmem:[%s16025_s7 + $0x180] sm:$0xff]  ;;  %v13663_v24 = vpop.permute.xlu0 %6349 }
 0xa1d   : > { %v4589_v58 = vmax.f32 %v13487_v15, 0.0  ;;  %v9298_v15 = vld [vmem:[%s16025_s7 + $0x200] sm:$0xff] }
 0xa1e   : > { %v4590_v9 = vmax.f32 %v13499_v63, 0.0  ;;  %v9299_v63 = vld [vmem:[%s16025_s7 + $0x208] sm:$0xff] }
 0xa1f   : > { %4599 = vrot.lane.b32.xlu0 %v4589_v58, %s16154_s24 }
 0xa20   : > { %6950 = vperm.xlu1 %9717, %v6936_v44   ;;  %v13665_v44 = vpop.permute.xlu1 %6354 }
 0xa23   : > { %6945 = vperm.xlu0 %9716, %v6935_v16   ;;  %v9284_v16 = vld [vmem:[%s16025_s7 + $0x190] sm:$0xff] }
 0xa24   : > { %4601 = vrot.lane.b32.xlu1 %v4590_v9, %s16154_s24  ;;  %s10297_s24 = smov 48  }
 0xa27   : > { %6955 = vperm.xlu0 %9716, %v6937_v17   ;;  %v9285_v17 = vld [vmem:[%s16025_s7 + $0x198] sm:$0xff] }
 0xa28   : > { %6960 = vperm.xlu1 %9717, %v6938_v43   ;;  %v9286_v43 = vld [vmem:[%s16025_s7 + $0x1a0] sm:$0xff] }
 0xa2b   : > { %6965 = vperm.xlu0 %9716, %v6939_v0   ;;  %v13676_v0 = vpop.permute.xlu0 %6359 }
 0xa2c   : > { %6970 = vperm.xlu1 %9717, %v6940_v30   ;;  %v9290_v30 = vld [vmem:[%s16025_s7 + $0x1c0] sm:$0xff] }
 0xa2f   : > { %6975 = vperm.xlu0 %9716, %v6941_v42   ;;  %v13681_v42 = vpop.permute.xlu1 %6364 }
 0xa30   : > { %6980 = vperm.xlu1 %9717, %v6942_v5   ;;  %v9291_v5 = vld [vmem:[%s16025_s7 + $0x1c8] sm:$0xff] }
 0xa33   : > { %7042 = vperm.xlu0 %9716, %v9242_v18  }
 0xa34   : > { %7047 = vperm.xlu1 %9717, %v9243_v21   ;;  %v9292_v21 = vld [vmem:[%s16025_s7 + $0x1d0] sm:$0xff] }
 0xa37   : > { %7052 = vperm.xlu0 %9716, %v9244_v35  }
 0xa38   : > { %7057 = vperm.xlu1 %9717, %v9245_v45  }
 0xa3b   : > { %7062 = vperm.xlu0 %9716, %v9246_v7  }
 0xa3c   : > { %7067 = vperm.xlu1 %9717, %v9247_v11  }
 0xa3f   : > { %7072 = vperm.xlu0 %9716, %v9248_v49  }
 0xa40   : > { %7077 = vperm.xlu1 %9717, %v9249_v61  }
 0xa43   : > { %7251 = vperm.xlu0 %9716, %v9250_v23  }
 0xa44   : > { %7256 = vperm.xlu1 %9717, %v9251_v13  }
 0xa47   : > { %7261 = vperm.xlu0 %9716, %v9252_v32  }
 0xa48   : > { %7266 = vperm.xlu1 %9717, %v9253_v2   ;;  %v9300_v2 = vld [vmem:[%s16025_s7 + $0x210] sm:$0xff] }
 0xa4b   : > { %7271 = vperm.xlu0 %9716, %v9254_v47   ;;  %v9293_v47 = vld [vmem:[%s16025_s7 + $0x1d8] sm:$0xff] }
 0xa4c   : > { %7276 = vperm.xlu1 %9717, %v9255_v36  }
 0xa4f   : > { %7281 = vperm.xlu0 %9716, %v9256_v50  }
 0xa50   : > { %7286 = vperm.xlu1 %9717, %v9257_v14   ;;  %v9294_v14 = vld [vmem:[%s16025_s7 + $0x1e0] sm:$0xff] }
 0xa53   : > { %7460 = vperm.xlu0 %9716, %v9258_v60   ;;  %v9287_v60 = vld [vmem:[%s16025_s7 + $0x1a8] sm:$0xff] }
 0xa54   : > { %7465 = vperm.xlu1 %9717, %v9259_v40  }
 0xa57   : > { %7470 = vperm.xlu0 %9716, %v9260_v48  }
 0xa58   : > { %7475 = vperm.xlu1 %9717, %v9261_v34  }
 0xa5b   : > { %7480 = vperm.xlu0 %9716, %v9262_v39  }
 0xa5c   : > { %7485 = vperm.xlu1 %9717, %v9263_v25  }
 0xa5f   : > { %7490 = vperm.xlu0 %9716, %v9264_v22  }
 0xa60   : > { %7495 = vperm.xlu1 %9717, %v9265_v10  }
 0xa63   : > { %7669 = vperm.xlu0 %9716, %v9266_v41  }
 0xa64   : > { %7674 = vperm.xlu1 %9717, %v9267_v62  }
 0xa67   : > { %7679 = vperm.xlu0 %9716, %v9268_v52  }
 0xa68   : > { %7684 = vperm.xlu1 %9717, %v9269_v46  }
 0xa6b   : > { %7689 = vperm.xlu0 %9716, %v9270_v8  }
 0xa6c   : > { %7694 = vperm.xlu1 %9717, %v9271_v56  }
 0xa6f   : > { %7699 = vperm.xlu0 %9716, %v9272_v54  }
 0xa70   : > { %7704 = vperm.xlu1 %9717, %v9273_v53  }
 0xa73   : > { %7878 = vperm.xlu0 %9716, %v9274_v51  }
 0xa74   : > { %7883 = vperm.xlu1 %9717, %v9275_v27  }
 0xa77   : > { %7888 = vperm.xlu0 %9716, %v9276_v31  }
 0xa78   : > { %7893 = vperm.xlu1 %9717, %v9277_v38  }
 0xa7b   : > { %7898 = vperm.xlu0 %9716, %v9278_v20  }
 0xa7c   : > { %7903 = vperm.xlu1 %9717, %v9279_v29  }
 0xa7f   : > { %7908 = vperm.xlu0 %9716, %v9280_v26  }
 0xa80   : > { %7913 = vperm.xlu1 %9717, %v9281_v33  }
 0xa83   : > { %8087 = vperm.xlu0 %9716, %v9282_v59  }
 0xa84   : > { %8092 = vperm.xlu1 %9717, %v9283_v57  }
 0xa87   : > { %8097 = vperm.xlu0 %9716, %v9284_v16  }
 0xa88   : > { %8102 = vperm.xlu1 %9717, %v9285_v17  }
 0xa8b   : > { %8107 = vperm.xlu0 %9716, %v9286_v43  }
 0xa8c   : > { %8296 = vperm.xlu1 %9717, %v9290_v30  }
 0xa8d   : > { %v4596_v18 = vpop.permute.xlu0 %4595 }
 0xa8e   : > { %v4598_v35 = vpop.permute.xlu1 %4597 }
 0xa8f   : > { %v4603_v45 = vsel %vm588_vm0, %v4596_v18, %v4598_v35  ;;  %8301 = vperm.xlu0 %9716, %v9291_v5   ;;  %v13696_v11 = vmax.f32 %v4588_v37, %v4598_v35 }
 0xa90   : > { %v13692_v7 = vmax.f32 %v4587_v12, %v4603_v45  ;;  %8306 = vperm.xlu1 %9717, %v9292_v21  }
 0xa91   : > { %v4600_v49 = vpop.permute.xlu0 %4599 }
 0xa93   : > { %4617 = vrot.lane.b32.xlu0 %v13692_v7, %s10286_s30 }
 0xa94   : > { %4619 = vrot.lane.b32.xlu1 %v13696_v11, %s10286_s30 }
 0xa9f   : > { %v13702_v61 = vpop.permute.xlu1 %6950 }
 0xaa0   : > { %16533 = vst [vmem:[#allocation16_spill] sm:$0xff] %v13702_v61 }
 0xaa2   : > { %v13704_v23 = vpop.permute.xlu0 %6945 }
 0xaa3   : > { %16534 = vst [vmem:[#allocation15_spill] sm:$0xff] %v13704_v23  ;;  %v4602_v13 = vpop.permute.xlu1 %4601 }
 0xaa4   : > { %v4604_v28 = vsel %vm588_vm0, %v4600_v49, %v4602_v13  ;;  %v13709_v12 = vmax.f32 %v4590_v9, %v4602_v13 }
 0xaa5   : > { %v13713_v19 = vmax.f32 %v4589_v58, %v4604_v28 }
 0xaa6   : > { %v13715_v37 = vpop.permute.xlu0 %6955  ;;  %4623 = vrot.lane.b32.xlu1 %v13709_v12, %s10286_s30 }
 0xaa7   : > { %16535 = vst [vmem:[#allocation17_spill] sm:$0xff] %v13715_v37  ;;  %4621 = vrot.lane.b32.xlu0 %v13713_v19, %s10286_s30  ;;  %v13721_v32 = vpop.permute.xlu1 %6960 }
 0xaa8   : > { %16536 = vst [vmem:[#allocation19_spill] sm:$0xff] %v13721_v32 }
 0xaaa   : > { %v13729_v58 = vpop.permute.xlu0 %6965  ;;  %8510 = vperm.xlu1 %9717, %v9299_v63  }
 0xaab   : > { %16537 = vst [vmem:[#allocation18_spill] sm:$0xff] %v13729_v58  ;;  %8505 = vperm.xlu0 %9716, %v9298_v15   ;;  %v13731_v9 = vpop.permute.xlu1 %6970 }
 0xaac   : > { %16538 = vst [vmem:[#allocation20_spill] sm:$0xff] %v13731_v9 }
 0xaae   : > { %v13739_v36 = vpop.permute.xlu0 %6975  ;;  %8515 = vperm.xlu1 %9717, %v9300_v2  }
 0xaaf   : > { %16539 = vst [vmem:[#allocation22_spill] sm:$0xff] %v13739_v36  ;;  %8311 = vperm.xlu0 %9716, %v9293_v47   ;;  %v13741_v50 = vpop.permute.xlu1 %6980 }
 0xab0   : > { %16540 = vst [vmem:[#allocation21_spill] sm:$0xff] %v13741_v50 }
 0xab2   : > { %v13749_v40 = vpop.permute.xlu0 %7042  ;;  %8316 = vperm.xlu1 %9717, %v9294_v14  }
 0xab3   : > { %8112 = vperm.xlu0 %9716, %v9287_v60   ;;  %v13751_v48 = vpop.permute.xlu1 %7047 }
 0xab6   : > { %v13753_v34 = vpop.permute.xlu0 %7052 }
 0xab7   : > { %v13755_v39 = vpop.permute.xlu1 %7057 }
 0xab8   : > { %16541 = vst [vmem:[#allocation23_spill] sm:$0xff] %v13755_v39 }
 0xaba   : > { %v13757_v25 = vpop.permute.xlu0 %7062 }
 0xabb   : > { %16542 = vst [vmem:[#allocation24_spill] sm:$0xff] %v13757_v25  ;;  %v13759_v22 = vpop.permute.xlu1 %7067 }
 0xabc   : > { %16543 = vst [vmem:[#allocation25_spill] sm:$0xff] %v13759_v22 }
 0xabe   : > { %v13761_v10 = vpop.permute.xlu0 %7072 }
 0xabf   : > { %16544 = vst [vmem:[#allocation27_spill] sm:$0xff] %v13761_v10  ;;  %v13763_v41 = vpop.permute.xlu1 %7077 }
 0xac0   : > { %16545 = vst [vmem:[#allocation29_spill] sm:$0xff] %v13763_v41 }
 0xac2   : > { %v13765_v62 = vpop.permute.xlu0 %7251 }
 0xac3   : > { %v13767_v52 = vpop.permute.xlu1 %7256 }
 0xac6   : > { %v13769_v46 = vpop.permute.xlu0 %7261 }
 0xac7   : > { %v13771_v8 = vpop.permute.xlu1 %7266 }
 0xac8   : > { %16546 = vst [vmem:[#allocation26_spill] sm:$0xff] %v13771_v8 }
 0xaca   : > { %v13773_v56 = vpop.permute.xlu0 %7271 }
 0xacb   : > { %16547 = vst [vmem:[#allocation28_spill] sm:$0xff] %v13773_v56  ;;  %v13775_v54 = vpop.permute.xlu1 %7276 }
 0xacc   : > { %16548 = vst [vmem:[#allocation30_spill] sm:$0xff] %v13775_v54 }
 0xace   : > { %v13777_v53 = vpop.permute.xlu0 %7281 }
 0xacf   : > { %16549 = vst [vmem:[#allocation31_spill] sm:$0xff] %v13777_v53  ;;  %v13779_v51 = vpop.permute.xlu1 %7286 }
 0xad0   : > { %16550 = vst [vmem:[#allocation32_spill] sm:$0xff] %v13779_v51 }
 0xad2   : > { %v13781_v27 = vpop.permute.xlu0 %7460 }
 0xad3   : > { %v13783_v31 = vpop.permute.xlu1 %7465 }
 0xad6   : > { %v13785_v38 = vpop.permute.xlu0 %7470 }
 0xad7   : > { %v13787_v20 = vpop.permute.xlu1 %7475 }
 0xad8   : > { %16551 = vst [vmem:[#allocation34_spill] sm:$0xff] %v13787_v20 }
 0xada   : > { %v13789_v29 = vpop.permute.xlu0 %7480 }
 0xadb   : > { %16552 = vst [vmem:[#allocation33_spill] sm:$0xff] %v13789_v29  ;;  %v13791_v26 = vpop.permute.xlu1 %7485 }
 0xadc   : > { %16553 = vst [vmem:[#allocation35_spill] sm:$0xff] %v13791_v26 }
 0xade   : > { %v13793_v33 = vpop.permute.xlu0 %7490 }
 0xadf   : > { %16554 = vst [vmem:[#allocation37_spill] sm:$0xff] %v13793_v33  ;;  %v13795_v59 = vpop.permute.xlu1 %7495 }
 0xae0   : > { %16555 = vst [vmem:[#allocation36_spill] sm:$0xff] %v13795_v59 }
 0xae2   : > { %v13797_v57 = vpop.permute.xlu0 %7669 }
 0xae3   : > { %v13799_v16 = vpop.permute.xlu1 %7674 }
 0xae6   : > { %v13801_v17 = vpop.permute.xlu0 %7679 }
 0xae7   : > { %v13803_v43 = vpop.permute.xlu1 %7684 }
 0xae8   : > { %16556 = vst [vmem:[#allocation38_spill] sm:$0xff] %v13803_v43 }
 0xaea   : > { %v13805_v30 = vpop.permute.xlu0 %7689 }
 0xaeb   : > { %16557 = vst [vmem:[#allocation40_spill] sm:$0xff] %v13805_v30  ;;  %v13807_v5 = vpop.permute.xlu1 %7694 }
 0xaec   : > { %16558 = vst [vmem:[#allocation39_spill] sm:$0xff] %v13807_v5 }
 0xaee   : > { %v13811_v21 = vpop.permute.xlu0 %7699 }
 0xaef   : > { %v13809_v18 = vpop.permute.xlu1 %7704  ;;  %16560 = vst [vmem:[#allocation43_spill] sm:$0xff] %v13811_v21 }
 0xaf0   : > { %16559 = vst [vmem:[#allocation41_spill] sm:$0xff] %v13809_v18 }
 0xaf2   : > { %v13815_v45 = vpop.permute.xlu0 %7878 }
 0xaf3   : > { %v13813_v35 = vpop.permute.xlu1 %7883 }
 0xaf6   : > { %v13821_v28 = vpop.permute.xlu0 %7888 }
 0xaf7   : > { %v13817_v49 = vpop.permute.xlu1 %7893 }
 0xaf8   : > { %16561 = vst [vmem:[#allocation42_spill] sm:$0xff] %v13817_v49 }
 0xafa   : > { %v13825_v15 = vpop.permute.xlu0 %7898 }
 0xafb   : > { %v13819_v13 = vpop.permute.xlu1 %7903  ;;  %16564 = vst [vmem:[#allocation45_spill] sm:$0xff] %v13825_v15 }
 0xafc   : > { %16562 = vst [vmem:[#allocation44_spill] sm:$0xff] %v13819_v13 }
 0xafe   : > { %v13831_v14 = vpop.permute.xlu0 %7908 }
 0xaff   : > { %v13823_v63 = vpop.permute.xlu1 %7913  ;;  %16566 = vst [vmem:[#allocation49_spill] sm:$0xff] %v13831_v14 }
 0xb00   : > { %16563 = vst [vmem:[#allocation46_spill] sm:$0xff] %v13823_v63 }
 0xb02   : > { %v13835_v50 = vpop.permute.xlu0 %8087 }
 0xb03   : > { %v13827_v2 = vpop.permute.xlu1 %8092 }
 0xb06   : > { %v13839_v18 = vpop.permute.xlu0 %8097 }
 0xb07   : > { %v13829_v47 = vpop.permute.xlu1 %8102 }
 0xb08   : > { %16565 = vst [vmem:[#allocation47_spill] sm:$0xff] %v13829_v47 }
 0xb0a   : > { %v13845_v41 = vpop.permute.xlu0 %8107 }
 0xb0b   : > { %v13833_v60 = vpop.permute.xlu1 %8296  ;;  %16567 = vst [vmem:[#allocation48_spill] sm:$0xff] %v13845_v41 }
 0xb0e   : > { %v13851_v58 = vpop.permute.xlu0 %8301 }
 0xb0f   : > { %v13837_v36 = vpop.permute.xlu1 %8306 }
 0xb13   : > { %v4620_v9 = vpop.permute.xlu1 %4619 }
 0xb14   : > { %v4632_v59 = vmax.f32 %v13696_v11, %v4620_v9  ;;  %v4618_v11 = vpop.permute.xlu0 %4617 }
 0xb16   : > { %4722 = vrot.lane.b32.xlu0 %v4632_v59, %s10280_s16  ;;  %4708 = vrot.lane.b32.xlu1 %v4632_v59, %s10279_s15 }
 0xb18   : > { %v4624_v63 = vpop.permute.xlu1 %4623 }
 0xb19   : > { %v4634_v51 = vmax.f32 %v13709_v12, %v4624_v63  ;;  %v4625_v12 = vsel %vm3599_vm12, %v4618_v11, %v4620_v9  ;;  %v4622_v21 = vpop.permute.xlu0 %4621  ;;  %v9295_v9 = vld [vmem:[%s16025_s7 + $0x1e8] sm:$0xff] }
 0xb1a   : > { %4730 = vrot.lane.b32.xlu0 %v4632_v59, %s10281_s17  ;;  %v4631_v14 = vmax.f32 %v13692_v7, %v4625_v12  ;;  %v4626_v33 = vsel %vm3599_vm12, %v4622_v21, %v4624_v63  ;;  %v9301_v7 = vld [vmem:[%s16025_s7 + $0x218] sm:$0xff]  ;;  %v9304_v63 = vld [vmem:[%s16025_s7 + $0x230] sm:$0xff] }
 0xb1b   : > { %4712 = vrot.lane.b32.xlu1 %v4634_v51, %s10279_s15  ;;  %v4633_v53 = vmax.f32 %v13713_v19, %v4626_v33  ;;  %v9288_v19 = vld [vmem:[%s16025_s7 + $0x1b0] sm:$0xff]  ;;  %v9297_v21 = vld [vmem:[%s16025_s7 + $0x1f8] sm:$0xff] }
 0xb1c   : > { %v9296_v33 = vld [vmem:[%s16025_s7 + $0x1f0] sm:$0xff] }
 0xb1e   : > { %4738 = vrot.lane.b32.xlu0 %v4632_v59, %s10282_s18 }
 0xb1f   : > { %4724 = vrot.lane.b32.xlu1 %v4634_v51, %s10280_s16  ;;  %s16568_s16 = smov 15  }
 0xb22   : > { %4746 = vrot.lane.b32.xlu0 %v4632_v59, %s10283_s19 }
 0xb23   : > { %4732 = vrot.lane.b32.xlu1 %v4634_v51, %s10281_s17  ;;  %s16569_s17 = smov 14  }
 0xb26   : > { %4754 = vrot.lane.b32.xlu0 %v4632_v59, %s10284_s23 }
 0xb27   : > { %4740 = vrot.lane.b32.xlu1 %v4634_v51, %s10282_s18  ;;  %s16570_s18 = smov 13  }
 0xb29   : > { %v13911_v11 = vpop.permute.xlu1 %8510 }
 0xb2a   : > { %4762 = vrot.lane.b32.xlu0 %v4632_v59, %s10285_s8  ;;  %v9303_v59 = vld [vmem:[%s16025_s7 + $0x228] sm:$0xff]  ;;  %v13913_v12 = vpop.permute.xlu0 %8505 }
 0xb2b   : > { %4748 = vrot.lane.b32.xlu1 %v4634_v51, %s10283_s19  ;;  %s16572_s19 = smov 11  }
 0xb2e   : > { %4641 = vrot.lane.b32.xlu0 %v4631_v14, %s10272_s20 }
 0xb2f   : > { %4756 = vrot.lane.b32.xlu1 %v4634_v51, %s10284_s23  ;;  %s16571_s23 = smov 12  }
 0xb32   : > { %4650 = vrot.lane.b32.xlu0 %v4631_v14, %s10273_s26 }
 0xb33   : > { %4764 = vrot.lane.b32.xlu1 %v4634_v51, %s10285_s8  ;;  %v9302_v51 = vld [vmem:[%s16025_s7 + $0x220] sm:$0xff]  ;;  %s10304_s8 = smov 62  }
 0xb36   : > { %4659 = vrot.lane.b32.xlu0 %v4631_v14, %s16568_s16 }
 0xb37   : > { %4643 = vrot.lane.b32.xlu1 %v4633_v53, %s10272_s20  ;;  %s16576_s20 = smov 127  }
 0xb3a   : > { %4668 = vrot.lane.b32.xlu0 %v4631_v14, %s16569_s17 }
 0xb3b   : > { %4652 = vrot.lane.b32.xlu1 %v4633_v53, %s10273_s26  ;;  %s16577_s26 = smov 126  }
 0xb3e   : > { %4677 = vrot.lane.b32.xlu0 %v4631_v14, %s16570_s18 }
 0xb3f   : > { %4661 = vrot.lane.b32.xlu1 %v4633_v53, %s16568_s16  ;;  %s10299_s16 = smov 52  }
 0xb42   : > { %4686 = vrot.lane.b32.xlu0 %v4631_v14, %s16571_s23 }
 0xb43   : > { %4670 = vrot.lane.b32.xlu1 %v4633_v53, %s16569_s17  ;;  %s10300_s17 = smov 54  }
 0xb46   : > { %4695 = vrot.lane.b32.xlu0 %v4631_v14, %s16572_s19 }
 0xb47   : > { %4679 = vrot.lane.b32.xlu1 %v4633_v53, %s16570_s18  ;;  %s10301_s18 = smov 56  }
 0xb4a   : > { %4706 = vrot.lane.b32.xlu0 %v4631_v14, %s10279_s15  ;;  %v9305_v14 = vld [vmem:[%s16025_s7 + $0x238] sm:$0xff] }
 0xb4b   : > { %4688 = vrot.lane.b32.xlu1 %v4633_v53, %s16571_s23  ;;  %s10302_s23 = smov 58  }
 0xb4e   : > { %4710 = vrot.lane.b32.xlu0 %v4633_v53, %s10279_s15  ;;  %s10293_s15 = smov 40  }
 0xb4f   : > { %4697 = vrot.lane.b32.xlu1 %v4633_v53, %s16572_s19  ;;  %v9289_v53 = vld [vmem:[%s16025_s7 + $0x1b8] sm:$0xff]  ;;  %s10303_s19 = smov 60  }
 0xb52   : > { %8520 = vperm.xlu0 %9716, %v9301_v7   ;;  %v13915_v7 = vpop.permute.xlu1 %8515 }
 0xb53   : > { %8117 = vperm.xlu1 %9717, %v9288_v19   ;;  %v13917_v19 = vpop.permute.xlu0 %8311 }
 0xb54   : > { %16573 = vst [vmem:[#allocation50_spill] sm:$0xff] %v13917_v19 }
 0xb56   : > { %8321 = vperm.xlu0 %9716, %v9295_v9   ;;  %v13919_v9 = vpop.permute.xlu1 %8316 }
 0xb57   : > { %8525 = vperm.xlu1 %9717, %v9302_v51   ;;  %16574 = vst [vmem:[#allocation52_spill] sm:$0xff] %v13919_v9  ;;  %v13921_v51 = vpop.permute.xlu0 %8112 }
 0xb58   : > { %16575 = vst [vmem:[#allocation51_spill] sm:$0xff] %v13921_v51 }
 0xb5a   : > { %8122 = vperm.xlu0 %9716, %v9289_v53  }
 0xb5b   : > { %8326 = vperm.xlu1 %9717, %v9296_v33  }
 0xb5e   : > { %8530 = vperm.xlu0 %9716, %v9303_v59  }
 0xb5f   : > { %8331 = vperm.xlu1 %9717, %v9297_v21  }
 0xb62   : > { %8535 = vperm.xlu0 %9716, %v9304_v63  }
 0xb63   : > { %8540 = vperm.xlu1 %9717, %v9305_v14  }
 0xb88   : > { %v4723_v53 = vpop.permute.xlu0 %4722  ;;  %v4709_v33 = vpop.permute.xlu1 %4708 }
 0xb8c   : > { %v4731_v59 = vpop.permute.xlu0 %4730 }
 0xb8d   : > { %v4713_v21 = vpop.permute.xlu1 %4712 }
 0xb90   : > { %v4739_v10 = vpop.permute.xlu0 %4738 }
 0xb91   : > { %v4725_v32 = vpop.permute.xlu1 %4724 }
 0xb94   : > { %v4747_v63 = vpop.permute.xlu0 %4746 }
 0xb95   : > { %v4733_v14 = vpop.permute.xlu1 %4732 }
 0xb98   : > { %v4755_v13 = vpop.permute.xlu0 %4754 }
 0xb99   : > { %v4741_v5 = vpop.permute.xlu1 %4740 }
 0xb9c   : > { %v4763_v26 = vpop.permute.xlu0 %4762 }
 0xb9d   : > { %v4749_v54 = vpop.permute.xlu1 %4748 }
 0xba0   : > { %v4642_v22 = vpop.permute.xlu0 %4641 }
 0xba1   : > { %4648 = vst.msk [vmem:[#allocation3] sm:$0xff] %vm4647_vm15, %v4642_v22  ;;  %v4757_v37 = vpop.permute.xlu1 %4756 }
 0xba4   : > { %v4651_v41 = vpop.permute.xlu0 %4650 }
 0xba5   : > { %4657 = vst.msk [vmem:[#allocation3] sm:$0xff] %vm4656_vm8, %v4651_v41  ;;  %v4765_v51 = vpop.permute.xlu1 %4764 }
 0xba8   : > { %v4660_v15 = vpop.permute.xlu0 %4659 }
 0xba9   : > { %4666 = vst.msk [vmem:[#allocation3] sm:$0xff] %vm4665_vm9, %v4660_v15  ;;  %v4644_v30 = vpop.permute.xlu1 %4643 }
 0xbaa   : > { %4649 = vst.msk [vmem:[#allocation3 + $0x10] sm:$0xff] %vm4647_vm15, %v4644_v30 }
 0xbac   : > { %v4669_v9 = vpop.permute.xlu0 %4668 }
 0xbad   : > { %4675 = vst.msk [vmem:[#allocation3] sm:$0xff] %vm4674_vm10, %v4669_v9  ;;  %v4653_v29 = vpop.permute.xlu1 %4652 }
 0xbae   : > { %4658 = vst.msk [vmem:[#allocation3 + $0x10] sm:$0xff] %vm4656_vm8, %v4653_v29 }
 0xbb0   : > { %v4678_v22 = vpop.permute.xlu0 %4677 }
 0xbb1   : > { %4684 = vst.msk [vmem:[#allocation3] sm:$0xff] %vm4683_vm11, %v4678_v22  ;;  %v4662_v41 = vpop.permute.xlu1 %4661 }
 0xbb2   : > { %4667 = vst.msk [vmem:[#allocation3 + $0x10] sm:$0xff] %vm4665_vm9, %v4662_v41 }
 0xbb4   : > { %v4687_v56 = vpop.permute.xlu0 %4686 }
 0xbb5   : > { %4693 = vst.msk [vmem:[#allocation3] sm:$0xff] %vm4692_vm14, %v4687_v56  ;;  %v4671_v15 = vpop.permute.xlu1 %4670 }
 0xbb6   : > { %4676 = vst.msk [vmem:[#allocation3 + $0x10] sm:$0xff] %vm4674_vm10, %v4671_v15 }
 0xbb8   : > { %v4696_v30 = vpop.permute.xlu0 %4695 }
 0xbb9   : > { %4702 = vst.msk [vmem:[#allocation3] sm:$0xff] %vm4701_vm7, %v4696_v30  ;;  %v4680_v9 = vpop.permute.xlu1 %4679 }
 0xbba   : > { %4685 = vst.msk [vmem:[#allocation3 + $0x10] sm:$0xff] %vm4683_vm11, %v4680_v9 }
 0xbbc   : > { %v4707_v29 = vpop.permute.xlu0 %4706 }
 0xbbd   : > { %v4715_v22 = vsel %vm4714_vm6, %v4707_v29, %v4709_v33  ;;  %v4689_v25 = vpop.permute.xlu1 %4688 }
 0xbbe   : > { %4720 = vst.msk [vmem:[#allocation3 + $0x8] sm:$0xff] %vm4719_vm5, %v4715_v22 }
 0xbbf   : > { %4694 = vst.msk [vmem:[#allocation3 + $0x10] sm:$0xff] %vm4692_vm14, %v4689_v25 }
 0xbc0   : > { %4728 = vst.msk [vmem:[#allocation3 + $0x8] sm:$0xff] %vm4647_vm15, %v4723_v53  ;;  %v4711_v56 = vpop.permute.xlu0 %4710  ;;  %v13949_v25 = vld [vmem:[#allocation3] sm:$0xff] }
 0xbc1   : > { %4736 = vst.msk [vmem:[#allocation3 + $0x8] sm:$0xff] %vm4656_vm8, %v4731_v59  ;;  %v4716_v41 = vsel %vm4714_vm6, %v4711_v56, %v4713_v21  ;;  %v4698_v15 = vpop.permute.xlu1 %4697  ;;  %vm5277_vm6 = vcmask 916480  }
 0xbc2   : > { %4744 = vst.msk [vmem:[#allocation3 + $0x8] sm:$0xff] %vm4665_vm9, %v4739_v10 }
 0xbc3   : > { %4752 = vst.msk [vmem:[#allocation3 + $0x8] sm:$0xff] %vm4674_vm10, %v4747_v63 }
 0xbc4   : > { %4721 = vst.msk [vmem:[#allocation3 + $0x18] sm:$0xff] %vm4719_vm5, %v4716_v41  ;;  %vm4809_vm5 = vcmask 130048  }
 0xbc5   : > { %4703 = vst.msk [vmem:[#allocation3 + $0x10] sm:$0xff] %vm4701_vm7, %v4698_v15  ;;  %vm5806_vm7 = vcmask 785408  }
 0xbc6   : > { %4760 = vst.msk [vmem:[#allocation3 + $0x8] sm:$0xff] %vm4683_vm11, %v4755_v13 }
 0xbc7   : > { %4729 = vst.msk [vmem:[#allocation3 + $0x18] sm:$0xff] %vm4647_vm15, %v4725_v32  ;;  %vm6456_vm15 = vcmask 425264  }
 0xbc8   : > { %4768 = vst.msk [vmem:[#allocation3 + $0x8] sm:$0xff] %vm4692_vm14, %v4763_v26 }
 0xbc9   : > { %4737 = vst.msk [vmem:[#allocation3 + $0x18] sm:$0xff] %vm4656_vm8, %v4733_v14  ;;  %vm6489_vm8 = vcmask 572864  }
 0xbca   : > { %4745 = vst.msk [vmem:[#allocation3 + $0x18] sm:$0xff] %vm4665_vm9, %v4741_v5  ;;  %vm6522_vm9 = vcmask 720464  }
 0xbcb   : > { %4753 = vst.msk [vmem:[#allocation3 + $0x18] sm:$0xff] %vm4674_vm10, %v4749_v54  ;;  %vm6555_vm10 = vcmask 868064  }
 0xbcc   : > { %4761 = vst.msk [vmem:[#allocation3 + $0x18] sm:$0xff] %vm4683_vm11, %v4757_v37  ;;  %v13951_v10 = vld [vmem:[#allocation3 + $0x10] sm:$0xff]  ;;  %vm6588_vm11 = vcmask 1015664  }
 0xbcd   : > { %4769 = vst.msk [vmem:[#allocation3 + $0x18] sm:$0xff] %vm4692_vm14, %v4765_v51  ;;  %vm6621_vm14 = vcmask 113664  }
 0xbcf   : > { %v4779_v32 = vld [vmem:[#allocation3 + $0x8] sm:$0xff] }
 0xbd0   : > { %v10158_v26 = vpack.i.bf16 %v4779_v32, %v13949_v25 }
 0xbd1   : > { %v13969_v54 = vpop.permute.xlu0 %8520 }
 0xbd2   : > { %10159 = vrot.lane.b32.xlu0 %v10158_v26, %s16576_s20  ;;  %16580 = vst [vmem:[#allocation53_spill] sm:$0xff] %v13969_v54  ;;  %v13971_v51 = vpop.permute.xlu1 %8117 }
 0xbd3   : > { %16581 = vst [vmem:[#allocation55_spill] sm:$0xff] %v13971_v51 }
 0xbd4   : > { %v4781_v53 = vld [vmem:[#allocation3 + $0x18] sm:$0xff] }
 0xbd5   : > { %v10198_v5 = vpack.i.bf16 %v4781_v53, %v13951_v10  ;;  %v9456_v37 = vpack.c.bf16 %v4781_v53, %v4779_v32  ;;  %v13973_v33 = vpop.permute.xlu0 %8321 }
 0xbd6   : > { %10164 = vrot.lane.b32.xlu0 %v10158_v26, %s16577_s26  ;;  %16582 = vst [vmem:[#allocation54_spill] sm:$0xff] %v13973_v33  ;;  %v13975_v59 = vpop.permute.xlu1 %8525 }
 0xbd7   : > { %10199 = vrot.lane.b32.xlu1 %v10198_v5, %s16576_s20  ;;  %16583 = vst [vmem:[#allocation56_spill] sm:$0xff] %v13975_v59 }
 0xbd9   : > { %v13977_v21 = vpop.permute.xlu0 %8122 }
 0xbda   : > { %10169 = vrot.lane.b32.xlu0 %v10158_v26, %s10289_s27  ;;  %16584 = vst [vmem:[#allocation58_spill] sm:$0xff] %v13977_v21  ;;  %v13979_v63 = vpop.permute.xlu1 %8326 }
 0xbdb   : > { %10204 = vrot.lane.b32.xlu1 %v10198_v5, %s16577_s26  ;;  %16585 = vst [vmem:[#allocation57_spill] sm:$0xff] %v13979_v63 }
 0xbdd   : > { %v13981_v14 = vpop.permute.xlu0 %8530 }
 0xbde   : > { %10174 = vrot.lane.b32.xlu0 %v10158_v26, %s10286_s30  ;;  %16586 = vst [vmem:[#allocation59_spill] sm:$0xff] %v13981_v14  ;;  %v13983_v30 = vpop.permute.xlu1 %8331 }
 0xbdf   : > { %10209 = vrot.lane.b32.xlu1 %v10198_v5, %s10289_s27  ;;  %16587 = vst [vmem:[#allocation61_spill] sm:$0xff] %v13983_v30 }
 0xbe1   : > { %v13985_v9 = vpop.permute.xlu0 %8535 }
 0xbe2   : > { %10179 = vrot.lane.b32.xlu0 %v10158_v26, %s16578_s13  ;;  %16588 = vst [vmem:[#allocation60_spill] sm:$0xff] %v13985_v9  ;;  %v13987_v29 = vpop.permute.xlu1 %8540 }
 0xbe3   : > { %10214 = vrot.lane.b32.xlu1 %v10198_v5, %s10286_s30  ;;  %16589 = vst [vmem:[#allocation62_spill] sm:$0xff] %v13987_v29  ;;  %s10292_s30 = smov 38  }
 0xbe6   : > { %10184 = vrot.lane.b32.xlu0 %v10158_v26, %s10290_s22 }
 0xbe7   : > { %10219 = vrot.lane.b32.xlu1 %v10198_v5, %s16578_s13 }
 0xbea   : > { %10189 = vrot.lane.b32.xlu0 %v10158_v26, %s10291_s21 }
 0xbeb   : > { %10224 = vrot.lane.b32.xlu1 %v10198_v5, %s10290_s22  ;;  %s10305_s22 = smov 64  }
 0xbee   : > { %10194 = vrot.lane.b32.xlu0 %v10158_v26, %s16579_s10 }
 0xbef   : > { %10229 = vrot.lane.b32.xlu1 %v10198_v5, %s10291_s21  ;;  %s16591_s21 = smov 92  }
 0xbf3   : > { %10234 = vrot.lane.b32.xlu1 %v10198_v5, %s16579_s10  ;;  %s16592_s10 = smov 91  }
 0xc44   : > { %v10160_v22 = vpop.permute.xlu0 %10159 }
 0xc45   : > { %v10162_v56 = vunpack.i.h.bf16 %v10160_v22  ;;  %v10161_v41 = vunpack.i.l.bf16 %v10160_v22  ;;  %v9106_v22 = vld [vmem:[%s16023_s5 + $0x40] sm:$0xff] }
 0xc47   : > { %v4803_v21 = vsel %vm588_vm0, %v10161_v41, %v10162_v56 }
 0xc48   : > { %v10165_v15 = vpop.permute.xlu0 %10164 }
 0xc49   : > { %v10200_v32 = vpop.permute.xlu1 %10199  ;;  %v10166_v5 = vunpack.i.l.bf16 %v10165_v15  ;;  %v10167_v13 = vunpack.i.h.bf16 %v10165_v15 }
 0xc4a   : > { %v10202_v26 = vunpack.i.h.bf16 %v10200_v32  ;;  %v10201_v53 = vunpack.i.l.bf16 %v10200_v32 }
 0xc4b   : > { %v5101_v32 = vsel %vm16212_vm1, %v10166_v5, %v10167_v13 }
 0xc4c   : > { %v4804_v51 = vsel %vm588_vm0, %v10201_v53, %v10202_v26  ;;  %v9452_v63 = vpack.c.bf16 %v10202_v26, %v10162_v56  ;;  %v10170_v33 = vpop.permute.xlu0 %10169 }
 0xc4d   : > { %v10205_v30 = vpop.permute.xlu1 %10204  ;;  %v9454_v14 = vpack.c.bf16 %v4804_v51, %v4803_v21  ;;  %v10172_v15 = vunpack.i.h.bf16 %v10170_v33  ;;  %v10171_v59 = vunpack.i.l.bf16 %v10170_v33 }
 0xc4e   : > { %v10206_v9 = vunpack.i.l.bf16 %v10205_v30  ;;  %9453 = vmatprep.subr.bf16.mxu0 %v9452_v63  ;;  %v10207_v29 = vunpack.i.h.bf16 %v10205_v30  ;;  %v16590_v30 = vpack.c.bf16 %v13951_v10, %v13949_v25 }
 0xc4f   : > { %9455 = vmatpush1.bf16.msra.mxu0 %v9454_v14  ;;  %v5278_v33 = vsel %vm5277_vm6, %v10171_v59, %v10172_v15  ;;  %v9108_v59 = vld [vmem:[%s16023_s5 + $0x50] sm:$0xff] }
 0xc50   : > { %9457 = vmatprep.subr.bf16.mxu0 %v9456_v37  ;;  %v9460_v41 = vpack.c.bf16 %v10207_v29, %v10167_v13  ;;  %v5102_v56 = vsel %vm16212_vm1, %v10206_v9, %v10207_v29  ;;  %v13999_v14 = vpop.permute.xlu0 %10174  ;;  %v9107_v13 = vld [vmem:[%s16023_s5 + $0x48] sm:$0xff]  ;;  %vm6902_vm1 = vcmask 244864  }
 0xc51   : > { %v10210_v26 = vpop.permute.xlu1 %10209  ;;  %v13996_v51 = vpack.c.bf16 %v5102_v56, %v5101_v32  ;;  %v9131_v37 = vld [vmem:[%s16023_s5 + $0x88] sm:$0xff]  ;;  %v10177_v25 = vunpack.i.h.bf16 %v13999_v14  ;;  %v9110_v56 = vld [vmem:[%s16023_s5 + $0x60] sm:$0xff] }
 0xc52   : > { %v10212_v21 = vunpack.i.h.bf16 %v10210_v26  ;;  %v10211_v63 = vunpack.i.l.bf16 %v10210_v26  ;;  %9114 = vmatmul.mubr.msk.f32.vlgmr.msra.gmra.mrb[4].mxu0 %vm4809_vm5, %v9106_v22  ;;  %9488 = vmatprep.subr.bf16.mxu1 %v9460_v41  ;;  %v9132_v22 = vld [vmem:[%s16023_s5 + $0x90] sm:$0xff]  ;;  %v9134_v26 = vld [vmem:[%s16023_s5 + $0xa0] sm:$0xff] }
 0xc53   : > { %9459 = vmatpush1.bf16.msra.mxu0 %v16590_v30  ;;  %9489 = vmatpush1.bf16.msra.mxu1 %v13996_v51  ;;  %v9112_v30 = vld [vmem:[%s16023_s5 + $0x70] sm:$0xff] }
 0xc54   : > { %v5279_v9 = vsel %vm5277_vm6, %v10211_v63, %v10212_v21  ;;  %9461 = vmatprep.subr.bf16.mxu0 %v9460_v41  ;;  %4904 = vmatprep.mubr.f32.mxu0 %v13473_v3  ;;  %v9464_v29 = vpack.c.bf16 %v10212_v21, %v10172_v15  ;;  %v9109_v15 = vld [vmem:[%s16023_s5 + $0x58] sm:$0xff]  ;;  %v9111_v21 = vld [vmem:[%s16023_s5 + $0x68] sm:$0xff]  ;;  %vm6687_vm6 = vcmask 408864  }
 0xc55   : > { %v10215_v53 = vpop.permute.xlu1 %10214  ;;  %v9466_v5 = vpack.c.bf16 %v5279_v9, %v5278_v33  ;;  %v9133_v41 = vld [vmem:[%s16023_s5 + $0x98] sm:$0xff]  ;;  %v9135_v63 = vld [vmem:[%s16023_s5 + $0xa8] sm:$0xff] }
 0xc56   : > { %v10217_v10 = vunpack.i.h.bf16 %v10215_v53  ;;  %9115 = vmatmul.mubr.msk.f32.gmra.mrb[6].mxu0 %vm4809_vm5, %v9107_v13  ;;  %9139 = vmatmul.mubr.msk.f32.vlgmr.msra.gmra.mrb[0].mxu1 %vm4809_vm5, %v9131_v37  ;;  %v9136_v13 = vld [vmem:[%s16023_s5 + $0xb0] sm:$0xff]  ;;  %v10216_v37 = vunpack.i.l.bf16 %v10215_v53  ;;  %v9113_v9 = vld [vmem:[%s16023_s5 + $0x78] sm:$0xff]  ;;  %v10176_v53 = vunpack.i.l.bf16 %v13999_v14  ;;  %v9146_v14 = vld [vmem:[%s16023_s5 + $0xc0] sm:$0xff] }
 0xc57   : > { %9465 = vmatprep.subr.bf16.mxu1 %v9464_v29  ;;  %4910 = vmatprep.mubr.f32.mxu0 %v13473_v3  ;;  %v9137_v29 = vld [vmem:[%s16023_s5 + $0xb8] sm:$0xff] }
 0xc58   : > { %9467 = vmatpush1.bf16.msra.mxu1 %v9466_v5  ;;  %5207 = vmatprep.mubr.f32.mxu1 %v13473_v3  ;;  %v9468_v32 = vpack.c.bf16 %v10217_v10, %v10177_v25  ;;  %v14076_v5 = vpop.permute.xlu0 %10179 }
 0xc59   : > { %v14065_v33 = vpop.permute.xlu1 %10219 }
 0xc5a   : > { %9116 = vmatmul.mubr.msk.f32.gmra.mrb[8].mxu0 %vm4809_vm5, %v9108_v59  ;;  %9140 = vmatmul.mubr.msk.f32.gmra.mrb[2].mxu1 %vm4809_vm5, %v9132_v22  ;;  %v5455_v59 = vsel %vm3599_vm12, %v10216_v37, %v10217_v10  ;;  %v10222_v22 = vunpack.i.h.bf16 %v14065_v33  ;;  %v5454_v10 = vsel %vm3599_vm12, %v10176_v53, %v10177_v25  ;;  %v14101_v25 = vld [vmem:[#allocation4] sm:$0xff]  ;;  %v9152_v53 = vld [vmem:[%s16023_s5 + $0xf0] sm:$0xff]  ;;  %vm5983_vm12 = vcmask 777216  }
 0xc5b   : > { %9469 = vmatprep.subr.bf16.mxu1 %v9468_v32  ;;  %4916 = vmatprep.mubr.f32.mxu0 %v13473_v3  ;;  %v4770_v32 = vld [vmem:[%s16023_s5] sm:$0xff] }
 0xc5c   : > { %5213 = vmatprep.mubr.f32.mxu1 %v13473_v3  ;;  %v4774_v37 = vld [vmem:[%s16023_s5 + $0x20] sm:$0xff] }
 0xc5e   : > { %9117 = vmatmul.mubr.msk.f32.gmra.mrb[10].mxu0 %vm4809_vm5, %v9109_v15  ;;  %9141 = vmatmul.mubr.msk.f32.gmra.mrb[4].mxu1 %vm4809_vm5, %v9133_v41  ;;  %v10182_v15 = vunpack.i.h.bf16 %v14076_v5  ;;  %v9470_v41 = vpack.c.bf16 %v5455_v59, %v5454_v10  ;;  %v4776_v59 = vld [vmem:[%s16023_s5 + $0x30] sm:$0xff]  ;;  %v9153_v10 = vld [vmem:[%s16023_s5 + $0xf8] sm:$0xff] }
 0xc5f   : > { %4922 = vmatprep.mubr.f32.mxu0 %v13473_v3  ;;  %5219 = vmatprep.mubr.f32.mxu1 %v13473_v3 }
 0xc62   : > { %9118 = vmatmul.mubr.msk.f32.gmra.mrb[12].mxu0 %vm4809_vm5, %v9110_v56  ;;  %9142 = vmatmul.mubr.msk.f32.gmra.mrb[6].mxu1 %vm4809_vm5, %v9134_v26  ;;  %v9472_v56 = vpack.c.bf16 %v10222_v22, %v10182_v15  ;;  %v4771_v26 = vld [vmem:[%s16023_s5 + $0x8] sm:$0xff] }
 0xc63   : > { %4928 = vmatprep.mubr.f32.mxu0 %v13473_v3  ;;  %5225 = vmatprep.mubr.f32.mxu1 %v13473_v3 }
 0xc66   : > { %9119 = vmatmul.mubr.msk.f32.gmra.mrb[14].mxu0 %vm4809_vm5, %v9111_v21  ;;  %9143 = vmatmul.mubr.msk.f32.gmra.mrb[8].mxu1 %vm4809_vm5, %v9135_v63  ;;  %v4772_v21 = vld [vmem:[%s16023_s5 + $0x10] sm:$0xff]  ;;  %v9149_v63 = vld [vmem:[%s16023_s5 + $0xd8] sm:$0xff] }
 0xc67   : > { %4934 = vmatprep.mubr.f32.mxu0 %v13473_v3  ;;  %5231 = vmatprep.mubr.f32.mxu1 %v13473_v3 }
 0xc6a   : > { %9120 = vmatmul.mubr.msk.f32.gmra.mrb[16].mxu0 %vm4809_vm5, %v9112_v30  ;;  %9144 = vmatmul.mubr.msk.f32.gmra.mrb[10].mxu1 %vm4809_vm5, %v9136_v13  ;;  %v4773_v30 = vld [vmem:[%s16023_s5 + $0x18] sm:$0xff]  ;;  %v9150_v13 = vld [vmem:[%s16023_s5 + $0xe0] sm:$0xff] }
 0xc6b   : > { %4940 = vmatprep.mubr.f32.mxu0 %v13473_v3  ;;  %5237 = vmatprep.mubr.f32.mxu1 %v13473_v3 }
 0xc6e   : > { %9121 = vmatmul.mubr.msk.f32.gmra.mrb[18].mxu0 %vm4809_vm5, %v9113_v9  ;;  %9145 = vmatmul.mubr.msk.f32.gmra.mrb[12].mxu1 %vm4809_vm5, %v9137_v29  ;;  %v9151_v9 = vld [vmem:[%s16023_s5 + $0xe8] sm:$0xff] }
 0xc6f   : > { %5035 = vmatprep.mubr.f32.mxu0 %v13473_v3  ;;  %5372 = vmatprep.mubr.f32.mxu1 %v13473_v3  ;;  %v9147_v3 = vld [vmem:[%s16023_s5 + $0xc8] sm:$0xff] }
 0xc70   : > { %v4775_v29 = vld [vmem:[%s16023_s5 + $0x28] sm:$0xff] }
 0xc72   : > { %9122 = vmatmul.mubr.msk.f32.vlgmr.msra.gmra.mrb[4].mxu0 %vm4809_vm5, %v4770_v32  ;;  %9154 = vmatmul.mubr.msk.f32.vlgmr.msra.gmra.mrb[14].mxu1 %vm4809_vm5, %v9146_v14  ;;  %v10221_v32 = vunpack.i.l.bf16 %v14065_v33  ;;  %v10225_v14 = vpop.permute.xlu1 %10224  ;;  %v10185_v33 = vpop.permute.xlu0 %10184 }
 0xc73   : > { %9463 = vmatpush1.bf16.msra.mxu0 %v13996_v51  ;;  %9471 = vmatpush1.bf16.msra.mxu1 %v9470_v41  ;;  %v9148_v51 = vld [vmem:[%s16023_s5 + $0xd0] sm:$0xff]  ;;  %v4777_v41 = vld [vmem:[%s16023_s5 + $0x38] sm:$0xff] }
 0xc74   : > { %9473 = vmatprep.subr.bf16.mxu1 %v9472_v56  ;;  %5378 = vmatprep.mubr.f32.mxu1 %v14101_v25  ;;  %v10181_v56 = vunpack.i.l.bf16 %v14076_v5  ;;  %v9130_v5 = vld [vmem:[%s16023_s5 + $0x80] sm:$0xff] }
 0xc75   : > { %5041 = vmatprep.mubr.f32.mxu0 %v14101_v25 }
 0xc76   : > { %9155 = vmatmul.mubr.msk.f32.gmra.mrb[0].mxu1 %vm4809_vm5, %v9147_v3  ;;  %9123 = vmatmul.mubr.msk.f32.gmra.mrb[6].mxu0 %vm4809_vm5, %v4771_v26  ;;  %v5631_v3 = vsel %vm16211_vm2, %v10221_v32, %v10222_v22  ;;  %v10227_v26 = vunpack.i.h.bf16 %v10225_v14  ;;  %v10187_v22 = vunpack.i.h.bf16 %v10185_v33  ;;  %v10230_v32 = vpop.permute.xlu1 %10229 }
 0xc77   : > { %5384 = vmatprep.mubr.f32.mxu1 %v14101_v25  ;;  %5047 = vmatprep.mubr.f32.mxu0 %v14101_v25 }
 0xc7a   : > { %9156 = vmatmul.mubr.msk.f32.gmra.mrb[2].mxu1 %vm4809_vm5, %v9148_v51  ;;  %9124 = vmatmul.mubr.msk.f32.gmra.mrb[8].mxu0 %vm4809_vm5, %v4772_v21  ;;  %v9162_v51 = vld [vmem:[%s16023_s5 + $0x100] sm:$0xff]  ;;  %v5630_v21 = vsel %vm16211_vm2, %v10181_v56, %v10182_v15  ;;  %v9164_v15 = vld [vmem:[%s16023_s5 + $0x110] sm:$0xff]  ;;  %v10190_v56 = vpop.permute.xlu0 %10189  ;;  %vm6862_vm2 = vcmask 97280  }
 0xc7b   : > { %5390 = vmatprep.mubr.f32.mxu1 %v14101_v25  ;;  %5053 = vmatprep.mubr.f32.mxu0 %v14101_v25 }
 0xc7e   : > { %9157 = vmatmul.mubr.msk.f32.gmra.mrb[4].mxu1 %vm4809_vm5, %v9149_v63  ;;  %9125 = vmatmul.mubr.msk.f32.gmra.mrb[10].mxu0 %vm4809_vm5, %v4773_v30  ;;  %v9474_v63 = vpack.c.bf16 %v5631_v3, %v5630_v21  ;;  %v9476_v30 = vpack.c.bf16 %v10227_v26, %v10187_v22  ;;  %v10192_v21 = vunpack.i.h.bf16 %v10190_v56 }
 0xc7f   : > { %5396 = vmatprep.mubr.f32.mxu1 %v14101_v25  ;;  %5059 = vmatprep.mubr.f32.mxu0 %v14101_v25 }
 0xc82   : > { %9158 = vmatmul.mubr.msk.f32.gmra.mrb[6].mxu1 %vm4809_vm5, %v9150_v13  ;;  %9126 = vmatmul.mubr.msk.f32.gmra.mrb[12].mxu0 %vm4809_vm5, %v4774_v37  ;;  %v9163_v13 = vld [vmem:[%s16023_s5 + $0x108] sm:$0xff]  ;;  %v9165_v37 = vld [vmem:[%s16023_s5 + $0x118] sm:$0xff] }
 0xc83   : > { %5402 = vmatprep.mubr.f32.mxu1 %v14101_v25  ;;  %5065 = vmatprep.mubr.f32.mxu0 %v14101_v25 }
 0xc86   : > { %9159 = vmatmul.mubr.msk.f32.gmra.mrb[8].mxu1 %vm4809_vm5, %v9151_v9  ;;  %9127 = vmatmul.mubr.msk.f32.gmra.mrb[14].mxu0 %vm4809_vm5, %v4775_v29  ;;  %v9166_v9 = vld [vmem:[%s16023_s5 + $0x120] sm:$0xff]  ;;  %v9167_v29 = vld [vmem:[%s16023_s5 + $0x128] sm:$0xff] }
 0xc87   : > { %5408 = vmatprep.mubr.f32.mxu1 %v14101_v25  ;;  %5071 = vmatprep.mubr.f32.mxu0 %v14101_v25 }
 0xc8a   : > { %9160 = vmatmul.mubr.msk.f32.gmra.mrb[10].mxu1 %vm4809_vm5, %v9152_v53  ;;  %9128 = vmatmul.mubr.msk.f32.gmra.mrb[16].mxu0 %vm4809_vm5, %v4776_v59  ;;  %v9168_v53 = vld [vmem:[%s16023_s5 + $0x130] sm:$0xff]  ;;  %v10226_v59 = vunpack.i.l.bf16 %v10225_v14  ;;  %v9178_v14 = vld [vmem:[%s16023_s5 + $0x140] sm:$0xff] }
 0xc8b   : > { %5414 = vmatprep.mubr.f32.mxu1 %v14101_v25  ;;  %5077 = vmatprep.mubr.f32.mxu0 %v14101_v25 }
 0xc8c   : > { %v5808_v3 = vsel %vm5806_vm7, %v10226_v59, %v10227_v26  ;;  %v9180_v26 = vld [vmem:[%s16023_s5 + $0x150] sm:$0xff]  ;;  %v10191_v59 = vunpack.i.l.bf16 %v10190_v56  ;;  %v9195_v56 = vld [vmem:[%s16023_s5 + $0x188] sm:$0xff] }
 0xc8e   : > { %9161 = vmatmul.mubr.msk.f32.gmra.mrb[12].mxu1 %vm4809_vm5, %v9153_v10  ;;  %9129 = vmatmul.mubr.msk.f32.gmra.mrb[18].mxu0 %vm4809_vm5, %v4777_v41  ;;  %v9169_v10 = vld [vmem:[%s16023_s5 + $0x138] sm:$0xff]  ;;  %v10186_v41 = vunpack.i.l.bf16 %v10185_v33  ;;  %v9179_v33 = vld [vmem:[%s16023_s5 + $0x148] sm:$0xff] }
 0xc8f   : > { %5548 = vmatprep.mubr.f32.mxu1 %v14101_v25  ;;  %5195 = vmatprep.mubr.f32.mxu0 %v14101_v25 }
 0xc92   : > { %9170 = vmatmul.mubr.msk.f32.vlgmr.msra.gmra.mrb[14].mxu1 %vm4809_vm5, %v9162_v51  ;;  %9138 = vmatmul.mubr.msk.f32.vlgmr.msra.gmra.mrb[4].mxu0 %vm4809_vm5, %v9130_v5  ;;  %v10232_v51 = vunpack.i.h.bf16 %v10230_v32  ;;  %v5807_v5 = vsel %vm5806_vm7, %v10186_v41, %v10187_v22  ;;  %v9181_v22 = vld [vmem:[%s16023_s5 + $0x158] sm:$0xff]  ;;  %vm6728_vm7 = vcmask 556464  }
 0xc93   : > { %9475 = vmatpush1.bf16.msra.mxu1 %v9474_v63  ;;  %5554 = vmatprep.mubr.f32.mxu1 %v14101_v25  ;;  %v9478_v63 = vpack.c.bf16 %v5808_v3, %v5807_v5 }
 0xc94   : > { %9477 = vmatprep.subr.bf16.mxu1 %v9476_v30  ;;  %v9480_v30 = vpack.c.bf16 %v10232_v51, %v10192_v21 }
 0xc96   : > { %9171 = vmatmul.mubr.msk.f32.gmra.mrb[0].mxu1 %vm4809_vm5, %v9163_v13  ;;  %v9182_v13 = vld [vmem:[%s16023_s5 + $0x160] sm:$0xff] }
 0xc97   : > { %5560 = vmatprep.mubr.f32.mxu1 %v14101_v25 }
 0xc9a   : > { %9172 = vmatmul.mubr.msk.f32.gmra.mrb[2].mxu1 %vm4809_vm5, %v9164_v15  ;;  %v9183_v15 = vld [vmem:[%s16023_s5 + $0x168] sm:$0xff] }
 0xc9b   : > { %5566 = vmatprep.mubr.f32.mxu1 %v14101_v25 }
 0xc9e   : > { %9173 = vmatmul.mubr.msk.f32.gmra.mrb[4].mxu1 %vm4809_vm5, %v9165_v37  ;;  %v9184_v37 = vld [vmem:[%s16023_s5 + $0x170] sm:$0xff] }
 0xc9f   : > { %5572 = vmatprep.mubr.f32.mxu1 %v14101_v25 }
 0xca2   : > { %9174 = vmatmul.mubr.msk.f32.gmra.mrb[6].mxu1 %vm4809_vm5, %v9166_v9  ;;  %v10231_v9 = vunpack.i.l.bf16 %v10230_v32  ;;  %v9194_v32 = vld [vmem:[%s16023_s5 + $0x180] sm:$0xff] }
 0xca3   : > { %5578 = vmatprep.mubr.f32.mxu1 %v14101_v25 }
 0xca4   : > { %v5985_v41 = vsel %vm5983_vm12, %v10231_v9, %v10232_v51  ;;  %v9196_v51 = vld [vmem:[%s16023_s5 + $0x190] sm:$0xff] }
 0xca6   : > { %9175 = vmatmul.mubr.msk.f32.gmra.mrb[8].mxu1 %vm4809_vm5, %v9167_v29  ;;  %v10235_v29 = vpop.permute.xlu1 %10234 }
 0xca7   : > { %5584 = vmatprep.mubr.f32.mxu1 %v14101_v25  ;;  %v10237_v3 = vunpack.i.h.bf16 %v10235_v29 }
 0xcaa   : > { %9176 = vmatmul.mubr.msk.f32.gmra.mrb[10].mxu1 %vm4809_vm5, %v9168_v53  ;;  %v9185_v53 = vld [vmem:[%s16023_s5 + $0x178] sm:$0xff] }
 0xcab   : > { %5590 = vmatprep.mubr.f32.mxu1 %v14101_v25 }
 0xcae   : > { %9177 = vmatmul.mubr.msk.f32.gmra.mrb[12].mxu1 %vm4809_vm5, %v9169_v10  ;;  %v10195_v10 = vpop.permute.xlu0 %10194 }
 0xcaf   : > { %5724 = vmatprep.mubr.f32.mxu1 %v14101_v25  ;;  %v10197_v5 = vunpack.i.h.bf16 %v10195_v10 }
 0xcb2   : > { %9186 = vmatmul.mubr.msk.f32.vlgmr.msra.gmra.mrb[14].mxu1 %vm4809_vm5, %v9178_v14  ;;  %v5984_v14 = vsel %vm5983_vm12, %v10191_v59, %v10192_v21  ;;  %v9197_v21 = vld [vmem:[%s16023_s5 + $0x198] sm:$0xff]  ;;  %vm6761_vm12 = vcmask 704064  }
 0xcb3   : > { %9479 = vmatpush1.bf16.msra.mxu1 %v9478_v63  ;;  %5730 = vmatprep.mubr.f32.mxu1 %v14101_v25  ;;  %v9482_v63 = vpack.c.bf16 %v5985_v41, %v5984_v14  ;;  %v9212_v41 = vld [vmem:[%s16023_s5 + $0x1d0] sm:$0xff]  ;;  %v9215_v14 = vld [vmem:[%s16023_s5 + $0x1e8] sm:$0xff] }
 0xcb4   : > { %9481 = vmatprep.subr.bf16.mxu1 %v9480_v30  ;;  %v9484_v30 = vpack.c.bf16 %v10237_v3, %v10197_v5 }
 0xcb6   : > { %9187 = vmatmul.mubr.msk.f32.gmra.mrb[0].mxu1 %vm4809_vm5, %v9179_v33  ;;  %v9198_v33 = vld [vmem:[%s16023_s5 + $0x1a0] sm:$0xff] }
 0xcb7   : > { %5736 = vmatprep.mubr.f32.mxu1 %v14101_v25 }
 0xcba   : > { %9188 = vmatmul.mubr.msk.f32.gmra.mrb[2].mxu1 %vm4809_vm5, %v9180_v26  ;;  %v9199_v26 = vld [vmem:[%s16023_s5 + $0x1a8] sm:$0xff] }
 0xcbb   : > { %5742 = vmatprep.mubr.f32.mxu1 %v14101_v25 }
 0xcbe   : > { %9189 = vmatmul.mubr.msk.f32.gmra.mrb[4].mxu1 %vm4809_vm5, %v9181_v22  ;;  %v9200_v22 = vld [vmem:[%s16023_s5 + $0x1b0] sm:$0xff] }
 0xcbf   : > { %5748 = vmatprep.mubr.f32.mxu1 %v14101_v25 }
 0xcc2   : > { %9190 = vmatmul.mubr.msk.f32.gmra.mrb[6].mxu1 %vm4809_vm5, %v9182_v13  ;;  %v10236_v13 = vunpack.i.l.bf16 %v10235_v29 }
 0xcc3   : > { %5754 = vmatprep.mubr.f32.mxu1 %v14101_v25 }
 0xcc4   : > { %v6161_v9 = vsel %vm4110_vm13, %v10236_v13, %v10237_v3  ;;  %v9213_v3 = vld [vmem:[%s16023_s5 + $0x1d8] sm:$0xff] }
 0xcc5   : > { %v9233_v13 = vld [vmem:[%s16023_s5 + $0x238] sm:$0xff] }
 0xcc6   : > { %9191 = vmatmul.mubr.msk.f32.gmra.mrb[8].mxu1 %vm4809_vm5, %v9183_v15  ;;  %v9201_v15 = vld [vmem:[%s16023_s5 + $0x1b8] sm:$0xff] }
 0xcc7   : > { %5760 = vmatprep.mubr.f32.mxu1 %v14101_v25 }
 0xcca   : > { %9192 = vmatmul.mubr.msk.f32.gmra.mrb[10].mxu1 %vm4809_vm5, %v9184_v37  ;;  %v10196_v37 = vunpack.i.l.bf16 %v10195_v10  ;;  %v9211_v10 = vld [vmem:[%s16023_s5 + $0x1c8] sm:$0xff] }
 0xccb   : > { %5766 = vmatprep.mubr.f32.mxu1 %v14101_v25 }
 0xccc   : > { %v6160_v29 = vsel %vm4110_vm13, %v10196_v37, %v10197_v5  ;;  %v9216_v5 = vld [vmem:[%s16023_s5 + $0x1f0] sm:$0xff]  ;;  %vm6401_vm13 = vcmask 556032  }
 0xccd   : > { %v9486_v59 = vpack.c.bf16 %v6161_v9, %v6160_v29  ;;  %6402 = vst.msk [vmem:[#allocation4 + $0x10] sm:$0xff] %vm6401_vm13, %v14101_v25  ;;  %6405 = vst.msk [vmem:[#allocation4 + $0x28] sm:$0xff] %vm6401_vm13, %v14101_v25 }
 0xcce   : > { %9193 = vmatmul.mubr.msk.f32.gmra.mrb[12].mxu1 %vm4809_vm5, %v9185_v53  ;;  %v9210_v53 = vld [vmem:[%s16023_s5 + $0x1c0] sm:$0xff]  ;;  %6408 = vst.msk [vmem:[#allocation4 + $0x40] sm:$0xff] %vm6401_vm13, %v14101_v25  ;;  %6411 = vst.msk [vmem:[#allocation4 + $0x58] sm:$0xff] %vm6401_vm13, %v14101_v25 }
 0xccf   : > { %5901 = vmatprep.mubr.f32.mxu1 %v14101_v25  ;;  %6414 = vst.msk [vmem:[#allocation4 + $0x70] sm:$0xff] %vm6401_vm13, %v14101_v25  ;;  %6417 = vst.msk [vmem:[#allocation4 + $0x88] sm:$0xff] %vm6401_vm13, %v14101_v25 }
 0xcd0   : > { %6420 = vst.msk [vmem:[#allocation4 + $0xa0] sm:$0xff] %vm6401_vm13, %v14101_v25  ;;  %6423 = vst.msk [vmem:[#allocation4 + $0xb8] sm:$0xff] %vm6401_vm13, %v14101_v25  ;;  %vm6794_vm13 = vcmask 851664  }
 0xcd2   : > { %9202 = vmatmul.mubr.msk.f32.vlgmr.msra.gmra.mrb[14].mxu1 %vm4809_vm5, %v9194_v32  ;;  %v9214_v32 = vld [vmem:[%s16023_s5 + $0x1e0] sm:$0xff] }
 0xcd3   : > { %9483 = vmatpush1.bf16.msra.mxu1 %v9482_v63  ;;  %5907 = vmatprep.mubr.f32.mxu1 %v14101_v25  ;;  %v9217_v63 = vld [vmem:[%s16023_s5 + $0x1f8] sm:$0xff] }
 0xcd4   : > { %9485 = vmatprep.subr.bf16.mxu1 %v9484_v30  ;;  %v9226_v30 = vld [vmem:[%s16023_s5 + $0x200] sm:$0xff] }
 0xcd6   : > { %9203 = vmatmul.mubr.msk.f32.gmra.mrb[0].mxu1 %vm4809_vm5, %v9195_v56  ;;  %v9227_v56 = vld [vmem:[%s16023_s5 + $0x208] sm:$0xff] }
 0xcd7   : > { %5913 = vmatprep.mubr.f32.mxu1 %v14101_v25 }
 0xcda   : > { %9204 = vmatmul.mubr.msk.f32.gmra.mrb[2].mxu1 %vm4809_vm5, %v9196_v51  ;;  %v9228_v51 = vld [vmem:[%s16023_s5 + $0x210] sm:$0xff] }
 0xcdb   : > { %5919 = vmatprep.mubr.f32.mxu1 %v14101_v25 }
 0xcde   : > { %9205 = vmatmul.mubr.msk.f32.gmra.mrb[4].mxu1 %vm4809_vm5, %v9197_v21  ;;  %v9229_v21 = vld [vmem:[%s16023_s5 + $0x218] sm:$0xff] }
 0xcdf   : > { %5925 = vmatprep.mubr.f32.mxu1 %v14101_v25 }
 0xce2   : > { %9206 = vmatmul.mubr.msk.f32.gmra.mrb[6].mxu1 %vm4809_vm5, %v9198_v33  ;;  %v9230_v33 = vld [vmem:[%s16023_s5 + $0x220] sm:$0xff] }
 0xce3   : > { %5931 = vmatprep.mubr.f32.mxu1 %v14101_v25 }
 0xce6   : > { %9207 = vmatmul.mubr.msk.f32.gmra.mrb[8].mxu1 %vm4809_vm5, %v9199_v26  ;;  %v9231_v26 = vld [vmem:[%s16023_s5 + $0x228] sm:$0xff] }
 0xce7   : > { %5937 = vmatprep.mubr.f32.mxu1 %v14101_v25 }
 0xcea   : > { %9208 = vmatmul.mubr.msk.f32.gmra.mrb[10].mxu1 %vm4809_vm5, %v9200_v22  ;;  %v9232_v22 = vld [vmem:[%s16023_s5 + $0x230] sm:$0xff] }
 0xceb   : > { %5943 = vmatprep.mubr.f32.mxu1 %v14101_v25 }
 0xcee   : > { %9209 = vmatmul.mubr.msk.f32.gmra.mrb[12].mxu1 %vm4809_vm5, %v9201_v15 }
 0xcef   : > { %6078 = vmatprep.mubr.f32.mxu1 %v14101_v25 }
 0xcf2   : > { %9218 = vmatmul.mubr.msk.f32.vlgmr.msra.gmra.mrb[14].mxu1 %vm4809_vm5, %v9210_v53 }
 0xcf3   : > { %9487 = vmatpush1.bf16.msra.mxu1 %v9486_v59  ;;  %6084 = vmatprep.mubr.f32.mxu1 %v14101_v25 }
 0xcf6   : > { %9219 = vmatmul.mubr.msk.f32.gmra.mrb[0].mxu1 %vm4809_vm5, %v9211_v10 }
 0xcf7   : > { %6090 = vmatprep.mubr.f32.mxu1 %v14101_v25 }
 0xcfa   : > { %9220 = vmatmul.mubr.msk.f32.gmra.mrb[2].mxu1 %vm4809_vm5, %v9212_v41 }
 0xcfb   : > { %6096 = vmatprep.mubr.f32.mxu1 %v14101_v25 }
 0xcfe   : > { %9221 = vmatmul.mubr.msk.f32.gmra.mrb[4].mxu1 %vm4809_vm5, %v9213_v3 }
 0xcff   : > { %6102 = vmatprep.mubr.f32.mxu1 %v14101_v25 }
 0xd02   : > { %9222 = vmatmul.mubr.msk.f32.gmra.mrb[6].mxu1 %vm4809_vm5, %v9214_v32 }
 0xd03   : > { %6108 = vmatprep.mubr.f32.mxu1 %v14101_v25 }
 0xd06   : > { %9223 = vmatmul.mubr.msk.f32.gmra.mrb[8].mxu1 %vm4809_vm5, %v9215_v14 }
 0xd07   : > { %6114 = vmatprep.mubr.f32.mxu1 %v14101_v25 }
 0xd0a   : > { %9224 = vmatmul.mubr.msk.f32.gmra.mrb[10].mxu1 %vm4809_vm5, %v9216_v5 }
 0xd0b   : > { %6120 = vmatprep.mubr.f32.mxu1 %v14101_v25 }
 0xd0e   : > { %9225 = vmatmul.mubr.msk.f32.gmra.mrb[12].mxu1 %vm4809_vm5, %v9217_v63 }
 0xd0f   : > { %6254 = vmatprep.mubr.f32.mxu1 %v14101_v25 }
 0xd12   : > { %9234 = vmatmul.mubr.msk.f32.vlgmr.msra.gmra.mrb[14].mxu1 %vm4809_vm5, %v9226_v30 }
 0xd13   : > { %6260 = vmatprep.mubr.f32.mxu1 %v14101_v25 }
 0xd16   : > { %9235 = vmatmul.mubr.msk.f32.gmra.mrb[0].mxu1 %vm4809_vm5, %v9227_v56 }
 0xd17   : > { %6266 = vmatprep.mubr.f32.mxu1 %v14101_v25 }
 0xd1a   : > { %9236 = vmatmul.mubr.msk.f32.gmra.mrb[2].mxu1 %vm4809_vm5, %v9228_v51 }
 0xd1b   : > { %6272 = vmatprep.mubr.f32.mxu1 %v14101_v25 }
 0xd1e   : > { %9237 = vmatmul.mubr.msk.f32.gmra.mrb[4].mxu1 %vm4809_vm5, %v9229_v21 }
 0xd1f   : > { %6278 = vmatprep.mubr.f32.mxu1 %v14101_v25 }
 0xd22   : > { %9238 = vmatmul.mubr.msk.f32.gmra.mrb[6].mxu1 %vm4809_vm5, %v9230_v33 }
 0xd23   : > { %6284 = vmatprep.mubr.f32.mxu1 %v14101_v25 }
 0xd26   : > { %9239 = vmatmul.mubr.msk.f32.gmra.mrb[8].mxu1 %vm4809_vm5, %v9231_v26 }
 0xd27   : > { %6290 = vmatprep.mubr.f32.mxu1 %v14101_v25 }
 0xd2a   : > { %9240 = vmatmul.mubr.msk.f32.gmra.mrb[10].mxu1 %vm4809_vm5, %v9232_v22 }
 0xd2b   : > { %6296 = vmatprep.mubr.f32.mxu1 %v14101_v25 }
 0xd2e   : > { %9241 = vmatmul.mubr.msk.f32.gmra.mrb[12].mxu1 %vm4809_vm5, %v9233_v13  ;;  %vm6654_vm5 = vcmask 261264  }
 0xd49   : > { %v5043_v15 = vpop.f32.mrb[6].mxu0 }
 0xd4a   : > { %v5045_v37 = vpop.f32.mrb[7].mxu0 }
 0xd4d   : > { %v5049_v9 = vpop.f32.mrb[8].mxu0 }
 0xd4e   : > { %v5051_v53 = vpop.f32.mrb[9].mxu0 }
 0xd51   : > { %v5055_v29 = vpop.f32.mrb[10].mxu0 }
 0xd52   : > { %v5057_v59 = vpop.f32.mrb[11].mxu0 }
 0xd55   : > { %v5061_v10 = vpop.f32.mrb[12].mxu0 }
 0xd56   : > { %v5063_v41 = vpop.f32.mrb[13].mxu0 }
 0xd59   : > { %v5067_v3 = vpop.f32.mrb[14].mxu0 }
 0xd5a   : > { %v5069_v32 = vpop.f32.mrb[15].mxu0 }
 0xd5d   : > { %v5073_v14 = vpop.f32.mrb[16].mxu0 }
 0xd5e   : > { %v5075_v5 = vpop.f32.mrb[17].mxu0 }
 0xd61   : > { %v5079_v63 = vpop.f32.mrb[18].mxu0 }
 0xd62   : > { %v5081_v30 = vpop.f32.mrb[19].mxu0 }
 0xd65   : > { %v5197_v56 = vpop.f32.mrb[4].mxu0 }
 0xd66   : > { %v5199_v51 = vpop.f32.mrb[5].mxu0 }
 0xde5   : > { %v6256_v21 = vpop.f32.mrb[14].mxu1 }
 0xde6   : > { %v9490_v33 = vadd.f32 %v6256_v21, %v5197_v56  ;;  %v6258_v26 = vpop.f32.mrb[15].mxu1 }
 0xde7   : > { %v9491_v22 = vadd.f32 %v6258_v26, %v5199_v51 }
 0xde8   : > { %v6367_v13 = vadd.f32 %v9490_v33, %v13637_v1 }
 0xde9   : > { %v6262_v19 = vpop.f32.mrb[0].mxu1 }
 0xdea   : > { %v6383_v47 = vmax.f32 %v6367_v13, 0.0  ;;  %v9492_v61 = vadd.f32 %v6262_v19, %v5043_v15  ;;  %v6264_v23 = vpop.f32.mrb[1].mxu1 }
 0xdeb   : > { %v9493_v54 = vadd.f32 %v6264_v23, %v5045_v37 }
 0xdec   : > { %v6369_v49 = vadd.f32 %v9492_v61, %v13639_v55  ;;  %6432 = vrot.lane.b32.xlu0 %v6383_v47, %s10292_s30 }
 0xded   : > { %v6268_v43 = vpop.f32.mrb[2].mxu1  ;;  %v6370_v13 = vadd.f32 %v9493_v54, %v13639_v55 }
 0xdee   : > { %v6385_v20 = vmax.f32 %v6369_v49, 0.0  ;;  %v14381_v8 = vadd.f32 %v6268_v43, %v5049_v9  ;;  %v6270_v39 = vpop.f32.mrb[3].mxu1 }
 0xdef   : > { %v14383_v56 = vadd.f32 %v6270_v39, %v5051_v53 }
 0xdf0   : > { %6434 = vrot.lane.b32.xlu1 %v6385_v20, %s10292_s30  ;;  %6465 = vrot.lane.b32.xlu0 %v6383_v47, %s10293_s15 }
 0xdf1   : > { %v6274_v19 = vpop.f32.mrb[4].mxu1 }
 0xdf2   : > { %v14387_v15 = vadd.f32 %v6274_v19, %v5055_v29  ;;  %v6276_v23 = vpop.f32.mrb[5].mxu1 }
 0xdf3   : > { %v14389_v61 = vadd.f32 %v6276_v23, %v5057_v59 }
 0xdf4   : > { %6467 = vrot.lane.b32.xlu1 %v6385_v20, %s10293_s15  ;;  %6498 = vrot.lane.b32.xlu0 %v6383_v47, %s10294_s25 }
 0xdf5   : > { %v6280_v43 = vpop.f32.mrb[6].mxu1  ;;  %v6374_v25 = vadd.f32 %v14389_v61, %v13655_v6 }
 0xdf6   : > { %v14393_v49 = vadd.f32 %v6280_v43, %v5061_v10  ;;  %v6282_v39 = vpop.f32.mrb[7].mxu1 }
 0xdf7   : > { %v14395_v37 = vadd.f32 %v6282_v39, %v5063_v41 }
 0xdf8   : > { %6500 = vrot.lane.b32.xlu1 %v6385_v20, %s10294_s25  ;;  %6531 = vrot.lane.b32.xlu0 %v6383_v47, %s10295_s29 }
 0xdf9   : > { %v6286_v9 = vpop.f32.mrb[8].mxu1 }
 0xdfa   : > { %v14399_v53 = vadd.f32 %v6286_v9, %v5067_v3  ;;  %v6288_v29 = vpop.f32.mrb[9].mxu1 }
 0xdfb   : > { %v14401_v59 = vadd.f32 %v6288_v29, %v5069_v32 }
 0xdfc   : > { %6533 = vrot.lane.b32.xlu1 %v6385_v20, %s10295_s29  ;;  %6564 = vrot.lane.b32.xlu0 %v6383_v47, %s10296_s14 }
 0xdfd   : > { %v6292_v10 = vpop.f32.mrb[10].mxu1 }
 0xdfe   : > { %v14405_v51 = vadd.f32 %v6292_v10, %v5073_v14  ;;  %v6294_v41 = vpop.f32.mrb[11].mxu1  ;;  %v6368_v14 = vadd.f32 %v9491_v22, %v13637_v1  ;;  %v6371_v1 = vadd.f32 %v14381_v8, %v13650_v4  ;;  %v6372_v8 = vadd.f32 %v14383_v56, %v13650_v4 }
 0xdff   : > { %v14407_v21 = vadd.f32 %v6294_v41, %v5075_v5  ;;  %v6375_v4 = vadd.f32 %v14393_v49, %v13663_v24  ;;  %v6377_v22 = vadd.f32 %v14399_v53, %v13665_v44  ;;  %v6376_v41 = vadd.f32 %v14395_v37, %v13663_v24 }
 0xe00   : > { %6566 = vrot.lane.b32.xlu1 %v6385_v20, %s10296_s14  ;;  %6597 = vrot.lane.b32.xlu0 %v6383_v47, %s10297_s24  ;;  %v6384_v5 = vmax.f32 %v6368_v14, 0.0  ;;  %v6387_v55 = vmax.f32 %v6371_v1, 0.0  ;;  %v6388_v54 = vmax.f32 %v6372_v8, 0.0 }
 0xe01   : > { %v6298_v3 = vpop.f32.mrb[12].mxu1  ;;  %v6393_v56 = vmax.f32 %v6377_v22, 0.0  ;;  %v6392_v14 = vmax.f32 %v6376_v41, 0.0  ;;  %v6380_v41 = vadd.f32 %v14407_v21, %v13676_v0 }
 0xe02   : > { %v14411_v33 = vadd.f32 %v6298_v3, %v5079_v63  ;;  %v6300_v32 = vpop.f32.mrb[13].mxu1  ;;  %v6386_v63 = vmax.f32 %v6370_v13, 0.0 }
 0xe03   : > { %v14413_v26 = vadd.f32 %v6300_v32, %v5081_v30  ;;  %v6390_v30 = vmax.f32 %v6374_v25, 0.0 }
 0xe04   : > { %6599 = vrot.lane.b32.xlu1 %v6385_v20, %s10297_s24  ;;  %6630 = vrot.lane.b32.xlu0 %v6383_v47, %s10298_s28 }
 0xe08   : > { %6632 = vrot.lane.b32.xlu1 %v6385_v20, %s10298_s28  ;;  %6663 = vrot.lane.b32.xlu0 %v6383_v47, %s10299_s16 }
 0xe0c   : > { %6665 = vrot.lane.b32.xlu1 %v6385_v20, %s10299_s16  ;;  %6704 = vrot.lane.b32.xlu0 %v6384_v5, %s10300_s17  ;;  %v6373_v20 = vadd.f32 %v14387_v15, %v13655_v6  ;;  %v6391_v6 = vmax.f32 %v6375_v4, 0.0 }
 0xe0e   : > { %v6389_v47 = vmax.f32 %v6373_v20, 0.0 }
 0xe10   : > { %6706 = vrot.lane.b32.xlu1 %v6386_v63, %s10300_s17  ;;  %6737 = vrot.lane.b32.xlu0 %v6384_v5, %s10301_s18 }
 0xe14   : > { %6739 = vrot.lane.b32.xlu1 %v6386_v63, %s10301_s18  ;;  %6770 = vrot.lane.b32.xlu0 %v6384_v5, %s10302_s23 }
 0xe18   : > { %6772 = vrot.lane.b32.xlu1 %v6386_v63, %s10302_s23  ;;  %6803 = vrot.lane.b32.xlu0 %v6384_v5, %s10303_s19 }
 0xe1c   : > { %6805 = vrot.lane.b32.xlu1 %v6386_v63, %s10303_s19  ;;  %6836 = vrot.lane.b32.xlu0 %v6384_v5, %s10304_s8 }
 0xe20   : > { %6838 = vrot.lane.b32.xlu1 %v6386_v63, %s10304_s8  ;;  %6878 = vrot.lane.b32.xlu0 %v6384_v5, %s10305_s22  ;;  %v6378_v5 = vadd.f32 %v14401_v59, %v13665_v44 }
 0xe22   : > { %v6394_v24 = vmax.f32 %v6378_v5, 0.0  ;;  %v6382_v5 = vadd.f32 %v14413_v26, %v13681_v42 }
 0xe24   : > { %6880 = vrot.lane.b32.xlu1 %v6386_v63, %s10305_s22  ;;  %6436 = vrot.lane.b32.xlu0 %v6387_v55, %s10292_s30 }
 0xe28   : > { %6438 = vrot.lane.b32.xlu1 %v6389_v47, %s10292_s30  ;;  %6469 = vrot.lane.b32.xlu0 %v6387_v55, %s10293_s15 }
 0xe2c   : > { %6471 = vrot.lane.b32.xlu1 %v6389_v47, %s10293_s15  ;;  %6502 = vrot.lane.b32.xlu0 %v6387_v55, %s10294_s25 }
 0xe30   : > { %6504 = vrot.lane.b32.xlu1 %v6389_v47, %s10294_s25  ;;  %6535 = vrot.lane.b32.xlu0 %v6387_v55, %s10295_s29 }
 0xe34   : > { %6537 = vrot.lane.b32.xlu1 %v6389_v47, %s10295_s29  ;;  %6568 = vrot.lane.b32.xlu0 %v6387_v55, %s10296_s14 }
 0xe38   : > { %6570 = vrot.lane.b32.xlu1 %v6389_v47, %s10296_s14  ;;  %6601 = vrot.lane.b32.xlu0 %v6387_v55, %s10297_s24 }
 0xe3c   : > { %6603 = vrot.lane.b32.xlu1 %v6389_v47, %s10297_s24  ;;  %6634 = vrot.lane.b32.xlu0 %v6387_v55, %s10298_s28 }
 0xe40   : > { %6636 = vrot.lane.b32.xlu1 %v6389_v47, %s10298_s28  ;;  %6667 = vrot.lane.b32.xlu0 %v6387_v55, %s10299_s16 }
 0xe44   : > { %6669 = vrot.lane.b32.xlu1 %v6389_v47, %s10299_s16  ;;  %6708 = vrot.lane.b32.xlu0 %v6388_v54, %s10300_s17 }
 0xe48   : > { %6710 = vrot.lane.b32.xlu1 %v6390_v30, %s10300_s17  ;;  %6741 = vrot.lane.b32.xlu0 %v6388_v54, %s10301_s18 }
 0xe4c   : > { %6743 = vrot.lane.b32.xlu1 %v6390_v30, %s10301_s18  ;;  %6774 = vrot.lane.b32.xlu0 %v6388_v54, %s10302_s23 }
 0xe50   : > { %6776 = vrot.lane.b32.xlu1 %v6390_v30, %s10302_s23  ;;  %6807 = vrot.lane.b32.xlu0 %v6388_v54, %s10303_s19 }
 0xe54   : > { %6809 = vrot.lane.b32.xlu1 %v6390_v30, %s10303_s19  ;;  %6840 = vrot.lane.b32.xlu0 %v6388_v54, %s10304_s8 }
 0xe58   : > { %6842 = vrot.lane.b32.xlu1 %v6390_v30, %s10304_s8  ;;  %6882 = vrot.lane.b32.xlu0 %v6388_v54, %s10305_s22  ;;  %v6379_v54 = vadd.f32 %v14405_v51, %v13676_v0  ;;  %v6398_v0 = vmax.f32 %v6382_v5, 0.0 }
 0xe5a   : > { %v6395_v4 = vmax.f32 %v6379_v54, 0.0 }
 0xe5c   : > { %6884 = vrot.lane.b32.xlu1 %v6390_v30, %s10305_s22  ;;  %6440 = vrot.lane.b32.xlu0 %v6391_v6, %s10292_s30 }
 0xe5e   : > { %v6433_v19 = vpop.permute.xlu0 %6432 }
 0xe5f   : > { %6457 = vst.msk [vmem:[#allocation4] sm:$0xff] %vm6456_vm15, %v6433_v19 }
 0xe60   : > { %6442 = vrot.lane.b32.xlu1 %v6393_v56, %s10292_s30  ;;  %6473 = vrot.lane.b32.xlu0 %v6391_v6, %s10293_s15 }
 0xe62   : > { %v6435_v15 = vpop.permute.xlu1 %6434  ;;  %v6466_v23 = vpop.permute.xlu0 %6465 }
 0xe63   : > { %6458 = vst.msk [vmem:[#allocation4 + $0x18] sm:$0xff] %vm6456_vm15, %v6435_v15 }
 0xe64   : > { %6490 = vst.msk [vmem:[#allocation4] sm:$0xff] %vm6489_vm8, %v6466_v23  ;;  %6475 = vrot.lane.b32.xlu1 %v6393_v56, %s10293_s15  ;;  %6506 = vrot.lane.b32.xlu0 %v6391_v6, %s10294_s25 }
 0xe66   : > { %v6468_v61 = vpop.permute.xlu1 %6467  ;;  %v6499_v43 = vpop.permute.xlu0 %6498 }
 0xe67   : > { %6491 = vst.msk [vmem:[#allocation4 + $0x18] sm:$0xff] %vm6489_vm8, %v6468_v61 }
 0xe68   : > { %6523 = vst.msk [vmem:[#allocation4] sm:$0xff] %vm6522_vm9, %v6499_v43  ;;  %6508 = vrot.lane.b32.xlu1 %v6393_v56, %s10294_s25  ;;  %6539 = vrot.lane.b32.xlu0 %v6391_v6, %s10295_s29 }
 0xe6a   : > { %v6501_v49 = vpop.permute.xlu1 %6500  ;;  %v6532_v39 = vpop.permute.xlu0 %6531 }
 0xe6b   : > { %6524 = vst.msk [vmem:[#allocation4 + $0x18] sm:$0xff] %vm6522_vm9, %v6501_v49 }
 0xe6c   : > { %6556 = vst.msk [vmem:[#allocation4] sm:$0xff] %vm6555_vm10, %v6532_v39  ;;  %6541 = vrot.lane.b32.xlu1 %v6393_v56, %s10295_s29  ;;  %6572 = vrot.lane.b32.xlu0 %v6391_v6, %s10296_s14 }
 0xe6e   : > { %v6534_v9 = vpop.permute.xlu1 %6533  ;;  %v6565_v53 = vpop.permute.xlu0 %6564 }
 0xe6f   : > { %6557 = vst.msk [vmem:[#allocation4 + $0x18] sm:$0xff] %vm6555_vm10, %v6534_v9 }
 0xe70   : > { %6589 = vst.msk [vmem:[#allocation4] sm:$0xff] %vm6588_vm11, %v6565_v53  ;;  %6574 = vrot.lane.b32.xlu1 %v6393_v56, %s10296_s14  ;;  %6605 = vrot.lane.b32.xlu0 %v6391_v6, %s10297_s24 }
 0xe72   : > { %v6567_v29 = vpop.permute.xlu1 %6566  ;;  %v6598_v10 = vpop.permute.xlu0 %6597 }
 0xe73   : > { %6590 = vst.msk [vmem:[#allocation4 + $0x18] sm:$0xff] %vm6588_vm11, %v6567_v29 }
 0xe74   : > { %6622 = vst.msk [vmem:[#allocation4 + $0x8] sm:$0xff] %vm6621_vm14, %v6598_v10  ;;  %6607 = vrot.lane.b32.xlu1 %v6393_v56, %s10297_s24  ;;  %6638 = vrot.lane.b32.xlu0 %v6391_v6, %s10298_s28 }
 0xe76   : > { %v6600_v3 = vpop.permute.xlu1 %6599  ;;  %v6631_v32 = vpop.permute.xlu0 %6630 }
 0xe77   : > { %6623 = vst.msk [vmem:[#allocation4 + $0x20] sm:$0xff] %vm6621_vm14, %v6600_v3 }
 0xe78   : > { %6655 = vst.msk [vmem:[#allocation4 + $0x8] sm:$0xff] %vm6654_vm5, %v6631_v32  ;;  %6640 = vrot.lane.b32.xlu1 %v6393_v56, %s10298_s28  ;;  %6671 = vrot.lane.b32.xlu0 %v6391_v6, %s10299_s16  ;;  %v6381_v6 = vadd.f32 %v14411_v33, %v13681_v42 }
 0xe7a   : > { %v6633_v13 = vpop.permute.xlu1 %6632  ;;  %v6664_v63 = vpop.permute.xlu0 %6663  ;;  %v6397_v51 = vmax.f32 %v6381_v6, 0.0 }
 0xe7b   : > { %6656 = vst.msk [vmem:[#allocation4 + $0x20] sm:$0xff] %vm6654_vm5, %v6633_v13 }
 0xe7c   : > { %6688 = vst.msk [vmem:[#allocation4 + $0x8] sm:$0xff] %vm6687_vm6, %v6664_v63  ;;  %6673 = vrot.lane.b32.xlu1 %v6393_v56, %s10299_s16  ;;  %6712 = vrot.lane.b32.xlu0 %v6392_v14, %s10300_s17 }
 0xe7e   : > { %v6666_v37 = vpop.permute.xlu1 %6665  ;;  %v6705_v1 = vpop.permute.xlu0 %6704 }
 0xe7f   : > { %6689 = vst.msk [vmem:[#allocation4 + $0x20] sm:$0xff] %vm6687_vm6, %v6666_v37 }
 0xe80   : > { %6729 = vst.msk [vmem:[#allocation4 + $0x8] sm:$0xff] %vm6728_vm7, %v6705_v1  ;;  %6714 = vrot.lane.b32.xlu1 %v6394_v24, %s10300_s17  ;;  %6745 = vrot.lane.b32.xlu0 %v6392_v14, %s10301_s18 }
 0xe82   : > { %v6707_v44 = vpop.permute.xlu1 %6706  ;;  %v6738_v59 = vpop.permute.xlu0 %6737 }
 0xe83   : > { %6730 = vst.msk [vmem:[#allocation4 + $0x20] sm:$0xff] %vm6728_vm7, %v6707_v44 }
 0xe84   : > { %6762 = vst.msk [vmem:[#allocation4 + $0x8] sm:$0xff] %vm6761_vm12, %v6738_v59  ;;  %6747 = vrot.lane.b32.xlu1 %v6394_v24, %s10301_s18  ;;  %6778 = vrot.lane.b32.xlu0 %v6392_v14, %s10302_s23 }
 0xe86   : > { %v6740_v55 = vpop.permute.xlu1 %6739  ;;  %v6771_v20 = vpop.permute.xlu0 %6770 }
 0xe87   : > { %6763 = vst.msk [vmem:[#allocation4 + $0x20] sm:$0xff] %vm6761_vm12, %v6740_v55 }
 0xe88   : > { %6795 = vst.msk [vmem:[#allocation4 + $0x8] sm:$0xff] %vm6794_vm13, %v6771_v20  ;;  %6780 = vrot.lane.b32.xlu1 %v6394_v24, %s10302_s23  ;;  %6811 = vrot.lane.b32.xlu0 %v6392_v14, %s10303_s19 }
 0xe8a   : > { %v6773_v47 = vpop.permute.xlu1 %6772  ;;  %v6804_v8 = vpop.permute.xlu0 %6803 }
 0xe8b   : > { %6796 = vst.msk [vmem:[#allocation4 + $0x20] sm:$0xff] %vm6794_vm13, %v6773_v47 }
 0xe8c   : > { %6828 = vst.msk [vmem:[#allocation4 + $0x8] sm:$0xff] %vm6827_vm4, %v6804_v8  ;;  %6813 = vrot.lane.b32.xlu1 %v6394_v24, %s10303_s19  ;;  %6844 = vrot.lane.b32.xlu0 %v6392_v14, %s10304_s8 }
 0xe8e   : > { %v6806_v25 = vpop.permute.xlu1 %6805  ;;  %v6837_v30 = vpop.permute.xlu0 %6836 }
 0xe8f   : > { %6829 = vst.msk [vmem:[#allocation4 + $0x20] sm:$0xff] %vm6827_vm4, %v6806_v25 }
 0xe90   : > { %6861 = vst.msk [vmem:[#allocation4 + $0x8] sm:$0xff] %vm6860_vm3, %v6837_v30  ;;  %6846 = vrot.lane.b32.xlu1 %v6394_v24, %s10304_s8  ;;  %6886 = vrot.lane.b32.xlu0 %v6392_v14, %s10305_s22  ;;  %v6396_v14 = vmax.f32 %v6380_v41, 0.0 }
 0xe91   : > { %6863 = vst.msk [vmem:[#allocation4 + $0x10] sm:$0xff] %vm6862_vm2, %v6837_v30 }
 0xe92   : > { %v6839_v22 = vpop.permute.xlu1 %6838  ;;  %v6879_v56 = vpop.permute.xlu0 %6878 }
 0xe93   : > { %6864 = vst.msk [vmem:[#allocation4 + $0x20] sm:$0xff] %vm6860_vm3, %v6839_v22 }
 0xe94   : > { %6865 = vst.msk [vmem:[#allocation4 + $0x28] sm:$0xff] %vm6862_vm2, %v6839_v22  ;;  %6888 = vrot.lane.b32.xlu1 %v6394_v24, %s10305_s22  ;;  %6444 = vrot.lane.b32.xlu0 %v6395_v4, %s10292_s30 }
 0xe95   : > { %6903 = vst.msk [vmem:[#allocation4 + $0x10] sm:$0xff] %vm6902_vm1, %v6879_v56 }
 0xe96   : > { %v6881_v19 = vpop.permute.xlu1 %6880  ;;  %v6437_v15 = vpop.permute.xlu0 %6436 }
 0xe97   : > { %6904 = vst.msk [vmem:[#allocation4 + $0x28] sm:$0xff] %vm6902_vm1, %v6881_v19 }
 0xe98   : > { %6459 = vst.msk [vmem:[#allocation4 + $0x30] sm:$0xff] %vm6456_vm15, %v6437_v15  ;;  %6446 = vrot.lane.b32.xlu1 %v6397_v51, %s10292_s30  ;;  %6477 = vrot.lane.b32.xlu0 %v6395_v4, %s10293_s15  ;;  %s16593_s30 = smov 109  }
 0xe9a   : > { %v6439_v33 = vpop.permute.xlu1 %6438  ;;  %v6470_v23 = vpop.permute.xlu0 %6469 }
 0xe9b   : > { %6460 = vst.msk [vmem:[#allocation4 + $0x48] sm:$0xff] %vm6456_vm15, %v6439_v33  ;;  %v14628_v33 = vld [vmem:[#allocation4] sm:$0xff] }
 0xe9c   : > { %6492 = vst.msk [vmem:[#allocation4 + $0x30] sm:$0xff] %vm6489_vm8, %v6470_v23  ;;  %6479 = vrot.lane.b32.xlu1 %v6397_v51, %s10293_s15  ;;  %6510 = vrot.lane.b32.xlu0 %v6395_v4, %s10294_s25  ;;  %v14603_v47 = vld [vmem:[#allocation4 + $0x10] sm:$0xff]  ;;  %s16594_s15 = smov 90  }
 0xe9d   : > { %v7082_v25 = vmul.f32 %v13749_v40, %v14603_v47  ;;  %v8127_v6 = vmul.f32 %v13835_v50, %v14603_v47  ;;  %v7291_v22 = vmul.f32 %v13765_v62, %v14603_v47  ;;  %v8336_v19 = vmul.f32 %v13833_v60, %v14603_v47 }
 0xe9e   : > { %v6472_v61 = vpop.permute.xlu1 %6471  ;;  %v6503_v43 = vpop.permute.xlu0 %6502  ;;  %v7500_v15 = vmul.f32 %v13781_v27, %v14603_v47 }
 0xe9f   : > { %6493 = vst.msk [vmem:[#allocation4 + $0x48] sm:$0xff] %vm6489_vm8, %v6472_v61 }
 0xea0   : > { %6525 = vst.msk [vmem:[#allocation4 + $0x30] sm:$0xff] %vm6522_vm9, %v6503_v43  ;;  %6512 = vrot.lane.b32.xlu1 %v6397_v51, %s10294_s25  ;;  %6543 = vrot.lane.b32.xlu0 %v6395_v4, %s10295_s29  ;;  %v8334_v43 = vmul.f32 %v13833_v60, %v14628_v33  ;;  %s16595_s25 = smov 108  }
 0xea2   : > { %v6505_v49 = vpop.permute.xlu1 %6504  ;;  %v6536_v39 = vpop.permute.xlu0 %6535 }
 0xea3   : > { %6526 = vst.msk [vmem:[#allocation4 + $0x48] sm:$0xff] %vm6522_vm9, %v6505_v49  ;;  %v7709_v49 = vmul.f32 %v13797_v57, %v14603_v47 }
 0xea4   : > { %6558 = vst.msk [vmem:[#allocation4 + $0x30] sm:$0xff] %vm6555_vm10, %v6536_v39  ;;  %6545 = vrot.lane.b32.xlu1 %v6397_v51, %s10295_s29  ;;  %6576 = vrot.lane.b32.xlu0 %v6395_v4, %s10296_s14 }
 0xea6   : > { %v6538_v9 = vpop.permute.xlu1 %6537  ;;  %v6569_v53 = vpop.permute.xlu0 %6568 }
 0xea7   : > { %6559 = vst.msk [vmem:[#allocation4 + $0x48] sm:$0xff] %vm6555_vm10, %v6538_v9 }
 0xea8   : > { %6591 = vst.msk [vmem:[#allocation4 + $0x30] sm:$0xff] %vm6588_vm11, %v6569_v53  ;;  %6578 = vrot.lane.b32.xlu1 %v6397_v51, %s10296_s14  ;;  %6609 = vrot.lane.b32.xlu0 %v6395_v4, %s10297_s24  ;;  %v8543_v53 = vmul.f32 %v13913_v12, %v14628_v33 }
 0xeaa   : > { %v6571_v29 = vpop.permute.xlu1 %6570  ;;  %v6602_v10 = vpop.permute.xlu0 %6601 }
 0xeab   : > { %6592 = vst.msk [vmem:[#allocation4 + $0x48] sm:$0xff] %vm6588_vm11, %v6571_v29  ;;  %v7918_v29 = vmul.f32 %v13815_v45, %v14603_v47 }
 0xeac   : > { %6624 = vst.msk [vmem:[#allocation4 + $0x38] sm:$0xff] %vm6621_vm14, %v6602_v10  ;;  %6611 = vrot.lane.b32.xlu1 %v6397_v51, %s10297_s24  ;;  %6642 = vrot.lane.b32.xlu0 %v6395_v4, %s10298_s28  ;;  %v14646_v10 = vld [vmem:[#allocation4 + $0x28] sm:$0xff] }
 0xeae   : > { %v6604_v3 = vpop.permute.xlu1 %6603  ;;  %v6635_v32 = vpop.permute.xlu0 %6634 }
 0xeaf   : > { %6625 = vst.msk [vmem:[#allocation4 + $0x50] sm:$0xff] %vm6621_vm14, %v6604_v3 }
 0xeb0   : > { %6657 = vst.msk [vmem:[#allocation4 + $0x38] sm:$0xff] %vm6654_vm5, %v6635_v32  ;;  %6644 = vrot.lane.b32.xlu1 %v6397_v51, %s10298_s28  ;;  %6675 = vrot.lane.b32.xlu0 %v6395_v4, %s10299_s16  ;;  %v7085_v32 = vmul.f32 %v13751_v48, %v14646_v10  ;;  %s10308_s28 = smov 122  }
 0xeb2   : > { %v6637_v13 = vpop.permute.xlu1 %6636  ;;  %v6668_v63 = vpop.permute.xlu0 %6667 }
 0xeb3   : > { %6658 = vst.msk [vmem:[#allocation4 + $0x50] sm:$0xff] %vm6654_vm5, %v6637_v13 }
 0xeb4   : > { %6690 = vst.msk [vmem:[#allocation4 + $0x38] sm:$0xff] %vm6687_vm6, %v6668_v63  ;;  %6677 = vrot.lane.b32.xlu1 %v6397_v51, %s10299_s16  ;;  %6716 = vrot.lane.b32.xlu0 %v6396_v14, %s10300_s17  ;;  %v7294_v63 = vmul.f32 %v13767_v52, %v14646_v10  ;;  %s10309_s16 = smov 106  }
 0xeb6   : > { %v6670_v21 = vpop.permute.xlu1 %6669  ;;  %v6709_v24 = vpop.permute.xlu0 %6708 }
 0xeb7   : > { %6691 = vst.msk [vmem:[#allocation4 + $0x50] sm:$0xff] %vm6687_vm6, %v6670_v21 }
 0xeb8   : > { %6731 = vst.msk [vmem:[#allocation4 + $0x38] sm:$0xff] %vm6728_vm7, %v6709_v24  ;;  %6718 = vrot.lane.b32.xlu1 %v6398_v0, %s10300_s17  ;;  %6749 = vrot.lane.b32.xlu0 %v6396_v14, %s10301_s18  ;;  %s10310_s17 = smov 118  }
 0xeba   : > { %v6711_v42 = vpop.permute.xlu1 %6710  ;;  %v6742_v26 = vpop.permute.xlu0 %6741 }
 0xebb   : > { %6732 = vst.msk [vmem:[#allocation4 + $0x50] sm:$0xff] %vm6728_vm7, %v6711_v42  ;;  %v7503_v42 = vmul.f32 %v13783_v31, %v14646_v10 }
 0xebc   : > { %6764 = vst.msk [vmem:[#allocation4 + $0x38] sm:$0xff] %vm6761_vm12, %v6742_v26  ;;  %6751 = vrot.lane.b32.xlu1 %v6398_v0, %s10301_s18  ;;  %6782 = vrot.lane.b32.xlu0 %v6396_v14, %s10302_s23  ;;  %v7289_v26 = vmul.f32 %v13765_v62, %v14628_v33  ;;  %s10311_s18 = smov 120  }
 0xebe   : > { %v6744_v37 = vpop.permute.xlu1 %6743  ;;  %v6775_v1 = vpop.permute.xlu0 %6774 }
 0xebf   : > { %6765 = vst.msk [vmem:[#allocation4 + $0x50] sm:$0xff] %vm6761_vm12, %v6744_v37 }
 0xec0   : > { %6797 = vst.msk [vmem:[#allocation4 + $0x38] sm:$0xff] %vm6794_vm13, %v6775_v1  ;;  %6784 = vrot.lane.b32.xlu1 %v6398_v0, %s10302_s23  ;;  %6815 = vrot.lane.b32.xlu0 %v6396_v14, %s10303_s19  ;;  %s10315_s23 = smov 102  }
 0xec2   : > { %v6777_v44 = vpop.permute.xlu1 %6776  ;;  %v6808_v59 = vpop.permute.xlu0 %6807 }
 0xec3   : > { %6798 = vst.msk [vmem:[#allocation4 + $0x50] sm:$0xff] %vm6794_vm13, %v6777_v44  ;;  %v7712_v44 = vmul.f32 %v13799_v16, %v14646_v10 }
 0xec4   : > { %6830 = vst.msk [vmem:[#allocation4 + $0x38] sm:$0xff] %vm6827_vm4, %v6808_v59  ;;  %6817 = vrot.lane.b32.xlu1 %v6398_v0, %s10303_s19  ;;  %6848 = vrot.lane.b32.xlu0 %v6396_v14, %s10304_s8  ;;  %v7498_v59 = vmul.f32 %v13781_v27, %v14628_v33  ;;  %s10316_s19 = smov 116  }
 0xec6   : > { %v6810_v55 = vpop.permute.xlu1 %6809  ;;  %v6841_v20 = vpop.permute.xlu0 %6840 }
 0xec7   : > { %6831 = vst.msk [vmem:[#allocation4 + $0x50] sm:$0xff] %vm6827_vm4, %v6810_v55 }
 0xec8   : > { %6866 = vst.msk [vmem:[#allocation4 + $0x38] sm:$0xff] %vm6860_vm3, %v6841_v20  ;;  %6850 = vrot.lane.b32.xlu1 %v6398_v0, %s10304_s8  ;;  %6890 = vrot.lane.b32.xlu0 %v6396_v14, %s10305_s22  ;;  %v8545_v14 = vmul.f32 %v13913_v12, %v14603_v47  ;;  %s10317_s8 = smov 98  }
 0xec9   : > { %6867 = vst.msk [vmem:[#allocation4 + $0x40] sm:$0xff] %vm6862_vm2, %v6841_v20 }
 0xeca   : > { %v6843_v8 = vpop.permute.xlu1 %6842  ;;  %v6883_v54 = vpop.permute.xlu0 %6882 }
 0xecb   : > { %6868 = vst.msk [vmem:[#allocation4 + $0x50] sm:$0xff] %vm6860_vm3, %v6843_v8 }
 0xecc   : > { %6869 = vst.msk [vmem:[#allocation4 + $0x58] sm:$0xff] %vm6862_vm2, %v6843_v8  ;;  %6892 = vrot.lane.b32.xlu1 %v6398_v0, %s10305_s22  ;;  %7132 = vrot.lane.b32.xlu0 %v7082_v25, %s16576_s20  ;;  %v7080_v0 = vmul.f32 %v13749_v40, %v14628_v33  ;;  %v7921_v8 = vmul.f32 %v13813_v35, %v14646_v10 }
 0xecd   : > { %6905 = vst.msk [vmem:[#allocation4 + $0x40] sm:$0xff] %vm6902_vm1, %v6883_v54  ;;  %v7707_v54 = vmul.f32 %v13797_v57, %v14628_v33 }
 0xece   : > { %v6885_v30 = vpop.permute.xlu1 %6884  ;;  %v6441_v4 = vpop.permute.xlu0 %6440 }
 0xecf   : > { %6906 = vst.msk [vmem:[#allocation4 + $0x58] sm:$0xff] %vm6902_vm1, %v6885_v30 }
 0xed0   : > { %6461 = vst.msk [vmem:[#allocation4 + $0x60] sm:$0xff] %vm6456_vm15, %v6441_v4  ;;  %8177 = vrot.lane.b32.xlu1 %v8127_v6, %s16591_s21  ;;  %7341 = vrot.lane.b32.xlu0 %v7291_v22, %s16577_s26  ;;  %v8130_v4 = vmul.f32 %v13827_v2, %v14646_v10  ;;  %v7916_v6 = vmul.f32 %v13815_v45, %v14628_v33 }
 0xed2   : > { %v6443_v56 = vpop.permute.xlu1 %6442  ;;  %v6474_v51 = vpop.permute.xlu0 %6473 }
 0xed3   : > { %6462 = vst.msk [vmem:[#allocation4 + $0x78] sm:$0xff] %vm6456_vm15, %v6443_v56 }
 0xed4   : > { %6494 = vst.msk [vmem:[#allocation4 + $0x60] sm:$0xff] %vm6489_vm8, %v6474_v51  ;;  %8386 = vrot.lane.b32.xlu1 %v8336_v19, %s16592_s10  ;;  %7550 = vrot.lane.b32.xlu0 %v7500_v15, %s16578_s13  ;;  %v8339_v51 = vmul.f32 %v13851_v58, %v14646_v10  ;;  %v8125_v19 = vmul.f32 %v13835_v50, %v14628_v33  ;;  %v14704_v15 = vld [vmem:[#allocation4 + $0x8] sm:$0xff] }
 0xed6   : > { %v6476_v23 = vpop.permute.xlu1 %6475  ;;  %v6507_v61 = vpop.permute.xlu0 %6506 }
 0xed7   : > { %6495 = vst.msk [vmem:[#allocation4 + $0x78] sm:$0xff] %vm6489_vm8, %v6476_v23 }
 0xed8   : > { %6527 = vst.msk [vmem:[#allocation4 + $0x60] sm:$0xff] %vm6522_vm9, %v6507_v61  ;;  %8382 = vrot.lane.b32.xlu1 %v8334_v43, %s16592_s10  ;;  %7759 = vrot.lane.b32.xlu0 %v7709_v49, %s16593_s30  ;;  %v7081_v43 = vmul.f32 %v13749_v40, %v14704_v15  ;;  %v8548_v49 = vmul.f32 %v13911_v11, %v14646_v10 }
 0xeda   : > { %v6509_v39 = vpop.permute.xlu1 %6508  ;;  %v6540_v9 = vpop.permute.xlu0 %6539 }
 0xedb   : > { %6528 = vst.msk [vmem:[#allocation4 + $0x78] sm:$0xff] %vm6522_vm9, %v6509_v39 }
 0xedc   : > { %6560 = vst.msk [vmem:[#allocation4 + $0x60] sm:$0xff] %vm6555_vm10, %v6540_v9  ;;  %8591 = vrot.lane.b32.xlu1 %v8543_v53, %s16594_s15  ;;  %7968 = vrot.lane.b32.xlu0 %v7918_v29, %s16595_s25  ;;  %v7290_v53 = vmul.f32 %v13765_v62, %v14704_v15  ;;  %v8126_v29 = vmul.f32 %v13835_v50, %v14704_v15  ;;  %v14732_v50 = vld [vmem:[#allocation4 + $0x18] sm:$0xff] }
 0xedd   : > { %v8335_v62 = vmul.f32 %v13833_v60, %v14704_v15  ;;  %v8337_v60 = vmul.f32 %v13851_v58, %v14732_v50 }
 0xede   : > { %v6542_v41 = vpop.permute.xlu1 %6541  ;;  %v6573_v3 = vpop.permute.xlu0 %6572 }
 0xedf   : > { %6561 = vst.msk [vmem:[#allocation4 + $0x78] sm:$0xff] %vm6555_vm10, %v6542_v41 }
 0xee0   : > { %6593 = vst.msk [vmem:[#allocation4 + $0x60] sm:$0xff] %vm6588_vm11, %v6573_v3  ;;  %7138 = vrot.lane.b32.xlu1 %v7085_v32, %s16576_s20  ;;  %8595 = vrot.lane.b32.xlu0 %v8545_v14, %s16594_s15  ;;  %v7499_v3 = vmul.f32 %v13781_v27, %v14704_v15  ;;  %v7708_v27 = vmul.f32 %v13797_v57, %v14704_v15  ;;  %v14750_v57 = vld [vmem:[#allocation4 + $0x40] sm:$0xff] }
 0xee2   : > { %v6575_v5 = vpop.permute.xlu1 %6574  ;;  %v6606_v13 = vpop.permute.xlu0 %6605 }
 0xee3   : > { %6594 = vst.msk [vmem:[#allocation4 + $0x78] sm:$0xff] %vm6588_vm11, %v6575_v5 }
 0xee4   : > { %6626 = vst.msk [vmem:[#allocation4 + $0x68] sm:$0xff] %vm6621_vm14, %v6606_v13  ;;  %7347 = vrot.lane.b32.xlu1 %v7294_v63, %s16577_s26  ;;  %7128 = vrot.lane.b32.xlu0 %v7080_v0, %s16576_s20  ;;  %v7917_v63 = vmul.f32 %v13815_v45, %v14704_v15  ;;  %v8546_v0 = vmul.f32 %v13911_v11, %v14732_v50 }
 0xee5   : > { %v7088_v45 = vmul.f32 %v13753_v34, %v14750_v57 }
 0xee6   : > { %v6608_v21 = vpop.permute.xlu1 %6607  ;;  %v6639_v24 = vpop.permute.xlu0 %6638 }
 0xee7   : > { %6627 = vst.msk [vmem:[#allocation4 + $0x80] sm:$0xff] %vm6621_vm14, %v6608_v21 }
 0xee8   : > { %6659 = vst.msk [vmem:[#allocation4 + $0x68] sm:$0xff] %vm6654_vm5, %v6639_v24  ;;  %7556 = vrot.lane.b32.xlu1 %v7503_v42, %s16578_s13  ;;  %7337 = vrot.lane.b32.xlu0 %v7289_v26, %s16577_s26  ;;  %v8544_v42 = vmul.f32 %v13913_v12, %v14704_v15 }
 0xeea   : > { %v6641_v37 = vpop.permute.xlu1 %6640  ;;  %v6672_v1 = vpop.permute.xlu0 %6671 }
 0xeeb   : > { %6660 = vst.msk [vmem:[#allocation4 + $0x80] sm:$0xff] %vm6654_vm5, %v6641_v37 }
 0xeec   : > { %6692 = vst.msk [vmem:[#allocation4 + $0x68] sm:$0xff] %vm6687_vm6, %v6672_v1  ;;  %7765 = vrot.lane.b32.xlu1 %v7712_v44, %s16593_s30  ;;  %7546 = vrot.lane.b32.xlu0 %v7498_v59, %s16578_s13  ;;  %v7083_v1 = vmul.f32 %v13751_v48, %v14732_v50  ;;  %v7297_v44 = vmul.f32 %v13769_v46, %v14750_v57 }
 0xeee   : > { %v6674_v55 = vpop.permute.xlu1 %6673  ;;  %v6713_v20 = vpop.permute.xlu0 %6712 }
 0xeef   : > { %6693 = vst.msk [vmem:[#allocation4 + $0x80] sm:$0xff] %vm6687_vm6, %v6674_v55  ;;  %v7292_v55 = vmul.f32 %v13767_v52, %v14732_v50 }
 0xef0   : > { %6733 = vst.msk [vmem:[#allocation4 + $0x68] sm:$0xff] %vm6728_vm7, %v6713_v20  ;;  %7974 = vrot.lane.b32.xlu1 %v7921_v8, %s16595_s25  ;;  %7755 = vrot.lane.b32.xlu0 %v7707_v54, %s16593_s30  ;;  %v7506_v20 = vmul.f32 %v13785_v38, %v14750_v57 }
 0xef2   : > { %v6715_v25 = vpop.permute.xlu1 %6714  ;;  %v6746_v30 = vpop.permute.xlu0 %6745 }
 0xef3   : > { %6734 = vst.msk [vmem:[#allocation4 + $0x80] sm:$0xff] %vm6728_vm7, %v6715_v25  ;;  %v7501_v25 = vmul.f32 %v13783_v31, %v14732_v50 }
 0xef4   : > { %6766 = vst.msk [vmem:[#allocation4 + $0x68] sm:$0xff] %vm6761_vm12, %v6746_v30  ;;  %8183 = vrot.lane.b32.xlu1 %v8130_v4, %s16591_s21  ;;  %7964 = vrot.lane.b32.xlu0 %v7916_v6, %s16595_s25  ;;  %v7715_v30 = vmul.f32 %v13801_v17, %v14750_v57 }
 0xef6   : > { %v6748_v22 = vpop.permute.xlu1 %6747  ;;  %v6779_v56 = vpop.permute.xlu0 %6778 }
 0xef7   : > { %6767 = vst.msk [vmem:[#allocation4 + $0x80] sm:$0xff] %vm6761_vm12, %v6748_v22  ;;  %v7710_v22 = vmul.f32 %v13799_v16, %v14732_v50 }
 0xef8   : > { %6799 = vst.msk [vmem:[#allocation4 + $0x68] sm:$0xff] %vm6794_vm13, %v6779_v56  ;;  %8392 = vrot.lane.b32.xlu1 %v8339_v51, %s16592_s10  ;;  %8173 = vrot.lane.b32.xlu0 %v8125_v19, %s16591_s21  ;;  %v7924_v56 = vmul.f32 %v13821_v28, %v14750_v57 }
 0xefa   : > { %v6781_v23 = vpop.permute.xlu1 %6780  ;;  %v6812_v61 = vpop.permute.xlu0 %6811 }
 0xefb   : > { %6800 = vst.msk [vmem:[#allocation4 + $0x80] sm:$0xff] %vm6794_vm13, %v6781_v23  ;;  %v7919_v23 = vmul.f32 %v13813_v35, %v14732_v50 }
 0xefc   : > { %6832 = vst.msk [vmem:[#allocation4 + $0x68] sm:$0xff] %vm6827_vm4, %v6812_v61  ;;  %7130 = vrot.lane.b32.xlu1 %v7081_v43, %s16576_s20  ;;  %8601 = vrot.lane.b32.xlu0 %v8548_v49, %s16594_s15  ;;  %v8342_v61 = vmul.f32 %v13837_v36, %v14750_v57 }
 0xefe   : > { %v6814_v39 = vpop.permute.xlu1 %6813  ;;  %v6845_v9 = vpop.permute.xlu0 %6844 }
 0xeff   : > { %6833 = vst.msk [vmem:[#allocation4 + $0x80] sm:$0xff] %vm6827_vm4, %v6814_v39  ;;  %v8128_v39 = vmul.f32 %v13827_v2, %v14732_v50 }
 0xf00   : > { %6870 = vst.msk [vmem:[#allocation4 + $0x68] sm:$0xff] %vm6860_vm3, %v6845_v9  ;;  %7339 = vrot.lane.b32.xlu1 %v7290_v53, %s16577_s26  ;;  %8175 = vrot.lane.b32.xlu0 %v8126_v29, %s16591_s21  ;;  %v14808_v53 = vld [vmem:[#allocation4 + $0x20] sm:$0xff] }
 0xf01   : > { %6871 = vst.msk [vmem:[#allocation4 + $0x70] sm:$0xff] %vm6862_vm2, %v6845_v9  ;;  %v8551_v9 = vmul.f32 %v13915_v7, %v14750_v57 }
 0xf02   : > { %v6847_v40 = vpop.permute.xlu1 %6846  ;;  %v6887_v41 = vpop.permute.xlu0 %6886 }
 0xf03   : > { %6872 = vst.msk [vmem:[#allocation4 + $0x80] sm:$0xff] %vm6860_vm3, %v6847_v40 }
 0xf04   : > { %6873 = vst.msk [vmem:[#allocation4 + $0x88] sm:$0xff] %vm6862_vm2, %v6847_v40  ;;  %7548 = vrot.lane.b32.xlu1 %v7499_v3, %s16578_s13  ;;  %8384 = vrot.lane.b32.xlu0 %v8335_v62, %s16592_s10  ;;  %v7084_v3 = vmul.f32 %v13751_v48, %v14808_v53  ;;  %v14826_v48 = vld [vmem:[#allocation4 + $0x30] sm:$0xff] }
 0xf05   : > { %6907 = vst.msk [vmem:[#allocation4 + $0x70] sm:$0xff] %vm6902_vm1, %v6887_v41  ;;  %v8133_v41 = vmul.f32 %v13839_v18, %v14750_v57  ;;  %16596 = vst [vmem:[#allocation64_spill] sm:$0xff] %v14826_v48 }
 0xf06   : > { %v6889_v32 = vpop.permute.xlu1 %6888  ;;  %v6445_v14 = vpop.permute.xlu0 %6444 }
 0xf07   : > { %6908 = vst.msk [vmem:[#allocation4 + $0x88] sm:$0xff] %vm6902_vm1, %v6889_v32 }
 0xf08   : > { %6463 = vst.msk [vmem:[#allocation4 + $0x90] sm:$0xff] %vm6456_vm15, %v6445_v14  ;;  %7757 = vrot.lane.b32.xlu1 %v7708_v27, %s16593_s30  ;;  %8388 = vrot.lane.b32.xlu0 %v8337_v60, %s16592_s10  ;;  %v8547_v14 = vmul.f32 %v13911_v11, %v14808_v53  ;;  %v7293_v27 = vmul.f32 %v13767_v52, %v14808_v53  ;;  %v14836_v52 = vld [vmem:[#allocation4 + $0x58] sm:$0xff] }
 0xf09   : > { %v7502_v11 = vmul.f32 %v13783_v31, %v14808_v53  ;;  %16597 = vst [vmem:[#allocation63_spill] sm:$0xff] %v14836_v52 }
 0xf0a   : > { %v6447_v5 = vpop.permute.xlu1 %6446  ;;  %v6478_v13 = vpop.permute.xlu0 %6477 }
 0xf0b   : > { %6464 = vst.msk [vmem:[#allocation4 + $0xa8] sm:$0xff] %vm6456_vm15, %v6447_v5 }
 0xf0c   : > { %6496 = vst.msk [vmem:[#allocation4 + $0x90] sm:$0xff] %vm6489_vm8, %v6478_v13  ;;  %7966 = vrot.lane.b32.xlu1 %v7917_v63, %s16595_s25  ;;  %8597 = vrot.lane.b32.xlu0 %v8546_v0, %s16594_s15  ;;  %v8549_v13 = vmul.f32 %v13915_v7, %v14826_v48 }
 0xf0e   : > { %v6480_v21 = vpop.permute.xlu1 %6479  ;;  %v6511_v24 = vpop.permute.xlu0 %6510 }
 0xf0f   : > { %6497 = vst.msk [vmem:[#allocation4 + $0xa8] sm:$0xff] %vm6489_vm8, %v6480_v21  ;;  %v16598_v21 = vld [vmem:[#allocation23_spill] sm:$0xff]  ;;  %vm16641_vm8 = vcmask 891904  }
 0xf10   : > { %6529 = vst.msk [vmem:[#allocation4 + $0x90] sm:$0xff] %vm6522_vm9, %v6511_v24  ;;  %8593 = vrot.lane.b32.xlu1 %v8544_v42, %s16594_s15  ;;  %7144 = vrot.lane.b32.xlu0 %v7088_v45, %s16576_s20  ;;  %v7091_v24 = vmul.f32 %v16598_v21, %v14836_v52  ;;  %v7711_v42 = vmul.f32 %v13799_v16, %v14808_v53 }
 0xf12   : > { %v6513_v26 = vpop.permute.xlu1 %6512  ;;  %v6544_v37 = vpop.permute.xlu0 %6543 }
 0xf13   : > { %6530 = vst.msk [vmem:[#allocation4 + $0xa8] sm:$0xff] %vm6522_vm9, %v6513_v26  ;;  %v16599_v26 = vld [vmem:[#allocation26_spill] sm:$0xff]  ;;  %vm16642_vm9 = vmmov %vm16641_vm8 }
 0xf14   : > { %6562 = vst.msk [vmem:[#allocation4 + $0x90] sm:$0xff] %vm6555_vm10, %v6544_v37  ;;  %7134 = vrot.lane.b32.xlu1 %v7083_v1, %s16576_s20  ;;  %7353 = vrot.lane.b32.xlu0 %v7297_v44, %s16577_s26  ;;  %v7300_v37 = vmul.f32 %v16599_v26, %v14836_v52  ;;  %v7920_v1 = vmul.f32 %v13813_v35, %v14808_v53 }
 0xf16   : > { %v6546_v12 = vpop.permute.xlu1 %6545  ;;  %v6577_v59 = vpop.permute.xlu0 %6576 }
 0xf17   : > { %6563 = vst.msk [vmem:[#allocation4 + $0xa8] sm:$0xff] %vm6555_vm10, %v6546_v12  ;;  %v16600_v12 = vld [vmem:[#allocation34_spill] sm:$0xff]  ;;  %vm16644_vm10 = vcmask 883712  }
 0xf18   : > { %6595 = vst.msk [vmem:[#allocation4 + $0x90] sm:$0xff] %vm6588_vm11, %v6577_v59  ;;  %7343 = vrot.lane.b32.xlu1 %v7292_v55, %s16577_s26  ;;  %7562 = vrot.lane.b32.xlu0 %v7506_v20, %s16578_s13  ;;  %v7509_v59 = vmul.f32 %v16600_v12, %v14836_v52  ;;  %v8129_v55 = vmul.f32 %v13827_v2, %v14808_v53 }
 0xf1a   : > { %v6579_v8 = vpop.permute.xlu1 %6578  ;;  %v6610_v54 = vpop.permute.xlu0 %6609 }
 0xf1b   : > { %6596 = vst.msk [vmem:[#allocation4 + $0xa8] sm:$0xff] %vm6588_vm11, %v6579_v8  ;;  %v16601_v8 = vld [vmem:[#allocation38_spill] sm:$0xff]  ;;  %vm16645_vm11 = vmmov %vm16644_vm10 }
 0xf1c   : > { %6628 = vst.msk [vmem:[#allocation4 + $0x98] sm:$0xff] %vm6621_vm14, %v6610_v54  ;;  %7552 = vrot.lane.b32.xlu1 %v7501_v25, %s16578_s13  ;;  %7771 = vrot.lane.b32.xlu0 %v7715_v30, %s16593_s30  ;;  %v7718_v54 = vmul.f32 %v16601_v8, %v14836_v52  ;;  %v8338_v25 = vmul.f32 %v13851_v58, %v14808_v53 }
 0xf1e   : > { %v6612_v4 = vpop.permute.xlu1 %6611  ;;  %v6643_v6 = vpop.permute.xlu0 %6642 }
 0xf1f   : > { %6629 = vst.msk [vmem:[#allocation4 + $0xb0] sm:$0xff] %vm6621_vm14, %v6612_v4  ;;  %v16603_v4 = vld [vmem:[#allocation42_spill] sm:$0xff] }
 0xf20   : > { %6661 = vst.msk [vmem:[#allocation4 + $0x98] sm:$0xff] %vm6654_vm5, %v6643_v6  ;;  %7761 = vrot.lane.b32.xlu1 %v7710_v22, %s16593_s30  ;;  %7980 = vrot.lane.b32.xlu0 %v7924_v56, %s16595_s25  ;;  %v7927_v6 = vmul.f32 %v16603_v4, %v14836_v52  ;;  %v7086_v22 = vmul.f32 %v13753_v34, %v14826_v48 }
 0xf22   : > { %v6645_v51 = vpop.permute.xlu1 %6644  ;;  %v6676_v19 = vpop.permute.xlu0 %6675 }
 0xf23   : > { %6662 = vst.msk [vmem:[#allocation4 + $0xb0] sm:$0xff] %vm6654_vm5, %v6645_v51  ;;  %v16605_v51 = vld [vmem:[#allocation53_spill] sm:$0xff] }
 0xf24   : > { %6694 = vst.msk [vmem:[#allocation4 + $0x98] sm:$0xff] %vm6687_vm6, %v6676_v19  ;;  %7970 = vrot.lane.b32.xlu1 %v7919_v23, %s16595_s25  ;;  %8398 = vrot.lane.b32.xlu0 %v8342_v61, %s16592_s10  ;;  %v8554_v19 = vmul.f32 %v16605_v51, %v14836_v52  ;;  %v7295_v23 = vmul.f32 %v13769_v46, %v14826_v48  ;;  %v14895_v61 = vld [vmem:[#allocation4 + $0x38] sm:$0xff] }
 0xf25   : > { %16606 = vst [vmem:[#allocation66_spill] sm:$0xff] %v14895_v61 }
 0xf26   : > { %v6678_v43 = vpop.permute.xlu1 %6677  ;;  %v6717_v49 = vpop.permute.xlu0 %6716 }
 0xf27   : > { %6695 = vst.msk [vmem:[#allocation4 + $0xb0] sm:$0xff] %vm6687_vm6, %v6678_v43 }
 0xf28   : > { %6735 = vst.msk [vmem:[#allocation4 + $0x98] sm:$0xff] %vm6728_vm7, %v6717_v49  ;;  %8179 = vrot.lane.b32.xlu1 %v8128_v39, %s16591_s21  ;;  %8607 = vrot.lane.b32.xlu0 %v8551_v9, %s16594_s15  ;;  %v7087_v39 = vmul.f32 %v13753_v34, %v14895_v61  ;;  %v7504_v9 = vmul.f32 %v13785_v38, %v14826_v48 }
 0xf2a   : > { %v6719_v29 = vpop.permute.xlu1 %6718  ;;  %v6750_v40 = vpop.permute.xlu0 %6749 }
 0xf2b   : > { %6736 = vst.msk [vmem:[#allocation4 + $0xb0] sm:$0xff] %vm6728_vm7, %v6719_v29 }
 0xf2c   : > { %6768 = vst.msk [vmem:[#allocation4 + $0x98] sm:$0xff] %vm6761_vm12, %v6750_v40  ;;  %8189 = vrot.lane.b32.xlu1 %v8133_v41, %s16591_s21  ;;  %7136 = vrot.lane.b32.xlu0 %v7084_v3, %s16576_s20  ;;  %v7296_v41 = vmul.f32 %v13769_v46, %v14895_v61  ;;  %v7713_v3 = vmul.f32 %v13801_v17, %v14826_v48 }
 0xf2e   : > { %v6752_v62 = vpop.permute.xlu1 %6751  ;;  %v6783_v32 = vpop.permute.xlu0 %6782 }
 0xf2f   : > { %6769 = vst.msk [vmem:[#allocation4 + $0xb0] sm:$0xff] %vm6761_vm12, %v6752_v62  ;;  %vm16651_vm12 = vmmov %vm16641_vm8 }
 0xf30   : > { %6801 = vst.msk [vmem:[#allocation4 + $0x98] sm:$0xff] %vm6794_vm13, %v6783_v32  ;;  %8599 = vrot.lane.b32.xlu1 %v8547_v14, %s16594_s15  ;;  %7345 = vrot.lane.b32.xlu0 %v7293_v27, %s16577_s26  ;;  %v7505_v32 = vmul.f32 %v13785_v38, %v14895_v61  ;;  %v7922_v14 = vmul.f32 %v13821_v28, %v14826_v48  ;;  %v16609_v27 = vld [vmem:[#allocation15_spill] sm:$0xff] }
 0xf31   : > { %v6985_v46 = vmul.f32 %v16609_v27, %v14603_v47  ;;  %v8131_v38 = vmul.f32 %v13839_v18, %v14826_v48 }
 0xf32   : > { %v6785_v60 = vpop.permute.xlu1 %6784  ;;  %v6816_v5 = vpop.permute.xlu0 %6815 }
 0xf33   : > { %6802 = vst.msk [vmem:[#allocation4 + $0xb0] sm:$0xff] %vm6794_vm13, %v6785_v60  ;;  %vm16652_vm13 = vmmov %vm16641_vm8 }
 0xf34   : > { %6834 = vst.msk [vmem:[#allocation4 + $0x98] sm:$0xff] %vm6827_vm4, %v6816_v5  ;;  %8603 = vrot.lane.b32.xlu1 %v8549_v13, %s16594_s15  ;;  %7554 = vrot.lane.b32.xlu0 %v7502_v11, %s16578_s13  ;;  %v7714_v11 = vmul.f32 %v13801_v17, %v14895_v61  ;;  %v8340_v17 = vmul.f32 %v13837_v36, %v14826_v48  ;;  %v15065_v48 = vld [vmem:[#allocation4 + $0x50] sm:$0xff] }
 0xf36   : > { %v6818_v63 = vpop.permute.xlu1 %6817  ;;  %v6849_v0 = vpop.permute.xlu0 %6848 }
 0xf37   : > { %6835 = vst.msk [vmem:[#allocation4 + $0xb0] sm:$0xff] %vm6827_vm4, %v6818_v63  ;;  %vm16638_vm4 = vcmask 900096  }
 0xf38   : > { %6874 = vst.msk [vmem:[#allocation4 + $0x98] sm:$0xff] %vm6860_vm3, %v6849_v0  ;;  %7150 = vrot.lane.b32.xlu1 %v7091_v24, %s16576_s20  ;;  %7763 = vrot.lane.b32.xlu0 %v7711_v42, %s16593_s30  ;;  %v7923_v42 = vmul.f32 %v13821_v28, %v14895_v61  ;;  %v8341_v28 = vmul.f32 %v13837_v36, %v14895_v61  ;;  %vm16640_vm15 = vmmov %vm16638_vm4 }
 0xf39   : > { %6875 = vst.msk [vmem:[#allocation4 + $0xa0] sm:$0xff] %vm6862_vm2, %v6849_v0  ;;  %v8550_v36 = vmul.f32 %v13915_v7, %v14895_v61  ;;  %vm16648_vm6 = vmmov %vm16638_vm4 }
 0xf3a   : > { %v6851_v31 = vpop.permute.xlu1 %6850  ;;  %v6891_v45 = vpop.permute.xlu0 %6890  ;;  %vm16649_vm7 = vmmov %vm16638_vm4 }
 0xf3b   : > { %6876 = vst.msk [vmem:[#allocation4 + $0xb0] sm:$0xff] %vm6860_vm3, %v6851_v31 }
 0xf3c   : > { %6877 = vst.msk [vmem:[#allocation4 + $0xb8] sm:$0xff] %vm6862_vm2, %v6851_v31  ;;  %7359 = vrot.lane.b32.xlu1 %v7300_v37, %s16577_s26  ;;  %7972 = vrot.lane.b32.xlu0 %v7920_v1, %s16595_s25  ;;  %vm16636_vm2 = vcmask 1031168  }
 0xf3d   : > { %6909 = vst.msk [vmem:[#allocation4 + $0xa0] sm:$0xff] %vm6902_vm1, %v6891_v45  ;;  %v16610_v45 = vld [vmem:[#allocation16_spill] sm:$0xff]  ;;  %vm16637_vm3 = vmmov %vm16636_vm2 }
 0xf3e   : > { %v6893_v16 = vpop.permute.xlu1 %6892  ;;  %v14858_v44 = vpop.permute.xlu0 %7132  ;;  %v6988_v37 = vmul.f32 %v16610_v45, %v14646_v10  ;;  %vm16646_vm14 = vmmov %vm16636_vm2 }
 0xf3f   : > { %6910 = vst.msk [vmem:[#allocation4 + $0xb8] sm:$0xff] %vm6902_vm1, %v6893_v16  ;;  %v7218_v60 = vadd.f32 %v14858_v44, %v6985_v46  ;;  %vm8729_vm1 = vcmask 244736   ;;  %vm16647_vm5 = vmmov %vm16636_vm2 }
 0xf40   : > { %7568 = vrot.lane.b32.xlu1 %v7509_v59, %s16578_s13  ;;  %8181 = vrot.lane.b32.xlu0 %v8129_v55, %s16591_s21 }
 0xf42   : > { %v14867_v35 = vpop.permute.xlu1 %8177  ;;  %v14869_v20 = vpop.permute.xlu0 %7341 }
 0xf43   : > { %v7427_v63 = vadd.f32 %v14869_v20, %v7218_v60 }
 0xf44   : > { %7777 = vrot.lane.b32.xlu1 %v7718_v54, %s16593_s30  ;;  %8390 = vrot.lane.b32.xlu0 %v8338_v25, %s16592_s10  ;;  %v16611_v54 = vld [vmem:[#allocation47_spill] sm:$0xff] }
 0xf45   : > { %v8136_v25 = vmul.f32 %v16611_v54, %v14836_v52 }
 0xf46   : > { %v14877_v2 = vpop.permute.xlu1 %8386  ;;  %v14879_v30 = vpop.permute.xlu0 %7550 }
 0xf47   : > { %16602 = vst [vmem:[#allocation65_spill] sm:$0xff] %v14877_v2  ;;  %v7636_v47 = vadd.f32 %v14879_v30, %v7427_v63 }
 0xf48   : > { %7986 = vrot.lane.b32.xlu1 %v7927_v6, %s16595_s25  ;;  %7140 = vrot.lane.b32.xlu0 %v7086_v22, %s16576_s20 }
 0xf4a   : > { %v14887_v56 = vpop.permute.xlu1 %8382  ;;  %v14889_v58 = vpop.permute.xlu0 %7759 }
 0xf4b   : > { %16604 = vst [vmem:[#allocation67_spill] sm:$0xff] %v14887_v56  ;;  %v7845_v31 = vadd.f32 %v14889_v58, %v7636_v47  ;;  %v15123_v56 = vld [vmem:[#allocation4 + $0x88] sm:$0xff] }
 0xf4c   : > { %8613 = vrot.lane.b32.xlu1 %v8554_v19, %s16594_s15  ;;  %7349 = vrot.lane.b32.xlu0 %v7295_v23, %s16577_s26 }
 0xf4e   : > { %v14899_v43 = vpop.permute.xlu1 %8591  ;;  %v14901_v49 = vpop.permute.xlu0 %7968 }
 0xf4f   : > { %16607 = vst [vmem:[#allocation68_spill] sm:$0xff] %v14899_v43  ;;  %v8054_v1 = vadd.f32 %v14901_v49, %v7845_v31 }
 0xf50   : > { %7142 = vrot.lane.b32.xlu1 %v7087_v39, %s16576_s20  ;;  %7558 = vrot.lane.b32.xlu0 %v7504_v9, %s16578_s13  ;;  %v16612_v39 = vld [vmem:[#allocation50_spill] sm:$0xff] }
 0xf51   : > { %v8263_v6 = vadd.f32 %v14867_v35, %v8054_v1  ;;  %v8345_v9 = vmul.f32 %v16612_v39, %v14836_v52  ;;  %v16627_v52 = vld [vmem:[#allocation45_spill] sm:$0xff] }
 0xf52   : > { %v14909_v29 = vpop.permute.xlu1 %7138  ;;  %v14911_v40 = vpop.permute.xlu0 %8595 }
 0xf53   : > { %16608 = vst [vmem:[#allocation70_spill] sm:$0xff] %v14911_v40  ;;  %v7221_v16 = vadd.f32 %v14909_v29, %v6988_v37 }
 0xf54   : > { %7351 = vrot.lane.b32.xlu1 %v7296_v41, %s16577_s26  ;;  %7767 = vrot.lane.b32.xlu0 %v7713_v3, %s16593_s30  ;;  %v14981_v3 = vld [vmem:[#allocation4 + $0x48] sm:$0xff] }
 0xf55   : > { %16613 = vst [vmem:[#allocation69_spill] sm:$0xff] %v14981_v3  ;;  %v7089_v7 = vmul.f32 %v16598_v21, %v14981_v3  ;;  %v7298_v31 = vmul.f32 %v16599_v26, %v14981_v3 }
 0xf56   : > { %v14919_v34 = vpop.permute.xlu1 %7347  ;;  %v14921_v62 = vpop.permute.xlu0 %7128 }
 0xf57   : > { %v7430_v10 = vadd.f32 %v14919_v34, %v7221_v16 }
 0xf58   : > { %7560 = vrot.lane.b32.xlu1 %v7505_v32, %s16578_s13  ;;  %7976 = vrot.lane.b32.xlu0 %v7922_v14, %s16595_s25  ;;  %v8472_v32 = vadd.f32 %v14877_v2, %v8263_v6  ;;  %v7507_v6 = vmul.f32 %v16600_v12, %v14981_v3 }
 0xf5a   : > { %v14932_v5 = vpop.permute.xlu1 %7556  ;;  %v14934_v13 = vpop.permute.xlu0 %7337  ;;  %v8681_v63 = vadd.f32 %v14911_v40, %v8472_v32  ;;  %v7716_v32 = vmul.f32 %v16601_v8, %v14981_v3 }
 0xf5b   : > { %v7639_v22 = vadd.f32 %v14932_v5, %v7430_v10 }
 0xf5c   : > { %7769 = vrot.lane.b32.xlu1 %v7714_v11, %s16593_s30  ;;  %8185 = vrot.lane.b32.xlu0 %v8131_v38, %s16591_s21  ;;  %v8132_v11 = vmul.f32 %v13839_v18, %v14895_v61  ;;  %v8343_v18 = vmul.f32 %v16612_v39, %v14981_v3  ;;  %v8730_v1 = vsel %vm8729_vm1, %v8681_v63, 0.0  ;;  %v7925_v63 = vmul.f32 %v16603_v4, %v14981_v3 }
 0xf5e   : > { %v14944_v0 = vpop.permute.xlu1 %7765  ;;  %v14946_v24 = vpop.permute.xlu0 %7546 }
 0xf5f   : > { %v7848_v41 = vadd.f32 %v14944_v0, %v7639_v22  ;;  %v8552_v22 = vmul.f32 %v16605_v51, %v14981_v3 }
 0xf60   : > { %7978 = vrot.lane.b32.xlu1 %v7923_v42, %s16595_s25  ;;  %8394 = vrot.lane.b32.xlu0 %v8340_v17, %s16592_s10 }
 0xf62   : > { %v14959_v59 = vpop.permute.xlu1 %7974  ;;  %v14961_v55 = vpop.permute.xlu0 %7755 }
 0xf63   : > { %v8057_v14 = vadd.f32 %v14959_v59, %v7848_v41 }
 0xf64   : > { %8396 = vrot.lane.b32.xlu1 %v8341_v28, %s16592_s10  ;;  %8195 = vrot.lane.b32.xlu0 %v8136_v25, %s16591_s21 }
 0xf66   : > { %v14972_v19 = vpop.permute.xlu1 %8183  ;;  %v14974_v23 = vpop.permute.xlu0 %7964 }
 0xf67   : > { %v8266_v38 = vadd.f32 %v14972_v19, %v8057_v14  ;;  %v16617_v14 = vld [vmem:[#allocation24_spill] sm:$0xff] }
 0xf68   : > { %8605 = vrot.lane.b32.xlu1 %v8550_v36, %s16594_s15  ;;  %8404 = vrot.lane.b32.xlu0 %v8345_v9, %s16592_s10  ;;  %v15023_v36 = vld [vmem:[#allocation4 + $0x70] sm:$0xff] }
 0xf69   : > { %16616 = vst [vmem:[#allocation73_spill] sm:$0xff] %v15023_v36 }
 0xf6a   : > { %v14987_v46 = vpop.permute.xlu1 %8392  ;;  %v14989_v60 = vpop.permute.xlu0 %8173 }
 0xf6b   : > { %16614 = vst [vmem:[#allocation71_spill] sm:$0xff] %v14987_v46  ;;  %v8475_v47 = vadd.f32 %v14987_v46, %v8266_v38 }
 0xf6c   : > { %7146 = vrot.lane.b32.xlu1 %v7089_v7, %s16576_s20  ;;  %8187 = vrot.lane.b32.xlu0 %v8132_v11, %s16591_s21  ;;  %v7094_v7 = vmul.f32 %v16617_v14, %v15023_v36 }
 0xf6e   : > { %v15000_v42 = vpop.permute.xlu1 %7130  ;;  %v15002_v17 = vpop.permute.xlu0 %8601 }
 0xf6f   : > { %16615 = vst [vmem:[#allocation72_spill] sm:$0xff] %v15002_v17  ;;  %v8684_v37 = vadd.f32 %v15002_v17, %v8475_v47  ;;  %v16619_v47 = vld [vmem:[#allocation28_spill] sm:$0xff]  ;;  %v7930_v17 = vmul.f32 %v16627_v52, %v15023_v36 }
 0xf70   : > { %7355 = vrot.lane.b32.xlu1 %v7298_v31, %s16577_s26  ;;  %8400 = vrot.lane.b32.xlu0 %v8343_v18, %s16592_s10  ;;  %v7303_v31 = vmul.f32 %v16619_v47, %v15023_v36  ;;  %v16630_v52 = vld [vmem:[#allocation56_spill] sm:$0xff] }
 0xf71   : > { %v8731_v16 = vsel %vm8729_vm1, %v8684_v37, 0.0  ;;  %v8557_v46 = vmul.f32 %v16630_v52, %v15023_v36 }
 0xf72   : > { %v15013_v28 = vadd.f32 %v8731_v16, %v8730_v1  ;;  %v15015_v25 = vpop.permute.xlu1 %7339  ;;  %v15017_v10 = vpop.permute.xlu0 %8175  ;;  %v8134_v1 = vmul.f32 %v16611_v54, %v14981_v3  ;;  %v16621_v16 = vld [vmem:[#allocation33_spill] sm:$0xff] }
 0xf74   : > { %7564 = vrot.lane.b32.xlu1 %v7507_v6, %s16578_s13  ;;  %8609 = vrot.lane.b32.xlu0 %v8552_v22, %s16594_s15  ;;  %v7512_v6 = vmul.f32 %v16621_v16, %v15023_v36 }
 0xf76   : > { %v15027_v9 = vpop.permute.xlu1 %7548  ;;  %v15029_v41 = vpop.permute.xlu0 %8384 }
 0xf78   : > { %7773 = vrot.lane.b32.xlu1 %v7716_v32, %s16593_s30  ;;  %7156 = vrot.lane.b32.xlu0 %v7094_v7, %s16576_s20  ;;  %v16624_v7 = vld [vmem:[#allocation52_spill] sm:$0xff] }
 0xf7a   : > { %v15037_v11 = vpop.permute.xlu1 %7757  ;;  %v15039_v38 = vpop.permute.xlu0 %8388 }
 0xf7b   : > { %16618 = vst [vmem:[#allocation75_spill] sm:$0xff] %v15039_v38 }
 0xf7c   : > { %7982 = vrot.lane.b32.xlu1 %v7925_v63, %s16595_s25  ;;  %7365 = vrot.lane.b32.xlu0 %v7303_v31, %s16577_s26  ;;  %v8348_v63 = vmul.f32 %v16624_v7, %v15023_v36  ;;  %v16625_v31 = vld [vmem:[#allocation40_spill] sm:$0xff] }
 0xf7d   : > { %v7721_v61 = vmul.f32 %v16625_v31, %v15023_v36  ;;  %v16632_v31 = vld [vmem:[#allocation17_spill] sm:$0xff] }
 0xf7e   : > { %v15047_v18 = vpop.permute.xlu1 %7966  ;;  %v15049_v37 = vpop.permute.xlu0 %8597 }
 0xf7f   : > { %16620 = vst [vmem:[#allocation77_spill] sm:$0xff] %v15049_v37 }
 0xf80   : > { %8191 = vrot.lane.b32.xlu1 %v8134_v1, %s16591_s21  ;;  %7574 = vrot.lane.b32.xlu0 %v7512_v6, %s16578_s13  ;;  %v8135_v6 = vmul.f32 %v16611_v54, %v15065_v48 }
 0xf82   : > { %v15057_v22 = vpop.permute.xlu1 %8593  ;;  %v15059_v32 = vpop.permute.xlu0 %7144 }
 0xf83   : > { %16622 = vst [vmem:[#allocation74_spill] sm:$0xff] %v15057_v22  ;;  %16623 = vst [vmem:[#allocation76_spill] sm:$0xff] %v15059_v32  ;;  %v15087_v22 = vld [vmem:[#allocation4 + $0x60] sm:$0xff] }
 0xf84   : > { %8410 = vrot.lane.b32.xlu1 %v8348_v63, %s16592_s10  ;;  %7783 = vrot.lane.b32.xlu0 %v7721_v61, %s16593_s30  ;;  %v8344_v61 = vmul.f32 %v16612_v39, %v15065_v48  ;;  %v16629_v63 = vld [vmem:[#allocation48_spill] sm:$0xff]  ;;  %v8555_v2 = vmul.f32 %v16630_v52, %v15087_v22 }
 0xf85   : > { %v8139_v43 = vmul.f32 %v16629_v63, %v15023_v36 }
 0xf86   : > { %v15069_v3 = vpop.permute.xlu1 %7134  ;;  %v15071_v1 = vpop.permute.xlu0 %7353 }
 0xf87   : > { %16626 = vst [vmem:[#allocation78_spill] sm:$0xff] %v15071_v1 }
 0xf88   : > { %8193 = vrot.lane.b32.xlu1 %v8135_v6, %s16591_s21  ;;  %7992 = vrot.lane.b32.xlu0 %v7930_v17, %s16595_s25  ;;  %v8137_v17 = vmul.f32 %v16629_v63, %v15087_v22  ;;  %v6991_v63 = vmul.f32 %v16632_v31, %v14750_v57 }
 0xf8a   : > { %v15079_v37 = vpop.permute.xlu1 %7343  ;;  %v15081_v40 = vpop.permute.xlu0 %7562 }
 0xf8b   : > { %16628 = vst [vmem:[#allocation79_spill] sm:$0xff] %v15081_v40 }
 0xf8c   : > { %8402 = vrot.lane.b32.xlu1 %v8344_v61, %s16592_s10  ;;  %8201 = vrot.lane.b32.xlu0 %v8139_v43, %s16591_s21  ;;  %v8346_v43 = vmul.f32 %v16624_v7, %v15087_v22  ;;  %v7090_v61 = vmul.f32 %v16598_v21, %v15065_v48  ;;  %v7299_v7 = vmul.f32 %v16599_v26, %v15065_v48 }
 0xf8d   : > { %v7508_v26 = vmul.f32 %v16600_v12, %v15065_v48  ;;  %v7176_v12 = vsel %vm588_vm0, %v14921_v62, %v15000_v42  ;;  %v7385_v62 = vsel %vm16636_vm2, %v14934_v13, %v15015_v25  ;;  %vm16654_vm2 = vcmask 752640  }
 0xf8e   : > { %v15091_v54 = vpop.permute.xlu1 %7552  ;;  %v15093_v6 = vpop.permute.xlu0 %7771 }
 0xf90   : > { %8197 = vrot.lane.b32.xlu1 %v8137_v17, %s16591_s21  ;;  %8619 = vrot.lane.b32.xlu0 %v8557_v46, %s16594_s15  ;;  %v7224_v17 = vadd.f32 %v15059_v32, %v6991_v63  ;;  %v7717_v32 = vmul.f32 %v16601_v8, %v15065_v48  ;;  %v16635_v8 = vld [vmem:[#allocation35_spill] sm:$0xff] }
 0xf92   : > { %v15101_v39 = vpop.permute.xlu1 %7761  ;;  %v15103_v38 = vpop.permute.xlu0 %7980  ;;  %v7433_v21 = vadd.f32 %v15071_v1, %v7224_v17 }
 0xf93   : > { %16631 = vst [vmem:[#allocation80_spill] sm:$0xff] %v15103_v38 }
 0xf94   : > { %8406 = vrot.lane.b32.xlu1 %v8346_v43, %s16592_s10  ;;  %7148 = vrot.lane.b32.xlu0 %v7090_v61, %s16576_s20  ;;  %v7642_v57 = vadd.f32 %v15081_v40, %v7433_v21  ;;  %v16633_v61 = vld [vmem:[#allocation25_spill] sm:$0xff]  ;;  %v16634_v40 = vld [vmem:[#allocation30_spill] sm:$0xff] }
 0xf95   : > { %v7097_v31 = vmul.f32 %v16633_v61, %v15123_v56  ;;  %v7306_v1 = vmul.f32 %v16634_v40, %v15123_v56 }
 0xf96   : > { %v15114_v46 = vpop.permute.xlu1 %7970  ;;  %v15116_v36 = vpop.permute.xlu0 %8398  ;;  %v7851_v17 = vadd.f32 %v15093_v6, %v7642_v57  ;;  %v6983_v57 = vmul.f32 %v16609_v27, %v14628_v33  ;;  %v6984_v33 = vmul.f32 %v16609_v27, %v14704_v15 }
 0xf98   : > { %8615 = vrot.lane.b32.xlu1 %v8555_v2, %s16594_s15  ;;  %7357 = vrot.lane.b32.xlu0 %v7299_v7, %s16577_s26  ;;  %v8060_v2 = vadd.f32 %v15103_v38, %v7851_v17  ;;  %v7515_v38 = vmul.f32 %v16635_v8, %v15123_v56 }
 0xf9a   : > { %v15128_v63 = vpop.permute.xlu1 %8179  ;;  %v15130_v43 = vpop.permute.xlu0 %8607 }
 0xf9c   : > { %7162 = vrot.lane.b32.xlu1 %v7097_v31, %s16576_s20  ;;  %7566 = vrot.lane.b32.xlu0 %v7508_v26, %s16578_s13 }
 0xf9e   : > { %v15140_v7 = vpop.permute.xlu1 %8189  ;;  %v7137_v21 = vpop.permute.xlu0 %7136 }
 0xf9f   : > { %v8269_v61 = vadd.f32 %v15140_v7, %v8060_v2  ;;  %v7216_v2 = vadd.f32 %v7176_v12, %v6983_v57  ;;  %v16639_v12 = vld [vmem:[#allocation39_spill] sm:$0xff] }
 0xfa0   : > { %7371 = vrot.lane.b32.xlu1 %v7306_v1, %s16577_s26  ;;  %7775 = vrot.lane.b32.xlu0 %v7717_v32, %s16593_s30  ;;  %v7926_v1 = vmul.f32 %v16603_v4, %v15065_v48  ;;  %v7177_v32 = vsel %vm588_vm0, %v15000_v42, %v14858_v44  ;;  %v7386_v4 = vsel %vm16637_vm3, %v15015_v25, %v14869_v20  ;;  %vm16655_vm3 = vmmov %vm16654_vm2 }
 0xfa1   : > { %v8478_v31 = vadd.f32 %v15116_v36, %v8269_v61  ;;  %v7594_v44 = vsel %vm16638_vm4, %v14946_v24, %v15027_v9  ;;  %v8553_v42 = vmul.f32 %v16605_v51, %v15065_v48  ;;  %v7425_v15 = vadd.f32 %v7385_v62, %v7216_v2  ;;  %v16643_v2 = vld [vmem:[#allocation44_spill] sm:$0xff]  ;;  %vm16656_vm4 = vmmov %vm16644_vm10 }
 0xfa2   : > { %v15155_v26 = vpop.permute.xlu1 %8599  ;;  %v7346_v17 = vpop.permute.xlu0 %7345  ;;  %v7724_v57 = vmul.f32 %v16639_v12, %v15123_v56  ;;  %v7595_v20 = vsel %vm16640_vm15, %v15027_v9, %v14879_v30  ;;  %v7803_v24 = vsel %vm16641_vm8, %v14961_v55, %v15037_v11  ;;  %v6987_v30 = vmul.f32 %v16610_v45, %v14808_v53  ;;  %vm16657_vm15 = vmmov %vm16656_vm4 }
 0xfa3   : > { %v8687_v61 = vadd.f32 %v15130_v43, %v8478_v31  ;;  %v7217_v31 = vadd.f32 %v7177_v32, %v6984_v33  ;;  %v7634_v25 = vadd.f32 %v7594_v44, %v7425_v15  ;;  %v6986_v32 = vmul.f32 %v16610_v45, %v14732_v50  ;;  %vm16658_vm8 = vmmov %vm16654_vm2 }
 0xfa4   : > { %7580 = vrot.lane.b32.xlu1 %v7515_v38, %s16578_s13  ;;  %7984 = vrot.lane.b32.xlu0 %v7926_v1, %s16595_s25  ;;  %v7178_v9 = vsel %vm588_vm0, %v15069_v3, %v7137_v21  ;;  %v7179_v55 = vsel %vm588_vm0, %v7137_v21, %v14909_v29  ;;  %v8012_v53 = vsel %vm16644_vm10, %v14974_v23, %v15047_v18  ;;  %vm16661_vm10 = vcmask 744448  }
 0xfa5   : > { %v8733_v13 = vsel %vm8729_vm1, %v8687_v61, 0.0  ;;  %v7426_v51 = vadd.f32 %v7386_v4, %v7217_v31  ;;  %v7843_v61 = vadd.f32 %v7803_v24, %v7634_v25  ;;  %v7933_v4 = vmul.f32 %v16643_v2, %v15123_v56 }
 0xfa6   : > { %v15181_v27 = vpop.permute.xlu1 %8603  ;;  %v7555_v38 = vpop.permute.xlu0 %7554  ;;  %v15186_v1 = vadd.f32 %v8733_v13, %v15013_v28  ;;  %v7804_v28 = vsel %vm16642_vm9, %v15037_v11, %v14889_v58  ;;  %v7092_v58 = vmul.f32 %v16617_v14, %v15087_v22  ;;  %v8013_v45 = vsel %vm16645_vm11, %v15047_v18, %v14901_v49  ;;  %v16650_v49 = vld [vmem:[#allocation51_spill] sm:$0xff]  ;;  %vm16659_vm9 = vmmov %vm16654_vm2 }
 0xfa7   : > { %v7635_v62 = vadd.f32 %v7595_v20, %v7426_v51  ;;  %v7387_v29 = vsel %vm16646_vm14, %v15079_v37, %v7346_v17  ;;  %v7388_v3 = vsel %vm16647_vm5, %v7346_v17, %v14919_v34  ;;  %v7219_v21 = vadd.f32 %v7178_v9, %v6986_v32  ;;  %v16653_v51 = vld [vmem:[#allocation59_spill] sm:$0xff]  ;;  %vm16663_vm11 = vmmov %vm16661_vm10 }
 0xfa8   : > { %7789 = vrot.lane.b32.xlu1 %v7724_v57, %s16593_s30  ;;  %8611 = vrot.lane.b32.xlu0 %v8553_v42, %s16594_s15  ;;  %v7220_v44 = vadd.f32 %v7179_v55, %v6987_v30  ;;  %v7596_v23 = vsel %vm16648_vm6, %v15091_v54, %v7555_v38  ;;  %v7597_v13 = vsel %vm16649_vm7, %v7555_v38, %v14932_v5  ;;  %vm16666_vm14 = vmmov %vm16661_vm10  ;;  %vm16672_vm6 = vcmask 736256  }
 0xfa9   : > { %v7844_v11 = vadd.f32 %v7804_v28, %v7635_v62  ;;  %v8142_v18 = vmul.f32 %v16650_v49, %v15123_v56  ;;  %v7301_v37 = vmul.f32 %v16619_v47, %v15087_v22  ;;  %v8052_v34 = vadd.f32 %v8012_v53, %v7843_v61  ;;  %v16662_v53 = vld [vmem:[#allocation65_spill] sm:$0xff]  ;;  %vm16668_vm5 = vmmov %vm16661_vm10 }
 0xfaa   : > { %v15207_v50 = vpop.permute.xlu1 %7150  ;;  %v7764_v33 = vpop.permute.xlu0 %7763  ;;  %v7428_v42 = vadd.f32 %v7387_v29, %v7219_v21  ;;  %v7429_v31 = vadd.f32 %v7388_v3, %v7220_v44  ;;  %v7510_v5 = vmul.f32 %v16621_v16, %v15087_v22  ;;  %v8560_v25 = vmul.f32 %v16653_v51, %v15123_v56  ;;  %v16664_v29 = vld [vmem:[#allocation40_spill] sm:$0xff]  ;;  %vm16674_vm7 = vmmov %vm16672_vm6 }
 0xfab   : > { %v8053_v17 = vadd.f32 %v8013_v45, %v7844_v11  ;;  %v7805_v20 = vsel %vm16651_vm12, %v15101_v39, %v7764_v33  ;;  %v7806_v54 = vsel %vm16652_vm13, %v7764_v33, %v14944_v0  ;;  %v8221_v32 = vsel %vm16654_vm2, %v14989_v60, %v15017_v10  ;;  %vm16676_vm12 = vmmov %vm16672_vm6 }
 0xfac   : > { %7998 = vrot.lane.b32.xlu1 %v7933_v4, %s16595_s25  ;;  %7152 = vrot.lane.b32.xlu0 %v7092_v58, %s16576_s20  ;;  %v7637_v38 = vadd.f32 %v7596_v23, %v7428_v42  ;;  %v7638_v24 = vadd.f32 %v7597_v13, %v7429_v31  ;;  %v8222_v0 = vsel %vm16655_vm3, %v15017_v10, %v14867_v35  ;;  %v15257_v4 = vld [vmem:[#allocation4 + $0x68] sm:$0xff]  ;;  %vm16678_vm13 = vmmov %vm16672_vm6  ;;  %vm16692_vm2 = vcmask 1031168  }
 0xfad   : > { %v8261_v30 = vadd.f32 %v8221_v32, %v8052_v34  ;;  %v8262_v9 = vadd.f32 %v8222_v0, %v8053_v17  ;;  %v8431_v45 = vsel %vm16663_vm11, %v15029_v41, %v16662_v53  ;;  %v16667_v34 = vld [vmem:[#allocation71_spill] sm:$0xff]  ;;  %v16677_v0 = vld [vmem:[#allocation72_spill] sm:$0xff]  ;;  %vm16694_vm3 = vmmov %vm16692_vm2 }
 0xfae   : > { %v15233_v15 = vpop.permute.xlu1 %7359  ;;  %v7973_v57 = vpop.permute.xlu0 %7972  ;;  %v7846_v55 = vadd.f32 %v7805_v20, %v7637_v38  ;;  %v7847_v62 = vadd.f32 %v7806_v54, %v7638_v24  ;;  %v16670_v20 = vld [vmem:[#allocation74_spill] sm:$0xff]  ;;  %v16671_v54 = vld [vmem:[#allocation68_spill] sm:$0xff] }
 0xfaf   : > { %v8014_v39 = vsel %vm16656_vm4, %v15114_v46, %v7973_v57  ;;  %v8015_v28 = vsel %vm16657_vm15, %v7973_v57, %v14959_v59  ;;  %v16660_v59 = vld [vmem:[#allocation67_spill] sm:$0xff]  ;;  %v8471_v11 = vadd.f32 %v8431_v45, %v8262_v9  ;;  %v7302_v57 = vmul.f32 %v16619_v47, %v15257_v4  ;;  %v16673_v38 = vld [vmem:[#allocation70_spill] sm:$0xff] }
 0xfb0   : > { %8207 = vrot.lane.b32.xlu1 %v8142_v18, %s16591_s21  ;;  %7361 = vrot.lane.b32.xlu0 %v7301_v37, %s16577_s26  ;;  %v8055_v10 = vadd.f32 %v8014_v39, %v7846_v55  ;;  %v8056_v46 = vadd.f32 %v8015_v28, %v7847_v62  ;;  %v8430_v58 = vsel %vm16661_vm10, %v16660_v59, %v15029_v41  ;;  %v16665_v18 = vld [vmem:[#allocation75_spill] sm:$0xff]  ;;  %v16669_v41 = vld [vmem:[#allocation45_spill] sm:$0xff]  ;;  %vm16696_vm4 = vcmask 900096  }
 0xfb1   : > { %v8470_v3 = vadd.f32 %v8430_v58, %v8261_v30  ;;  %v7928_v42 = vmul.f32 %v16669_v41, %v15087_v22  ;;  %v8640_v24 = vsel %vm16674_vm7, %v16670_v20, %v16673_v38  ;;  %v8642_v39 = vsel %vm16678_vm13, %v15155_v26, %v16677_v0  ;;  %vm16698_vm15 = vmmov %vm16696_vm4 }
 0xfb2   : > { %v15255_v61 = vpop.permute.xlu1 %7568  ;;  %v8182_v33 = vpop.permute.xlu0 %8181  ;;  %v8680_v30 = vadd.f32 %v8640_v24, %v8471_v11  ;;  %v7720_v45 = vmul.f32 %v16664_v29, %v15257_v4  ;;  %vm16702_vm10 = vcmask 883712   ;;  %vm16711_vm13 = vmmov %vm16676_vm12 }
 0xfb3   : > { %v8223_v60 = vsel %vm16658_vm8, %v15128_v63, %v8182_v33  ;;  %v8224_v35 = vsel %vm16659_vm9, %v8182_v33, %v14972_v19  ;;  %v7093_v63 = vmul.f32 %v16617_v14, %v15257_v4  ;;  %v7719_v19 = vmul.f32 %v16664_v29, %v15087_v22  ;;  %vm16704_vm11 = vmmov %vm16702_vm10 }
 0xfb4   : > { %8625 = vrot.lane.b32.xlu1 %v8560_v25, %s16594_s15  ;;  %7570 = vrot.lane.b32.xlu0 %v7510_v5, %s16578_s13  ;;  %v8264_v21 = vadd.f32 %v8223_v60, %v8055_v10  ;;  %v8265_v44 = vadd.f32 %v8224_v35, %v8056_v46  ;;  %v8639_v5 = vsel %vm16672_vm6, %v16671_v54, %v16670_v20  ;;  %v16675_v25 = vld [vmem:[#allocation77_spill] sm:$0xff]  ;;  %v16679_v46 = vld [vmem:[#allocation54_spill] sm:$0xff]  ;;  %vm16699_vm8 = vcmask 891904  }
 0xfb5   : > { %v8641_v32 = vsel %vm16676_vm12, %v16675_v25, %v15155_v26  ;;  %v8679_v28 = vadd.f32 %v8639_v5, %v8470_v3  ;;  %v7511_v26 = vmul.f32 %v16621_v16, %v15257_v4  ;;  %v8351_v59 = vmul.f32 %v16679_v46, %v15123_v56  ;;  %v15319_v3 = vld [vmem:[#allocation4 + $0x78] sm:$0xff]  ;;  %v15342_v5 = vld [vmem:[#allocation4 + $0xa0] sm:$0xff]  ;;  %vm16700_vm9 = vmmov %vm16699_vm8 }
 0xfb6   : > { %v15275_v23 = vpop.permute.xlu1 %7777  ;;  %v8391_v13 = vpop.permute.xlu0 %8390  ;;  %16681 = vst [vmem:[#allocation82_spill] sm:$0xff] %v15319_v3  ;;  %v8558_v20 = vmul.f32 %v16653_v51, %v15319_v3  ;;  %16685 = vst [vmem:[#allocation81_spill] sm:$0xff] %v15342_v5  ;;  %vm16708_vm6 = vcmask 744448  }
 0xfb7   : > { %v8432_v37 = vsel %vm16666_vm14, %v16665_v18, %v8391_v13  ;;  %v8433_v17 = vsel %vm16668_vm5, %v8391_v13, %v16667_v34  ;;  %v16682_v18 = vld [vmem:[#allocation48_spill] sm:$0xff]  ;;  %v8349_v34 = vmul.f32 %v16679_v46, %v15319_v3  ;;  %vm16706_vm14 = vcmask 752640   ;;  %vm16709_vm7 = vmmov %vm16708_vm6 }
 0xfb8   : > { %v8473_v14 = vadd.f32 %v8432_v37, %v8264_v21  ;;  %v8474_v31 = vadd.f32 %v8433_v17, %v8265_v44  ;;  %7154 = vrot.lane.b32.xlu1 %v7093_v63, %s16576_s20  ;;  %7779 = vrot.lane.b32.xlu0 %v7719_v19, %s16593_s30  ;;  %v16680_v63 = vld [vmem:[#allocation52_spill] sm:$0xff]  ;;  %v7929_v21 = vmul.f32 %v16669_v41, %v15257_v4  ;;  %v16683_v17 = vld [vmem:[#allocation63_spill] sm:$0xff]  ;;  %vm16707_vm5 = vmmov %vm16706_vm14 }
 0xfb9   : > { %v8347_v19 = vmul.f32 %v16680_v63, %v15257_v4  ;;  %v8140_v44 = vmul.f32 %v16650_v49, %v15319_v3  ;;  %v8138_v37 = vmul.f32 %v16682_v18, %v15257_v4  ;;  %v16684_v41 = vld [vmem:[#allocation19_spill] sm:$0xff]  ;;  %v16691_v63 = vld [vmem:[#allocation66_spill] sm:$0xff] }
 0xfba   : > { %v8682_v9 = vadd.f32 %v8641_v32, %v8473_v14  ;;  %v8683_v47 = vadd.f32 %v8642_v39, %v8474_v31  ;;  %v15299_v55 = vpop.permute.xlu1 %7986  ;;  %v7141_v62 = vpop.permute.xlu0 %7140  ;;  %v16686_v32 = vld [vmem:[#allocation25_spill] sm:$0xff]  ;;  %v16693_v18 = vld [vmem:[#allocation78_spill] sm:$0xff] }
 0xfbb   : > { %v7095_v0 = vmul.f32 %v16686_v32, %v15319_v3 }
 0xfbc   : > { %v15301_v33 = vadd.f32 %v8682_v9, %v8679_v28  ;;  %v15303_v60 = vadd.f32 %v8683_v47, %v8680_v30  ;;  %7363 = vrot.lane.b32.xlu1 %v7302_v57, %s16577_s26  ;;  %7988 = vrot.lane.b32.xlu0 %v7928_v42, %s16595_s25  ;;  %v6994_v42 = vmul.f32 %v16684_v41, %v16683_v17  ;;  %v16688_v9 = vld [vmem:[#allocation76_spill] sm:$0xff] }
 0xfbd   : > { %v8556_v57 = vmul.f32 %v16630_v52, %v15257_v4  ;;  %v16687_v52 = vld [vmem:[#allocation27_spill] sm:$0xff] }
 0xfbe   : > { %v15307_v35 = vpop.permute.xlu1 %8613  ;;  %v7350_v10 = vpop.permute.xlu0 %7349  ;;  %v7227_v54 = vadd.f32 %v15207_v50, %v6994_v42  ;;  %v7100_v39 = vmul.f32 %v16687_v52, %v15342_v5  ;;  %v7304_v42 = vmul.f32 %v16634_v40, %v15319_v3 }
 0xfc0   : > { %7572 = vrot.lane.b32.xlu1 %v7511_v26, %s16578_s13  ;;  %8416 = vrot.lane.b32.xlu0 %v8351_v59, %s16592_s10  ;;  %v7436_v38 = vadd.f32 %v15233_v15, %v7227_v54  ;;  %v16689_v26 = vld [vmem:[#allocation64_spill] sm:$0xff]  ;;  %v16690_v59 = vld [vmem:[#allocation17_spill] sm:$0xff] }
 0xfc2   : > { %v7143_v58 = vpop.permute.xlu1 %7142  ;;  %v7559_v53 = vpop.permute.xlu0 %7558  ;;  %v7645_v28 = vadd.f32 %v15255_v61, %v7436_v38 }
 0xfc3   : > { %v7180_v30 = vsel %vm588_vm0, %v7141_v62, %v7143_v58  ;;  %v7181_v47 = vsel %vm588_vm0, %v7143_v58, %v16688_v9 }
 0xfc4   : > { %7781 = vrot.lane.b32.xlu1 %v7720_v45, %s16593_s30  ;;  %8408 = vrot.lane.b32.xlu0 %v8347_v19, %s16592_s10  ;;  %v6989_v45 = vmul.f32 %v16690_v59, %v16689_v26  ;;  %v6990_v19 = vmul.f32 %v16690_v59, %v16691_v63 }
 0xfc6   : > { %v7352_v16 = vpop.permute.xlu1 %7351  ;;  %v7768_v11 = vpop.permute.xlu0 %7767 }
 0xfc7   : > { %v7390_v62 = vsel %vm16694_vm3, %v7352_v16, %v16693_v18  ;;  %vm16729_vm3 = vmmov %vm16692_vm2 }
 0xfc8   : > { %7990 = vrot.lane.b32.xlu1 %v7929_v21, %s16595_s25  ;;  %8203 = vrot.lane.b32.xlu0 %v8140_v44, %s16591_s21  ;;  %v7854_v21 = vadd.f32 %v15275_v23, %v7645_v28  ;;  %v7389_v44 = vsel %vm16692_vm2, %v7350_v10, %v7352_v16 }
 0xfca   : > { %v7561_v29 = vpop.permute.xlu1 %7560  ;;  %v7977_v13 = vpop.permute.xlu0 %7976  ;;  %v8063_v54 = vadd.f32 %v15299_v55, %v7854_v21  ;;  %v16703_v21 = vld [vmem:[#allocation80_spill] sm:$0xff] }
 0xfcb   : > { %v7598_v38 = vsel %vm16696_vm4, %v7559_v53, %v7561_v29 }
 0xfcc   : > { %8199 = vrot.lane.b32.xlu1 %v8138_v37, %s16591_s21  ;;  %8412 = vrot.lane.b32.xlu0 %v8349_v34, %s16592_s10  ;;  %v7222_v37 = vadd.f32 %v7180_v30, %v6989_v45  ;;  %v7223_v34 = vadd.f32 %v7181_v47, %v6990_v19  ;;  %v16701_v45 = vld [vmem:[#allocation37_spill] sm:$0xff] }
 0xfcd   : > { %v7518_v63 = vmul.f32 %v16701_v45, %v15342_v5 }
 0xfce   : > { %v7770_v14 = vpop.permute.xlu1 %7769  ;;  %v8186_v31 = vpop.permute.xlu0 %8185  ;;  %v7432_v16 = vadd.f32 %v7390_v62, %v7223_v34 }
 0xfcf   : > { %v7807_v28 = vsel %vm16699_vm8, %v7768_v11, %v7770_v14  ;;  %v7808_v30 = vsel %vm16700_vm9, %v7770_v14, %v15093_v6  ;;  %vm16731_vm9 = vmmov %vm16699_vm8 }
 0xfd0   : > { %8617 = vrot.lane.b32.xlu1 %v8556_v57, %s16594_s15  ;;  %8621 = vrot.lane.b32.xlu0 %v8558_v20, %s16594_s15  ;;  %v16695_v57 = vld [vmem:[#allocation31_spill] sm:$0xff] }
 0xfd1   : > { %v7309_v20 = vmul.f32 %v16695_v57, %v15342_v5 }
 0xfd2   : > { %v7979_v24 = vpop.permute.xlu1 %7978  ;;  %v8395_v25 = vpop.permute.xlu0 %8394 }
 0xfd3   : > { %v8016_v19 = vsel %vm16702_vm10, %v7977_v13, %v7979_v24  ;;  %v8017_v11 = vsel %vm16704_vm11, %v7979_v24, %v16703_v21  ;;  %v7722_v13 = vmul.f32 %v16639_v12, %v15319_v3  ;;  %v16705_v24 = vld [vmem:[#allocation43_spill] sm:$0xff]  ;;  %vm16732_vm11 = vmmov %vm16702_vm10 }
 0xfd4   : > { %7158 = vrot.lane.b32.xlu1 %v7095_v0, %s16576_s20  ;;  %7168 = vrot.lane.b32.xlu0 %v7100_v39, %s16576_s20  ;;  %v16697_v0 = vld [vmem:[#allocation79_spill] sm:$0xff]  ;;  %v7431_v39 = vadd.f32 %v7389_v44, %v7222_v37 }
 0xfd5   : > { %v7599_v10 = vsel %vm16698_vm15, %v7561_v29, %v16697_v0  ;;  %v7513_v29 = vmul.f32 %v16635_v8, %v15319_v3  ;;  %vm16730_vm15 = vmmov %vm16696_vm4 }
 0xfd6   : > { %v8397_v58 = vpop.permute.xlu1 %8396  ;;  %v15365_v17 = vpop.permute.xlu0 %8195  ;;  %v7640_v47 = vadd.f32 %v7598_v38, %v7431_v39  ;;  %v7641_v26 = vadd.f32 %v7599_v10, %v7432_v16 }
 0xfd7   : > { %v8272_v9 = vadd.f32 %v15365_v17, %v8063_v54 }
 0xfd8   : > { %7367 = vrot.lane.b32.xlu1 %v7304_v42, %s16577_s26  ;;  %7377 = vrot.lane.b32.xlu0 %v7309_v20, %s16577_s26  ;;  %v7849_v14 = vadd.f32 %v7807_v28, %v7640_v47  ;;  %v7850_v44 = vadd.f32 %v7808_v30, %v7641_v26  ;;  %v7727_v20 = vmul.f32 %v16705_v24, %v15342_v5 }
 0xfd9   : > { %v8434_v28 = vsel %vm16708_vm6, %v8395_v25, %v8397_v58  ;;  %v8435_v30 = vsel %vm16709_vm7, %v8397_v58, %v15116_v36  ;;  %vm16734_vm7 = vmmov %vm16708_vm6 }
 0xfda   : > { %v8606_v59 = vpop.permute.xlu1 %8605  ;;  %v15381_v53 = vpop.permute.xlu0 %8404  ;;  %v8058_v62 = vadd.f32 %v8016_v19, %v7849_v14  ;;  %v8059_v37 = vadd.f32 %v8017_v11, %v7850_v44  ;;  %v16712_v11 = vld [vmem:[#allocation57_spill] sm:$0xff]  ;;  %v16713_v14 = vld [vmem:[#allocation55_spill] sm:$0xff] }
 0xfdb   : > { %v8481_v6 = vadd.f32 %v15381_v53, %v8272_v9  ;;  %v8644_v25 = vsel %vm16711_vm13, %v8606_v59, %v15130_v43  ;;  %v8145_v44 = vmul.f32 %v16713_v14, %v15342_v5  ;;  %vm16735_vm13 = vmmov %vm16676_vm12 }
 0xfdc   : > { %7576 = vrot.lane.b32.xlu1 %v7513_v29, %s16578_s13  ;;  %7586 = vrot.lane.b32.xlu0 %v7518_v63, %s16578_s13  ;;  %v16710_v29 = vld [vmem:[#allocation49_spill] sm:$0xff] }
 0xfdd   : > { %v8690_v18 = vadd.f32 %v15307_v35, %v8481_v6  ;;  %v7936_v63 = vmul.f32 %v16710_v29, %v15342_v5  ;;  %v8354_v6 = vmul.f32 %v16712_v11, %v15342_v5 }
 0xfde   : > { %v15394_v34 = vpop.permute.xlu1 %7146  ;;  %v8188_v42 = vpop.permute.xlu0 %8187 }
 0xfdf   : > { %v8735_v54 = vsel %vm8729_vm1, %v8690_v18, 0.0  ;;  %v8225_v38 = vsel %vm16706_vm14, %v8186_v31, %v8188_v42  ;;  %v8226_v0 = vsel %vm16707_vm5, %v8188_v42, %v15140_v7  ;;  %v7931_v7 = vmul.f32 %v16643_v2, %v15319_v3  ;;  %v16715_v42 = vld [vmem:[#allocation60_spill] sm:$0xff]  ;;  %vm16733_vm14 = vmmov %vm16707_vm5 }
 0xfe0   : > { %v8267_v10 = vadd.f32 %v8225_v38, %v8058_v62  ;;  %v8268_v39 = vadd.f32 %v8226_v0, %v8059_v37  ;;  %7785 = vrot.lane.b32.xlu1 %v7722_v13, %s16593_s30  ;;  %7795 = vrot.lane.b32.xlu0 %v7727_v20, %s16593_s30  ;;  %v15407_v16 = vadd.f32 %v8735_v54, %v15186_v1  ;;  %v15452_v13 = vld [vmem:[#allocation4 + $0x90] sm:$0xff] }
 0xfe1   : > { %v8643_v1 = vsel %vm16676_vm12, %v15181_v27, %v8606_v59  ;;  %v15440_v59 = vld [vmem:[#allocation4 + $0x80] sm:$0xff]  ;;  %v8143_v54 = vmul.f32 %v16713_v14, %v15452_v13 }
 0xfe2   : > { %v8476_v9 = vadd.f32 %v8434_v28, %v8267_v10  ;;  %v8477_v47 = vadd.f32 %v8435_v30, %v8268_v39  ;;  %v15412_v31 = vpop.permute.xlu1 %7355  ;;  %v15414_v26 = vpop.permute.xlu0 %8400  ;;  %16714 = vst [vmem:[#allocation83_spill] sm:$0xff] %v15440_v59  ;;  %v8350_v37 = vmul.f32 %v16679_v46, %v15440_v59  ;;  %v7096_v38 = vmul.f32 %v16686_v32, %v15440_v59  ;;  %v16716_v28 = vld [vmem:[#allocation73_spill] sm:$0xff]  ;;  %v16717_v30 = vld [vmem:[#allocation18_spill] sm:$0xff] }
 0xfe3   : > { %v8352_v10 = vmul.f32 %v16712_v11, %v15452_v13  ;;  %v7305_v39 = vmul.f32 %v16634_v40, %v15440_v59  ;;  %v7514_v40 = vmul.f32 %v16635_v8, %v15440_v59 }
 0xfe4   : > { %v8685_v19 = vadd.f32 %v8643_v1, %v8476_v9  ;;  %v8686_v36 = vadd.f32 %v8644_v25, %v8477_v47  ;;  %7994 = vrot.lane.b32.xlu1 %v7931_v7, %s16595_s25  ;;  %8004 = vrot.lane.b32.xlu0 %v7936_v63, %s16595_s25  ;;  %v6997_v9 = vmul.f32 %v16717_v30, %v16716_v28  ;;  %v15476_v47 = vld [vmem:[#allocation4 + $0xb8] sm:$0xff] }
 0xfe5   : > { %v16719_v1 = vld [vmem:[#allocation29_spill] sm:$0xff]  ;;  %v16721_v28 = vld [vmem:[#allocation36_spill] sm:$0xff] }
 0xfe6   : > { %v15426_v58 = vpop.permute.xlu1 %7564  ;;  %v15428_v21 = vpop.permute.xlu0 %8609  ;;  %v15435_v27 = vadd.f32 %v15301_v33, %v8685_v19  ;;  %v15438_v43 = vadd.f32 %v15303_v60, %v8686_v36  ;;  %v8563_v33 = vmul.f32 %v16715_v42, %v15342_v5  ;;  %v7103_v25 = vmul.f32 %v16719_v1, %v15476_v47 }
 0xfe7   : > { %v6993_v5 = vmul.f32 %v16684_v41, %v15065_v48 }
 0xfe8   : > { %8422 = vrot.lane.b32.xlu1 %v8354_v6, %s16592_s10  ;;  %8213 = vrot.lane.b32.xlu0 %v8145_v44, %s16591_s21 }
 0xfea   : > { %v15444_v18 = vpop.permute.xlu1 %7773  ;;  %v15446_v62 = vpop.permute.xlu0 %7156 }
 0xfeb   : > { %v7230_v32 = vadd.f32 %v15446_v62, %v6997_v9  ;;  %v7521_v9 = vmul.f32 %v16721_v28, %v15476_v47 }
 0xfec   : > { %8414 = vrot.lane.b32.xlu1 %v8350_v37, %s16592_s10  ;;  %8631 = vrot.lane.b32.xlu0 %v8563_v33, %s16594_s15  ;;  %v16720_v37 = vld [vmem:[#allocation32_spill] sm:$0xff] }
 0xfed   : > { %v7312_v33 = vmul.f32 %v16720_v37, %v15476_v47 }
 0xfee   : > { %v15456_v60 = vpop.permute.xlu1 %7982  ;;  %v15458_v20 = vpop.permute.xlu0 %7365 }
 0xfef   : > { %v7439_v19 = vadd.f32 %v15458_v20, %v7230_v32  ;;  %v7932_v32 = vmul.f32 %v16643_v2, %v15440_v59 }
 0xff0   : > { %8209 = vrot.lane.b32.xlu1 %v8143_v54, %s16591_s21  ;;  %7160 = vrot.lane.b32.xlu0 %v7096_v38, %s16576_s20  ;;  %v7723_v54 = vmul.f32 %v16639_v12, %v15440_v59 }
 0xff2   : > { %v15466_v46 = vpop.permute.xlu1 %8191  ;;  %v15468_v0 = vpop.permute.xlu0 %7574 }
 0xff3   : > { %v7648_v36 = vadd.f32 %v15468_v0, %v7439_v19 }
 0xff4   : > { %8418 = vrot.lane.b32.xlu1 %v8352_v10, %s16592_s10  ;;  %7369 = vrot.lane.b32.xlu0 %v7305_v39, %s16577_s26 }
 0xff6   : > { %v15481_v7 = vpop.permute.xlu1 %8410  ;;  %v15483_v63 = vpop.permute.xlu0 %7783 }
 0xff7   : > { %16718 = vst [vmem:[#allocation85_spill] sm:$0xff] %v15481_v7  ;;  %v7857_v8 = vadd.f32 %v15483_v63, %v7648_v36  ;;  %v16723_v36 = vld [vmem:[#allocation41_spill] sm:$0xff] }
 0xff8   : > { %7174 = vrot.lane.b32.xlu1 %v7103_v25, %s16576_s20  ;;  %7578 = vrot.lane.b32.xlu0 %v7514_v40, %s16578_s13 }
 0xffa   : > { %v15493_v6 = vpop.permute.xlu1 %8193  ;;  %v15495_v44 = vpop.permute.xlu0 %7992 }
 0xffb   : > { %v8066_v38 = vadd.f32 %v15495_v44, %v7857_v8 }
 0xffc   : > { %7383 = vrot.lane.b32.xlu1 %v7312_v33, %s16577_s26  ;;  %7787 = vrot.lane.b32.xlu0 %v7723_v54, %s16593_s30  ;;  %v7730_v33 = vmul.f32 %v16723_v36, %v15476_v47  ;;  %v8141_v54 = vmul.f32 %v16650_v49, %v15440_v59  ;;  %v8559_v49 = vmul.f32 %v16653_v51, %v15440_v59 }
 0xffe   : > { %v15505_v10 = vpop.permute.xlu1 %8402  ;;  %v15507_v39 = vpop.permute.xlu0 %8201 }
 0xfff   : > { %v8275_v12 = vadd.f32 %v15507_v39, %v8066_v38 }
0x1000   : > { %7592 = vrot.lane.b32.xlu1 %v7521_v9, %s16578_s13  ;;  %7996 = vrot.lane.b32.xlu0 %v7932_v32, %s16595_s25 }
0x1001   : > { %v8484_v25 = vadd.f32 %v15481_v7, %v8275_v12  ;;  %v16725_v12 = vld [vmem:[#allocation46_spill] sm:$0xff] }
0x1002   : > { %v15517_v40 = vpop.permute.xlu1 %8197  ;;  %v15519_v19 = vpop.permute.xlu0 %8619  ;;  %v7939_v3 = vmul.f32 %v16725_v12, %v15476_v47 }
0x1003   : > { %16722 = vst [vmem:[#allocation84_spill] sm:$0xff] %v15519_v19  ;;  %v8693_v2 = vadd.f32 %v15519_v19, %v8484_v25 }
0x1004   : > { %7801 = vrot.lane.b32.xlu1 %v7730_v33, %s16593_s30  ;;  %8205 = vrot.lane.b32.xlu0 %v8141_v54, %s16591_s21  ;;  %v16727_v54 = vld [vmem:[#allocation58_spill] sm:$0xff] }
0x1005   : > { %v8737_v8 = vsel %vm8729_vm1, %v8693_v2, 0.0  ;;  %v7098_v2 = vmul.f32 %v16687_v52, %v15452_v13 }
0x1006   : > { %v15530_v38 = vadd.f32 %v8737_v8, %v15407_v16  ;;  %v15532_v9 = vpop.permute.xlu1 %8406  ;;  %v7149_v32 = vpop.permute.xlu0 %7148  ;;  %v8148_v16 = vmul.f32 %v16727_v54, %v15476_v47  ;;  %v15546_v8 = vld [vmem:[#allocation4 + $0x98] sm:$0xff] }
0x1007   : > { %16724 = vst [vmem:[#allocation86_spill] sm:$0xff] %v15532_v9  ;;  %v7182_v51 = vsel %vm588_vm0, %v15394_v34, %v7149_v32 }
0x1008   : > { %8010 = vrot.lane.b32.xlu1 %v7939_v3, %s16595_s25  ;;  %8623 = vrot.lane.b32.xlu0 %v8559_v49, %s16594_s15  ;;  %v7183_v3 = vsel %vm588_vm0, %v7149_v32, %v15207_v50  ;;  %v16728_v49 = vld [vmem:[#allocation69_spill] sm:$0xff] }
0x1009   : > { %v6992_v59 = vmul.f32 %v16684_v41, %v16728_v49  ;;  %v7226_v49 = vadd.f32 %v7183_v3, %v6993_v5  ;;  %v7516_v5 = vmul.f32 %v16701_v45, %v15452_v13 }
0x100a   : > { %v15540_v25 = vpop.permute.xlu1 %8615  ;;  %v7358_v33 = vpop.permute.xlu0 %7357 }
0x100b   : > { %16726 = vst [vmem:[#allocation88_spill] sm:$0xff] %v15540_v25  ;;  %v7391_v34 = vsel %vm16692_vm2, %v15412_v31, %v7358_v33  ;;  %v7392_v50 = vsel %vm16729_vm3, %v7358_v33, %v15233_v15  ;;  %v7225_v32 = vadd.f32 %v7182_v51, %v6992_v59  ;;  %v7308_v15 = vmul.f32 %v16695_v57, %v15546_v8  ;;  %vm16738_vm3 = vmmov %vm16692_vm2 }
0x100c   : > { %8219 = vrot.lane.b32.xlu1 %v8148_v16, %s16591_s21  ;;  %7164 = vrot.lane.b32.xlu0 %v7098_v2, %s16576_s20  ;;  %v7099_v16 = vmul.f32 %v16687_v52, %v15546_v8  ;;  %v7307_v2 = vmul.f32 %v16695_v57, %v15452_v13  ;;  %v7435_v7 = vadd.f32 %v7392_v50, %v7226_v49 }
0x100d   : > { %v7434_v52 = vadd.f32 %v7391_v34, %v7225_v32  ;;  %v8227_v50 = vsel %vm16733_vm14, %v15466_v46, %v15493_v6  ;;  %v8437_v46 = vsel %vm16734_vm7, %v15505_v10, %v15381_v53  ;;  %v7935_v53 = vmul.f32 %v16710_v29, %v15546_v8  ;;  %vm16742_vm14 = vmmov %vm16707_vm5 }
0x100e   : > { %v15558_v19 = vpop.permute.xlu1 %7162  ;;  %v7567_v25 = vpop.permute.xlu0 %7566  ;;  %vm16745_vm7 = vmmov %vm16708_vm6 }
0x100f   : > { %v7600_v48 = vsel %vm16696_vm4, %v15426_v58, %v7567_v25  ;;  %v7601_v41 = vsel %vm16730_vm15, %v7567_v25, %v15255_v61  ;;  %vm16739_vm15 = vmmov %vm16696_vm4 }
0x1010   : > { %7166 = vrot.lane.b32.xlu1 %v7099_v16, %s16576_s20  ;;  %7373 = vrot.lane.b32.xlu0 %v7307_v2, %s16577_s26  ;;  %v7643_v33 = vadd.f32 %v7600_v48, %v7434_v52  ;;  %v7644_v51 = vadd.f32 %v7601_v41, %v7435_v7  ;;  %v7517_v16 = vmul.f32 %v16701_v45, %v15546_v8 }
0x1011   : > { %v8228_v45 = vsel %vm16707_vm5, %v15493_v6, %v15365_v17  ;;  %v7934_v41 = vmul.f32 %v16710_v29, %v15452_v13  ;;  %v8436_v52 = vsel %vm16708_vm6, %v15414_v26, %v15505_v10  ;;  %v8561_v10 = vmul.f32 %v16715_v42, %v15452_v13  ;;  %v16736_v29 = vld [vmem:[#allocation61_spill] sm:$0xff] }
0x1012   : > { %v15574_v9 = vpop.permute.xlu1 %7371  ;;  %v7776_v31 = vpop.permute.xlu0 %7775 }
0x1013   : > { %v7809_v59 = vsel %vm16699_vm8, %v15444_v18, %v7776_v31  ;;  %v7810_v58 = vsel %vm16731_vm9, %v7776_v31, %v15275_v23  ;;  %v7725_v18 = vmul.f32 %v16705_v24, %v15452_v13  ;;  %vm16740_vm9 = vmmov %vm16699_vm8 }
0x1014   : > { %7375 = vrot.lane.b32.xlu1 %v7308_v15, %s16577_s26  ;;  %7582 = vrot.lane.b32.xlu0 %v7516_v5, %s16578_s13  ;;  %v7852_v61 = vadd.f32 %v7809_v59, %v7643_v33  ;;  %v7853_v25 = vadd.f32 %v7810_v58, %v7644_v51  ;;  %v8144_v51 = vmul.f32 %v16713_v14, %v15546_v8 }
0x1016   : > { %v15586_v3 = vpop.permute.xlu1 %7580  ;;  %v7985_v57 = vpop.permute.xlu0 %7984 }
0x1017   : > { %v8018_v23 = vsel %vm16702_vm10, %v15456_v60, %v7985_v57  ;;  %v8019_v7 = vsel %vm16732_vm11, %v7985_v57, %v15299_v55  ;;  %v7726_v55 = vmul.f32 %v16705_v24, %v15546_v8  ;;  %vm16741_vm11 = vmmov %vm16702_vm10 }
0x1018   : > { %v8061_v2 = vadd.f32 %v8018_v23, %v7852_v61  ;;  %v8062_v34 = vadd.f32 %v8019_v7, %v7853_v25  ;;  %7584 = vrot.lane.b32.xlu1 %v7517_v16, %s16578_s13  ;;  %7791 = vrot.lane.b32.xlu0 %v7725_v18, %s16593_s30  ;;  %v8357_v61 = vmul.f32 %v16736_v29, %v15476_v47  ;;  %v15653_v23 = vld [vmem:[#allocation4 + $0xa8] sm:$0xff] }
0x1019   : > { %v8562_v16 = vmul.f32 %v16715_v42, %v15546_v8  ;;  %v8353_v18 = vmul.f32 %v16712_v11, %v15546_v8  ;;  %v7101_v11 = vmul.f32 %v16719_v1, %v15653_v23 }
0x101a   : > { %v8270_v32 = vadd.f32 %v8227_v50, %v8061_v2  ;;  %v8271_v49 = vadd.f32 %v8228_v45, %v8062_v34  ;;  %v15604_v60 = vpop.permute.xlu1 %7789  ;;  %v8612_v48 = vpop.permute.xlu0 %8611  ;;  %v6996_v2 = vmul.f32 %v16717_v30, %v15257_v4  ;;  %v8146_v50 = vmul.f32 %v16727_v54, %v15653_v23 }
0x101b   : > { %v8645_v24 = vsel %vm16676_vm12, %v15428_v21, %v8612_v48  ;;  %v8646_v31 = vsel %vm16735_vm13, %v8612_v48, %v15307_v35  ;;  %v15670_v48 = vld [vmem:[#allocation4 + $0xb0] sm:$0xff]  ;;  %vm16748_vm13 = vmmov %vm16676_vm12 }
0x101c   : > { %v8479_v17 = vadd.f32 %v8436_v52, %v8270_v32  ;;  %v8480_v6 = vadd.f32 %v8437_v46, %v8271_v49  ;;  %7793 = vrot.lane.b32.xlu1 %v7726_v55, %s16593_s30  ;;  %8000 = vrot.lane.b32.xlu0 %v7934_v41, %s16595_s25  ;;  %v7310_v52 = vmul.f32 %v16720_v37, %v15653_v23 }
0x101d   : > { %v7102_v46 = vmul.f32 %v16719_v1, %v15670_v48  ;;  %v7519_v1 = vmul.f32 %v16721_v28, %v15653_v23 }
0x101e   : > { %v8688_v15 = vadd.f32 %v8645_v24, %v8479_v17  ;;  %v8689_v5 = vadd.f32 %v8646_v31, %v8480_v6  ;;  %v15622_v59 = vpop.permute.xlu1 %7998  ;;  %v7153_v26 = vpop.permute.xlu0 %7152 }
0x1020   : > { %v15629_v58 = vadd.f32 %v15435_v27, %v8688_v15  ;;  %v15632_v33 = vadd.f32 %v15438_v43, %v8689_v5  ;;  %8002 = vrot.lane.b32.xlu1 %v7935_v53, %s16595_s25  ;;  %8627 = vrot.lane.b32.xlu0 %v8561_v10, %s16594_s15  ;;  %v16737_v27 = vld [vmem:[#allocation20_spill] sm:$0xff]  ;;  %v7311_v53 = vmul.f32 %v16720_v37, %v15670_v48 }
0x1021   : > { %v7000_v43 = vmul.f32 %v16737_v27, %v15123_v56  ;;  %v6995_v56 = vmul.f32 %v16717_v30, %v15087_v22  ;;  %v7728_v37 = vmul.f32 %v16723_v36, %v15653_v23 }
0x1022   : > { %v15636_v35 = vpop.permute.xlu1 %8207  ;;  %v7362_v21 = vpop.permute.xlu0 %7361 }
0x1023   : > { %v7233_v14 = vadd.f32 %v15558_v19, %v7000_v43 }
0x1024   : > { %8211 = vrot.lane.b32.xlu1 %v8144_v51, %s16591_s21  ;;  %8428 = vrot.lane.b32.xlu0 %v8357_v61, %s16592_s10 }
0x1025   : > { %v7442_v7 = vadd.f32 %v15574_v9, %v7233_v14 }
0x1026   : > { %v15646_v25 = vpop.permute.xlu1 %8625  ;;  %v7571_v57 = vpop.permute.xlu0 %7570 }
0x1027   : > { %v7651_v45 = vadd.f32 %v15586_v3, %v7442_v7 }
0x1028   : > { %8629 = vrot.lane.b32.xlu1 %v8562_v16, %s16594_s15  ;;  %8420 = vrot.lane.b32.xlu0 %v8353_v18, %s16592_s10 }
0x1029   : > { %v7860_v4 = vadd.f32 %v15604_v60, %v7651_v45 }
0x102a   : > { %v7155_v42 = vpop.permute.xlu1 %7154  ;;  %v7780_v34 = vpop.permute.xlu0 %7779 }
0x102b   : > { %v7184_v32 = vsel %vm588_vm0, %v7153_v26, %v7155_v42  ;;  %v7185_v49 = vsel %vm588_vm0, %v7155_v42, %v15446_v62  ;;  %v8069_v62 = vadd.f32 %v15622_v59, %v7860_v4  ;;  %v7938_v4 = vmul.f32 %v16725_v12, %v15670_v48 }
0x102c   : > { %v7228_v22 = vadd.f32 %v7184_v32, %v6995_v56  ;;  %v7229_v55 = vadd.f32 %v7185_v49, %v6996_v2  ;;  %7170 = vrot.lane.b32.xlu1 %v7101_v11, %s16576_s20  ;;  %8215 = vrot.lane.b32.xlu0 %v8146_v50, %s16591_s21 }
0x102d   : > { %v8278_v15 = vadd.f32 %v15636_v35, %v8069_v62  ;;  %v16744_v62 = vld [vmem:[#allocation85_spill] sm:$0xff] }
0x102e   : > { %v7364_v30 = vpop.permute.xlu1 %7363  ;;  %v7989_v41 = vpop.permute.xlu0 %7988 }
0x102f   : > { %v7393_v17 = vsel %vm16692_vm2, %v7362_v21, %v7364_v30  ;;  %v7394_v6 = vsel %vm16738_vm3, %v7364_v30, %v15458_v20  ;;  %vm16752_vm2 = vmmov %vm16708_vm6 }
0x1030   : > { %v7437_v24 = vadd.f32 %v7393_v17, %v7228_v22  ;;  %v7438_v31 = vadd.f32 %v7394_v6, %v7229_v55  ;;  %7379 = vrot.lane.b32.xlu1 %v7310_v52, %s16577_s26  ;;  %7172 = vrot.lane.b32.xlu0 %v7102_v46, %s16576_s20  ;;  %v8355_v55 = vmul.f32 %v16736_v29, %v15653_v23  ;;  %v16743_v52 = vld [vmem:[#allocation86_spill] sm:$0xff]  ;;  %vm16753_vm3 = vmmov %vm16752_vm2  ;;  %s9007_s20 = sshll.u32 %s16812_s12, 1  ;;  %s10307_s12 = smov 124  }
0x1031   : > { %s15918_s24 = scalar_lea.vmem %s16027_s9, %s9007_s20 }
0x1032   : > { %v7573_v5 = vpop.permute.xlu1 %7572  ;;  %v15686_v26 = vpop.permute.xlu0 %8416 }
0x1033   : > { %v7602_v10 = vsel %vm16696_vm4, %v7571_v57, %v7573_v5  ;;  %v7603_v20 = vsel %vm16739_vm15, %v7573_v5, %v15468_v0  ;;  %v8487_v21 = vadd.f32 %v15686_v26, %v8278_v15  ;;  %v7520_v57 = vmul.f32 %v16721_v28, %v15670_v48  ;;  %v16746_v15 = vld [vmem:[#allocation88_spill] sm:$0xff] }
0x1034   : > { %v7646_v51 = vadd.f32 %v7602_v10, %v7437_v24  ;;  %v7647_v61 = vadd.f32 %v7603_v20, %v7438_v31  ;;  %7588 = vrot.lane.b32.xlu1 %v7519_v1, %s16578_s13  ;;  %7381 = vrot.lane.b32.xlu0 %v7311_v53, %s16577_s26  ;;  %v7937_v28 = vmul.f32 %v16725_v12, %v15653_v23  ;;  %v16747_v1 = vld [vmem:[#allocation84_spill] sm:$0xff]  ;;  %vm16756_vm4 = vcmask 1031168  }
0x1035   : > { %v8696_v43 = vadd.f32 %v15646_v25, %v8487_v21  ;;  %v16749_v21 = vld [vmem:[#allocation81_spill] sm:$0xff]  ;;  %vm16757_vm15 = vmmov %vm16756_vm4 }
0x1036   : > { %v7782_v16 = vpop.permute.xlu1 %7781  ;;  %v8409_v18 = vpop.permute.xlu0 %8408 }
0x1037   : > { %v8739_v0 = vsel %vm8729_vm1, %v8696_v43, 0.0  ;;  %v7811_v14 = vsel %vm16699_vm8, %v7780_v34, %v7782_v16  ;;  %v7812_v7 = vsel %vm16740_vm9, %v7782_v16, %v15483_v63  ;;  %v7729_v34 = vmul.f32 %v16723_v36, %v15670_v48 }
0x1038   : > { %v7855_v56 = vadd.f32 %v7811_v14, %v7646_v51  ;;  %v7856_v2 = vadd.f32 %v7812_v7, %v7647_v61  ;;  %7797 = vrot.lane.b32.xlu1 %v7728_v37, %s16593_s30  ;;  %7590 = vrot.lane.b32.xlu0 %v7520_v57, %s16578_s13  ;;  %v15710_v42 = vadd.f32 %v8739_v0, %v15530_v38  ;;  %v16750_v51 = vld [vmem:[#allocation22_spill] sm:$0xff]  ;;  %vm16759_vm8 = vcmask 900096  }
0x1039   : > { %v8438_v46 = vsel %vm16708_vm6, %v16743_v52, %v8409_v18  ;;  %v8439_v17 = vsel %vm16745_vm7, %v8409_v18, %v16744_v62  ;;  %v7003_v61 = vmul.f32 %v16750_v51, %v16749_v21  ;;  %v16751_v18 = vld [vmem:[#allocation62_spill] sm:$0xff]  ;;  %vm16760_vm9 = vmmov %vm16759_vm8  ;;  %vm16765_vm6 = vcmask 752640  }
0x103a   : > { %v7991_v11 = vpop.permute.xlu1 %7990  ;;  %v15712_v50 = vpop.permute.xlu0 %8203  ;;  %v8565_v37 = vmul.f32 %v16751_v18, %v15670_v48  ;;  %v8566_v57 = vmul.f32 %v16751_v18, %v15476_v47  ;;  %vm16766_vm7 = vmmov %vm16765_vm6 }
0x103b   : > { %v8020_v63 = vsel %vm16702_vm10, %v7989_v41, %v7991_v11  ;;  %v8021_v45 = vsel %vm16741_vm11, %v7991_v11, %v15495_v44  ;;  %vm16761_vm10 = vcmask 891904  }
0x103c   : > { %v8064_v32 = vadd.f32 %v8020_v63, %v7855_v56  ;;  %v8065_v49 = vadd.f32 %v8021_v45, %v7856_v2  ;;  %8006 = vrot.lane.b32.xlu1 %v7937_v28, %s16595_s25  ;;  %7799 = vrot.lane.b32.xlu0 %v7729_v34, %s16593_s30  ;;  %vm16762_vm11 = vmmov %vm16761_vm10 }
0x103e   : > { %v8200_v38 = vpop.permute.xlu1 %8199  ;;  %v8413_v22 = vpop.permute.xlu0 %8412 }
0x103f   : > { %v8229_v36 = vsel %vm16742_vm14, %v15517_v40, %v8200_v38  ;;  %v8230_v44 = vsel %vm16707_vm5, %v8200_v38, %v15507_v39  ;;  %v8356_v39 = vmul.f32 %v16736_v29, %v15670_v48  ;;  %v8147_v40 = vmul.f32 %v16727_v54, %v15670_v48 }
0x1040   : > { %v8273_v30 = vadd.f32 %v8229_v36, %v8064_v32  ;;  %v8274_v41 = vadd.f32 %v8230_v44, %v8065_v49  ;;  %8424 = vrot.lane.b32.xlu1 %v8355_v55, %s16592_s10  ;;  %8008 = vrot.lane.b32.xlu0 %v7938_v4, %s16595_s25  ;;  %vm16763_vm14 = vcmask 883712  }
0x1041   : > { %vm16764_vm5 = vmmov %vm16763_vm14 }
0x1042   : > { %v8618_v6 = vpop.permute.xlu1 %8617  ;;  %v8482_v12 = vadd.f32 %v8438_v46, %v8273_v30  ;;  %v8483_v24 = vadd.f32 %v8439_v17, %v8274_v41  ;;  %v15737_v31 = vpop.permute.xlu0 %8621 }
0x1043   : > { %v8647_v5 = vsel %vm16676_vm12, %v16746_v15, %v8618_v6  ;;  %v8648_v53 = vsel %vm16748_vm13, %v8618_v6, %v16747_v1  ;;  %vm16767_vm13 = vmmov %vm16676_vm12 }
0x1044   : > { %v8691_v10 = vadd.f32 %v8647_v5, %v8482_v12  ;;  %v8692_v20 = vadd.f32 %v8648_v53, %v8483_v24  ;;  %8426 = vrot.lane.b32.xlu1 %v8356_v39, %s16592_s10  ;;  %8217 = vrot.lane.b32.xlu0 %v8147_v40, %s16591_s21  ;;  %v16754_v24 = vld [vmem:[#allocation82_spill] sm:$0xff]  ;;  %v16755_v40 = vld [vmem:[#allocation83_spill] sm:$0xff] }
0x1045   : > { %v6998_v39 = vmul.f32 %v16737_v27, %v16754_v24  ;;  %v6999_v15 = vmul.f32 %v16737_v27, %v16755_v40  ;;  %v16758_v27 = vld [vmem:[#allocation21_spill] sm:$0xff] }
0x1046   : > { %v15752_v29 = vadd.f32 %v15629_v58, %v8691_v10  ;;  %v15755_v54 = vadd.f32 %v15632_v33, %v8692_v20  ;;  %v7159_v43 = vpop.permute.xlu1 %7158  ;;  %v15757_v16 = vpop.permute.xlu0 %7168  ;;  %v8751_v58 = vld [vmem:[#allocation5] sm:$0x1]  ;;  %v8564_v33 = vmul.f32 %v16751_v18, %v15653_v23 }
0x1047   : > { %v7236_v0 = vadd.f32 %v15757_v16, %v7003_v61 }
0x1048   : > { %8635 = vrot.lane.b32.xlu1 %v8565_v37, %s16594_s15  ;;  %8637 = vrot.lane.b32.xlu0 %v8566_v57, %s16594_s15  ;;  %v7006_v37 = vmul.f32 %v16758_v27, %v15476_v47 }
0x104a   : > { %v7368_v14 = vpop.permute.xlu1 %7367  ;;  %v15766_v7 = vpop.permute.xlu0 %7377 }
0x104b   : > { %v7445_v56 = vadd.f32 %v15766_v7, %v7236_v0 }
0x104c   : > { %8633 = vrot.lane.b32.xlu1 %v8564_v33, %s16594_s15  ;;  %8754 = vperm.xlu0 %9716, %v8751_v58  }
0x104e   : > { %v7577_v2 = vpop.permute.xlu1 %7576  ;;  %v15772_v11 = vpop.permute.xlu0 %7586 }
0x104f   : > { %v7654_v28 = vadd.f32 %v15772_v11, %v7445_v56 }
0x1052   : > { %v7786_v34 = vpop.permute.xlu1 %7785  ;;  %v15775_v63 = vpop.permute.xlu0 %7795 }
0x1053   : > { %v7863_v45 = vadd.f32 %v15775_v63, %v7654_v28 }
0x1056   : > { %v7995_v32 = vpop.permute.xlu1 %7994  ;;  %v15778_v49 = vpop.permute.xlu0 %8004 }
0x1057   : > { %v8072_v38 = vadd.f32 %v15778_v49, %v7863_v45 }
0x105a   : > { %v15781_v55 = vpop.permute.xlu1 %8422  ;;  %v15783_v4 = vpop.permute.xlu0 %8213 }
0x105b   : > { %v8281_v36 = vadd.f32 %v15783_v4, %v8072_v38 }
0x105d   : > { %v8490_v44 = vadd.f32 %v15781_v55, %v8281_v36 }
0x105e   : > { %v8415_v30 = vpop.permute.xlu1 %8414  ;;  %v15787_v41 = vpop.permute.xlu0 %8631 }
0x105f   : > { %v8440_v52 = vsel %vm16752_vm2, %v8413_v22, %v8415_v30  ;;  %v8441_v46 = vsel %vm16753_vm3, %v8415_v30, %v15686_v26  ;;  %v8699_v62 = vadd.f32 %v15787_v41, %v8490_v44  ;;  %vm16768_vm2 = vmmov %vm16756_vm4 }
0x1060   : > { %vm16769_vm3 = vmmov %vm16759_vm8 }
0x1061   : > { %v8741_v17 = vsel %vm8729_vm1, %v8699_v62, 0.0 }
0x1062   : > { %v15795_v6 = vadd.f32 %v8741_v17, %v15710_v42  ;;  %v15797_v12 = vpop.permute.xlu1 %8209  ;;  %v7161_v5 = vpop.permute.xlu0 %7160 }
0x1063   : > { %v7186_v22 = vsel %vm588_vm0, %v7159_v43, %v7161_v5  ;;  %v7187_v26 = vsel %vm588_vm0, %v7161_v5, %v15558_v19 }
0x1064   : > { %v7231_v1 = vadd.f32 %v7186_v22, %v6998_v39  ;;  %v7232_v53 = vadd.f32 %v7187_v26, %v6999_v15 }
0x1066   : > { %v15806_v10 = vpop.permute.xlu1 %8418  ;;  %v7370_v42 = vpop.permute.xlu0 %7369 }
0x1067   : > { %v7395_v20 = vsel %vm16756_vm4, %v7368_v14, %v7370_v42  ;;  %v7396_v21 = vsel %vm16757_vm15, %v7370_v42, %v15574_v9  ;;  %vm16770_vm4 = vmmov %vm16768_vm2 }
0x1068   : > { %v7440_v61 = vadd.f32 %v7395_v20, %v7231_v1  ;;  %v7441_v18 = vadd.f32 %v7396_v21, %v7232_v53  ;;  %vm16771_vm15 = vmmov %vm16769_vm3 }
0x106a   : > { %v15813_v57 = vpop.permute.xlu1 %7174  ;;  %v7579_v43 = vpop.permute.xlu0 %7578 }
0x106b   : > { %v7239_v19 = vadd.f32 %v15813_v57, %v7006_v37  ;;  %v7604_v0 = vsel %vm16759_vm8, %v7577_v2, %v7579_v43  ;;  %v7605_v58 = vsel %vm16760_vm9, %v7579_v43, %v15586_v3  ;;  %vm16772_vm8 = vmmov %vm16761_vm10 }
0x106c   : > { %v7649_v33 = vadd.f32 %v7604_v0, %v7440_v61  ;;  %v7650_v14 = vadd.f32 %v7605_v58, %v7441_v18  ;;  %vm16773_vm9 = vmmov %vm16772_vm8 }
0x106e   : > { %v15819_v56 = vpop.permute.xlu1 %7383  ;;  %v7788_v9 = vpop.permute.xlu0 %7787 }
0x106f   : > { %v7448_v28 = vadd.f32 %v15819_v56, %v7239_v19  ;;  %v7813_v45 = vsel %vm16761_vm10, %v7786_v34, %v7788_v9  ;;  %v7814_v47 = vsel %vm16762_vm11, %v7788_v9, %v15604_v60  ;;  %vm16774_vm10 = vmmov %vm16764_vm5 }
0x1070   : > { %v7858_v38 = vadd.f32 %v7813_v45, %v7649_v33  ;;  %v7859_v36 = vadd.f32 %v7814_v47, %v7650_v14  ;;  %vm16775_vm11 = vmmov %vm16764_vm5 }
0x1072   : > { %v15825_v44 = vpop.permute.xlu1 %7592  ;;  %v7997_v2 = vpop.permute.xlu0 %7996 }
0x1073   : > { %v7657_v30 = vadd.f32 %v15825_v44, %v7448_v28  ;;  %v8022_v3 = vsel %vm16763_vm14, %v7995_v32, %v7997_v2  ;;  %v8023_v62 = vsel %vm16764_vm5, %v7997_v2, %v15622_v59  ;;  %vm16776_vm14 = vmmov %vm16765_vm6 }
0x1074   : > { %v8067_v17 = vadd.f32 %v8022_v3, %v7858_v38  ;;  %v8068_v24 = vadd.f32 %v8023_v62, %v7859_v36  ;;  %vm16777_vm5 = vmmov %vm16765_vm6 }
0x1076   : > { %v15831_v39 = vpop.permute.xlu1 %7801  ;;  %v8206_v34 = vpop.permute.xlu0 %8205 }
0x1077   : > { %v7866_v40 = vadd.f32 %v15831_v39, %v7657_v30  ;;  %v8231_v60 = vsel %vm16765_vm6, %v15712_v50, %v8206_v34  ;;  %v8232_v15 = vsel %vm16766_vm7, %v8206_v34, %v15636_v35  ;;  %vm16778_vm6 = vcmask 744448  }
0x1078   : > { %v8276_v5 = vadd.f32 %v8231_v60, %v8067_v17  ;;  %v8277_v22 = vadd.f32 %v8232_v15, %v8068_v24  ;;  %vm16779_vm7 = vmmov %vm16778_vm6 }
0x107a   : > { %v15838_v26 = vpop.permute.xlu1 %8010  ;;  %v8485_v32 = vadd.f32 %v8440_v52, %v8276_v5  ;;  %v8486_v1 = vadd.f32 %v8441_v46, %v8277_v22  ;;  %v8624_v59 = vpop.permute.xlu0 %8623  ;;  %v7002_v46 = vmul.f32 %v16750_v51, %v15546_v8  ;;  %v7001_v8 = vmul.f32 %v16750_v51, %v15452_v13 }
0x107b   : > { %v8075_v53 = vadd.f32 %v15838_v26, %v7866_v40  ;;  %v8649_v42 = vsel %vm16676_vm12, %v15737_v31, %v8624_v59  ;;  %v8650_v20 = vsel %vm16767_vm13, %v8624_v59, %v15646_v25  ;;  %vm16780_vm13 = vmmov %vm16676_vm12 }
0x107c   : > { %v8694_v21 = vadd.f32 %v8649_v42, %v8485_v32  ;;  %v8695_v50 = vadd.f32 %v8650_v20, %v8486_v1 }
0x107e   : > { %v8707_v61 = vadd.f32 %v15752_v29, %v8694_v21  ;;  %v8720_v35 = vadd.f32 %v15755_v54, %v8695_v50  ;;  %v15847_v18 = vpop.permute.xlu1 %8219  ;;  %v7165_v37 = vpop.permute.xlu0 %7164 }
0x107f   : > { %v15850_v52 = vadd.f32 %v15847_v18, %v8075_v53 }
0x1082   : > { %v7167_v43 = vpop.permute.xlu1 %7166  ;;  %v7374_v31 = vpop.permute.xlu0 %7373 }
0x1083   : > { %v7189_v25 = vsel %vm588_vm0, %v7167_v43, %v15757_v16  ;;  %v7188_v9 = vsel %vm588_vm0, %v7165_v37, %v7167_v43 }
0x1084   : > { %v7235_v19 = vadd.f32 %v7189_v25, %v7002_v46  ;;  %v7234_v47 = vadd.f32 %v7188_v9, %v7001_v8 }
0x1086   : > { %v7376_v0 = vpop.permute.xlu1 %7375  ;;  %v7583_v58 = vpop.permute.xlu0 %7582 }
0x1087   : > { %v7398_v29 = vsel %vm16768_vm2, %v7376_v0, %v15766_v7  ;;  %v7397_v16 = vsel %vm16770_vm4, %v7374_v31, %v7376_v0  ;;  %vm16781_vm4 = vmmov %vm16768_vm2 }
0x1088   : > { %v7444_v54 = vadd.f32 %v7398_v29, %v7235_v19  ;;  %v7443_v30 = vadd.f32 %v7397_v16, %v7234_v47 }
0x108a   : > { %v7585_v33 = vpop.permute.xlu1 %7584  ;;  %v7792_v14 = vpop.permute.xlu0 %7791 }
0x108b   : > { %v7607_v28 = vsel %vm16769_vm3, %v7585_v33, %v15772_v11  ;;  %v7606_v2 = vsel %vm16771_vm15, %v7583_v58, %v7585_v33  ;;  %vm16782_vm15 = vmmov %vm16769_vm3 }
0x108c   : > { %v7653_v45 = vadd.f32 %v7607_v28, %v7444_v54  ;;  %v7652_v17 = vadd.f32 %v7606_v2, %v7443_v30 }
0x108e   : > { %v7794_v38 = vpop.permute.xlu1 %7793  ;;  %v8001_v36 = vpop.permute.xlu0 %8000 }
0x108f   : > { %v7816_v7 = vsel %vm16772_vm8, %v7794_v38, %v15775_v63  ;;  %v7815_v62 = vsel %vm16773_vm9, %v7792_v14, %v7794_v38  ;;  %vm16783_vm9 = vmmov %vm16772_vm8 }
0x1090   : > { %v7862_v3 = vadd.f32 %v7816_v7, %v7653_v45  ;;  %v7861_v34 = vadd.f32 %v7815_v62, %v7652_v17 }
0x1092   : > { %v8003_v11 = vpop.permute.xlu1 %8002  ;;  %v8628_v24 = vpop.permute.xlu0 %8627 }
0x1093   : > { %v8024_v13 = vsel %vm16774_vm10, %v8001_v36, %v8003_v11  ;;  %v8025_v51 = vsel %vm16775_vm11, %v8003_v11, %v15778_v49  ;;  %vm16786_vm11 = vmmov %vm16777_vm5 }
0x1094   : > { %v8071_v40 = vadd.f32 %v8025_v51, %v7862_v3  ;;  %v8070_v60 = vadd.f32 %v8024_v13, %v7861_v34 }
0x1096   : > { %v8212_v15 = vpop.permute.xlu1 %8211  ;;  %v8429_v5 = vpop.permute.xlu0 %8428 }
0x1097   : > { %v8233_v63 = vsel %vm16776_vm14, %v15797_v12, %v8212_v15  ;;  %v8234_v22 = vsel %vm16777_vm5, %v8212_v15, %v15783_v4  ;;  %vm16787_vm14 = vmmov %vm16777_vm5  ;;  %v8493_v34 = vadd.f32 %v8429_v5, %v15850_v52 }
0x1098   : > { %v8279_v32 = vadd.f32 %v8233_v63, %v8070_v60  ;;  %v8280_v1 = vadd.f32 %v8234_v22, %v8071_v40  ;;  %vm16788_vm5 = vmmov %vm16778_vm6 }
0x109a   : > { %v8630_v59 = vpop.permute.xlu1 %8629  ;;  %v8421_v53 = vpop.permute.xlu0 %8420 }
0x109b   : > { %v8442_v42 = vsel %vm16778_vm6, %v15806_v10, %v8421_v53  ;;  %v8443_v49 = vsel %vm16779_vm7, %v8421_v53, %v15781_v55  ;;  %v8651_v50 = vsel %vm16676_vm12, %v8628_v24, %v8630_v59  ;;  %v8652_v12 = vsel %vm16780_vm13, %v8630_v59, %v15787_v41  ;;  %vm16789_vm6 = vmmov %vm16676_vm12 }
0x109c   : > { %v8488_v20 = vadd.f32 %v8442_v42, %v8279_v32  ;;  %v8489_v21 = vadd.f32 %v8443_v49, %v8280_v1  ;;  %v7005_v10 = vmul.f32 %v16758_v27, %v15670_v48  ;;  %v7004_v48 = vmul.f32 %v16758_v27, %v15653_v23  ;;  %vm16790_vm7 = vmmov %vm16788_vm5 }
0x109d   : > { %vm16791_vm12 = vmmov %vm16789_vm6 }
0x109e   : > { %v8697_v37 = vadd.f32 %v8651_v50, %v8488_v20  ;;  %v8698_v46 = vadd.f32 %v8652_v12, %v8489_v21  ;;  %v7171_v4 = vpop.permute.xlu1 %7170  ;;  %v8216_v43 = vpop.permute.xlu0 %8215 }
0x10a0   : > { %v8721_v31 = vadd.f32 %v8720_v35, %v8698_v46  ;;  %v8708_v25 = vadd.f32 %v8707_v61, %v8697_v37 }
0x10a2   : > { %v7380_v19 = vpop.permute.xlu1 %7379  ;;  %v7173_v0 = vpop.permute.xlu0 %7172 }
0x10a3   : > { %v7191_v55 = vsel %vm588_vm0, %v7173_v0, %v15813_v57  ;;  %v7190_v28 = vsel %vm588_vm0, %v7171_v4, %v7173_v0  ;;  %vm16784_vm0 = vmmov %vm16774_vm10 }
0x10a4   : > { %v7238_v58 = vadd.f32 %v7191_v55, %v7005_v10  ;;  %v7237_v16 = vadd.f32 %v7190_v28, %v7004_v48  ;;  %vm16785_vm10 = vmmov %vm16784_vm0 }
0x10a6   : > { %v7589_v29 = vpop.permute.xlu1 %7588  ;;  %v7382_v54 = vpop.permute.xlu0 %7381 }
0x10a7   : > { %v7400_v41 = vsel %vm16768_vm2, %v7382_v54, %v15819_v56  ;;  %v7399_v45 = vsel %vm16781_vm4, %v7380_v19, %v7382_v54 }
0x10a8   : > { %v7447_v33 = vadd.f32 %v7400_v41, %v7238_v58  ;;  %v7446_v38 = vadd.f32 %v7399_v45, %v7237_v16 }
0x10aa   : > { %v7798_v14 = vpop.permute.xlu1 %7797  ;;  %v7591_v9 = vpop.permute.xlu0 %7590 }
0x10ab   : > { %v7609_v61 = vsel %vm16769_vm3, %v7591_v9, %v15825_v44  ;;  %v7608_v47 = vsel %vm16782_vm15, %v7589_v29, %v7591_v9  ;;  %v16792_v9 = vld [vmem:[#allocation6_spill] sm:$0xff] }
0x10ac   : > { %v7656_v35 = vadd.f32 %v7609_v61, %v7447_v33  ;;  %v7655_v30 = vadd.f32 %v7608_v47, %v7446_v38  ;;  %v16793_v61 = vsub.s32 0, %v16792_v9 }
0x10ae   : > { %v8007_v8 = vpop.permute.xlu1 %8006  ;;  %v7800_v57 = vpop.permute.xlu0 %7799 }
0x10af   : > { %v7818_v56 = vsel %vm16772_vm8, %v7800_v57, %v15831_v39  ;;  %v7817_v44 = vsel %vm16783_vm9, %v7798_v14, %v7800_v57 }
0x10b0   : > { %v7865_v23 = vadd.f32 %v7818_v56, %v7656_v35  ;;  %v7864_v3 = vadd.f32 %v7817_v44, %v7655_v30 }
0x10b2   : > { %v8425_v36 = vpop.permute.xlu1 %8424  ;;  %v8009_v2 = vpop.permute.xlu0 %8008 }
0x10b3   : > { %v8027_v7 = vsel %vm16784_vm0, %v8009_v2, %v15838_v26  ;;  %v8026_v27 = vsel %vm16785_vm10, %v8007_v8, %v8009_v2 }
0x10b4   : > { %v8074_v62 = vadd.f32 %v8027_v7, %v7865_v23  ;;  %v8073_v13 = vadd.f32 %v8026_v27, %v7864_v3  ;;  %v10306_v23 = vmov 1966171168  }
0x10b5   : > { %v8789_v27 = vunpack.c.l.s4 %v10306_v23 }
0x10b6   : > { %v8427_v17 = vpop.permute.xlu1 %8426  ;;  %v8218_v11 = vpop.permute.xlu0 %8217 }
0x10b7   : > { %v8235_v24 = vsel %vm16786_vm11, %v8216_v43, %v8218_v11  ;;  %v8236_v39 = vsel %vm16787_vm14, %v8218_v11, %v15847_v18  ;;  %v8445_v40 = vsel %vm16788_vm5, %v8427_v17, %v8429_v5  ;;  %v8444_v59 = vsel %vm16790_vm7, %v8425_v36, %v8427_v17 }
0x10b8   : > { %v8283_v51 = vadd.f32 %v8236_v39, %v8074_v62  ;;  %v8282_v26 = vadd.f32 %v8235_v24, %v8073_v13  ;;  %v8790_v62 = vunpack.c.0.s8 %v8789_v27  ;;  %v16794_v24 = vlaneseq }
0x10ba   : > { %v8636_v60 = vpop.permute.xlu1 %8635  ;;  %v8492_v15 = vadd.f32 %v8445_v40, %v8283_v51  ;;  %v8638_v63 = vpop.permute.xlu0 %8637  ;;  %v8491_v20 = vadd.f32 %v8444_v59, %v8282_v26  ;;  %v8793_v17 = vsub.s32 %v8790_v62, %v16792_v9  ;;  %vm8805_vm13 = vcmp.ge.s32.totalorder %v16794_v24, 16 }
0x10bb   : > { %v8654_v22 = vsel %vm16789_vm6, %v8636_v60, %v8638_v63  ;;  %v8702_v32 = vadd.f32 %v8638_v63, %v8493_v34  ;;  %vm8806_vm2 = vcmp.lt.s32.totalorder %v16794_v24, 32  ;;  %vm8812_vm4 = vcmp.ge.s32.totalorder %v16794_v24, 32 }
0x10bc   : > { %v8701_v1 = vadd.f32 %v8654_v22, %v8492_v15  ;;  %vm8807_vm3 = vmand %vm8805_vm13, %vm8806_vm2  ;;  %vm8813_vm15 = vcmp.lt.s32.totalorder %v16794_v24, 48  ;;  %vm8819_vm9 = vcmp.ge.s32.totalorder %v16794_v24, 48  ;;  %vm8820_vm0 = vcmp.lt.s32.totalorder %v16794_v24, 64 }
0x10bd   : > { %v8743_v53 = vsel %vm8729_vm1, %v8702_v32, 0.0  ;;  %vm15921_vm1 = vcmp.lt.s32.totalorder %v16794_v24, 16  ;;  %vm8814_vm8 = vmand %vm8812_vm4, %vm8813_vm15  ;;  %vm15947_vm11 = vcmp.ge.s32.totalorder %v16794_v24, 64  ;;  %vm15952_vm14 = vcmp.lt.s32.totalorder %v16794_v24, 80 }
0x10be   : > { %v8722_v42 = vadd.f32 %v8721_v31, %v8701_v1  ;;  %v8744_v18 = vadd.f32 %v8743_v53, %v15795_v6  ;;  %v8634_v49 = vpop.permute.xlu1 %8633  ;;  %vm8821_vm10 = vmand %vm8819_vm9, %vm8820_vm0  ;;  %vm15957_vm5 = vcmp.ge.s32.totalorder %v16794_v24, 80  ;;  %vm15962_vm6 = vcmp.lt.s32.totalorder %v16794_v24, 96 }
0x10bf   : > { %v8653_v52 = vsel %vm16791_vm12, %v8634_v49, %v8636_v60  ;;  %vm8828_vm7 = vmand %vm15947_vm11, %vm15952_vm14  ;;  %vm15988_vm13 = vcmp.lt.s32.totalorder %v16794_v24, 112  ;;  %vm8927_vm2 = vcmask 818176   ;;  %vm8867_vm4 = vcmp.lt.s32.totalorder %v16794_v24, 128 }
0x10c0   : > { %v8723_v5 = vrot.slane %v8722_v42, 4  ;;  %v8745_v21 = vrot.slane %v8744_v18, 4  ;;  %v8700_v50 = vadd.f32 %v8653_v52, %v8491_v20  ;;  %vm8835_vm12 = vmand %vm15957_vm5, %vm15962_vm6 }
0x10c2   : > { %v8724_v12 = vadd.f32 %v8723_v5, %v8722_v42  ;;  %v8746_v37 = vadd.f32 %v8745_v21, %v8744_v18  ;;  %v8709_v46 = vadd.f32 %v8708_v25, %v8700_v50 }
0x10c4   : > { %v8725_v4 = vrot.slane %v8724_v12, 2  ;;  %v8747_v43 = vrot.slane %v8746_v37, 2  ;;  %v8710_v19 = vrot.slane %v8709_v46, 4 }
0x10c6   : > { %v8726_v10 = vadd.f32 %v8725_v4, %v8724_v12  ;;  %v8748_v0 = vadd.f32 %v8747_v43, %v8746_v37  ;;  %v8711_v55 = vadd.f32 %v8710_v19, %v8709_v46 }
0x10c8   : > { %v8712_v58 = vrot.slane %v8711_v55, 2  ;;  %v8727_v31 = vrot.slane %v8726_v10, 1  ;;  %v8749_v29 = vrot.slane %v8748_v0, 1 }
0x10ca   : > { %v8713_v6 = vadd.f32 %v8712_v58, %v8711_v55  ;;  %v8728_v33 = vadd.f32 %v8727_v31, %v8726_v10  ;;  %v8750_v14 = vadd.f32 %v8749_v29, %v8748_v0 }
0x10cb   : > { %v8755_v54 = vpop.permute.xlu0 %8754 }
0x10cc   : > { %v8714_v41 = vrot.slane %v8713_v6, 1  ;;  %v8760_v35 = vrot.slane %v8755_v54, %v16793_v61 }
0x10ce   : > { %v8715_v28 = vadd.f32 %v8714_v41, %v8713_v6  ;;  %v8762_v48 = vadd.f32 %v8760_v35, %v8728_v33  ;;  %v8763_v25 = vadd.f32 %v8760_v35, %v8750_v14 }
0x10d0   : > { %v8761_v8 = vadd.f32 %v8760_v35, %v8715_v28  ;;  %v8765_v57 = vsub.f32 0.0, %v8762_v48  ;;  %v8766_v45 = vsub.f32 0.0, %v8763_v25 }
0x10d2   : > { %v8764_v16 = vsub.f32 0.0, %v8761_v8  ;;  %v8769_v47 = vmul.f32 1.442695, %v8765_v57  ;;  %v8771_v56 = vmul.f32 1.442695, %v8766_v45 }
0x10d4   : > { %v8767_v38 = vmul.f32 1.442695, %v8764_v16  ;;  %10238 = vpow2.f32 %v8769_v47 }
0x10d5   : > { %10240 = vpow2.f32 %v8771_v56 }
0x10d6   : > { %10242 = vpow2.f32 %v8767_v38 }
0x10de   : > { %v10239_v36 = vpop.eup %10238 }
0x10df   : > { %v10241_v2 = vpop.eup %10240  ;;  %v8774_v44 = vadd.f32 1.0, %v10239_v36 }
0x10e0   : > { %v10243_v7 = vpop.eup %10242  ;;  %v8775_v30 = vadd.f32 1.0, %v10241_v2 }
0x10e1   : > { %v8773_v3 = vadd.f32 1.0, %v10243_v7  ;;  %10244 = vrcp.f32 %v8774_v44 }
0x10e2   : > { %10246 = vrcp.f32 %v8775_v30 }
0x10e3   : > { %10248 = vrcp.f32 %v8773_v3 }
0x10eb   : > { %v10245_v11 = vpop.eup %10244 }
0x10ec   : > { %v10247_v13 = vpop.eup %10246  ;;  %v8876_v51 = vrot.slane %v10245_v11, %v8793_v17 }
0x10ed   : > { %v10249_v34 = vpop.eup %10248  ;;  %v8909_v40 = vcombine.low %v10245_v11, %v10247_v13  ;;  %v8937_v53 = vrot.slane %v10247_v13, %v8793_v17 }
0x10ee   : > { %v8883_v26 = vrot.slane %v8876_v51, %v8793_v17  ;;  %v8794_v60 = vrot.slane %v10249_v34, %v8793_v17  ;;  %v8845_v15 = vcombine.low %v10249_v34, %v10245_v11  ;;  %8786 = vst.msk [vmem:[%s15918_s24] sm:$0x1] %vm15921_vm1, %v10249_v34 }
0x10ef   : > { %v8916_v22 = vrot.slane %v8909_v40, %v8793_v17  ;;  %v8944_v42 = vrot.slane %v8937_v53, %v8793_v17 }
0x10f0   : > { %8884 = vrot.lane.b32.xlu1 %v8883_v26, %s10289_s27  ;;  %v8801_v63 = vrot.slane %v8794_v60, %v8793_v17  ;;  %v8852_v1 = vrot.slane %v8845_v15, %v8793_v17  ;;  %s10312_s27 = smov 100  }
0x10f1   : > { %v8923_v32 = vrot.slane %v8916_v22, %v8793_v17 }
0x10f2   : > { %8802 = vrot.lane.b32.xlu0 %v8801_v63, %s16577_s26  ;;  %s10313_s26 = smov 104   ;;  %v8859_v59 = vrot.slane %v8852_v1, %v8793_v17 }
0x10f4   : > { %8888 = vrot.lane.b32.xlu1 %v8883_v26, %s16578_s13  ;;  %s10314_s13 = smov 114  }
0x10f6   : > { %8809 = vrot.lane.b32.xlu0 %v8801_v63, %s10307_s12 }
0x10f8   : > { %8892 = vrot.lane.b32.xlu1 %v8883_v26, %s16595_s25 }
0x10fa   : > { %8816 = vrot.lane.b32.xlu0 %v8801_v63, %s10308_s28 }
0x10fc   : > { %8896 = vrot.lane.b32.xlu1 %v8883_v26, %s10309_s16 }
0x10fe   : > { %8830 = vrot.lane.b32.xlu0 %v8801_v63, %s10310_s17 }
0x1100   : > { %8823 = vrot.lane.b32.xlu1 %v8801_v63, %s10311_s18 }
0x1102   : > { %8924 = vrot.lane.b32.xlu0 %v8923_v32, %s10312_s27 }
0x1104   : > { %8900 = vrot.lane.b32.xlu1 %v8883_v26, %s10313_s26 }
0x1106   : > { %8860 = vrot.lane.b32.xlu0 %v8859_v59, %s10314_s13 }
0x1108   : > { %8904 = vrot.lane.b32.xlu1 %v8883_v26, %s10315_s23 }
0x110a   : > { %8837 = vrot.lane.b32.xlu0 %v8801_v63, %s10316_s19 }
0x110c   : > { %8945 = vrot.lane.b32.xlu1 %v8944_v42, %s10317_s8 }
0x1162   : > { %v8885_v18 = vpop.permute.xlu1 %8884 }
0x1163   : > { %8887 = vst.msk [vmem:[%s15918_s24 + $0x1] sm:$0x1] %vm15921_vm1, %v8885_v18  ;;  %vm15983_vm1 = vcmp.ge.s32.totalorder %v16794_v24, 96 }
0x1164   : > { %v8803_v49 = vpop.permute.xlu0 %8802  ;;  %vm8842_vm15 = vmand %vm15983_vm1, %vm15988_vm13 }
0x1165   : > { %8808 = vst.msk [vmem:[%s15918_s24] sm:$0x1] %vm8807_vm3, %v8803_v49 }
0x1166   : > { %v8889_v20 = vpop.permute.xlu1 %8888 }
0x1167   : > { %8891 = vst.msk [vmem:[%s15918_s24 + $0x1] sm:$0x1] %vm8807_vm3, %v8889_v20  ;;  %vm15994_vm3 = vcmp.ge.s32.totalorder %v16794_v24, 112 }
0x1168   : > { %v8810_v52 = vpop.permute.xlu0 %8809  ;;  %vm8868_vm9 = vmand %vm15994_vm3, %vm8867_vm4 }
0x1169   : > { %8815 = vst.msk [vmem:[%s15918_s24] sm:$0x1] %vm8814_vm8, %v8810_v52 }
0x116a   : > { %v8893_v5 = vpop.permute.xlu1 %8892 }
0x116b   : > { %8895 = vst.msk [vmem:[%s15918_s24 + $0x1] sm:$0x1] %vm8814_vm8, %v8893_v5  ;;  %vm8863_vm8 = vcmask 932864  }
0x116c   : > { %v8817_v21 = vpop.permute.xlu0 %8816 }
0x116d   : > { %8822 = vst.msk [vmem:[%s15918_s24] sm:$0x1] %vm8821_vm10, %v8817_v21 }
0x116e   : > { %v8897_v37 = vpop.permute.xlu1 %8896 }
0x116f   : > { %8899 = vst.msk [vmem:[%s15918_s24 + $0x1] sm:$0x1] %vm8821_vm10, %v8897_v37 }
0x1170   : > { %v8831_v43 = vpop.permute.xlu0 %8830 }
0x1172   : > { %v8824_v19 = vpop.permute.xlu1 %8823 }
0x1173   : > { %8829 = vst.msk [vmem:[%s15918_s24] sm:$0x1] %vm8828_vm7, %v8824_v19 }
0x1174   : > { %v8925_v10 = vpop.permute.xlu0 %8924  ;;  %8836 = vst.msk [vmem:[%s15918_s24] sm:$0x1] %vm8835_vm12, %v8831_v43 }
0x1175   : > { %v8926_v31 = vrot.slane %v8925_v10, 1 }
0x1176   : > { %v8901_v0 = vpop.permute.xlu1 %8900 }
0x1177   : > { %8903 = vst.msk [vmem:[%s15918_s24 + $0x1] sm:$0x1] %vm8828_vm7, %v8901_v0  ;;  %v8928_v33 = vsel %vm8927_vm2, %v8925_v10, %v8926_v31 }
0x1178   : > { %v8861_v29 = vpop.permute.xlu0 %8860 }
0x1179   : > { %v8862_v54 = vrot.slane %v8861_v29, 1 }
0x117a   : > { %v8905_v41 = vpop.permute.xlu1 %8904 }
0x117b   : > { %8907 = vst.msk [vmem:[%s15918_s24 + $0x1] sm:$0x1] %vm8835_vm12, %v8905_v41  ;;  %v8864_v9 = vsel %vm8863_vm8, %v8861_v29, %v8862_v54 }
0x117c   : > { %v8838_v14 = vpop.permute.xlu0 %8837  ;;  %8930 = vst.msk [vmem:[%s15918_s24 + $0x1] sm:$0x1] %vm8842_vm15, %v8928_v33 }
0x117d   : > { %8843 = vst.msk [vmem:[%s15918_s24] sm:$0x1] %vm8842_vm15, %v8838_v14 }
0x117e   : > { %8869 = vst.msk [vmem:[%s15918_s24] sm:$0x1] %vm8868_vm9, %v8864_v9  ;;  %v8946_v61 = vpop.permute.xlu1 %8945 }
0x117f   : > { %8948 = vst.msk [vmem:[%s15918_s24 + $0x1] sm:$0x1] %vm8868_vm9, %v8946_v61 }
0x1180 PF: > { %s21_s11 = sadd.s32 1, %s10259_s11  }
0x1181   : > { %p18_p4 = scmp.ge.s32.totalorder %s21_s11, 4  }
0x1183   :  { %20 = sbr.rel (!%p18_p4) target bundleno = 3 (0x3), region = 118 }

</bundles_post_ra>
